<compile_context>
chip_gen: v5e
topology: v5e:2x2
jax: 0.10.0
libtpu: 0.0.40
codegen_flags: <defaults>
</compile_context>

<pallas_src>
import numpy as np

import jax
import jax.numpy as jnp
from jax import lax
from jax.experimental import pallas as pl
from jax.experimental.pallas import tpu as pltpu

LEAKY_SLOPE = 0.01
BN_EPS = 1e-5


def _leaky(x):
    return jnp.where(x >= 0, x, LEAKY_SLOPE * x)


# ----------------------------------------------------------------------------
# Kernel 1: fused conv1 -> BN1 -> LeakyReLU -> conv2 -> BN2 -> LeakyReLU
# ----------------------------------------------------------------------------
def _conv_stack_kernel(t_ref, w1_ref, w2_ref, shift2_ref, o_ref, acc_ref):
    """Per-batch fused conv stack.

    t_ref    : [1, 9, 49, 10] f32   conv1-input taps gathered per conv2 tap;
                                    col 9 is a validity mask (bias trick).
    w1_ref   : [10, 128]      f32   conv1 weight (BN1 scale folded) + shift row.
    w2_ref   : [9, 128, 512]  bf16  conv2 weight [tap, cin, cout] (BN2 folded).
    shift2   : [1, 512]       f32
    o_ref    : [1, 49, 512]   bf16  NHWC-flat conv2 output (pos = oy*7+ox).
    acc_ref  : [49, 512]      f32   VMEM accumulator scratch.
    """
    acc_ref[...] = jnp.zeros_like(acc_ref)
    for t in range(9):  # 9 conv2 taps, statically unrolled
        # conv1 (+BN1 shift via the augmented mask column) for the 49 y1
        # positions this conv2 tap needs.  Rows belonging to conv2's zero
        # padding are all-zero incl. the mask column => leaky(0) = 0.
        p = jnp.dot(t_ref[0, t], w1_ref[...],
                    preferred_element_type=jnp.float32)          # [49,128]
        p = _leaky(p)
        acc_ref[...] += jnp.dot(p.astype(jnp.bfloat16), w2_ref[t],
                                preferred_element_type=jnp.float32)
    o_ref[0] = _leaky(acc_ref[...] + shift2_ref[...]).astype(o_ref.dtype)


def conv_stack(taps, w1_aug, w2, shift2):
    B = taps.shape[0]
    return pl.pallas_call(
        _conv_stack_kernel,
        out_shape=jax.ShapeDtypeStruct((B, 49, 512), jnp.bfloat16),
        grid_spec=pltpu.PrefetchScalarGridSpec(
            num_scalar_prefetch=0,
            grid=(B,),
            in_specs=[
                pl.BlockSpec((1, 9, 49, 10), lambda b: (b, 0, 0, 0)),
                pl.BlockSpec((10, 128), lambda b: (0, 0)),
                pl.BlockSpec((9, 128, 512), lambda b: (0, 0, 0)),
                pl.BlockSpec((1, 512), lambda b: (0, 0)),
            ],
            out_specs=pl.BlockSpec((1, 49, 512), lambda b: (b, 0, 0)),
            scratch_shapes=[pltpu.VMEM((49, 512), jnp.float32)],
        ),
        compiler_params=pltpu.CompilerParams(
            dimension_semantics=("parallel",)),
    )(taps, w1_aug, w2, shift2)


# ----------------------------------------------------------------------------
# Kernel 2: Linear(25088 -> 128) + Tanh, K tiled on the grid axis
# ----------------------------------------------------------------------------
def _fc_tanh_kernel(a_ref, w_ref, b_ref, o_ref, acc_ref):
    @pl.when(pl.program_id(0) == 0)
    def _():
        acc_ref[...] = jnp.zeros_like(acc_ref)

    acc_ref[...] += jnp.dot(a_ref[...], w_ref[...],
                            preferred_element_type=jnp.float32)

    @pl.when(pl.program_id(0) == pl.num_programs(0) - 1)
    def _():
        o_ref[...] = jnp.tanh(acc_ref[...] + b_ref[...])


def fc_tanh(a, w, b, *, tk):
    M, K = a.shape
    _, N = w.shape
    assert K % tk == 0
    return pl.pallas_call(
        _fc_tanh_kernel,
        out_shape=jax.ShapeDtypeStruct((M, N), jnp.float32),
        grid_spec=pltpu.PrefetchScalarGridSpec(
            num_scalar_prefetch=0,
            grid=(K // tk,),
            in_specs=[
                pl.BlockSpec((M, tk), lambda k: (0, k)),
                pl.BlockSpec((tk, N), lambda k: (k, 0)),
                pl.BlockSpec((1, N), lambda k: (0, 0)),
            ],
            out_specs=pl.BlockSpec((M, N), lambda k: (0, 0)),
            scratch_shapes=[pltpu.VMEM((M, N), jnp.float32)],
        ),
        compiler_params=pltpu.CompilerParams(
            dimension_semantics=("arbitrary",)),
    )(a, w, b)


# ----------------------------------------------------------------------------
# Plain-JAX glue (tiny): input tap gather, BN folding, parameter prep
# ----------------------------------------------------------------------------
def _make_tap_mask():
    """mask[t, pos] = 1 if conv2 tap t at output pos reads a valid y1 pixel."""
    m = np.ones((9, 49), np.float32)
    for ky in range(3):
        for kx in range(3):
            for oy in range(7):
                for ox in range(7):
                    iy, ix = 2 * oy + ky - 1, 2 * ox + kx - 1
                    if not (0 <= iy < 14 and 0 <= ix < 14):
                        m[ky * 3 + kx, oy * 7 + ox] = 0.0
    return m


_TAP_MASK = _make_tap_mask()


def build_input_taps(x):
    """x: [B,1,28,28] -> [B, 9, 49, 10] f32.

    taps[b, ky*3+kx, oy*7+ox, jy*3+jx] = x_pad3[b, 4oy+2ky+jy, 4ox+2kx+jx]
    (the conv1-input pixel feeding conv1 tap (jy,jx) of the y1 pixel that
    conv2 tap (ky,kx) reads at output (oy,ox)); column 9 is the validity mask.
    Total size is ~18 KB/batch, so this replaces the big im2col tensor.
    """
    B = x.shape[0]
    xp = jnp.pad(x[:, 0], ((0, 0), (3, 3), (3, 3)))           # [B, 34, 34]
    mask = jnp.asarray(_TAP_MASK)                             # [9, 49]
    blocks = []
    for ky in range(3):
        for kx in range(3):
            cols = []
            for jy in range(3):
                for jx in range(3):
                    r0 = 2 * ky + jy
                    c0 = 2 * kx + jx
                    cols.append(
                        xp[:, r0:r0 + 25:4, c0:c0 + 25:4].reshape(B, 49))
            cols.append(jnp.broadcast_to(mask[ky * 3 + kx][None, :], (B, 49)))
            blocks.append(jnp.stack(cols, axis=-1))           # [B, 49, 10]
    return jnp.stack(blocks, axis=1)                          # [B, 9, 49, 10]


def fold_bn(gamma, beta, mean, var, eps=BN_EPS):
    scale = gamma / jnp.sqrt(var + eps)
    shift = beta - mean * scale
    return scale, shift


def prepare_params(p):
    """One-time weight re-layout (hoisted out of the jitted forward)."""
    s1, t1 = fold_bn(p["bn1_gamma"], p["bn1_beta"], p["bn1_mean"], p["bn1_var"])
    s2, t2 = fold_bn(p["bn2_gamma"], p["bn2_beta"], p["bn2_mean"], p["bn2_var"])

    # conv1: [9,128] with BN1 scale folded + shift as augmented row -> [10,128]
    w1 = p["w1"].reshape(128, 9).T * s1[None, :]
    w1_aug = jnp.concatenate([w1, t1[None, :]], axis=0).astype(jnp.float32)

    # conv2: OIHW -> [tap, cin, cout], BN2 scale folded, bf16
    w2 = p["w2"].transpose(2, 3, 1, 0).reshape(9, 128, 512)
    w2 = (w2 * s2[None, None, :]).astype(jnp.bfloat16)

    # fc: permute rows so NHWC-flat activations match torch's NCHW flatten,
    # pre-transpose to [K, N], bf16
    fc_w = p["fc_w"].reshape(128, 512, 49).transpose(2, 1, 0).reshape(25088, 128)
    fc_w = fc_w.astype(jnp.bfloat16)

    return {"w1_aug": w1_aug, "w2": w2, "shift2": t2.reshape(1, 512),
            "fc_w": fc_w, "fc_b": p["fc_b"].reshape(1, 128)}


def init_params(key):
    ks = jax.random.split(key, 12)
    p = {}
    p["w1"] = jax.random.normal(ks[0], (128, 1, 3, 3), jnp.float32) * 0.1
    p["bn1_gamma"] = 1.0 + 0.05 * jax.random.normal(ks[1], (128,), jnp.float32)
    p["bn1_beta"] = 0.05 * jax.random.normal(ks[2], (128,), jnp.float32)
    p["bn1_mean"] = 0.05 * jax.random.normal(ks[3], (128,), jnp.float32)
    p["bn1_var"] = jnp.abs(jax.random.normal(ks[4], (128,), jnp.float32)) * 0.1 + 1.0
    p["w2"] = jax.random.normal(ks[5], (512, 128, 3, 3), jnp.float32) * 0.02
    p["bn2_gamma"] = 1.0 + 0.05 * jax.random.normal(ks[6], (512,), jnp.float32)
    p["bn2_beta"] = 0.05 * jax.random.normal(ks[7], (512,), jnp.float32)
    p["bn2_mean"] = 0.05 * jax.random.normal(ks[8], (512,), jnp.float32)
    p["bn2_var"] = jnp.abs(jax.random.normal(ks[9], (512,), jnp.float32)) * 0.1 + 1.0
    p["fc_w"] = jax.random.normal(ks[10], (128, 7 * 7 * 512), jnp.float32) * 0.005
    p["fc_b"] = 0.05 * jax.random.normal(ks[11], (128,), jnp.float32)
    return p


@jax.jit
def encoder_forward(x, params):
    # x: [B, 1, 28, 28] (NCHW, matches the PyTorch module)
    B = x.shape[0]
    taps = build_input_taps(x)                                  # [B,9,49,10]
    y2 = conv_stack(taps, params["w1_aug"], params["w2"],
                    params["shift2"])                           # [B,49,512] bf16
    flat = y2.reshape(B, 49 * 512)                              # free reshape
    out = fc_tanh(flat, params["fc_w"], params["fc_b"], tk=12544)
    return out                                                  # [B, 128] f32


# ----------------------------------------------------------------------------
# Pure-JAX reference (for a sanity check)
# ----------------------------------------------------------------------------
def encoder_reference(x, p):
    def bn(y, g, b, m, v):
        inv = g / jnp.sqrt(v + BN_EPS)
        return (y - m[None, :, None, None]) * inv[None, :, None, None] \
            + b[None, :, None, None]

    y = lax.conv_general_dilated(x, p["w1"], (2, 2), ((1, 1), (1, 1)),
                                 dimension_numbers=("NCHW", "OIHW", "NCHW"))
    y = _leaky(bn(y, p["bn1_gamma"], p["bn1_beta"], p["bn1_mean"], p["bn1_var"]))
    y = lax.conv_general_dilated(y, p["w2"], (2, 2), ((1, 1), (1, 1)),
                                 dimension_numbers=("NCHW", "OIHW", "NCHW"))
    y = _leaky(bn(y, p["bn2_gamma"], p["bn2_beta"], p["bn2_mean"], p["bn2_var"]))
    flat = y.reshape(x.shape[0], 7 * 7 * 512)
    return jnp.tanh(flat @ p["fc_w"].T + p["fc_b"][None, :])


if __name__ == "__main__":
    key = jax.random.PRNGKey(0)
    k_x, k_p = jax.random.split(key)
    # Spatial must be 28x28 so that the 7*7*512 reshape in the module holds.
    x = jax.random.normal(k_x, (2, 1, 28, 28), jnp.float32)
    raw_params = init_params(k_p)
    params = prepare_params(raw_params)     # one-time re-layout, outside jit

    out = jax.block_until_ready(encoder_forward(x, params))
    assert out.shape == (2, 128), out.shape
    assert bool(jnp.all(jnp.isfinite(out)))

    # Loose tolerance: kernel uses bf16 matmul operands with f32 accumulation.
    ref = encoder_reference(x, raw_params)
    max_err = float(jnp.max(jnp.abs(out - ref)))
    assert max_err < 0.05, max_err

    print("KERNEL_OK")
</pallas_src>

<mosaic_0001>
module attributes {stable_mosaic.version = 11 : i64} {
  func.func @_fc_tanh_kernel(%arg0: i32, %arg1: memref<2x12544xbf16, #tpu.memory_space<vmem>>, %arg2: memref<12544x128xbf16, #tpu.memory_space<vmem>>, %arg3: memref<1x128xf32, #tpu.memory_space<vmem>>, %arg4: memref<2x128xf32, #tpu.memory_space<vmem>>, %arg5: memref<2x128xf32, #tpu.memory_space<vmem>>) attributes {dimension_semantics = [#tpu.dimension_semantics<arbitrary>], iteration_bounds = array<i64: 2>, scalar_prefetch = 0 : i64, scratch_operands = 1 : i64, tpu.core_type = #tpu.core_type<tc>, window_params = [{transform_indices = @transform_0, window_bounds = array<i64: 2, 12544>}, {transform_indices = @transform_1, window_bounds = array<i64: 12544, 128>}, {pipeline_mode = #tpu.pipeline_mode<synchronous>, transform_indices = @transform_2, window_bounds = array<i64: 1, 128>}, {pipeline_mode = #tpu.pipeline_mode<synchronous>, transform_indices = @transform_3, window_bounds = array<i64: 2, 128>}]} {
    %c0_i32 = arith.constant 0 : i32
    %0 = arith.cmpi eq, %arg0, %c0_i32 : i32
    %1 = arith.extui %0 : i1 to i32
    %c0_i32_0 = arith.constant 0 : i32
    %2 = arith.cmpi ne, %1, %c0_i32_0 : i32
    scf.if %2 {
      %cst_9 = arith.constant 0.000000e+00 : f32
      %12 = vector.broadcast %cst_9 : f32 to vector<2x128xf32>
      %c0_10 = arith.constant 0 : index
      %c0_11 = arith.constant 0 : index
      %13 = vector.load %arg5[%c0_10, %c0_11] : memref<2x128xf32, #tpu.memory_space<vmem>>, vector<2x128xf32>
      tpu.vector_store %arg5[%c0_10, %c0_11], %12 {strides = array<i32>} : memref<2x128xf32, #tpu.memory_space<vmem>>, vector<2x128xf32>,
    } else {
    }
    %c0 = arith.constant 0 : index
    %c0_1 = arith.constant 0 : index
    %3 = vector.load %arg5[%c0, %c0_1] : memref<2x128xf32, #tpu.memory_space<vmem>>, vector<2x128xf32>
    %c0_2 = arith.constant 0 : index
    %c0_3 = arith.constant 0 : index
    %4 = vector.load %arg1[%c0_2, %c0_3] : memref<2x12544xbf16, #tpu.memory_space<vmem>>, vector<2x12544xbf16>
    %c0_4 = arith.constant 0 : index
    %c0_5 = arith.constant 0 : index
    %5 = vector.load %arg2[%c0_4, %c0_5] : memref<12544x128xbf16, #tpu.memory_space<vmem>>, vector<12544x128xbf16>
    %cst = arith.constant dense<0.000000e+00> : vector<2x128xf32>
    %6 = tpu.matmul %4, %5, %cst {dimension_numbers = #tpu.dot_dimension_numbers<[1], [0], [0], [1], [0, 0, 1, 1], [], []>} : vector<2x12544xbf16>, vector<12544x128xbf16>, vector<2x128xf32> -> vector<2x128xf32>
    %7 = arith.addf %3, %6 : vector<2x128xf32>
    %c0_6 = arith.constant 0 : index
    %c0_7 = arith.constant 0 : index
    %8 = vector.load %arg5[%c0_6, %c0_7] : memref<2x128xf32, #tpu.memory_space<vmem>>, vector<2x128xf32>
    tpu.vector_store %arg5[%c0_6, %c0_7], %7 {strides = array<i32>} : memref<2x128xf32, #tpu.memory_space<vmem>>, vector<2x128xf32>,
    %c1_i32 = arith.constant 1 : i32
    %9 = arith.cmpi eq, %arg0, %c1_i32 : i32
    %10 = arith.extui %9 : i1 to i32
    %c0_i32_8 = arith.constant 0 : i32
    %11 = arith.cmpi ne, %10, %c0_i32_8 : i32
    scf.if %11 {
      %c0_9 = arith.constant 0 : index
      %c0_10 = arith.constant 0 : index
      %12 = vector.load %arg5[%c0_9, %c0_10] : memref<2x128xf32, #tpu.memory_space<vmem>>, vector<2x128xf32>
      %c0_11 = arith.constant 0 : index
      %c0_12 = arith.constant 0 : index
      %13 = vector.load %arg3[%c0_11, %c0_12] : memref<1x128xf32, #tpu.memory_space<vmem>>, vector<1x128xf32>
      %14 = vector.broadcast %13 : vector<1x128xf32> to vector<2x128xf32>
      %15 = arith.addf %12, %14 : vector<2x128xf32>
      %16 = math.tanh %15 : vector<2x128xf32>
      %c0_13 = arith.constant 0 : index
      %c0_14 = arith.constant 0 : index
      %17 = vector.load %arg4[%c0_13, %c0_14] : memref<2x128xf32, #tpu.memory_space<vmem>>, vector<2x128xf32>
      tpu.vector_store %arg4[%c0_13, %c0_14], %16 {strides = array<i32>} : memref<2x128xf32, #tpu.memory_space<vmem>>, vector<2x128xf32>,
    } else {
    }
    return
  }
  func.func @transform_0(%arg0: i32) -> (i32, i32) {
    %c0_i32 = arith.constant 0 : i32
    %c0_i32_0 = arith.constant 0 : i32
    return %c0_i32, %arg0 : i32, i32
  }
  func.func @transform_1(%arg0: i32) -> (i32, i32) {
    %c0_i32 = arith.constant 0 : i32
    %c0_i32_0 = arith.constant 0 : i32
    return %arg0, %c0_i32 : i32, i32
  }
  func.func @transform_2(%arg0: i32) -> (i32, i32) {
    %c0_i32 = arith.constant 0 : i32
    %c0_i32_0 = arith.constant 0 : i32
    %c0_i32_1 = arith.constant 0 : i32
    return %c0_i32, %c0_i32_0 : i32, i32
  }
  func.func @transform_3(%arg0: i32) -> (i32, i32) {
    %c0_i32 = arith.constant 0 : i32
    %c0_i32_0 = arith.constant 0 : i32
    %c0_i32_1 = arith.constant 0 : i32
    return %c0_i32, %c0_i32_0 : i32, i32
  }
}

module attributes {stable_mosaic.version = 11 : i64} {
  func.func @_conv_stack_kernel(%arg0: i32, %arg1: memref<1x9x49x10xf32, #tpu.memory_space<vmem>>, %arg2: memref<10x128xf32, #tpu.memory_space<vmem>>, %arg3: memref<9x128x512xbf16, #tpu.memory_space<vmem>>, %arg4: memref<1x512xf32, #tpu.memory_space<vmem>>, %arg5: memref<1x49x512xbf16, #tpu.memory_space<vmem>>, %arg6: memref<49x512xf32, #tpu.memory_space<vmem>>) attributes {dimension_semantics = [#tpu.dimension_semantics<parallel>], iteration_bounds = array<i64: 2>, scalar_prefetch = 0 : i64, scratch_operands = 1 : i64, tpu.core_type = #tpu.core_type<tc>, window_params = [{transform_indices = @transform_0, window_bounds = array<i64: 1, 9, 49, 10>}, {pipeline_mode = #tpu.pipeline_mode<synchronous>, transform_indices = @transform_1, window_bounds = array<i64: 10, 128>}, {pipeline_mode = #tpu.pipeline_mode<synchronous>, transform_indices = @transform_2, window_bounds = array<i64: 9, 128, 512>}, {pipeline_mode = #tpu.pipeline_mode<synchronous>, transform_indices = @transform_3, window_bounds = array<i64: 1, 512>}, {transform_indices = @transform_4, window_bounds = array<i64: 1, 49, 512>}]} {
    %cst = arith.constant 0.000000e+00 : f32
    %0 = vector.broadcast %cst : f32 to vector<49x512xf32>
    %c0 = arith.constant 0 : index
    %c0_0 = arith.constant 0 : index
    %1 = vector.load %arg6[%c0, %c0_0] : memref<49x512xf32, #tpu.memory_space<vmem>>, vector<49x512xf32>
    tpu.vector_store %arg6[%c0, %c0_0], %0 {strides = array<i32>} : memref<49x512xf32, #tpu.memory_space<vmem>>, vector<49x512xf32>,
    %c0_1 = arith.constant 0 : index
    %c0_2 = arith.constant 0 : index
    %c0_3 = arith.constant 0 : index
    %c0_4 = arith.constant 0 : index
    %2 = vector.load %arg1[%c0_1, %c0_2, %c0_3, %c0_4] : memref<1x9x49x10xf32, #tpu.memory_space<vmem>>, vector<1x1x49x10xf32>
    %3 = vector.shape_cast %2 : vector<1x1x49x10xf32> to vector<49x10xf32>
    %c0_5 = arith.constant 0 : index
    %c0_6 = arith.constant 0 : index
    %4 = vector.load %arg2[%c0_5, %c0_6] : memref<10x128xf32, #tpu.memory_space<vmem>>, vector<10x128xf32>
    %cst_7 = arith.constant dense<0.000000e+00> : vector<49x128xf32>
    %5 = tpu.matmul %3, %4, %cst_7 {dimension_numbers = #tpu.dot_dimension_numbers<[1], [0], [0], [1], [0, 0, 1, 1], [], []>} : vector<49x10xf32>, vector<10x128xf32>, vector<49x128xf32> -> vector<49x128xf32>
    %cst_8 = arith.constant 0.000000e+00 : f32
    %6 = vector.broadcast %cst_8 : f32 to vector<49x128xf32>
    %7 = arith.cmpf oge, %5, %6 : vector<49x128xf32>
    %cst_9 = arith.constant 0.00999999977 : f32
    %8 = vector.broadcast %cst_9 : f32 to vector<49x128xf32>
    %9 = arith.mulf %8, %5 : vector<49x128xf32>
    %10 = arith.select %7, %5, %9 : vector<49x128xi1>, vector<49x128xf32>
    %c0_10 = arith.constant 0 : index
    %c0_11 = arith.constant 0 : index
    %11 = vector.load %arg6[%c0_10, %c0_11] : memref<49x512xf32, #tpu.memory_space<vmem>>, vector<49x512xf32>
    %12 = arith.truncf %10 : vector<49x128xf32> to vector<49x128xbf16>
    %c0_12 = arith.constant 0 : index
    %c0_13 = arith.constant 0 : index
    %c0_14 = arith.constant 0 : index
    %13 = vector.load %arg3[%c0_12, %c0_13, %c0_14] : memref<9x128x512xbf16, #tpu.memory_space<vmem>>, vector<1x128x512xbf16>
    %14 = vector.shape_cast %13 : vector<1x128x512xbf16> to vector<128x512xbf16>
    %cst_15 = arith.constant dense<0.000000e+00> : vector<49x512xf32>
    %15 = tpu.matmul %12, %14, %cst_15 {dimension_numbers = #tpu.dot_dimension_numbers<[1], [0], [0], [1], [0, 0, 1, 1], [], []>} : vector<49x128xbf16>, vector<128x512xbf16>, vector<49x512xf32> -> vector<49x512xf32>
    %16 = arith.addf %11, %15 : vector<49x512xf32>
    %c0_16 = arith.constant 0 : index
    %c0_17 = arith.constant 0 : index
    %17 = vector.load %arg6[%c0_16, %c0_17] : memref<49x512xf32, #tpu.memory_space<vmem>>, vector<49x512xf32>
    tpu.vector_store %arg6[%c0_16, %c0_17], %16 {strides = array<i32>} : memref<49x512xf32, #tpu.memory_space<vmem>>, vector<49x512xf32>,
    %c0_18 = arith.constant 0 : index
    %c1 = arith.constant 1 : index
    %c0_19 = arith.constant 0 : index
    %c0_20 = arith.constant 0 : index
    %18 = vector.load %arg1[%c0_18, %c1, %c0_19, %c0_20] : memref<1x9x49x10xf32, #tpu.memory_space<vmem>>, vector<1x1x49x10xf32>
    %19 = vector.shape_cast %18 : vector<1x1x49x10xf32> to vector<49x10xf32>
    %c0_21 = arith.constant 0 : index
    %c0_22 = arith.constant 0 : index
    %20 = vector.load %arg2[%c0_21, %c0_22] : memref<10x128xf32, #tpu.memory_space<vmem>>, vector<10x128xf32>
    %cst_23 = arith.constant dense<0.000000e+00> : vector<49x128xf32>
    %21 = tpu.matmul %19, %20, %cst_23 {dimension_numbers = #tpu.dot_dimension_numbers<[1], [0], [0], [1], [0, 0, 1, 1], [], []>} : vector<49x10xf32>, vector<10x128xf32>, vector<49x128xf32> -> vector<49x128xf32>
    %cst_24 = arith.constant 0.000000e+00 : f32
    %22 = vector.broadcast %cst_24 : f32 to vector<49x128xf32>
    %23 = arith.cmpf oge, %21, %22 : vector<49x128xf32>
    %cst_25 = arith.constant 0.00999999977 : f32
    %24 = vector.broadcast %cst_25 : f32 to vector<49x128xf32>
    %25 = arith.mulf %24, %21 : vector<49x128xf32>
    %26 = arith.select %23, %21, %25 : vector<49x128xi1>, vector<49x128xf32>
    %c0_26 = arith.constant 0 : index
    %c0_27 = arith.constant 0 : index
    %27 = vector.load %arg6[%c0_26, %c0_27] : memref<49x512xf32, #tpu.memory_space<vmem>>, vector<49x512xf32>
    %28 = arith.truncf %26 : vector<49x128xf32> to vector<49x128xbf16>
    %c1_28 = arith.constant 1 : index
    %c0_29 = arith.constant 0 : index
    %c0_30 = arith.constant 0 : index
    %29 = vector.load %arg3[%c1_28, %c0_29, %c0_30] : memref<9x128x512xbf16, #tpu.memory_space<vmem>>, vector<1x128x512xbf16>
    %30 = vector.shape_cast %29 : vector<1x128x512xbf16> to vector<128x512xbf16>
    %cst_31 = arith.constant dense<0.000000e+00> : vector<49x512xf32>
    %31 = tpu.matmul %28, %30, %cst_31 {dimension_numbers = #tpu.dot_dimension_numbers<[1], [0], [0], [1], [0, 0, 1, 1], [], []>} : vector<49x128xbf16>, vector<128x512xbf16>, vector<49x512xf32> -> vector<49x512xf32>
    %32 = arith.addf %27, %31 : vector<49x512xf32>
    %c0_32 = arith.constant 0 : index
    %c0_33 = arith.constant 0 : index
    %33 = vector.load %arg6[%c0_32, %c0_33] : memref<49x512xf32, #tpu.memory_space<vmem>>, vector<49x512xf32>
    tpu.vector_store %arg6[%c0_32, %c0_33], %32 {strides = array<i32>} : memref<49x512xf32, #tpu.memory_space<vmem>>, vector<49x512xf32>,
    %c0_34 = arith.constant 0 : index
    %c2 = arith.constant 2 : index
    %c0_35 = arith.constant 0 : index
    %c0_36 = arith.constant 0 : index
    %34 = vector.load %arg1[%c0_34, %c2, %c0_35, %c0_36] : memref<1x9x49x10xf32, #tpu.memory_space<vmem>>, vector<1x1x49x10xf32>
    %35 = vector.shape_cast %34 : vector<1x1x49x10xf32> to vector<49x10xf32>
    %c0_37 = arith.constant 0 : index
    %c0_38 = arith.constant 0 : index
    %36 = vector.load %arg2[%c0_37, %c0_38] : memref<10x128xf32, #tpu.memory_space<vmem>>, vector<10x128xf32>
    %cst_39 = arith.constant dense<0.000000e+00> : vector<49x128xf32>
    %37 = tpu.matmul %35, %36, %cst_39 {dimension_numbers = #tpu.dot_dimension_numbers<[1], [0], [0], [1], [0, 0, 1, 1], [], []>} : vector<49x10xf32>, vector<10x128xf32>, vector<49x128xf32> -> vector<49x128xf32>
    %cst_40 = arith.constant 0.000000e+00 : f32
    %38 = vector.broadcast %cst_40 : f32 to vector<49x128xf32>
    %39 = arith.cmpf oge, %37, %38 : vector<49x128xf32>
    %cst_41 = arith.constant 0.00999999977 : f32
    %40 = vector.broadcast %cst_41 : f32 to vector<49x128xf32>
    %41 = arith.mulf %40, %37 : vector<49x128xf32>
    %42 = arith.select %39, %37, %41 : vector<49x128xi1>, vector<49x128xf32>
    %c0_42 = arith.constant 0 : index
    %c0_43 = arith.constant 0 : index
    %43 = vector.load %arg6[%c0_42, %c0_43] : memref<49x512xf32, #tpu.memory_space<vmem>>, vector<49x512xf32>
    %44 = arith.truncf %42 : vector<49x128xf32> to vector<49x128xbf16>
    %c2_44 = arith.constant 2 : index
    %c0_45 = arith.constant 0 : index
    %c0_46 = arith.constant 0 : index
    %45 = vector.load %arg3[%c2_44, %c0_45, %c0_46] : memref<9x128x512xbf16, #tpu.memory_space<vmem>>, vector<1x128x512xbf16>
    %46 = vector.shape_cast %45 : vector<1x128x512xbf16> to vector<128x512xbf16>
    %cst_47 = arith.constant dense<0.000000e+00> : vector<49x512xf32>
    %47 = tpu.matmul %44, %46, %cst_47 {dimension_numbers = #tpu.dot_dimension_numbers<[1], [0], [0], [1], [0, 0, 1, 1], [], []>} : vector<49x128xbf16>, vector<128x512xbf16>, vector<49x512xf32> -> vector<49x512xf32>
    %48 = arith.addf %43, %47 : vector<49x512xf32>
    %c0_48 = arith.constant 0 : index
    %c0_49 = arith.constant 0 : index
    %49 = vector.load %arg6[%c0_48, %c0_49] : memref<49x512xf32, #tpu.memory_space<vmem>>, vector<49x512xf32>
    tpu.vector_store %arg6[%c0_48, %c0_49], %48 {strides = array<i32>} : memref<49x512xf32, #tpu.memory_space<vmem>>, vector<49x512xf32>,
    %c0_50 = arith.constant 0 : index
    %c3 = arith.constant 3 : index
    %c0_51 = arith.constant 0 : index
    %c0_52 = arith.constant 0 : index
    %50 = vector.load %arg1[%c0_50, %c3, %c0_51, %c0_52] : memref<1x9x49x10xf32, #tpu.memory_space<vmem>>, vector<1x1x49x10xf32>
    %51 = vector.shape_cast %50 : vector<1x1x49x10xf32> to vector<49x10xf32>
    %c0_53 = arith.constant 0 : index
    %c0_54 = arith.constant 0 : index
    %52 = vector.load %arg2[%c0_53, %c0_54] : memref<10x128xf32, #tpu.memory_space<vmem>>, vector<10x128xf32>
    %cst_55 = arith.constant dense<0.000000e+00> : vector<49x128xf32>
    %53 = tpu.matmul %51, %52, %cst_55 {dimension_numbers = #tpu.dot_dimension_numbers<[1], [0], [0], [1], [0, 0, 1, 1], [], []>} : vector<49x10xf32>, vector<10x128xf32>, vector<49x128xf32> -> vector<49x128xf32>
    %cst_56 = arith.constant 0.000000e+00 : f32
    %54 = vector.broadcast %cst_56 : f32 to vector<49x128xf32>
    %55 = arith.cmpf oge, %53, %54 : vector<49x128xf32>
    %cst_57 = arith.constant 0.00999999977 : f32
    %56 = vector.broadcast %cst_57 : f32 to vector<49x128xf32>
    %57 = arith.mulf %56, %53 : vector<49x128xf32>
    %58 = arith.select %55, %53, %57 : vector<49x128xi1>, vector<49x128xf32>
    %c0_58 = arith.constant 0 : index
    %c0_59 = arith.constant 0 : index
    %59 = vector.load %arg6[%c0_58, %c0_59] : memref<49x512xf32, #tpu.memory_space<vmem>>, vector<49x512xf32>
    %60 = arith.truncf %58 : vector<49x128xf32> to vector<49x128xbf16>
    %c3_60 = arith.constant 3 : index
    %c0_61 = arith.constant 0 : index
    %c0_62 = arith.constant 0 : index
    %61 = vector.load %arg3[%c3_60, %c0_61, %c0_62] : memref<9x128x512xbf16, #tpu.memory_space<vmem>>, vector<1x128x512xbf16>
    %62 = vector.shape_cast %61 : vector<1x128x512xbf16> to vector<128x512xbf16>
    %cst_63 = arith.constant dense<0.000000e+00> : vector<49x512xf32>
    %63 = tpu.matmul %60, %62, %cst_63 {dimension_numbers = #tpu.dot_dimension_numbers<[1], [0], [0], [1], [0, 0, 1, 1], [], []>} : vector<49x128xbf16>, vector<128x512xbf16>, vector<49x512xf32> -> vector<49x512xf32>
    %64 = arith.addf %59, %63 : vector<49x512xf32>
    %c0_64 = arith.constant 0 : index
    %c0_65 = arith.constant 0 : index
    %65 = vector.load %arg6[%c0_64, %c0_65] : memref<49x512xf32, #tpu.memory_space<vmem>>, vector<49x512xf32>
    tpu.vector_store %arg6[%c0_64, %c0_65], %64 {strides = array<i32>} : memref<49x512xf32, #tpu.memory_space<vmem>>, vector<49x512xf32>,
    %c0_66 = arith.constant 0 : index
    %c4 = arith.constant 4 : index
    %c0_67 = arith.constant 0 : index
    %c0_68 = arith.constant 0 : index
    %66 = vector.load %arg1[%c0_66, %c4, %c0_67, %c0_68] : memref<1x9x49x10xf32, #tpu.memory_space<vmem>>, vector<1x1x49x10xf32>
    %67 = vector.shape_cast %66 : vector<1x1x49x10xf32> to vector<49x10xf32>
    %c0_69 = arith.constant 0 : index
    %c0_70 = arith.constant 0 : index
    %68 = vector.load %arg2[%c0_69, %c0_70] : memref<10x128xf32, #tpu.memory_space<vmem>>, vector<10x128xf32>
    %cst_71 = arith.constant dense<0.000000e+00> : vector<49x128xf32>
    %69 = tpu.matmul %67, %68, %cst_71 {dimension_numbers = #tpu.dot_dimension_numbers<[1], [0], [0], [1], [0, 0, 1, 1], [], []>} : vector<49x10xf32>, vector<10x128xf32>, vector<49x128xf32> -> vector<49x128xf32>
    %cst_72 = arith.constant 0.000000e+00 : f32
    %70 = vector.broadcast %cst_72 : f32 to vector<49x128xf32>
    %71 = arith.cmpf oge, %69, %70 : vector<49x128xf32>
    %cst_73 = arith.constant 0.00999999977 : f32
    %72 = vector.broadcast %cst_73 : f32 to vector<49x128xf32>
    %73 = arith.mulf %72, %69 : vector<49x128xf32>
    %74 = arith.select %71, %69, %73 : vector<49x128xi1>, vector<49x128xf32>
    %c0_74 = arith.constant 0 : index
    %c0_75 = arith.constant 0 : index
    %75 = vector.load %arg6[%c0_74, %c0_75] : memref<49x512xf32, #tpu.memory_space<vmem>>, vector<49x512xf32>
    %76 = arith.truncf %74 : vector<49x128xf32> to vector<49x128xbf16>
    %c4_76 = arith.constant 4 : index
    %c0_77 = arith.constant 0 : index
    %c0_78 = arith.constant 0 : index
    %77 = vector.load %arg3[%c4_76, %c0_77, %c0_78] : memref<9x128x512xbf16, #tpu.memory_space<vmem>>, vector<1x128x512xbf16>
    %78 = vector.shape_cast %77 : vector<1x128x512xbf16> to vector<128x512xbf16>
    %cst_79 = arith.constant dense<0.000000e+00> : vector<49x512xf32>
    %79 = tpu.matmul %76, %78, %cst_79 {dimension_numbers = #tpu.dot_dimension_numbers<[1], [0], [0], [1], [0, 0, 1, 1], [], []>} : vector<49x128xbf16>, vector<128x512xbf16>, vector<49x512xf32> -> vector<49x512xf32>
    %80 = arith.addf %75, %79 : vector<49x512xf32>
    %c0_80 = arith.constant 0 : index
    %c0_81 = arith.constant 0 : index
    %81 = vector.load %arg6[%c0_80, %c0_81] : memref<49x512xf32, #tpu.memory_space<vmem>>, vector<49x512xf32>
    tpu.vector_store %arg6[%c0_80, %c0_81], %80 {strides = array<i32>} : memref<49x512xf32, #tpu.memory_space<vmem>>, vector<49x512xf32>,
    %c0_82 = arith.constant 0 : index
    %c5 = arith.constant 5 : index
    %c0_83 = arith.constant 0 : index
    %c0_84 = arith.constant 0 : index
    %82 = vector.load %arg1[%c0_82, %c5, %c0_83, %c0_84] : memref<1x9x49x10xf32, #tpu.memory_space<vmem>>, vector<1x1x49x10xf32>
    %83 = vector.shape_cast %82 : vector<1x1x49x10xf32> to vector<49x10xf32>
    %c0_85 = arith.constant 0 : index
    %c0_86 = arith.constant 0 : index
    %84 = vector.load %arg2[%c0_85, %c0_86] : memref<10x128xf32, #tpu.memory_space<vmem>>, vector<10x128xf32>
    %cst_87 = arith.constant dense<0.000000e+00> : vector<49x128xf32>
    %85 = tpu.matmul %83, %84, %cst_87 {dimension_numbers = #tpu.dot_dimension_numbers<[1], [0], [0], [1], [0, 0, 1, 1], [], []>} : vector<49x10xf32>, vector<10x128xf32>, vector<49x128xf32> -> vector<49x128xf32>
    %cst_88 = arith.constant 0.000000e+00 : f32
    %86 = vector.broadcast %cst_88 : f32 to vector<49x128xf32>
    %87 = arith.cmpf oge, %85, %86 : vector<49x128xf32>
    %cst_89 = arith.constant 0.00999999977 : f32
    %88 = vector.broadcast %cst_89 : f32 to vector<49x128xf32>
    %89 = arith.mulf %88, %85 : vector<49x128xf32>
    %90 = arith.select %87, %85, %89 : vector<49x128xi1>, vector<49x128xf32>
    %c0_90 = arith.constant 0 : index
    %c0_91 = arith.constant 0 : index
    %91 = vector.load %arg6[%c0_90, %c0_91] : memref<49x512xf32, #tpu.memory_space<vmem>>, vector<49x512xf32>
    %92 = arith.truncf %90 : vector<49x128xf32> to vector<49x128xbf16>
    %c5_92 = arith.constant 5 : index
    %c0_93 = arith.constant 0 : index
    %c0_94 = arith.constant 0 : index
    %93 = vector.load %arg3[%c5_92, %c0_93, %c0_94] : memref<9x128x512xbf16, #tpu.memory_space<vmem>>, vector<1x128x512xbf16>
    %94 = vector.shape_cast %93 : vector<1x128x512xbf16> to vector<128x512xbf16>
    %cst_95 = arith.constant dense<0.000000e+00> : vector<49x512xf32>
    %95 = tpu.matmul %92, %94, %cst_95 {dimension_numbers = #tpu.dot_dimension_numbers<[1], [0], [0], [1], [0, 0, 1, 1], [], []>} : vector<49x128xbf16>, vector<128x512xbf16>, vector<49x512xf32> -> vector<49x512xf32>
    %96 = arith.addf %91, %95 : vector<49x512xf32>
    %c0_96 = arith.constant 0 : index
    %c0_97 = arith.constant 0 : index
    %97 = vector.load %arg6[%c0_96, %c0_97] : memref<49x512xf32, #tpu.memory_space<vmem>>, vector<49x512xf32>
    tpu.vector_store %arg6[%c0_96, %c0_97], %96 {strides = array<i32>} : memref<49x512xf32, #tpu.memory_space<vmem>>, vector<49x512xf32>,
    %c0_98 = arith.constant 0 : index
    %c6 = arith.constant 6 : index
    %c0_99 = arith.constant 0 : index
    %c0_100 = arith.constant 0 : index
    %98 = vector.load %arg1[%c0_98, %c6, %c0_99, %c0_100] : memref<1x9x49x10xf32, #tpu.memory_space<vmem>>, vector<1x1x49x10xf32>
    %99 = vector.shape_cast %98 : vector<1x1x49x10xf32> to vector<49x10xf32>
    %c0_101 = arith.constant 0 : index
    %c0_102 = arith.constant 0 : index
    %100 = vector.load %arg2[%c0_101, %c0_102] : memref<10x128xf32, #tpu.memory_space<vmem>>, vector<10x128xf32>
    %cst_103 = arith.constant dense<0.000000e+00> : vector<49x128xf32>
    %101 = tpu.matmul %99, %100, %cst_103 {dimension_numbers = #tpu.dot_dimension_numbers<[1], [0], [0], [1], [0, 0, 1, 1], [], []>} : vector<49x10xf32>, vector<10x128xf32>, vector<49x128xf32> -> vector<49x128xf32>
    %cst_104 = arith.constant 0.000000e+00 : f32
    %102 = vector.broadcast %cst_104 : f32 to vector<49x128xf32>
    %103 = arith.cmpf oge, %101, %102 : vector<49x128xf32>
    %cst_105 = arith.constant 0.00999999977 : f32
    %104 = vector.broadcast %cst_105 : f32 to vector<49x128xf32>
    %105 = arith.mulf %104, %101 : vector<49x128xf32>
    %106 = arith.select %103, %101, %105 : vector<49x128xi1>, vector<49x128xf32>
    %c0_106 = arith.constant 0 : index
    %c0_107 = arith.constant 0 : index
    %107 = vector.load %arg6[%c0_106, %c0_107] : memref<49x512xf32, #tpu.memory_space<vmem>>, vector<49x512xf32>
    %108 = arith.truncf %106 : vector<49x128xf32> to vector<49x128xbf16>
    %c6_108 = arith.constant 6 : index
    %c0_109 = arith.constant 0 : index
    %c0_110 = arith.constant 0 : index
    %109 = vector.load %arg3[%c6_108, %c0_109, %c0_110] : memref<9x128x512xbf16, #tpu.memory_space<vmem>>, vector<1x128x512xbf16>
    %110 = vector.shape_cast %109 : vector<1x128x512xbf16> to vector<128x512xbf16>
    %cst_111 = arith.constant dense<0.000000e+00> : vector<49x512xf32>
    %111 = tpu.matmul %108, %110, %cst_111 {dimension_numbers = #tpu.dot_dimension_numbers<[1], [0], [0], [1], [0, 0, 1, 1], [], []>} : vector<49x128xbf16>, vector<128x512xbf16>, vector<49x512xf32> -> vector<49x512xf32>
    %112 = arith.addf %107, %111 : vector<49x512xf32>
    %c0_112 = arith.constant 0 : index
    %c0_113 = arith.constant 0 : index
    %113 = vector.load %arg6[%c0_112, %c0_113] : memref<49x512xf32, #tpu.memory_space<vmem>>, vector<49x512xf32>
    tpu.vector_store %arg6[%c0_112, %c0_113], %112 {strides = array<i32>} : memref<49x512xf32, #tpu.memory_space<vmem>>, vector<49x512xf32>,
    %c0_114 = arith.constant 0 : index
    %c7 = arith.constant 7 : index
    %c0_115 = arith.constant 0 : index
    %c0_116 = arith.constant 0 : index
    %114 = vector.load %arg1[%c0_114, %c7, %c0_115, %c0_116] : memref<1x9x49x10xf32, #tpu.memory_space<vmem>>, vector<1x1x49x10xf32>
    %115 = vector.shape_cast %114 : vector<1x1x49x10xf32> to vector<49x10xf32>
    %c0_117 = arith.constant 0 : index
    %c0_118 = arith.constant 0 : index
    %116 = vector.load %arg2[%c0_117, %c0_118] : memref<10x128xf32, #tpu.memory_space<vmem>>, vector<10x128xf32>
    %cst_119 = arith.constant dense<0.000000e+00> : vector<49x128xf32>
    %117 = tpu.matmul %115, %116, %cst_119 {dimension_numbers = #tpu.dot_dimension_numbers<[1], [0], [0], [1], [0, 0, 1, 1], [], []>} : vector<49x10xf32>, vector<10x128xf32>, vector<49x128xf32> -> vector<49x128xf32>
    %cst_120 = arith.constant 0.000000e+00 : f32
    %118 = vector.broadcast %cst_120 : f32 to vector<49x128xf32>
    %119 = arith.cmpf oge, %117, %118 : vector<49x128xf32>
    %cst_121 = arith.constant 0.00999999977 : f32
    %120 = vector.broadcast %cst_121 : f32 to vector<49x128xf32>
    %121 = arith.mulf %120, %117 : vector<49x128xf32>
    %122 = arith.select %119, %117, %121 : vector<49x128xi1>, vector<49x128xf32>
    %c0_122 = arith.constant 0 : index
    %c0_123 = arith.constant 0 : index
    %123 = vector.load %arg6[%c0_122, %c0_123] : memref<49x512xf32, #tpu.memory_space<vmem>>, vector<49x512xf32>
    %124 = arith.truncf %122 : vector<49x128xf32> to vector<49x128xbf16>
    %c7_124 = arith.constant 7 : index
    %c0_125 = arith.constant 0 : index
    %c0_126 = arith.constant 0 : index
    %125 = vector.load %arg3[%c7_124, %c0_125, %c0_126] : memref<9x128x512xbf16, #tpu.memory_space<vmem>>, vector<1x128x512xbf16>
    %126 = vector.shape_cast %125 : vector<1x128x512xbf16> to vector<128x512xbf16>
    %cst_127 = arith.constant dense<0.000000e+00> : vector<49x512xf32>
    %127 = tpu.matmul %124, %126, %cst_127 {dimension_numbers = #tpu.dot_dimension_numbers<[1], [0], [0], [1], [0, 0, 1, 1], [], []>} : vector<49x128xbf16>, vector<128x512xbf16>, vector<49x512xf32> -> vector<49x512xf32>
    %128 = arith.addf %123, %127 : vector<49x512xf32>
    %c0_128 = arith.constant 0 : index
    %c0_129 = arith.constant 0 : index
    %129 = vector.load %arg6[%c0_128, %c0_129] : memref<49x512xf32, #tpu.memory_space<vmem>>, vector<49x512xf32>
    tpu.vector_store %arg6[%c0_128, %c0_129], %128 {strides = array<i32>} : memref<49x512xf32, #tpu.memory_space<vmem>>, vector<49x512xf32>,
    %c0_130 = arith.constant 0 : index
    %c8 = arith.constant 8 : index
    %c0_131 = arith.constant 0 : index
    %c0_132 = arith.constant 0 : index
    %130 = vector.load %arg1[%c0_130, %c8, %c0_131, %c0_132] : memref<1x9x49x10xf32, #tpu.memory_space<vmem>>, vector<1x1x49x10xf32>
    %131 = vector.shape_cast %130 : vector<1x1x49x10xf32> to vector<49x10xf32>
    %c0_133 = arith.constant 0 : index
    %c0_134 = arith.constant 0 : index
    %132 = vector.load %arg2[%c0_133, %c0_134] : memref<10x128xf32, #tpu.memory_space<vmem>>, vector<10x128xf32>
    %cst_135 = arith.constant dense<0.000000e+00> : vector<49x128xf32>
    %133 = tpu.matmul %131, %132, %cst_135 {dimension_numbers = #tpu.dot_dimension_numbers<[1], [0], [0], [1], [0, 0, 1, 1], [], []>} : vector<49x10xf32>, vector<10x128xf32>, vector<49x128xf32> -> vector<49x128xf32>
    %cst_136 = arith.constant 0.000000e+00 : f32
    %134 = vector.broadcast %cst_136 : f32 to vector<49x128xf32>
    %135 = arith.cmpf oge, %133, %134 : vector<49x128xf32>
    %cst_137 = arith.constant 0.00999999977 : f32
    %136 = vector.broadcast %cst_137 : f32 to vector<49x128xf32>
    %137 = arith.mulf %136, %133 : vector<49x128xf32>
    %138 = arith.select %135, %133, %137 : vector<49x128xi1>, vector<49x128xf32>
    %c0_138 = arith.constant 0 : index
    %c0_139 = arith.constant 0 : index
    %139 = vector.load %arg6[%c0_138, %c0_139] : memref<49x512xf32, #tpu.memory_space<vmem>>, vector<49x512xf32>
    %140 = arith.truncf %138 : vector<49x128xf32> to vector<49x128xbf16>
    %c8_140 = arith.constant 8 : index
    %c0_141 = arith.constant 0 : index
    %c0_142 = arith.constant 0 : index
    %141 = vector.load %arg3[%c8_140, %c0_141, %c0_142] : memref<9x128x512xbf16, #tpu.memory_space<vmem>>, vector<1x128x512xbf16>
    %142 = vector.shape_cast %141 : vector<1x128x512xbf16> to vector<128x512xbf16>
    %cst_143 = arith.constant dense<0.000000e+00> : vector<49x512xf32>
    %143 = tpu.matmul %140, %142, %cst_143 {dimension_numbers = #tpu.dot_dimension_numbers<[1], [0], [0], [1], [0, 0, 1, 1], [], []>} : vector<49x128xbf16>, vector<128x512xbf16>, vector<49x512xf32> -> vector<49x512xf32>
    %144 = arith.addf %139, %143 : vector<49x512xf32>
    %c0_144 = arith.constant 0 : index
    %c0_145 = arith.constant 0 : index
    %145 = vector.load %arg6[%c0_144, %c0_145] : memref<49x512xf32, #tpu.memory_space<vmem>>, vector<49x512xf32>
    tpu.vector_store %arg6[%c0_144, %c0_145], %144 {strides = array<i32>} : memref<49x512xf32, #tpu.memory_space<vmem>>, vector<49x512xf32>,
    %c0_146 = arith.constant 0 : index
    %c0_147 = arith.constant 0 : index
    %146 = vector.load %arg6[%c0_146, %c0_147] : memref<49x512xf32, #tpu.memory_space<vmem>>, vector<49x512xf32>
    %c0_148 = arith.constant 0 : index
    %c0_149 = arith.constant 0 : index
    %147 = vector.load %arg4[%c0_148, %c0_149] : memref<1x512xf32, #tpu.memory_space<vmem>>, vector<1x512xf32>
    %148 = vector.broadcast %147 : vector<1x512xf32> to vector<49x512xf32>
    %149 = arith.addf %146, %148 : vector<49x512xf32>
    %cst_150 = arith.constant 0.000000e+00 : f32
    %150 = vector.broadcast %cst_150 : f32 to vector<49x512xf32>
    %151 = arith.cmpf oge, %149, %150 : vector<49x512xf32>
    %cst_151 = arith.constant 0.00999999977 : f32
    %152 = vector.broadcast %cst_151 : f32 to vector<49x512xf32>
    %153 = arith.mulf %152, %149 : vector<49x512xf32>
    %154 = arith.select %151, %149, %153 : vector<49x512xi1>, vector<49x512xf32>
    %155 = arith.truncf %154 : vector<49x512xf32> to vector<49x512xbf16>
    %c0_152 = arith.constant 0 : index
    %c0_153 = arith.constant 0 : index
    %c0_154 = arith.constant 0 : index
    %156 = vector.load %arg5[%c0_152, %c0_153, %c0_154] : memref<1x49x512xbf16, #tpu.memory_space<vmem>>, vector<1x49x512xbf16>
    %157 = vector.shape_cast %156 : vector<1x49x512xbf16> to vector<49x512xbf16>
    %158 = vector.shape_cast %155 : vector<49x512xbf16> to vector<1x49x512xbf16>
    tpu.vector_store %arg5[%c0_152, %c0_153, %c0_154], %158 {strides = array<i32>} : memref<1x49x512xbf16, #tpu.memory_space<vmem>>, vector<1x49x512xbf16>,
    return
  }
  func.func @transform_0(%arg0: i32) -> (i32, i32, i32, i32) {
    %c0_i32 = arith.constant 0 : i32
    %c0_i32_0 = arith.constant 0 : i32
    %c0_i32_1 = arith.constant 0 : i32
    %c0_i32_2 = arith.constant 0 : i32
    return %arg0, %c0_i32, %c0_i32_0, %c0_i32_1 : i32, i32, i32, i32
  }
  func.func @transform_1(%arg0: i32) -> (i32, i32) {
    %c0_i32 = arith.constant 0 : i32
    %c0_i32_0 = arith.constant 0 : i32
    %c0_i32_1 = arith.constant 0 : i32
    return %c0_i32, %c0_i32_0 : i32, i32
  }
  func.func @transform_2(%arg0: i32) -> (i32, i32, i32) {
    %c0_i32 = arith.constant 0 : i32
    %c0_i32_0 = arith.constant 0 : i32
    %c0_i32_1 = arith.constant 0 : i32
    %c0_i32_2 = arith.constant 0 : i32
    return %c0_i32, %c0_i32_0, %c0_i32_1 : i32, i32, i32
  }
  func.func @transform_3(%arg0: i32) -> (i32, i32) {
    %c0_i32 = arith.constant 0 : i32
    %c0_i32_0 = arith.constant 0 : i32
    %c0_i32_1 = arith.constant 0 : i32
    return %c0_i32, %c0_i32_0 : i32, i32
  }
  func.func @transform_4(%arg0: i32) -> (i32, i32, i32) {
    %c0_i32 = arith.constant 0 : i32
    %c0_i32_0 = arith.constant 0 : i32
    %c0_i32_1 = arith.constant 0 : i32
    return %arg0, %c0_i32, %c0_i32_0 : i32, i32, i32
  }
}

</mosaic_0001>

<bundles_post_ra>
// kernel: encoder_forward.2
= control target key start
LH: loop header
LB: loop body
LE: loop exit
PB: predicated region body
PF: predicated region fallthrough
CT: control target
= control target key end

     0   :  { %9 = vsyncpa [#allocation4], 0  ;;  %s7553_s0 = inlined_call_operand.vmem [shape: f32[2,9,49,10], index: 0, kind: input, shape index: {}]   ;;  %s7554_s1 = inlined_call_operand.hbm [shape: f32[10,128], index: 1, kind: input, shape index: {}]   ;;  %s7555_s2 = inlined_call_operand.hbm [shape: bf16[9,128,512], index: 2, kind: input, shape index: {}]   ;;  %s7556_s3 = inlined_call_operand.hbm [shape: f32[1,512], index: 3, kind: input, shape index: {}]   ;;  %s7557_s4 = inlined_call_operand.vmem [shape: bf16[2,49,512], index: 4, kind: output, shape index: {}]  }
   0x1   :  { %10 = vsyncpa [#allocation6], 0  ;;  %s6693_s15 = smov 0  }
   0x2 LB: > { %s161_s18 = sshll.u32 %s7555_s2, 4  ;;  %s6702_s19 = sadd.s32 4294967295, %s6658_s15   ;;  %s6658_s15 = sphi %s6693_s15, %s16_s15   ;;  %s162_s18 = int_to_ptr.hbm [resolvable:$true] %s161_s18 }
   0x3   : > { %p4925_p0 = scmp.ge.s32.totalorder %s6658_s15, 1  ;;  %p136_p1 = scmp.lt.s32.totalorder %s6658_s15, 3 }
   0x4   : > { %p6532_p2 = scmp.eq.s32.totalorder %s6702_s19, 0  ;;  %s6660_s21 = smov [#allocation5]  }
   0x5   : > { %p6707_p3 = pnand %p4925_p0, %p136_p1  ;;  %s163_s22 = sshll.u32 %s6660_s21, 4  ;;  %s164_s22 = int_to_ptr.vmem [resolvable:$true] %s163_s22 }
   0x6   : > { %s147_s25 = sshll.u32 %s7554_s1, 4  ;;  %s6661_s27 = smov [#allocation3]   ;;  %s148_s25 = int_to_ptr.hbm [resolvable:$true] %s147_s25 }
   0x7   : > { %p6522_p4 = pneg %p6707_p3  ;;  %s149_s28 = sshll.u32 %s6661_s27, 4  ;;  %s150_s28 = int_to_ptr.vmem [resolvable:$true] %s149_s28 }
   0x8   : > { %s6662_s29 = smov 256   ;;  %s6663_s30 = smov 16  }
   0x9   : > { %p6718_p5 = pnand %p6532_p2, %p6522_p4  ;;  %s176_s7 = sshll.u32 %s7556_s3, 4  ;;  %s177_s7 = int_to_ptr.hbm [resolvable:$true] %s176_s7 }
   0xa   : > { %s6664_s8 = smov 128   ;;  %s6665_s9 = smov 8  }
   0xb   : > { %6528 = dma.hbm_to_vmem [thread:$0]  (!%p6718_p5), %s162_s18, 36864, %s164_s22, [#allocation6], %s6662_s29, %s6662_s29, %s6663_s30  }
   0xc   : > { %6525 = dma.hbm_to_vmem [thread:$0]  (!%p6718_p5), %s148_s25, 256, %s150_s28, [#allocation4], %s6664_s8, %s6664_s8, %s6665_s9  }
   0xd   : > { %s6666_s10 = smov [#allocation7]   ;;  %199 = sbr.rel (%p6707_p3) target bundleno = 2016 (0x7e0), region = 36 }
   0xe   : > { %s178_s11 = sshll.u32 %s6666_s10, 4  ;;  %s179_s11 = int_to_ptr.vmem [resolvable:$true] %s178_s11 }
   0xf   : > { %6531 = dma.hbm_to_vmem [thread:$0]  (!%p6718_p5), %s177_s7, 64, %s179_s11, [#allocation6]  }
  0x12   : > { %6649 = dma.done.wait (%p6532_p2), [#allocation4], 256  }
  0x13   : > { %6651 = vsyncadd (%p6532_p2), [#allocation4], 4294967040 }
  0x14   : > { %6653 = dma.done.wait (%p6532_p2), [#allocation6], 36928  }
  0x15   : > { %6655 = vsyncadd (%p6532_p2), [#allocation6], 4294930368  ;;  %p236_p6 = scmp.lt.s32.totalorder %s6702_s19, 1  ;;  %vm305_vm0 = vcmask 1041408   ;;  %v282_v0 = vld [vmem:[#allocation3 + $0x8] sm:$0x3] }
  0x16   : > { %v6751_v1 = vld [vmem:[#allocation3] sm:$0xff]  ;;  %4936 = vmatpush.msk.msra.mxu0 %vm305_vm0, %v282_v0  ;;  %vm283_vm1 = vcmask 80896   ;;  %6506 = vmatpush.msk.msra.mxu1 %vm305_vm0, %v282_v0  ;;  %v5058_v4 = vld [vmem:[#allocation5 + $0xe0] sm:$0xf]  ;;  %v6246_v6 = vld [vmem:[#allocation5 + $0xe4] sm:$0xf] }
  0x17   : > { %s7705_s19 = smov (!%p236_p6, %s6702_s19), 1  ;;  %v6248_v5 = vld [vmem:[#allocation5 + $0xec] sm:$0xf0]  ;;  %v5060_v8 = vld [vmem:[#allocation5 + $0xf0] sm:$0xf0] }
  0x18   : > { %s6508_s12 = smul.u32 504, %s7705_s19  ;;  %324 = vmatpush.msra.mxu0 %v6751_v1  ;;  %6507 = vmatpush.msra.mxu1 %v6751_v1  ;;  %v5059_v7 = vor.u32 %v6248_v5, %v5058_v4  ;;  %v5066_v9 = vld [vmem:[#allocation5 + $0xe8] sm:$0xf]  ;;  %v6249_v10 = vld [vmem:[#allocation5 + $0xf4] sm:$0xf0]  ;;  %v5063_v11 = vor.u32 %v6246_v6, %v5060_v8 }
  0x19   : > { %v5067_v12 = vor.u32 %v6249_v10, %v5066_v9  ;;  %v6247_v13 = vld [vmem:[#allocation5 + $0xec] sm:$0xf]  ;;  %v5068_v14 = vld [vmem:[#allocation5 + $0xf8] sm:$0xf0]  ;;  %v5042_v15 = vld [vmem:[#allocation5 + $0xc0] sm:$0xf] }
  0x1a   : > { %s6749_s16 = scalar_lea.vmem %s7553_s0, %s6508_s12  ;;  %592 = vmatpush.bf16.msrb.mxu1 %v5059_v7  ;;  %v5071_v16 = vor.u32 %v6247_v13, %v5068_v14  ;;  %v6244_v17 = vld [vmem:[#allocation5 + $0xcc] sm:$0xf0]  ;;  %v6242_v18 = vld [vmem:[#allocation5 + $0xc4] sm:$0xf]  ;;  %v5044_v19 = vld [vmem:[#allocation5 + $0xd0] sm:$0xf0]  ;;  %620 = vmatpush.bf16.msra.mxu2 %v5063_v11 }
  0x1b   : > { %v274_v2 = vld [vmem:[%s6749_s16] sm:$0xff]  ;;  %v275_v20 = vld [vmem:[%s6749_s16 + $0x8] sm:$0xff]  ;;  %648 = vmatpush.bf16.msra.mxu3 %v5067_v12  ;;  %v5043_v22 = vor.u32 %v6244_v17, %v5042_v15  ;;  %v5047_v23 = vor.u32 %v6242_v18, %v5044_v19  ;;  %v5050_v24 = vld [vmem:[#allocation5 + $0xc8] sm:$0xf]  ;;  %s6509_s17 = smul.u32 112, %s7705_s19 }
  0x1c   : > { %v278_v3 = vld [vmem:[%s6749_s16 + $0x20] sm:$0xff]  ;;  %4937 = vmatmul.msk.f32.vlgmr.msra.gmra.mxu0 %vm283_vm1, %v274_v2  ;;  %v279_v21 = vld [vmem:[%s6749_s16 + $0x28] sm:$0xff]  ;;  %v6243_v26 = vld [vmem:[#allocation5 + $0xcc] sm:$0xf] }
  0x1d   : > { %4941 = vmatmul.msk.f32.vlgmr.msra.gmra.mxu1 %vm283_vm1, %v278_v3  ;;  %v6245_v25 = vld [vmem:[#allocation5 + $0xd4] sm:$0xf0]  ;;  %676 = vmatpush.bf16.msrb.mxu0 %v5071_v16  ;;  %v5052_v28 = vld [vmem:[#allocation5 + $0xd8] sm:$0xf0]  ;;  %v5026_v29 = vld [vmem:[#allocation5 + $0xa0] sm:$0xf]  ;;  %s7461_s20 = scalar_lea.vmem %s7557_s4, %s6509_s17 }
  0x1e   : > { %v5051_v27 = vor.u32 %v6245_v25, %v5050_v24  ;;  %v6240_v30 = vld [vmem:[#allocation5 + $0xac] sm:$0xf0]  ;;  %v5055_v31 = vor.u32 %v6243_v26, %v5052_v28  ;;  %v6238_v32 = vld [vmem:[#allocation5 + $0xa4] sm:$0xf]  ;;  %v5028_v33 = vld [vmem:[#allocation5 + $0xb0] sm:$0xf0]  ;;  %593 = vmatpush.bf16.msrb.mxu1 %v5043_v22  ;;  %621 = vmatpush.bf16.msra.mxu2 %v5047_v23 }
  0x1f   : > { %v5034_v34 = vld [vmem:[#allocation5 + $0xa8] sm:$0xf]  ;;  %v5027_v35 = vor.u32 %v6240_v30, %v5026_v29  ;;  %v6241_v36 = vld [vmem:[#allocation5 + $0xb4] sm:$0xf0]  ;;  %v6239_v37 = vld [vmem:[#allocation5 + $0xac] sm:$0xf]  ;;  %v5031_v39 = vor.u32 %v6238_v32, %v5028_v33 }
  0x20   : > { %v5036_v38 = vld [vmem:[#allocation5 + $0xb8] sm:$0xf0]  ;;  %649 = vmatpush.bf16.msra.mxu3 %v5051_v27  ;;  %v5035_v40 = vor.u32 %v6241_v36, %v5034_v34  ;;  %v5010_v41 = vld [vmem:[#allocation5 + $0x80] sm:$0xf]  ;;  %v6236_v42 = vld [vmem:[#allocation5 + $0x8c] sm:$0xf0] }
  0x21   : > { %v6234_v43 = vld [vmem:[#allocation5 + $0x84] sm:$0xf]  ;;  %v5012_v44 = vld [vmem:[#allocation5 + $0x90] sm:$0xf0]  ;;  %v5018_v45 = vld [vmem:[#allocation5 + $0x88] sm:$0xf]  ;;  %677 = vmatpush.bf16.msrb.mxu0 %v5055_v31  ;;  %v5039_v47 = vor.u32 %v6239_v37, %v5036_v38  ;;  %v5011_v48 = vor.u32 %v6236_v42, %v5010_v41 }
  0x22   : > { %v6237_v46 = vld [vmem:[#allocation5 + $0x94] sm:$0xf0]  ;;  %594 = vmatpush.bf16.msrb.mxu1 %v5027_v35  ;;  %v6235_v49 = vld [vmem:[#allocation5 + $0x8c] sm:$0xf]  ;;  %v5020_v50 = vld [vmem:[#allocation5 + $0x98] sm:$0xf0]  ;;  %622 = vmatpush.bf16.msra.mxu2 %v5031_v39  ;;  %v5015_v51 = vor.u32 %v6234_v43, %v5012_v44 }
  0x23   : > { %v5019_v52 = vor.u32 %v6237_v46, %v5018_v45  ;;  %v4994_v53 = vld [vmem:[#allocation5 + $0x60] sm:$0xf]  ;;  %v6232_v54 = vld [vmem:[#allocation5 + $0x6c] sm:$0xf0]  ;;  %v6230_v55 = vld [vmem:[#allocation5 + $0x64] sm:$0xf]  ;;  %v5023_v61 = vor.u32 %v6235_v49, %v5020_v50 }
  0x24   : > { %4938 = vmatmul.msk.f32.gmra.mxu0 %vm283_vm1, %v275_v20  ;;  %650 = vmatpush.bf16.msra.mxu3 %v5035_v40  ;;  %v4996_v56 = vld [vmem:[#allocation5 + $0x70] sm:$0xf0]  ;;  %v5002_v57 = vld [vmem:[#allocation5 + $0x68] sm:$0xf]  ;;  %v6233_v58 = vld [vmem:[#allocation5 + $0x74] sm:$0xf0]  ;;  %v4995_v62 = vor.u32 %v6232_v54, %v4994_v53 }
  0x25   : > { %4942 = vmatmul.msk.f32.gmra.mxu1 %vm283_vm1, %v279_v21  ;;  %v276_v59 = vld [vmem:[%s6749_s16 + $0x10] sm:$0xff]  ;;  %678 = vmatpush.bf16.msrb.mxu0 %v5039_v47  ;;  %v6231_v63 = vld [vmem:[#allocation5 + $0x6c] sm:$0xf]  ;;  %v5004_v0 = vld [vmem:[#allocation5 + $0x78] sm:$0xf0]  ;;  %v4999_v2 = vor.u32 %v6230_v55, %v4996_v56  ;;  %v5003_v3 = vor.u32 %v6233_v58, %v5002_v57 }
  0x26   : > { %v280_v60 = vld [vmem:[%s6749_s16 + $0x30] sm:$0x1]  ;;  %595 = vmatpush.bf16.msrb.mxu1 %v5011_v48  ;;  %623 = vmatpush.bf16.msra.mxu2 %v5015_v51  ;;  %v5007_v4 = vor.u32 %v6231_v63, %v5004_v0  ;;  %v277_v5 = vld [vmem:[%s6749_s16 + $0x18] sm:$0xff]  ;;  %v6228_v7 = vld [vmem:[#allocation5 + $0x4c] sm:$0xf0] }
  0x27   : > { %v4978_v6 = vld [vmem:[#allocation5 + $0x40] sm:$0xf]  ;;  %v6226_v8 = vld [vmem:[#allocation5 + $0x44] sm:$0xf]  ;;  %v4980_v10 = vld [vmem:[#allocation5 + $0x50] sm:$0xf0] }
  0x28   : > { %651 = vmatpush.bf16.msra.mxu3 %v5019_v52  ;;  %v4979_v9 = vor.u32 %v6228_v7, %v4978_v6  ;;  %v4986_v11 = vld [vmem:[#allocation5 + $0x48] sm:$0xf]  ;;  %v6229_v12 = vld [vmem:[#allocation5 + $0x54] sm:$0xf0]  ;;  %v4983_v13 = vor.u32 %v6226_v8, %v4980_v10  ;;  %v6227_v15 = vld [vmem:[#allocation5 + $0x4c] sm:$0xf] }
  0x29   : > { %679 = vmatpush.bf16.msrb.mxu0 %v5023_v61  ;;  %v4987_v14 = vor.u32 %v6229_v12, %v4986_v11  ;;  %v4988_v16 = vld [vmem:[#allocation5 + $0x58] sm:$0xf0]  ;;  %v4962_v18 = vld [vmem:[#allocation5 + $0x20] sm:$0xf]  ;;  %v6224_v19 = vld [vmem:[#allocation5 + $0x2c] sm:$0xf0] }
  0x2a   : > { %596 = vmatpush.bf16.msrb.mxu1 %v4995_v62  ;;  %624 = vmatpush.bf16.msra.mxu2 %v4999_v2  ;;  %v4991_v17 = vor.u32 %v6227_v15, %v4988_v16  ;;  %v6222_v20 = vld [vmem:[#allocation5 + $0x24] sm:$0xf]  ;;  %v4963_v21 = vor.u32 %v6224_v19, %v4962_v18  ;;  %v4964_v22 = vld [vmem:[#allocation5 + $0x30] sm:$0xf0]  ;;  %v4970_v23 = vld [vmem:[#allocation5 + $0x28] sm:$0xf] }
  0x2b   : > { %v6225_v24 = vld [vmem:[#allocation5 + $0x34] sm:$0xf0]  ;;  %v4967_v25 = vor.u32 %v6222_v20, %v4964_v22  ;;  %v6223_v27 = vld [vmem:[#allocation5 + $0x2c] sm:$0xf]  ;;  %v4972_v28 = vld [vmem:[#allocation5 + $0x38] sm:$0xf0] }
  0x2c   : > { %4939 = vmatmul.msk.f32.gmra.mxu0 %vm283_vm1, %v276_v59  ;;  %652 = vmatpush.bf16.msra.mxu3 %v5003_v3  ;;  %v4971_v26 = vor.u32 %v6225_v24, %v4970_v23  ;;  %v4975_v29 = vor.u32 %v6223_v27, %v4972_v28  ;;  %v4946_v30 = vld [vmem:[#allocation5] sm:$0xf]  ;;  %v6220_v31 = vld [vmem:[#allocation5 + $0xc] sm:$0xf0]  ;;  %v6218_v32 = vld [vmem:[#allocation5 + $0x4] sm:$0xf] }
  0x2d   : > { %4943 = vmatmul.msk.f32.gmra.mxu1 %vm283_vm1, %v280_v60  ;;  %680 = vmatpush.bf16.msrb.mxu0 %v5007_v4  ;;  %v4947_v33 = vor.u32 %v6220_v31, %v4946_v30  ;;  %v4948_v34 = vld [vmem:[#allocation5 + $0x10] sm:$0xf0]  ;;  %v4954_v35 = vld [vmem:[#allocation5 + $0x8] sm:$0xf]  ;;  %v6221_v36 = vld [vmem:[#allocation5 + $0x14] sm:$0xf0] }
  0x2e   : > { %597 = vmatpush.bf16.msrb.mxu1 %v4979_v9  ;;  %625 = vmatpush.bf16.msra.mxu2 %v4983_v13  ;;  %v4951_v37 = vor.u32 %v6218_v32, %v4948_v34  ;;  %v4955_v38 = vor.u32 %v6221_v36, %v4954_v35  ;;  %v6219_v39 = vld [vmem:[#allocation5 + $0xc] sm:$0xf]  ;;  %v4956_v40 = vld [vmem:[#allocation5 + $0x18] sm:$0xf0]  ;;  %v769_v42 = vld [vmem:[#allocation3 + $0x8] sm:$0x3] }
  0x2f   : > { %v4959_v41 = vor.u32 %v6219_v39, %v4956_v40  ;;  %v5072_v4 = vld [vmem:[%s6749_s16 + $0x38] sm:$0xff]  ;;  %v5074_v6 = vld [vmem:[%s6749_s16 + $0x48] sm:$0xff]  ;;  %v6667_v7 = vmov 0.0   ;;  %v5075_v8 = vld [vmem:[%s6749_s16 + $0x50] sm:$0xff] }
  0x30   : > { %653 = vmatpush.bf16.msra.mxu3 %v4987_v14  ;;  %270 = vst [vmem:[#allocation2 + $0x20] sm:$0x1] %v6667_v7  ;;  %v5076_v9 = vld [vmem:[%s6749_s16 + $0x58] sm:$0xff]  ;;  %v5077_v10 = vld [vmem:[%s6749_s16 + $0x60] sm:$0xff]  ;;  %v5078_v11 = vld [vmem:[%s6749_s16 + $0x68] sm:$0x1] }
  0x31   : > { %681 = vmatpush.bf16.msrb.mxu0 %v4991_v17  ;;  %271 = vst [vmem:[#allocation2 + $0x10] sm:$0x1] %v6667_v7  ;;  %v5201_v12 = vld [vmem:[#allocation5 + $0x1e0] sm:$0xf]  ;;  %v6280_v13 = vld [vmem:[#allocation5 + $0x1ec] sm:$0xf0] }
  0x32   : > { %598 = vmatpush.bf16.msrb.mxu1 %v4963_v21  ;;  %626 = vmatpush.bf16.msra.mxu2 %v4967_v25  ;;  %272 = vst [vmem:[#allocation2 + $0xc8] sm:$0x1] %v6667_v7  ;;  %v5202_v14 = vor.u32 %v6280_v13, %v5201_v12  ;;  %v5185_v15 = vld [vmem:[#allocation5 + $0x1c0] sm:$0xf]  ;;  %v6276_v16 = vld [vmem:[#allocation5 + $0x1cc] sm:$0xf0] }
  0x33   : > { %273 = vst [vmem:[#allocation2 + $0x70] sm:$0x1] %v6667_v7  ;;  %v5186_v17 = vor.u32 %v6276_v16, %v5185_v15  ;;  %v5169_v19 = vld [vmem:[#allocation5 + $0x1a0] sm:$0xf]  ;;  %v6272_v20 = vld [vmem:[#allocation5 + $0x1ac] sm:$0xf0] }
  0x34   : > { %4940 = vmatmul.msk.f32.gmra.mxu0 %vm283_vm1, %v277_v5  ;;  %654 = vmatpush.bf16.msra.mxu3 %v4971_v26  ;;  %v5073_v5 = vld [vmem:[%s6749_s16 + $0x40] sm:$0xff]  ;;  %v5170_v22 = vor.u32 %v6272_v20, %v5169_v19  ;;  %v5153_v26 = vld [vmem:[#allocation5 + $0x180] sm:$0xf]  ;;  %v6278_v30 = vld [vmem:[#allocation5 + $0x1e4] sm:$0xf] }
  0x35   : > { %682 = vmatpush.bf16.msrb.mxu0 %v4975_v29  ;;  %v6268_v27 = vld [vmem:[#allocation5 + $0x18c] sm:$0xf0]  ;;  %v5203_v31 = vld [vmem:[#allocation5 + $0x1f0] sm:$0xf0]  ;;  %v5209_v32 = vld [vmem:[#allocation5 + $0x1e8] sm:$0xf] }
  0x36   : > { %599 = vmatpush.bf16.msrb.mxu1 %v4947_v33  ;;  %627 = vmatpush.bf16.msra.mxu2 %v4951_v37  ;;  %v5154_v29 = vor.u32 %v6268_v27, %v5153_v26  ;;  %v5206_v34 = vor.u32 %v6278_v30, %v5203_v31  ;;  %v6281_v35 = vld [vmem:[#allocation5 + $0x1f4] sm:$0xf0]  ;;  %v6279_v36 = vld [vmem:[#allocation5 + $0x1ec] sm:$0xf]  ;;  %v5211_v37 = vld [vmem:[#allocation5 + $0x1f8] sm:$0xf0] }
  0x37   : > { %v5210_v39 = vor.u32 %v6281_v35, %v5209_v32  ;;  %v5214_v40 = vor.u32 %v6279_v36, %v5211_v37  ;;  %v5121_v7 = vld [vmem:[#allocation5 + $0x140] sm:$0xf]  ;;  %v6267_v13 = vld [vmem:[#allocation5 + $0x18c] sm:$0xf]  ;;  %v6262_v16 = vld [vmem:[#allocation5 + $0x164] sm:$0xf] }
  0x38   : > { %655 = vmatpush.bf16.msra.mxu3 %v4955_v38  ;;  %v5145_v19 = vld [vmem:[#allocation5 + $0x168] sm:$0xf]  ;;  %v6265_v26 = vld [vmem:[#allocation5 + $0x174] sm:$0xf0]  ;;  %v6263_v27 = vld [vmem:[#allocation5 + $0x16c] sm:$0xf] }
  0x39   : > { %683 = vmatpush.bf16.msrb.mxu0 %v4959_v41  ;;  %v5105_v31 = vld [vmem:[#allocation5 + $0x120] sm:$0xf]  ;;  %v6256_v32 = vld [vmem:[#allocation5 + $0x12c] sm:$0xf0] }
  0x3a   : > { %5079 = vmatpush.msk.msra.mxu1 %vm305_vm0, %v769_v42  ;;  %1078 = vmatpush.bf16.msrb.mxu2 %v5202_v14  ;;  %v5137_v42 = vld [vmem:[#allocation5 + $0x160] sm:$0xf]  ;;  %v5163_v14 = vld [vmem:[#allocation5 + $0x198] sm:$0xf0]  ;;  %v5106_v37 = vor.u32 %v6256_v32, %v5105_v31 }
  0x3b   : > { %v5166_v15 = vor.u32 %v6267_v13, %v5163_v14  ;;  %v5099_v13 = vld [vmem:[#allocation5 + $0x118] sm:$0xf0] }
  0x3c   : > { %809 = vmatpush.msra.mxu1 %v6751_v1  ;;  %1106 = vmatpush.bf16.msrb.mxu3 %v5206_v34  ;;  %v5146_v34 = vor.u32 %v6265_v26, %v5145_v19  ;;  %v1255_v26 = vld [vmem:[#allocation3 + $0x8] sm:$0x3] }
  0x3d   : > { %1134 = vmatpush.bf16.msra.mxu0 %v5210_v39 }
  0x3e   : > { %1079 = vmatpush.bf16.msrb.mxu2 %v5186_v17  ;;  %v5139_v17 = vld [vmem:[#allocation5 + $0x170] sm:$0xf0] }
  0x42   : > { %1080 = vmatpush.bf16.msrb.mxu2 %v5170_v22  ;;  %v5142_v22 = vor.u32 %v6262_v16, %v5139_v17  ;;  %v392_v17 = vld [vmem:[#allocation2 + $0x20] sm:$0x1] }
  0x46   : > { %1081 = vmatpush.bf16.msrb.mxu2 %v5154_v29  ;;  %v5147_v29 = vld [vmem:[#allocation5 + $0x178] sm:$0xf0] }
  0x47   : > { %v5150_v35 = vor.u32 %v6263_v27, %v5147_v29 }
  0x99   : > { %v326_v43 = vpop.f32.mrf.mxu0 }
  0x9a   : > { %v354_v44 = vmul.f32 0.01, %v326_v43  ;;  %vm347_vm2 = vcmp.ge.f32.partialorder %v326_v43, 0.0  ;;  %v338_v52 = vpop.f32.mrf.mxu1 }
  0x9b   : > { %v358_v58 = vmul.f32 0.01, %v338_v52  ;;  %vm351_vm6 = vcmp.ge.f32.partialorder %v338_v52, 0.0 }
  0x9c   : > { %v361_v47 = vsel %vm347_vm2, %v326_v43, %v354_v44  ;;  %v6264_v43 = vld [vmem:[#allocation5 + $0x16c] sm:$0xf0] }
  0x9d   : > { %v365_v60 = vsel %vm351_vm6, %v338_v52, %v358_v58 }
  0xa1   : > { %v329_v45 = vpop.f32.mrf.mxu0 }
  0xa2   : > { %vm348_vm3 = vcmp.ge.f32.partialorder %v329_v45, 0.0  ;;  %v355_v46 = vmul.f32 0.01, %v329_v45  ;;  %v341_v57 = vpop.f32.mrf.mxu1 }
  0xa3   : > { %v359_v59 = vmul.f32 0.01, %v341_v57  ;;  %vm352_vm7 = vcmp.ge.f32.partialorder %v341_v57, 0.0 }
  0xa4   : > { %v362_v48 = vsel %vm348_vm3, %v329_v45, %v355_v46  ;;  %v5138_v45 = vor.u32 %v6264_v43, %v5137_v42  ;;  %v6274_v46 = vld [vmem:[#allocation5 + $0x1c4] sm:$0xf]  ;;  %v5123_v42 = vld [vmem:[#allocation5 + $0x150] sm:$0xf0]  ;;  %v5129_v43 = vld [vmem:[#allocation5 + $0x148] sm:$0xf] }
  0xa5   : > { %v396_v49 = vpack.c.bf16 %v362_v48, %v361_v47  ;;  %v366_v61 = vsel %vm352_vm7, %v341_v57, %v359_v59  ;;  %v5187_v47 = vld [vmem:[#allocation5 + $0x1d0] sm:$0xf0]  ;;  %v6273_v59 = vld [vmem:[#allocation5 + $0x1b4] sm:$0xf0] }
  0xa6   : > { %v398_v62 = vpack.c.bf16 %v366_v61, %v365_v60  ;;  %v5190_v48 = vor.u32 %v6274_v46, %v5187_v47  ;;  %1082 = vmatpush.bf16.msrb.mxu2 %v5138_v45  ;;  %v6271_v60 = vld [vmem:[#allocation5 + $0x1ac] sm:$0xf]  ;;  %v5179_v61 = vld [vmem:[#allocation5 + $0x1b8] sm:$0xf0]  ;;  %v6261_v46 = vld [vmem:[#allocation5 + $0x154] sm:$0xf0] }
  0xa7   : > { %600 = vmatmul.bf16.vlgmr.msrb.gmra.mxu1 %v396_v49  ;;  %628 = vmatmul.bf16.vlgmr.msra.gmra.mxu2 %v396_v49  ;;  %v6259_v47 = vld [vmem:[#allocation5 + $0x14c] sm:$0xf] }
  0xa8   : > { %656 = vmatmul.bf16.vlgmr.msra.gmra.mxu3 %v396_v49  ;;  %684 = vmatmul.bf16.vlgmr.msrb.gmra.mxu0 %v396_v49  ;;  %v5193_v49 = vld [vmem:[#allocation5 + $0x1c8] sm:$0xf] }
  0xa9   : > { %v332_v50 = vpop.f32.mrf.mxu0  ;;  %1162 = vmatpush.bf16.msrb.mxu1 %v5214_v40  ;;  %1107 = vmatpush.bf16.msrb.mxu3 %v5190_v48  ;;  %v6258_v40 = vld [vmem:[#allocation5 + $0x144] sm:$0xf]  ;;  %v5131_v48 = vld [vmem:[#allocation5 + $0x158] sm:$0xf0] }
  0xaa   : > { %v356_v51 = vmul.f32 0.01, %v332_v50  ;;  %vm349_vm4 = vcmp.ge.f32.partialorder %v332_v50, 0.0  ;;  %v344_v63 = vpop.f32.mrf.mxu1  ;;  %v5126_v45 = vor.u32 %v6258_v40, %v5123_v42 }
  0xab   : > { %v360_v0 = vmul.f32 0.01, %v344_v63  ;;  %vm353_vm8 = vcmp.ge.f32.partialorder %v344_v63, 0.0 }
  0xac   : > { %v363_v54 = vsel %vm349_vm4, %v332_v50, %v356_v51  ;;  %v6277_v50 = vld [vmem:[#allocation5 + $0x1d4] sm:$0xf0]  ;;  %v6275_v51 = vld [vmem:[#allocation5 + $0x1cc] sm:$0xf] }
  0xad   : > { %v367_v2 = vsel %vm353_vm8, %v344_v63, %v360_v0  ;;  %v5194_v52 = vor.u32 %v6277_v50, %v5193_v49  ;;  %v5182_v0 = vor.u32 %v6271_v60, %v5179_v61  ;;  %v5130_v49 = vor.u32 %v6261_v46, %v5129_v43  ;;  %v6255_v60 = vld [vmem:[#allocation5 + $0x12c] sm:$0xf]  ;;  %v5115_v61 = vld [vmem:[#allocation5 + $0x138] sm:$0xf0] }
  0xae   : > { %v399_v3 = vpack.c.bf16 %v367_v2, %v367_v2  ;;  %v5134_v50 = vor.u32 %v6259_v47, %v5131_v48 }
  0xaf   : > { %1135 = vmatpush.bf16.msra.mxu0 %v5194_v52  ;;  %v6252_v52 = vld [vmem:[#allocation5 + $0x10c] sm:$0xf0] }
  0xb1   : > { %v335_v53 = vpop.f32.mrf.mxu0 }
  0xb2   : > { %vm350_vm5 = vcmp.ge.f32.partialorder %v335_v53, 0.0  ;;  %v357_v1 = vmul.f32 0.01, %v335_v53 }
  0xb4   : > { %v364_v55 = vsel %vm350_vm5, %v335_v53, %v357_v1  ;;  %v5195_v53 = vld [vmem:[#allocation5 + $0x1d8] sm:$0xf0] }
  0xb5   : > { %v397_v56 = vpack.c.bf16 %v364_v55, %v363_v54  ;;  %v5198_v1 = vor.u32 %v6275_v51, %v5195_v53  ;;  %v6270_v54 = vld [vmem:[#allocation5 + $0x1a4] sm:$0xf]  ;;  %v5171_v55 = vld [vmem:[#allocation5 + $0x1b0] sm:$0xf0]  ;;  %v5089_v51 = vld [vmem:[#allocation5 + $0x100] sm:$0xf] }
  0xb6   : > { %v5174_v58 = vor.u32 %v6270_v54, %v5171_v55  ;;  %v6254_v53 = vld [vmem:[#allocation5 + $0x124] sm:$0xf]  ;;  %v5107_v54 = vld [vmem:[#allocation5 + $0x130] sm:$0xf0]  ;;  %v5113_v55 = vld [vmem:[#allocation5 + $0x128] sm:$0xf] }
  0xb7   : > { %605 = vmatmul.bf16.gmra.mxu1 %v397_v56  ;;  %633 = vmatmul.bf16.gmra.mxu2 %v397_v56 }
  0xb8   : > { %661 = vmatmul.bf16.gmra.mxu3 %v397_v56  ;;  %689 = vmatmul.bf16.gmra.mxu0 %v397_v56  ;;  %v5177_v56 = vld [vmem:[#allocation5 + $0x1a8] sm:$0xf] }
  0xb9   : > { %1163 = vmatpush.bf16.msrb.mxu1 %v5198_v1  ;;  %v5178_v63 = vor.u32 %v6273_v59, %v5177_v56  ;;  %1108 = vmatpush.bf16.msrb.mxu3 %v5174_v58  ;;  %v5090_v1 = vor.u32 %v6252_v52, %v5089_v51  ;;  %v6257_v56 = vld [vmem:[#allocation5 + $0x134] sm:$0xf0]  ;;  %v5110_v58 = vor.u32 %v6254_v53, %v5107_v54 }
  0xba   : > { %v5114_v59 = vor.u32 %v6257_v56, %v5113_v55  ;;  %v6836_v55 = vld [vmem:[#allocation3] sm:$0xff] }
  0xbb   : > { %1136 = vmatpush.bf16.msra.mxu0 %v5178_v63 }
  0xbd   : > { %1164 = vmatpush.bf16.msrb.mxu1 %v5182_v0  ;;  %v5118_v0 = vor.u32 %v6255_v60, %v5115_v61 }
  0xc1   : > { %1165 = vmatpush.bf16.msrb.mxu1 %v5166_v15 }
  0xc5   : > { %1166 = vmatpush.bf16.msrb.mxu1 %v5150_v35  ;;  %v394_v35 = vld [vmem:[#allocation2 + $0xc8] sm:$0x1] }
  0xc7   : > { %610 = vmatmul.bf16.gmra.mxu1 %v398_v62  ;;  %638 = vmatmul.bf16.gmra.mxu2 %v398_v62 }
  0xc8   : > { %666 = vmatmul.bf16.gmra.mxu3 %v398_v62  ;;  %694 = vmatmul.bf16.gmra.mxu0 %v398_v62 }
  0xc9   : > { %1167 = vmatpush.bf16.msrb.mxu1 %v5134_v50 }
  0xcd   : > { %1168 = vmatpush.bf16.msrb.mxu1 %v5118_v0 }
  0xd7   : > { %615 = vmatmul.bf16.gmra.mxu1 %v399_v3  ;;  %643 = vmatmul.bf16.gmra.mxu2 %v399_v3 }
  0xd8   : > { %671 = vmatmul.bf16.gmra.mxu3 %v399_v3  ;;  %699 = vmatmul.bf16.gmra.mxu0 %v399_v3 }
  0xe7   : > { %5080 = vmatmul.msk.f32.vlgmr.msra.gmra.mxu1 %vm283_vm1, %v5072_v4  ;;  %v6266_v4 = vld [vmem:[#allocation5 + $0x184] sm:$0xf] }
  0xef   : > { %5081 = vmatmul.msk.f32.gmra.mxu1 %vm283_vm1, %v5073_v5  ;;  %v5155_v5 = vld [vmem:[#allocation5 + $0x190] sm:$0xf0] }
  0xf7   : > { %5082 = vmatmul.msk.f32.gmra.mxu1 %vm283_vm1, %v5074_v6  ;;  %v5161_v6 = vld [vmem:[#allocation5 + $0x188] sm:$0xf] }
  0xff   : > { %5083 = vmatmul.msk.f32.gmra.mxu1 %vm283_vm1, %v5075_v8  ;;  %v6260_v8 = vld [vmem:[#allocation5 + $0x14c] sm:$0xf0] }
 0x107   : > { %5084 = vmatmul.msk.f32.gmra.mxu1 %vm283_vm1, %v5076_v9  ;;  %v5158_v9 = vor.u32 %v6266_v4, %v5155_v5 }
 0x109   : > { %1109 = vmatpush.bf16.msrb.mxu3 %v5158_v9  ;;  %v5097_v9 = vld [vmem:[#allocation5 + $0x108] sm:$0xf] }
 0x10d   : > { %1110 = vmatpush.bf16.msrb.mxu3 %v5142_v22  ;;  %v395_v22 = vld [vmem:[#allocation2 + $0x70] sm:$0x1] }
 0x10f   : > { %5085 = vmatmul.msk.f32.gmra.mxu1 %vm283_vm1, %v5077_v10  ;;  %v6269_v10 = vld [vmem:[#allocation5 + $0x194] sm:$0xf0] }
 0x110   : > { %v5162_v12 = vor.u32 %v6269_v10, %v5161_v6 }
 0x111   : > { %1111 = vmatpush.bf16.msrb.mxu3 %v5126_v45 }
 0x112   : > { %1137 = vmatpush.bf16.msra.mxu0 %v5162_v12  ;;  %v6251_v12 = vld [vmem:[#allocation5 + $0x10c] sm:$0xf] }
 0x113   : > { %v5102_v15 = vor.u32 %v6251_v12, %v5099_v13 }
 0x115   : > { %1112 = vmatpush.bf16.msrb.mxu3 %v5110_v58  ;;  %1169 = vmatpush.bf16.msrb.mxu1 %v5102_v15 }
 0x116   : > { %1138 = vmatpush.bf16.msra.mxu0 %v5146_v34  ;;  %v393_v34 = vld [vmem:[#allocation2 + $0x10] sm:$0x1] }
 0x117   : > { %5086 = vmatmul.msk.f32.gmra.mxu1 %vm283_vm1, %v5078_v11  ;;  %v5122_v11 = vor.u32 %v6260_v8, %v5121_v7  ;;  %v6250_v7 = vld [vmem:[#allocation5 + $0x104] sm:$0xf]  ;;  %v5091_v8 = vld [vmem:[#allocation5 + $0x110] sm:$0xf0] }
 0x118   : > { %v5094_v10 = vor.u32 %v6250_v7, %v5091_v8 }
 0x119   : > { %1083 = vmatpush.bf16.msrb.mxu2 %v5122_v11  ;;  %v6253_v11 = vld [vmem:[#allocation5 + $0x114] sm:$0xf0] }
 0x11a   : > { %1139 = vmatpush.bf16.msra.mxu0 %v5130_v49  ;;  %v5098_v14 = vor.u32 %v6253_v11, %v5097_v9  ;;  %1113 = vmatpush.bf16.msrb.mxu3 %v5094_v10 }
 0x11d   : > { %1084 = vmatpush.bf16.msrb.mxu2 %v5106_v37 }
 0x11e   : > { %1140 = vmatpush.bf16.msra.mxu0 %v5114_v59 }
 0x121   : > { %1085 = vmatpush.bf16.msrb.mxu2 %v5090_v1 }
 0x122   : > { %1141 = vmatpush.bf16.msra.mxu0 %v5098_v14 }
 0x124   : > { %v6787_v18 = vpop.f32.mrf.mxu1 }
 0x125   : > { %7560 = vst [vmem:[#allocation10_spill] sm:$0xff] %v6787_v18  ;;  %v6789_v21 = vpop.f32.mrf.mxu0  ;;  %5222 = vmatpush.msk.msra.mxu2 %vm305_vm0, %v1255_v26  ;;  %v5518_v18 = vld [vmem:[#allocation5 + $0x400] sm:$0xf] }
 0x127   : > { %1295 = vmatpush.msra.mxu2 %v6836_v55 }
 0x12a   : > { %v6791_v23 = vpop.f32.mrf.mxu2 }
 0x12b   : > { %7561 = vst [vmem:[#allocation11_spill] sm:$0xff] %v6791_v23  ;;  %v6793_v24 = vpop.f32.mrf.mxu3 }
 0x12c   : > { %v6795_v25 = vpop.f32.mrf.mxu1 }
 0x12d   : > { %v6797_v28 = vpop.f32.mrf.mxu0 }
 0x132   : > { %v6799_v33 = vpop.f32.mrf.mxu2 }
 0x133   : > { %v6801_v38 = vpop.f32.mrf.mxu3 }
 0x134   : > { %v6803_v41 = vpop.f32.mrf.mxu1 }
 0x135   : > { %7562 = vst [vmem:[#allocation12_spill] sm:$0xff] %v6803_v41  ;;  %v6805_v44 = vpop.f32.mrf.mxu0  ;;  %v5616_v41 = vld [vmem:[#allocation5 + $0x4d0] sm:$0xf0] }
 0x13a   : > { %v6807_v57 = vpop.f32.mrf.mxu2 }
 0x13b   : > { %7563 = vst [vmem:[#allocation13_spill] sm:$0xff] %v6807_v57  ;;  %v6809_v62 = vpop.f32.mrf.mxu3  ;;  %v6327_v57 = vld [vmem:[#allocation5 + $0x36c] sm:$0xf] }
 0x13c   : > { %v6811_v2 = vpop.f32.mrf.mxu1 }
 0x13d   : > { %v6813_v3 = vpop.f32.mrf.mxu0 }
 0x142   : > { %v6815_v20 = vpop.f32.mrf.mxu2 }
 0x143   : > { %v6817_v30 = vpop.f32.mrf.mxu3 }
 0x144   : > { %v6819_v36 = vpop.f32.mrf.mxu1 }
 0x145   : > { %7564 = vst [vmem:[#allocation14_spill] sm:$0xff] %v6819_v36  ;;  %v6821_v39 = vpop.f32.mrf.mxu0  ;;  %v6335_v36 = vld [vmem:[#allocation5 + $0x3ac] sm:$0xf] }
 0x14a   : > { %v6823_v63 = vpop.f32.mrf.mxu2 }
 0x14b   : > { %7565 = vst [vmem:[#allocation15_spill] sm:$0xff] %v6823_v63  ;;  %v6825_v4 = vpop.f32.mrf.mxu3  ;;  %v5463_v63 = vld [vmem:[#allocation5 + $0x3a8] sm:$0xf] }
 0x14c   : > { %7566 = vst [vmem:[#allocation16_spill] sm:$0xff] %v6825_v4  ;;  %v6827_v5 = vpop.f32.mrf.mxu1 }
 0x14d   : > { %v6829_v6 = vpop.f32.mrf.mxu0 }
 0x14e   : > { %7567 = vst [vmem:[#allocation17_spill] sm:$0xff] %v6829_v6  ;;  %v5695_v6 = vld [vmem:[#allocation5 + $0x550] sm:$0xf0] }
 0x152   : > { %v6831_v16 = vpop.f32.mrf.mxu2 }
 0x153   : > { %v6833_v19 = vpop.f32.mrf.mxu3 }
 0x154   : > { %7568 = vst [vmem:[#allocation18_spill] sm:$0xff] %v6833_v19  ;;  %v616_v27 = vpop.f32.mrf.mxu1  ;;  %v5685_v19 = vld [vmem:[#allocation5 + $0x528] sm:$0xf] }
 0x155   : > { %v728_v29 = vadd.f32 %v616_v27, %v392_v17  ;;  %v700_v31 = vpop.f32.mrf.mxu0  ;;  %v5215_v27 = vld [vmem:[%s6749_s16 + $0x70] sm:$0xff] }
 0x156   : > { %v731_v32 = vadd.f32 %v700_v31, %v395_v22  ;;  %v5217_v31 = vld [vmem:[%s6749_s16 + $0x80] sm:$0xff] }
 0x157   : > { %756 = vst [vmem:[#allocation2 + $0x20] sm:$0x1] %v728_v29  ;;  %v5216_v29 = vld [vmem:[%s6749_s16 + $0x78] sm:$0xff] }
 0x158   : > { %759 = vst [vmem:[#allocation2 + $0x70] sm:$0x1] %v731_v32  ;;  %v5218_v32 = vld [vmem:[%s6749_s16 + $0x88] sm:$0xff] }
 0x15a   : > { %v644_v37 = vpop.f32.mrf.mxu2 }
 0x15b   : > { %v729_v40 = vadd.f32 %v644_v37, %v393_v34  ;;  %v672_v42 = vpop.f32.mrf.mxu3  ;;  %v5219_v34 = vld [vmem:[%s6749_s16 + $0x90] sm:$0xff]  ;;  %v5221_v37 = vld [vmem:[%s6749_s16 + $0xa0] sm:$0x1] }
 0x15c   : > { %v730_v43 = vadd.f32 %v672_v42, %v394_v35  ;;  %v618_v45 = vpop.f32.mrf.mxu1  ;;  %v5220_v35 = vld [vmem:[%s6749_s16 + $0x98] sm:$0xff]  ;;  %v6312_v42 = vld [vmem:[#allocation5 + $0x2ec] sm:$0xf0] }
 0x15d   : > { %757 = vst [vmem:[#allocation2 + $0x10] sm:$0x1] %v729_v40  ;;  %v702_v46 = vpop.f32.mrf.mxu0  ;;  %v5344_v40 = vld [vmem:[#allocation5 + $0x2e0] sm:$0xf] }
 0x15e   : > { %758 = vst [vmem:[#allocation2 + $0xc8] sm:$0x1] %v730_v43  ;;  %v5345_v43 = vor.u32 %v6312_v42, %v5344_v40  ;;  %v5328_v45 = vld [vmem:[#allocation5 + $0x2c0] sm:$0xf]  ;;  %v6308_v46 = vld [vmem:[#allocation5 + $0x2cc] sm:$0xf0] }
 0x160   : > { %1564 = vmatpush.bf16.msra.mxu3 %v5345_v43 }
 0x162   : > { %v646_v47 = vpop.f32.mrf.mxu2 }
 0x163   : > { %v674_v48 = vpop.f32.mrf.mxu3  ;;  %v5329_v47 = vor.u32 %v6308_v46, %v5328_v45  ;;  %v6309_v45 = vld [vmem:[#allocation5 + $0x2d4] sm:$0xf0]  ;;  %v6307_v46 = vld [vmem:[#allocation5 + $0x2cc] sm:$0xf] }
 0x164   : > { %v811_v49 = vpop.f32.mrf.mxu1 }
 0x165   : > { %v839_v50 = vmul.f32 0.01, %v811_v49  ;;  %vm832_vm9 = vcmp.ge.f32.partialorder %v811_v49, 0.0  ;;  %1565 = vmatpush.bf16.msra.mxu3 %v5329_v47  ;;  %v5338_v47 = vld [vmem:[#allocation5 + $0x2d8] sm:$0xf0] }
 0x167   : > { %v846_v53 = vsel %vm832_vm9, %v811_v49, %v839_v50 }
 0x16c   : > { %v814_v51 = vpop.f32.mrf.mxu1 }
 0x16d   : > { %vm833_vm10 = vcmp.ge.f32.partialorder %v814_v51, 0.0  ;;  %v840_v52 = vmul.f32 0.01, %v814_v51 }
 0x16f   : > { %v847_v1 = vsel %vm833_vm10, %v814_v51, %v840_v52  ;;  %v5312_v51 = vld [vmem:[#allocation5 + $0x2a0] sm:$0xf]  ;;  %v6304_v52 = vld [vmem:[#allocation5 + $0x2ac] sm:$0xf0] }
 0x170   : > { %v881_v54 = vpack.c.bf16 %v847_v1, %v846_v53  ;;  %v5313_v53 = vor.u32 %v6304_v52, %v5312_v51  ;;  %v5341_v51 = vor.u32 %v6307_v46, %v5338_v47  ;;  %v5264_v52 = vld [vmem:[#allocation5 + $0x240] sm:$0xf]  ;;  %v6288_v46 = vld [vmem:[#allocation5 + $0x22c] sm:$0xf0]  ;;  %v6294_v47 = vld [vmem:[#allocation5 + $0x264] sm:$0xf] }
 0x172   : > { %1086 = vmatmul.bf16.vlgmr.msrb.gmra.mxu2 %v881_v54  ;;  %1114 = vmatmul.bf16.vlgmr.msrb.gmra.mxu3 %v881_v54 }
 0x173   : > { %1142 = vmatmul.bf16.vlgmr.msra.gmra.mxu0 %v881_v54  ;;  %1170 = vmatmul.bf16.vlgmr.msrb.gmra.mxu1 %v881_v54 }
 0x174   : > { %v817_v56 = vpop.f32.mrf.mxu1  ;;  %1566 = vmatpush.bf16.msra.mxu3 %v5313_v53  ;;  %v6292_v53 = vld [vmem:[#allocation5 + $0x24c] sm:$0xf0] }
 0x175   : > { %v841_v58 = vmul.f32 0.01, %v817_v56  ;;  %vm834_vm11 = vcmp.ge.f32.partialorder %v817_v56, 0.0 }
 0x177   : > { %v848_v61 = vsel %vm834_vm11, %v817_v56, %v841_v58 }
 0x17c   : > { %v820_v59 = vpop.f32.mrf.mxu1 }
 0x17d   : > { %vm835_vm12 = vcmp.ge.f32.partialorder %v820_v59, 0.0  ;;  %v842_v60 = vmul.f32 0.01, %v820_v59 }
 0x17f   : > { %v849_v0 = vsel %vm835_vm12, %v820_v59, %v842_v60  ;;  %v5296_v59 = vld [vmem:[#allocation5 + $0x280] sm:$0xf]  ;;  %v6300_v60 = vld [vmem:[#allocation5 + $0x28c] sm:$0xf0] }
 0x180   : > { %v882_v7 = vpack.c.bf16 %v849_v0, %v848_v61  ;;  %v5297_v61 = vor.u32 %v6300_v60, %v5296_v59  ;;  %v6302_v59 = vld [vmem:[#allocation5 + $0x2a4] sm:$0xf]  ;;  %v5265_v60 = vor.u32 %v6292_v53, %v5264_v52  ;;  %v5282_v53 = vld [vmem:[#allocation5 + $0x270] sm:$0xf0] }
 0x182   : > { %1091 = vmatmul.bf16.gmra.mxu2 %v882_v7  ;;  %1119 = vmatmul.bf16.gmra.mxu3 %v882_v7 }
 0x183   : > { %1147 = vmatmul.bf16.gmra.mxu0 %v882_v7  ;;  %1175 = vmatmul.bf16.gmra.mxu1 %v882_v7 }
 0x184   : > { %v823_v8 = vpop.f32.mrf.mxu1  ;;  %1567 = vmatpush.bf16.msra.mxu3 %v5297_v61  ;;  %v5314_v61 = vld [vmem:[#allocation5 + $0x2b0] sm:$0xf0] }
 0x185   : > { %v843_v9 = vmul.f32 0.01, %v823_v8  ;;  %vm836_vm13 = vcmp.ge.f32.partialorder %v823_v8, 0.0 }
 0x187   : > { %v850_v12 = vsel %vm836_vm13, %v823_v8, %v843_v9 }
 0x18c   : > { %v826_v10 = vpop.f32.mrf.mxu1 }
 0x18d   : > { %vm837_vm14 = vcmp.ge.f32.partialorder %v826_v10, 0.0  ;;  %v844_v11 = vmul.f32 0.01, %v826_v10 }
 0x18f   : > { %v851_v13 = vsel %vm837_vm14, %v826_v10, %v844_v11 }
 0x190   : > { %v883_v14 = vpack.c.bf16 %v851_v13, %v850_v12  ;;  %v6310_v12 = vld [vmem:[#allocation5 + $0x2e4] sm:$0xf]  ;;  %v5346_v13 = vld [vmem:[#allocation5 + $0x2f0] sm:$0xf0] }
 0x192   : > { %1096 = vmatmul.bf16.gmra.mxu2 %v883_v14  ;;  %1124 = vmatmul.bf16.gmra.mxu3 %v883_v14 }
 0x193   : > { %1152 = vmatmul.bf16.gmra.mxu0 %v883_v14  ;;  %1180 = vmatmul.bf16.gmra.mxu1 %v883_v14  ;;  %v5352_v14 = vld [vmem:[#allocation5 + $0x2e8] sm:$0xf] }
 0x194   : > { %v829_v15 = vpop.f32.mrf.mxu1 }
 0x195   : > { %v845_v17 = vmul.f32 0.01, %v829_v15  ;;  %vm838_vm15 = vcmp.ge.f32.partialorder %v829_v15, 0.0 }
 0x197   : > { %v852_v22 = vsel %vm838_vm15, %v829_v15, %v845_v17  ;;  %v5280_v15 = vld [vmem:[#allocation5 + $0x260] sm:$0xf]  ;;  %v6296_v17 = vld [vmem:[#allocation5 + $0x26c] sm:$0xf0] }
 0x198   : > { %v884_v26 = vpack.c.bf16 %v852_v22, %v852_v22  ;;  %v5349_v22 = vor.u32 %v6310_v12, %v5346_v13  ;;  %v6303_v13 = vld [vmem:[#allocation5 + $0x2ac] sm:$0xf] }
 0x19a   : > { %1592 = vmatpush.bf16.msrb.mxu0 %v5349_v22 }
 0x1a2   : > { %1101 = vmatmul.bf16.gmra.mxu2 %v884_v26  ;;  %1129 = vmatmul.bf16.gmra.mxu3 %v884_v26 }
 0x1a3   : > { %1157 = vmatmul.bf16.gmra.mxu0 %v884_v26  ;;  %1185 = vmatmul.bf16.gmra.mxu1 %v884_v26  ;;  %v6313_v26 = vld [vmem:[#allocation5 + $0x2f4] sm:$0xf0] }
 0x1b2   : > { %5223 = vmatmul.msk.f32.vlgmr.msra.gmra.mxu2 %vm283_vm1, %v5215_v27 }
 0x1ba   : > { %5224 = vmatmul.msk.f32.gmra.mxu2 %vm283_vm1, %v5216_v29  ;;  %v5281_v29 = vor.u32 %v6296_v17, %v5280_v15 }
 0x1bc   : > { %1568 = vmatpush.bf16.msra.mxu3 %v5281_v29  ;;  %v5298_v29 = vld [vmem:[#allocation5 + $0x290] sm:$0xf0] }
 0x1c0   : > { %1569 = vmatpush.bf16.msra.mxu3 %v5265_v60 }
 0x1c2   : > { %5225 = vmatmul.msk.f32.gmra.mxu2 %vm283_vm1, %v5217_v31  ;;  %v6311_v31 = vld [vmem:[#allocation5 + $0x2ec] sm:$0xf] }
 0x1ca   : > { %5226 = vmatmul.msk.f32.gmra.mxu2 %vm283_vm1, %v5218_v32  ;;  %v5354_v32 = vld [vmem:[#allocation5 + $0x2f8] sm:$0xf0] }
 0x1d2   : > { %5227 = vmatmul.msk.f32.gmra.mxu2 %vm283_vm1, %v5219_v34  ;;  %v5357_v34 = vor.u32 %v6311_v31, %v5354_v32 }
 0x1d4   : > { %1648 = vmatpush.bf16.msrb.mxu2 %v5357_v34 }
 0x1d8   : > { %1649 = vmatpush.bf16.msrb.mxu2 %v5341_v51 }
 0x1da   : > { %5228 = vmatmul.msk.f32.gmra.mxu2 %vm283_vm1, %v5220_v35  ;;  %v5330_v35 = vld [vmem:[#allocation5 + $0x2d0] sm:$0xf0] }
 0x1e2   : > { %5229 = vmatmul.msk.f32.gmra.mxu2 %vm283_vm1, %v5221_v37  ;;  %v5336_v37 = vld [vmem:[#allocation5 + $0x2c8] sm:$0xf] }
 0x1f0   : > { %v6853_v48 = vpop.f32.mrf.mxu0  ;;  %v1171_v49 = vpop.f32.mrf.mxu1 }
 0x1f1   : > { %v6856_v50 = vadd.f32 %v1171_v49, %v6789_v21  ;;  %v5337_v49 = vor.u32 %v6309_v45, %v5336_v37  ;;  %v5306_v37 = vld [vmem:[#allocation5 + $0x298] sm:$0xf0]  ;;  %v5248_v45 = vld [vmem:[#allocation5 + $0x220] sm:$0xf] }
 0x1f5   : > { %v6858_v1 = vpop.f32.mrf.mxu2  ;;  %v6860_v54 = vpop.f32.mrf.mxu3 }
 0x1f6   : > { %7569 = vst [vmem:[#allocation19_spill] sm:$0xff] %v6858_v1  ;;  %v6355_v1 = vld [vmem:[#allocation5 + $0x44c] sm:$0xf] }
 0x1f7   : > { %7570 = vst [vmem:[#allocation20_spill] sm:$0xff] %v6860_v54  ;;  %v5624_v54 = vld [vmem:[#allocation5 + $0x4d8] sm:$0xf0] }
 0x1f8   : > { %v6862_v56 = vpop.f32.mrf.mxu0  ;;  %v6864_v58 = vpop.f32.mrf.mxu1 }
 0x1fd   : > { %v1089_v0 = vpop.f32.mrf.mxu2  ;;  %v1117_v7 = vpop.f32.mrf.mxu3 }
 0x1fe   : > { %v6867_v21 = vadd.f32 %v1089_v0, %v6795_v25  ;;  %v6870_v8 = vadd.f32 %v1117_v7, %v6799_v33  ;;  %v5353_v33 = vor.u32 %v6313_v26, %v5352_v14  ;;  %v5320_v0 = vld [vmem:[#allocation5 + $0x2a8] sm:$0xf]  ;;  %v6305_v7 = vld [vmem:[#allocation5 + $0x2b4] sm:$0xf0]  ;;  %v5322_v14 = vld [vmem:[#allocation5 + $0x2b8] sm:$0xf0] }
 0x1ff   : > { %v5321_v12 = vor.u32 %v6305_v7, %v5320_v0  ;;  %v5325_v15 = vor.u32 %v6303_v13, %v5322_v14  ;;  %v6298_v26 = vld [vmem:[#allocation5 + $0x284] sm:$0xf]  ;;  %v5290_v0 = vld [vmem:[#allocation5 + $0x278] sm:$0xf0]  ;;  %v5285_v7 = vor.u32 %v6294_v47, %v5282_v53 }
 0x200   : > { %v6872_v9 = vpop.f32.mrf.mxu0  ;;  %v1176_v10 = vpop.f32.mrf.mxu1  ;;  %1620 = vmatpush.bf16.msra.mxu1 %v5353_v33  ;;  %v5304_v33 = vld [vmem:[#allocation5 + $0x288] sm:$0xf]  ;;  %v5301_v34 = vor.u32 %v6298_v26, %v5298_v29  ;;  %v6293_v26 = vld [vmem:[#allocation5 + $0x254] sm:$0xf0]  ;;  %v6291_v29 = vld [vmem:[#allocation5 + $0x24c] sm:$0xf] }
 0x201   : > { %v6875_v11 = vadd.f32 %v1176_v10, %v6805_v44  ;;  %v6306_v44 = vld [vmem:[#allocation5 + $0x2c4] sm:$0xf]  ;;  %v5317_v10 = vor.u32 %v6302_v59, %v5314_v61  ;;  %1650 = vmatpush.bf16.msrb.mxu2 %v5325_v15  ;;  %v5288_v59 = vld [vmem:[#allocation5 + $0x268] sm:$0xf]  ;;  %v6295_v61 = vld [vmem:[#allocation5 + $0x26c] sm:$0xf] }
 0x202   : > { %v5333_v43 = vor.u32 %v6306_v44, %v5330_v35  ;;  %v6301_v44 = vld [vmem:[#allocation5 + $0x294] sm:$0xf0]  ;;  %v6299_v35 = vld [vmem:[#allocation5 + $0x28c] sm:$0xf]  ;;  %v6290_v15 = vld [vmem:[#allocation5 + $0x244] sm:$0xf] }
 0x203   : > { %v5309_v52 = vor.u32 %v6299_v35, %v5306_v37 }
 0x204   : > { %1593 = vmatpush.bf16.msrb.mxu0 %v5333_v43  ;;  %1621 = vmatpush.bf16.msra.mxu1 %v5337_v49  ;;  %v5305_v43 = vor.u32 %v6301_v44, %v5304_v33  ;;  %v5274_v33 = vld [vmem:[#allocation5 + $0x258] sm:$0xf0] }
 0x205   : > { %v6877_v27 = vpop.f32.mrf.mxu2  ;;  %v6879_v25 = vpop.f32.mrf.mxu3  ;;  %1651 = vmatpush.bf16.msrb.mxu2 %v5309_v52  ;;  %v5277_v37 = vor.u32 %v6291_v29, %v5274_v33  ;;  %v5256_v52 = vld [vmem:[#allocation5 + $0x228] sm:$0xf] }
 0x206   : > { %7571 = vst [vmem:[#allocation21_spill] sm:$0xff] %v6877_v27  ;;  %v5240_v29 = vld [vmem:[#allocation5 + $0x208] sm:$0xf] }
 0x207   : > { %7572 = vst [vmem:[#allocation22_spill] sm:$0xff] %v6879_v25  ;;  %v6329_v25 = vld [vmem:[#allocation5 + $0x374] sm:$0xf0] }
 0x208   : > { %v6881_v40 = vpop.f32.mrf.mxu0  ;;  %v6883_v42 = vpop.f32.mrf.mxu1  ;;  %1594 = vmatpush.bf16.msrb.mxu0 %v5317_v10  ;;  %1622 = vmatpush.bf16.msra.mxu1 %v5321_v12  ;;  %v5293_v12 = vor.u32 %v6295_v61, %v5290_v0 }
 0x20a   : > { %1652 = vmatpush.bf16.msrb.mxu2 %v5293_v12 }
 0x20c   : > { %1595 = vmatpush.bf16.msrb.mxu0 %v5301_v34  ;;  %1623 = vmatpush.bf16.msra.mxu1 %v5305_v43  ;;  %v5232_v43 = vld [vmem:[#allocation5 + $0x200] sm:$0xf] }
 0x20d   : > { %v1094_v17 = vpop.f32.mrf.mxu2  ;;  %v1122_v22 = vpop.f32.mrf.mxu3 }
 0x20e   : > { %v6886_v31 = vadd.f32 %v1094_v17, %v6811_v2  ;;  %v6889_v32 = vadd.f32 %v1122_v22, %v6815_v20  ;;  %v5249_v2 = vor.u32 %v6288_v46, %v5248_v45  ;;  %v6297_v20 = vld [vmem:[#allocation5 + $0x274] sm:$0xf0]  ;;  %v5266_v17 = vld [vmem:[#allocation5 + $0x250] sm:$0xf0]  ;;  %v5272_v22 = vld [vmem:[#allocation5 + $0x248] sm:$0xf]  ;;  %1653 = vmatpush.bf16.msrb.mxu2 %v5277_v37 }
 0x20f   : > { %v5289_v10 = vor.u32 %v6297_v20, %v5288_v59  ;;  %v5273_v35 = vor.u32 %v6293_v26, %v5272_v22  ;;  %v6284_v45 = vld [vmem:[#allocation5 + $0x20c] sm:$0xf0]  ;;  %v6286_v46 = vld [vmem:[#allocation5 + $0x224] sm:$0xf]  ;;  %v6287_v59 = vld [vmem:[#allocation5 + $0x22c] sm:$0xf] }
 0x210   : > { %v6891_v49 = vpop.f32.mrf.mxu0  ;;  %v1181_v51 = vpop.f32.mrf.mxu1  ;;  %1570 = vmatpush.bf16.msra.mxu3 %v5249_v2  ;;  %1596 = vmatpush.bf16.msrb.mxu0 %v5285_v7  ;;  %v5233_v47 = vor.u32 %v6284_v45, %v5232_v43  ;;  %v6289_v2 = vld [vmem:[#allocation5 + $0x234] sm:$0xf0]  ;;  %v5258_v20 = vld [vmem:[#allocation5 + $0x238] sm:$0xf0]  ;;  %v880_v22 = vld [vmem:[#allocation2 + $0x70] sm:$0x1] }
 0x211   : > { %7573 = vst [vmem:[#allocation23_spill] sm:$0xff] %v6891_v49  ;;  %v6894_v60 = vadd.f32 %v1181_v51, %v6821_v39  ;;  %1624 = vmatpush.bf16.msra.mxu1 %v5289_v10  ;;  %v5269_v39 = vor.u32 %v6290_v15, %v5266_v17  ;;  %v5250_v51 = vld [vmem:[#allocation5 + $0x230] sm:$0xf0]  ;;  %v5257_v61 = vor.u32 %v6289_v2, %v5256_v52  ;;  %v879_v17 = vld [vmem:[#allocation2 + $0xc8] sm:$0x1] }
 0x212   : > { %v5253_v53 = vor.u32 %v6286_v46, %v5250_v51  ;;  %v5261_v0 = vor.u32 %v6287_v59, %v5258_v20  ;;  %v5234_v26 = vld [vmem:[#allocation5 + $0x210] sm:$0xf0]  ;;  %v6285_v43 = vld [vmem:[#allocation5 + $0x214] sm:$0xf0]  ;;  %v6283_v45 = vld [vmem:[#allocation5 + $0x20c] sm:$0xf] }
 0x213   : > { %v5242_v46 = vld [vmem:[#allocation5 + $0x218] sm:$0xf0]  ;;  %v5241_v51 = vor.u32 %v6285_v43, %v5240_v29  ;;  %v877_v2 = vld [vmem:[#allocation2 + $0x20] sm:$0x1]  ;;  %v878_v59 = vld [vmem:[#allocation2 + $0x10] sm:$0x1] }
 0x214   : > { %1597 = vmatpush.bf16.msrb.mxu0 %v5269_v39  ;;  %1571 = vmatpush.bf16.msra.mxu3 %v5233_v47  ;;  %v6282_v39 = vld [vmem:[#allocation5 + $0x204] sm:$0xf]  ;;  %v5245_v52 = vor.u32 %v6283_v45, %v5242_v46 }
 0x215   : > { %v6896_v13 = vpop.f32.mrf.mxu2  ;;  %v6898_v14 = vpop.f32.mrf.mxu3  ;;  %1625 = vmatpush.bf16.msra.mxu1 %v5273_v35  ;;  %1654 = vmatpush.bf16.msrb.mxu2 %v5261_v0  ;;  %v5237_v37 = vor.u32 %v6282_v39, %v5234_v26 }
 0x216   : > { %7574 = vst [vmem:[#allocation24_spill] sm:$0xff] %v6896_v13  ;;  %v6337_v13 = vld [vmem:[#allocation5 + $0x3b4] sm:$0xf0] }
 0x217   : > { %7575 = vst [vmem:[#allocation25_spill] sm:$0xff] %v6898_v14 }
 0x218   : > { %v6900_v34 = vpop.f32.mrf.mxu0  ;;  %v6902_v44 = vpop.f32.mrf.mxu1  ;;  %1598 = vmatpush.bf16.msrb.mxu0 %v5253_v53 }
 0x219   : > { %7576 = vst [vmem:[#allocation26_spill] sm:$0xff] %v6900_v34  ;;  %1626 = vmatpush.bf16.msra.mxu1 %v5257_v61  ;;  %1655 = vmatpush.bf16.msrb.mxu2 %v5245_v52  ;;  %v5701_v34 = vld [vmem:[#allocation5 + $0x548] sm:$0xf] }
 0x21a   : > { %7577 = vst [vmem:[#allocation27_spill] sm:$0xff] %v6902_v44 }
 0x21c   : > { %1599 = vmatpush.bf16.msrb.mxu0 %v5237_v37 }
 0x21d   : > { %v1099_v7 = vpop.f32.mrf.mxu2  ;;  %v1127_v10 = vpop.f32.mrf.mxu3  ;;  %1627 = vmatpush.bf16.msra.mxu1 %v5241_v51 }
 0x21e   : > { %v6905_v12 = vadd.f32 %v1099_v7, %v6827_v5  ;;  %v6908_v15 = vadd.f32 %v1127_v10, %v6831_v16  ;;  %v1741_v16 = vld [vmem:[#allocation3 + $0x8] sm:$0x3] }
 0x21f   : > { %5365 = vmatpush.msk.msrb.mxu3 %vm305_vm0, %v1741_v16 }
 0x220   : > { %v1158_v33 = vpop.f32.mrf.mxu0  ;;  %v1186_v35 = vpop.f32.mrf.mxu1 }
 0x221   : > { %v1216_v47 = vadd.f32 %v1158_v33, %v879_v17  ;;  %v1217_v5 = vadd.f32 %v1186_v35, %v880_v22  ;;  %1781 = vmatpush.msrb.mxu3 %v6836_v55 }
 0x223   : > { %1244 = vst [vmem:[#allocation2 + $0xc8] sm:$0x1] %v1216_v47 }
 0x224   : > { %1245 = vst [vmem:[#allocation2 + $0x70] sm:$0x1] %v1217_v5 }
 0x225   : > { %v1102_v53 = vpop.f32.mrf.mxu2  ;;  %v1130_v20 = vpop.f32.mrf.mxu3 }
 0x226   : > { %v1214_v61 = vadd.f32 %v1102_v53, %v877_v2  ;;  %v1215_v0 = vadd.f32 %v1130_v20, %v878_v59 }
 0x228   : > { %1242 = vst [vmem:[#allocation2 + $0x20] sm:$0x1] %v1214_v61  ;;  %v1160_v7 = vpop.f32.mrf.mxu0  ;;  %v1188_v10 = vpop.f32.mrf.mxu1 }
 0x229   : > { %1243 = vst [vmem:[#allocation2 + $0x10] sm:$0x1] %v1215_v0 }
 0x22d   : > { %v1104_v17 = vpop.f32.mrf.mxu2  ;;  %v1132_v22 = vpop.f32.mrf.mxu3 }
 0x235   : > { %v1297_v39 = vpop.f32.mrf.mxu2 }
 0x236   : > { %v1325_v26 = vmul.f32 0.01, %v1297_v39  ;;  %vm1318_vm2 = vcmp.ge.f32.partialorder %v1297_v39, 0.0 }
 0x238   : > { %v1332_v35 = vsel %vm1318_vm2, %v1297_v39, %v1325_v26  ;;  %v5358_v39 = vld [vmem:[%s6749_s16 + $0xa8] sm:$0xff]  ;;  %v5359_v26 = vld [vmem:[%s6749_s16 + $0xb0] sm:$0xff] }
 0x23d   : > { %v1300_v29 = vpop.f32.mrf.mxu2 }
 0x23e   : > { %vm1319_vm3 = vcmp.ge.f32.partialorder %v1300_v29, 0.0  ;;  %v1326_v33 = vmul.f32 0.01, %v1300_v29 }
 0x240   : > { %v1333_v37 = vsel %vm1319_vm3, %v1300_v29, %v1326_v33  ;;  %v5360_v29 = vld [vmem:[%s6749_s16 + $0xb8] sm:$0xff]  ;;  %v5361_v33 = vld [vmem:[%s6749_s16 + $0xc0] sm:$0xff] }
 0x241   : > { %v1367_v43 = vpack.c.bf16 %v1333_v37, %v1332_v35  ;;  %v5362_v35 = vld [vmem:[%s6749_s16 + $0xc8] sm:$0xff]  ;;  %v5363_v37 = vld [vmem:[%s6749_s16 + $0xd0] sm:$0xff] }
 0x243   : > { %1572 = vmatmul.bf16.vlgmr.msra.gmra.mxu3 %v1367_v43  ;;  %1600 = vmatmul.bf16.vlgmr.msrb.gmra.mxu0 %v1367_v43 }
 0x244   : > { %1628 = vmatmul.bf16.vlgmr.msra.gmra.mxu1 %v1367_v43  ;;  %1656 = vmatmul.bf16.vlgmr.msrb.gmra.mxu2 %v1367_v43  ;;  %v5364_v43 = vld [vmem:[%s6749_s16 + $0xd8] sm:$0x1] }
 0x245   : > { %v1303_v55 = vpop.f32.mrf.mxu2 }
 0x246   : > { %v1327_v45 = vmul.f32 0.01, %v1303_v55  ;;  %vm1320_vm4 = vcmp.ge.f32.partialorder %v1303_v55, 0.0 }
 0x248   : > { %v1334_v5 = vsel %vm1320_vm4, %v1303_v55, %v1327_v45  ;;  %v5487_v55 = vld [vmem:[#allocation5 + $0x3e0] sm:$0xf]  ;;  %v6344_v45 = vld [vmem:[#allocation5 + $0x3ec] sm:$0xf0] }
 0x24d   : > { %v1306_v46 = vpop.f32.mrf.mxu2 }
 0x24e   : > { %vm1321_vm5 = vcmp.ge.f32.partialorder %v1306_v46, 0.0  ;;  %v1328_v47 = vmul.f32 0.01, %v1306_v46 }
 0x250   : > { %v1335_v51 = vsel %vm1321_vm5, %v1306_v46, %v1328_v47  ;;  %v5488_v46 = vor.u32 %v6344_v45, %v5487_v55  ;;  %v5471_v47 = vld [vmem:[#allocation5 + $0x3c0] sm:$0xf]  ;;  %v6328_v55 = vld [vmem:[#allocation5 + $0x36c] sm:$0xf0] }
 0x251   : > { %v1368_v52 = vpack.c.bf16 %v1335_v51, %v1334_v5  ;;  %v6340_v5 = vld [vmem:[#allocation5 + $0x3cc] sm:$0xf0] }
 0x252   : > { %2050 = vmatpush.bf16.msra.mxu0 %v5488_v46  ;;  %v5472_v51 = vor.u32 %v6340_v5, %v5471_v47  ;;  %v5489_v46 = vld [vmem:[#allocation5 + $0x3f0] sm:$0xf0]  ;;  %v5495_v47 = vld [vmem:[#allocation5 + $0x3e8] sm:$0xf]  ;;  %v6345_v5 = vld [vmem:[#allocation5 + $0x3f4] sm:$0xf0] }
 0x253   : > { %1577 = vmatmul.bf16.gmra.mxu3 %v1368_v52  ;;  %1605 = vmatmul.bf16.gmra.mxu0 %v1368_v52 }
 0x254   : > { %1633 = vmatmul.bf16.gmra.mxu1 %v1368_v52  ;;  %1661 = vmatmul.bf16.gmra.mxu2 %v1368_v52 }
 0x255   : > { %v1309_v16 = vpop.f32.mrf.mxu2 }
 0x256   : > { %v1329_v2 = vmul.f32 0.01, %v1309_v16  ;;  %vm1322_vm6 = vcmp.ge.f32.partialorder %v1309_v16, 0.0  ;;  %2051 = vmatpush.bf16.msra.mxu0 %v5472_v51 }
 0x258   : > { %v1336_v20 = vsel %vm1322_vm6, %v1309_v16, %v1329_v2  ;;  %v5455_v2 = vld [vmem:[#allocation5 + $0x3a0] sm:$0xf] }
 0x25d   : > { %v1312_v53 = vpop.f32.mrf.mxu2 }
 0x25e   : > { %vm1323_vm7 = vcmp.ge.f32.partialorder %v1312_v53, 0.0  ;;  %v1330_v59 = vmul.f32 0.01, %v1312_v53 }
 0x260   : > { %v1337_v61 = vsel %vm1323_vm7, %v1312_v53, %v1330_v59  ;;  %v6336_v53 = vld [vmem:[#allocation5 + $0x3ac] sm:$0xf0] }
 0x261   : > { %v1369_v0 = vpack.c.bf16 %v1337_v61, %v1336_v20  ;;  %v5456_v59 = vor.u32 %v6336_v53, %v5455_v2  ;;  %v5496_v53 = vor.u32 %v6345_v5, %v5495_v47  ;;  %v6339_v47 = vld [vmem:[#allocation5 + $0x3cc] sm:$0xf] }
 0x263   : > { %1582 = vmatmul.bf16.gmra.mxu3 %v1369_v0  ;;  %1610 = vmatmul.bf16.gmra.mxu0 %v1369_v0 }
 0x264   : > { %1638 = vmatmul.bf16.gmra.mxu1 %v1369_v0  ;;  %1666 = vmatmul.bf16.gmra.mxu2 %v1369_v0 }
 0x265   : > { %v1315_v7 = vpop.f32.mrf.mxu2  ;;  %2052 = vmatpush.bf16.msra.mxu0 %v5456_v59  ;;  %v6343_v59 = vld [vmem:[#allocation5 + $0x3ec] sm:$0xf]  ;;  %2106 = vmatpush.bf16.msra.mxu2 %v5496_v53  ;;  %v5457_v53 = vld [vmem:[#allocation5 + $0x3b0] sm:$0xf0] }
 0x266   : > { %v1331_v10 = vmul.f32 0.01, %v1315_v7  ;;  %vm1324_vm8 = vcmp.ge.f32.partialorder %v1315_v7, 0.0 }
 0x268   : > { %v1338_v17 = vsel %vm1324_vm8, %v1315_v7, %v1331_v10 }
 0x269   : > { %v1370_v22 = vpack.c.bf16 %v1338_v17, %v1338_v17 }
 0x273   : > { %1587 = vmatmul.bf16.gmra.mxu3 %v1370_v22  ;;  %1615 = vmatmul.bf16.gmra.mxu0 %v1370_v22 }
 0x274   : > { %1643 = vmatmul.bf16.gmra.mxu1 %v1370_v22  ;;  %1671 = vmatmul.bf16.gmra.mxu2 %v1370_v22  ;;  %v5439_v22 = vld [vmem:[#allocation5 + $0x380] sm:$0xf] }
 0x283   : > { %5366 = vmatmul.msk.f32.vlgmr.msrb.gmra.mxu3 %vm283_vm1, %v5358_v39  ;;  %v6332_v39 = vld [vmem:[#allocation5 + $0x38c] sm:$0xf0] }
 0x28b   : > { %5367 = vmatmul.msk.f32.gmra.mxu3 %vm283_vm1, %v5359_v26  ;;  %v5440_v26 = vor.u32 %v6332_v39, %v5439_v22 }
 0x28d   : > { %2053 = vmatpush.bf16.msra.mxu0 %v5440_v26  ;;  %v6338_v26 = vld [vmem:[#allocation5 + $0x3c4] sm:$0xf] }
 0x293   : > { %5368 = vmatmul.msk.f32.gmra.mxu3 %vm283_vm1, %v5360_v29 }
 0x29b   : > { %5369 = vmatmul.msk.f32.gmra.mxu3 %vm283_vm1, %v5361_v33 }
 0x2a3   : > { %5370 = vmatmul.msk.f32.gmra.mxu3 %vm283_vm1, %v5362_v35 }
 0x2ab   : > { %5371 = vmatmul.msk.f32.gmra.mxu3 %vm283_vm1, %v5363_v37 }
 0x2b3   : > { %5372 = vmatmul.msk.f32.gmra.mxu3 %vm283_vm1, %v5364_v43  ;;  %v5423_v43 = vld [vmem:[#allocation5 + $0x360] sm:$0xf] }
 0x2b4   : > { %v5424_v45 = vor.u32 %v6328_v55, %v5423_v43  ;;  %v5479_v43 = vld [vmem:[#allocation5 + $0x3c8] sm:$0xf] }
 0x2b6   : > { %2054 = vmatpush.bf16.msra.mxu0 %v5424_v45  ;;  %v5481_v45 = vld [vmem:[#allocation5 + $0x3d8] sm:$0xf0] }
 0x2c0   : > { %v6926_v52 = vpop.f32.mrf.mxu0 }
 0x2c1   : > { %7578 = vst [vmem:[#allocation28_spill] sm:$0xff] %v6926_v52  ;;  %v6928_v16 = vpop.f32.mrf.mxu1  ;;  %v6371_v52 = vld [vmem:[#allocation5 + $0x4cc] sm:$0xf] }
 0x2c6   : > { %v6930_v20 = vpop.f32.mrf.mxu3 }
 0x2c7   : > { %7579 = vst [vmem:[#allocation29_spill] sm:$0xff] %v6930_v20  ;;  %v1657_v61 = vpop.f32.mrf.mxu2  ;;  %v6357_v20 = vld [vmem:[#allocation5 + $0x454] sm:$0xf0] }
 0x2c8   : > { %v6933_v0 = vadd.f32 %v1657_v61, %v6856_v50  ;;  %v1603_v7 = vpop.f32.mrf.mxu0 }
 0x2c9   : > { %v6936_v10 = vadd.f32 %v1603_v7, %v6870_v8  ;;  %v6938_v17 = vpop.f32.mrf.mxu1  ;;  %v6342_v8 = vld [vmem:[#allocation5 + $0x3e4] sm:$0xf] }
 0x2ca   : > { %v5492_v2 = vor.u32 %v6342_v8, %v5489_v46  ;;  %v6341_v46 = vld [vmem:[#allocation5 + $0x3d4] sm:$0xf0] }
 0x2cb   : > { %v5480_v5 = vor.u32 %v6341_v46, %v5479_v43  ;;  %v6330_v46 = vld [vmem:[#allocation5 + $0x384] sm:$0xf] }
 0x2cc   : > { %2078 = vmatpush.bf16.msrb.mxu1 %v5492_v2 }
 0x2cd   : > { %2107 = vmatpush.bf16.msra.mxu2 %v5480_v5  ;;  %v5449_v5 = vld [vmem:[#allocation5 + $0x398] sm:$0xf0] }
 0x2ce   : > { %v1575_v29 = vpop.f32.mrf.mxu3 }
 0x2cf   : > { %v6941_v33 = vadd.f32 %v1575_v29, %v6867_v21  ;;  %v6943_v35 = vpop.f32.mrf.mxu2  ;;  %v5497_v21 = vld [vmem:[#allocation5 + $0x3f8] sm:$0xf0]  ;;  %v5473_v29 = vld [vmem:[#allocation5 + $0x3d0] sm:$0xf0] }
 0x2d0   : > { %v6945_v37 = vpop.f32.mrf.mxu0  ;;  %v5500_v7 = vor.u32 %v6343_v59, %v5497_v21  ;;  %v5476_v8 = vor.u32 %v6338_v26, %v5473_v29  ;;  %v5484_v59 = vor.u32 %v6339_v47, %v5481_v45  ;;  %v6324_v21 = vld [vmem:[#allocation5 + $0x34c] sm:$0xf0]  ;;  %v5441_v47 = vld [vmem:[#allocation5 + $0x390] sm:$0xf0]  ;;  %v5447_v45 = vld [vmem:[#allocation5 + $0x388] sm:$0xf] }
 0x2d1   : > { %7580 = vst [vmem:[#allocation30_spill] sm:$0xff] %v6945_v37  ;;  %v6947_v50 = vpop.f32.mrf.mxu1  ;;  %v5465_v37 = vld [vmem:[#allocation5 + $0x3b8] sm:$0xf0] }
 0x2d2   : > { %2134 = vmatpush.bf16.msra.mxu3 %v5500_v7  ;;  %2079 = vmatpush.bf16.msrb.mxu1 %v5476_v8  ;;  %v5468_v7 = vor.u32 %v6335_v36, %v5465_v37  ;;  %v5444_v8 = vor.u32 %v6330_v46, %v5441_v47 }
 0x2d6   : > { %v6949_v51 = vpop.f32.mrf.mxu3  ;;  %2135 = vmatpush.bf16.msra.mxu3 %v5484_v59 }
 0x2d7   : > { %7581 = vst [vmem:[#allocation31_spill] sm:$0xff] %v6949_v51  ;;  %v1662_v61 = vpop.f32.mrf.mxu2 }
 0x2d8   : > { %v6952_v22 = vadd.f32 %v1662_v61, %v6875_v11  ;;  %v1608_v39 = vpop.f32.mrf.mxu0  ;;  %v5407_v11 = vld [vmem:[#allocation5 + $0x340] sm:$0xf]  ;;  %v6334_v61 = vld [vmem:[#allocation5 + $0x3a4] sm:$0xf] }
 0x2d9   : > { %v6955_v55 = vadd.f32 %v1608_v39, %v6889_v32  ;;  %v6957_v14 = vpop.f32.mrf.mxu1  ;;  %v5408_v2 = vor.u32 %v6324_v21, %v5407_v11  ;;  %v5460_v32 = vor.u32 %v6334_v61, %v5457_v53  ;;  %v5464_v39 = vor.u32 %v6337_v13, %v5463_v63  ;;  %v6333_v63 = vld [vmem:[#allocation5 + $0x394] sm:$0xf0]  ;;  %v6331_v13 = vld [vmem:[#allocation5 + $0x38c] sm:$0xf]  ;;  %v6320_v21 = vld [vmem:[#allocation5 + $0x32c] sm:$0xf0] }
 0x2da   : > { %2136 = vmatpush.bf16.msra.mxu3 %v5468_v7  ;;  %v5448_v36 = vor.u32 %v6333_v63, %v5447_v45  ;;  %v5452_v37 = vor.u32 %v6331_v13, %v5449_v5  ;;  %v6326_v61 = vld [vmem:[#allocation5 + $0x364] sm:$0xf]  ;;  %v5425_v53 = vld [vmem:[#allocation5 + $0x370] sm:$0xf0]  ;;  %v5415_v13 = vld [vmem:[#allocation5 + $0x348] sm:$0xf] }
 0x2db   : > { %2055 = vmatpush.bf16.msra.mxu0 %v5408_v2  ;;  %2080 = vmatpush.bf16.msrb.mxu1 %v5460_v32  ;;  %v5428_v32 = vor.u32 %v6326_v61, %v5425_v53  ;;  %v6322_v45 = vld [vmem:[#allocation5 + $0x344] sm:$0xf]  ;;  %v5409_v63 = vld [vmem:[#allocation5 + $0x350] sm:$0xf0]  ;;  %v5417_v61 = vld [vmem:[#allocation5 + $0x358] sm:$0xf0] }
 0x2dc   : > { %2108 = vmatpush.bf16.msra.mxu2 %v5464_v39  ;;  %v6316_v53 = vld [vmem:[#allocation5 + $0x30c] sm:$0xf0] }
 0x2de   : > { %v1580_v26 = vpop.f32.mrf.mxu3  ;;  %2137 = vmatpush.bf16.msra.mxu3 %v5452_v37 }
 0x2df   : > { %v6960_v29 = vadd.f32 %v1580_v26, %v6886_v31  ;;  %v6962_v43 = vpop.f32.mrf.mxu2  ;;  %v5391_v31 = vld [vmem:[#allocation5 + $0x320] sm:$0xf]  ;;  %v5431_v26 = vld [vmem:[#allocation5 + $0x368] sm:$0xf]  ;;  %2081 = vmatpush.bf16.msrb.mxu1 %v5444_v8  ;;  %v6325_v8 = vld [vmem:[#allocation5 + $0x354] sm:$0xf0] }
 0x2e0   : > { %v6964_v11 = vpop.f32.mrf.mxu0  ;;  %v5392_v2 = vor.u32 %v6320_v21, %v5391_v31  ;;  %2109 = vmatpush.bf16.msra.mxu2 %v5448_v36  ;;  %v5432_v39 = vor.u32 %v6329_v25, %v5431_v26  ;;  %v5412_v21 = vor.u32 %v6322_v45, %v5409_v63  ;;  %v6323_v36 = vld [vmem:[#allocation5 + $0x34c] sm:$0xf]  ;;  %v6318_v26 = vld [vmem:[#allocation5 + $0x324] sm:$0xf]  ;;  %v5401_v45 = vld [vmem:[#allocation5 + $0x338] sm:$0xf0] }
 0x2e1   : > { %7582 = vst [vmem:[#allocation32_spill] sm:$0xff] %v6964_v11  ;;  %v6966_v59 = vpop.f32.mrf.mxu1  ;;  %v5433_v11 = vld [vmem:[#allocation5 + $0x378] sm:$0xf0]  ;;  %v5420_v37 = vor.u32 %v6323_v36, %v5417_v61  ;;  %v1365_v36 = vld [vmem:[#allocation2 + $0xc8] sm:$0x1] }
 0x2e2   : > { %7583 = vst [vmem:[#allocation33_spill] sm:$0xff] %v6966_v59  ;;  %2056 = vmatpush.bf16.msra.mxu0 %v5392_v2  ;;  %v5436_v46 = vor.u32 %v6327_v57, %v5433_v11  ;;  %v5416_v11 = vor.u32 %v6325_v8, %v5415_v13  ;;  %v5375_v2 = vld [vmem:[#allocation5 + $0x300] sm:$0xf]  ;;  %v6383_v59 = vld [vmem:[#allocation5 + $0x52c] sm:$0xf] }
 0x2e3   : > { %2082 = vmatpush.bf16.msrb.mxu1 %v5428_v32  ;;  %v6321_v32 = vld [vmem:[#allocation5 + $0x334] sm:$0xf0]  ;;  %v1364_v8 = vld [vmem:[#allocation2 + $0x10] sm:$0x1] }
 0x2e4   : > { %2110 = vmatpush.bf16.msra.mxu2 %v5432_v39  ;;  %2138 = vmatpush.bf16.msra.mxu3 %v5436_v46  ;;  %v6319_v39 = vld [vmem:[#allocation5 + $0x32c] sm:$0xf] }
 0x2e6   : > { %v6968_v47 = vpop.f32.mrf.mxu3 }
 0x2e7   : > { %7584 = vst [vmem:[#allocation34_spill] sm:$0xff] %v6968_v47  ;;  %v1667_v7 = vpop.f32.mrf.mxu2  ;;  %v5399_v47 = vld [vmem:[#allocation5 + $0x328] sm:$0xf]  ;;  %2083 = vmatpush.bf16.msrb.mxu1 %v5412_v21 }
 0x2e8   : > { %v6971_v5 = vadd.f32 %v1667_v7, %v6894_v60  ;;  %v1613_v31 = vpop.f32.mrf.mxu0  ;;  %v5376_v60 = vor.u32 %v6316_v53, %v5375_v2  ;;  %v5393_v7 = vld [vmem:[#allocation5 + $0x330] sm:$0xf0]  ;;  %2111 = vmatpush.bf16.msra.mxu2 %v5416_v11  ;;  %v5400_v51 = vor.u32 %v6321_v32, %v5399_v47  ;;  %2139 = vmatpush.bf16.msra.mxu3 %v5420_v37  ;;  %v6314_v2 = vld [vmem:[#allocation5 + $0x304] sm:$0xf]  ;;  %v5383_v21 = vld [vmem:[#allocation5 + $0x308] sm:$0xf] }
 0x2e9   : > { %v6974_v25 = vadd.f32 %v1613_v31, %v6908_v15  ;;  %v6976_v57 = vpop.f32.mrf.mxu1  ;;  %v5396_v63 = vor.u32 %v6318_v26, %v5393_v7  ;;  %v5404_v15 = vor.u32 %v6319_v39, %v5401_v45  ;;  %v5377_v53 = vld [vmem:[#allocation5 + $0x310] sm:$0xf0]  ;;  %v6317_v37 = vld [vmem:[#allocation5 + $0x314] sm:$0xf0]  ;;  %v5385_v7 = vld [vmem:[#allocation5 + $0x318] sm:$0xf0] }
 0x2ea   : > { %7585 = vst [vmem:[#allocation35_spill] sm:$0xff] %v6976_v57  ;;  %2057 = vmatpush.bf16.msra.mxu0 %v5376_v60  ;;  %v5380_v47 = vor.u32 %v6314_v2, %v5377_v53  ;;  %v6315_v60 = vld [vmem:[#allocation5 + $0x30c] sm:$0xf]  ;;  %v2227_v45 = vld [vmem:[#allocation3 + $0x8] sm:$0x3] }
 0x2eb   : > { %2084 = vmatpush.bf16.msrb.mxu1 %v5396_v63  ;;  %v5388_v39 = vor.u32 %v6315_v60, %v5385_v7 }
 0x2ec   : > { %2112 = vmatpush.bf16.msra.mxu2 %v5400_v51  ;;  %2140 = vmatpush.bf16.msra.mxu3 %v5404_v15  ;;  %v1363_v51 = vld [vmem:[#allocation2 + $0x20] sm:$0x1] }
 0x2ee   : > { %v1585_v31 = vpop.f32.mrf.mxu3  ;;  %5508 = vmatpush.msk.msrb.mxu0 %vm305_vm0, %v2227_v45 }
 0x2ef   : > { %v6979_v46 = vadd.f32 %v1585_v31, %v6905_v12  ;;  %v6981_v13 = vpop.f32.mrf.mxu2  ;;  %v5384_v12 = vor.u32 %v6317_v37, %v5383_v21  ;;  %2085 = vmatpush.bf16.msrb.mxu1 %v5380_v47 }
 0x2f0   : > { %7586 = vst [vmem:[#allocation36_spill] sm:$0xff] %v6981_v13  ;;  %v1616_v61 = vpop.f32.mrf.mxu0  ;;  %2141 = vmatpush.bf16.msra.mxu3 %v5388_v39  ;;  %v5544_v13 = vld [vmem:[#allocation5 + $0x438] sm:$0xf0] }
 0x2f1   : > { %v1701_v11 = vadd.f32 %v1616_v61, %v1364_v8  ;;  %v1644_v26 = vpop.f32.mrf.mxu1  ;;  %2113 = vmatpush.bf16.msra.mxu2 %v5384_v12  ;;  %v1366_v8 = vld [vmem:[#allocation2 + $0x70] sm:$0x1]  ;;  %v6984_v12 = vld [vmem:[#allocation3] sm:$0xff] }
 0x2f2   : > { %v1702_v32 = vadd.f32 %v1644_v26, %v1365_v36  ;;  %2267 = vmatpush.msrb.mxu0 %v6984_v12 }
 0x2f3   : > { %1729 = vst [vmem:[#allocation2 + $0x10] sm:$0x1] %v1701_v11 }
 0x2f4   : > { %1730 = vst [vmem:[#allocation2 + $0xc8] sm:$0x1] %v1702_v32 }
 0x2f6   : > { %v1588_v63 = vpop.f32.mrf.mxu3 }
 0x2f7   : > { %v1700_v31 = vadd.f32 %v1588_v63, %v1363_v51  ;;  %v1672_v15 = vpop.f32.mrf.mxu2 }
 0x2f8   : > { %v1703_v61 = vadd.f32 %v1672_v15, %v1366_v8  ;;  %v1618_v2 = vpop.f32.mrf.mxu0 }
 0x2f9   : > { %1728 = vst [vmem:[#allocation2 + $0x20] sm:$0x1] %v1700_v31  ;;  %v1646_v53 = vpop.f32.mrf.mxu1 }
 0x2fa   : > { %1731 = vst [vmem:[#allocation2 + $0x70] sm:$0x1] %v1703_v61 }
 0x2fe   : > { %v1590_v36 = vpop.f32.mrf.mxu3 }
 0x2ff   : > { %v1674_v21 = vpop.f32.mrf.mxu2 }
 0x306   : > { %v1783_v11 = vpop.f32.mrf.mxu3 }
 0x307   : > { %v1811_v26 = vmul.f32 0.01, %v1783_v11  ;;  %vm1804_vm9 = vcmp.ge.f32.partialorder %v1783_v11, 0.0 }
 0x309   : > { %v1818_v60 = vsel %vm1804_vm9, %v1783_v11, %v1811_v26 }
 0x30e   : > { %v1786_v47 = vpop.f32.mrf.mxu3 }
 0x30f   : > { %vm1805_vm10 = vcmp.ge.f32.partialorder %v1786_v47, 0.0  ;;  %v1812_v37 = vmul.f32 0.01, %v1786_v47 }
 0x311   : > { %v1819_v7 = vsel %vm1805_vm10, %v1786_v47, %v1812_v37 }
 0x312   : > { %v1853_v32 = vpack.c.bf16 %v1819_v7, %v1818_v60 }
 0x314   : > { %2058 = vmatmul.bf16.vlgmr.msra.gmra.mxu0 %v1853_v32  ;;  %2086 = vmatmul.bf16.vlgmr.msrb.gmra.mxu1 %v1853_v32 }
 0x315   : > { %2114 = vmatmul.bf16.vlgmr.msra.gmra.mxu2 %v1853_v32  ;;  %2142 = vmatmul.bf16.vlgmr.msra.gmra.mxu3 %v1853_v32  ;;  %v5501_v32 = vld [vmem:[%s6749_s16 + $0xe0] sm:$0xff] }
 0x316   : > { %v1789_v39 = vpop.f32.mrf.mxu3 }
 0x317   : > { %v1813_v45 = vmul.f32 0.01, %v1789_v39  ;;  %vm1806_vm11 = vcmp.ge.f32.partialorder %v1789_v39, 0.0 }
 0x319   : > { %v1820_v31 = vsel %vm1806_vm11, %v1789_v39, %v1813_v45  ;;  %v5502_v39 = vld [vmem:[%s6749_s16 + $0xe8] sm:$0xff]  ;;  %v5503_v45 = vld [vmem:[%s6749_s16 + $0xf0] sm:$0xff] }
 0x31e   : > { %v1792_v51 = vpop.f32.mrf.mxu3 }
 0x31f   : > { %vm1807_vm12 = vcmp.ge.f32.partialorder %v1792_v51, 0.0  ;;  %v1814_v63 = vmul.f32 0.01, %v1792_v51 }
 0x321   : > { %v1821_v8 = vsel %vm1807_vm12, %v1792_v51, %v1814_v63  ;;  %v5504_v51 = vld [vmem:[%s6749_s16 + $0xf8] sm:$0xff]  ;;  %v5505_v63 = vld [vmem:[%s6749_s16 + $0x100] sm:$0xff] }
 0x322   : > { %v1854_v15 = vpack.c.bf16 %v1821_v8, %v1820_v31  ;;  %v5506_v31 = vld [vmem:[%s6749_s16 + $0x108] sm:$0xff]  ;;  %v5507_v8 = vld [vmem:[%s6749_s16 + $0x110] sm:$0x1] }
 0x324   : > { %2063 = vmatmul.bf16.gmra.mxu0 %v1854_v15  ;;  %2091 = vmatmul.bf16.gmra.mxu1 %v1854_v15 }
 0x325   : > { %2119 = vmatmul.bf16.gmra.mxu2 %v1854_v15  ;;  %2147 = vmatmul.bf16.gmra.mxu3 %v1854_v15  ;;  %v5630_v15 = vld [vmem:[#allocation5 + $0x4e0] sm:$0xf] }
 0x326   : > { %v1795_v61 = vpop.f32.mrf.mxu3 }
 0x327   : > { %v1815_v2 = vmul.f32 0.01, %v1795_v61  ;;  %vm1808_vm13 = vcmp.ge.f32.partialorder %v1795_v61, 0.0 }
 0x329   : > { %v1822_v21 = vsel %vm1808_vm13, %v1795_v61, %v1815_v2  ;;  %v6376_v61 = vld [vmem:[#allocation5 + $0x4ec] sm:$0xf0] }
 0x32a   : > { %v5631_v2 = vor.u32 %v6376_v61, %v5630_v15 }
 0x32c   : > { %2536 = vmatpush.bf16.msra.mxu1 %v5631_v2  ;;  %v6374_v2 = vld [vmem:[#allocation5 + $0x4e4] sm:$0xf] }
 0x32e   : > { %v1798_v53 = vpop.f32.mrf.mxu3 }
 0x32f   : > { %vm1809_vm14 = vcmp.ge.f32.partialorder %v1798_v53, 0.0  ;;  %v1816_v36 = vmul.f32 0.01, %v1798_v53 }
 0x331   : > { %v1823_v11 = vsel %vm1809_vm14, %v1798_v53, %v1816_v36  ;;  %v5614_v53 = vld [vmem:[#allocation5 + $0x4c0] sm:$0xf]  ;;  %v6372_v36 = vld [vmem:[#allocation5 + $0x4cc] sm:$0xf0] }
 0x332   : > { %v1855_v26 = vpack.c.bf16 %v1823_v11, %v1822_v21  ;;  %v5615_v21 = vor.u32 %v6372_v36, %v5614_v53  ;;  %v5632_v53 = vld [vmem:[#allocation5 + $0x4f0] sm:$0xf0]  ;;  %v5638_v36 = vld [vmem:[#allocation5 + $0x4e8] sm:$0xf] }
 0x334   : > { %2068 = vmatmul.bf16.gmra.mxu0 %v1855_v26  ;;  %2096 = vmatmul.bf16.gmra.mxu1 %v1855_v26 }
 0x335   : > { %2124 = vmatmul.bf16.gmra.mxu2 %v1855_v26  ;;  %2152 = vmatmul.bf16.gmra.mxu3 %v1855_v26 }
 0x336   : > { %v1801_v47 = vpop.f32.mrf.mxu3  ;;  %2537 = vmatpush.bf16.msra.mxu1 %v5615_v21 }
 0x337   : > { %v1817_v37 = vmul.f32 0.01, %v1801_v47  ;;  %vm1810_vm15 = vcmp.ge.f32.partialorder %v1801_v47, 0.0 }
 0x339   : > { %v1824_v60 = vsel %vm1810_vm15, %v1801_v47, %v1817_v37  ;;  %v5598_v47 = vld [vmem:[#allocation5 + $0x4a0] sm:$0xf]  ;;  %v6368_v37 = vld [vmem:[#allocation5 + $0x4ac] sm:$0xf0] }
 0x33a   : > { %v1856_v7 = vpack.c.bf16 %v1824_v60, %v1824_v60  ;;  %v5599_v60 = vor.u32 %v6368_v37, %v5598_v47  ;;  %v6377_v37 = vld [vmem:[#allocation5 + $0x4f4] sm:$0xf0] }
 0x33c   : > { %2538 = vmatpush.bf16.msra.mxu1 %v5599_v60  ;;  %v6375_v60 = vld [vmem:[#allocation5 + $0x4ec] sm:$0xf] }
 0x344   : > { %2073 = vmatmul.bf16.gmra.mxu0 %v1856_v7  ;;  %2101 = vmatmul.bf16.gmra.mxu1 %v1856_v7 }
 0x345   : > { %2129 = vmatmul.bf16.gmra.mxu2 %v1856_v7  ;;  %2157 = vmatmul.bf16.gmra.mxu3 %v1856_v7 }
 0x354   : > { %5509 = vmatmul.msk.f32.vlgmr.msrb.gmra.mxu0 %vm283_vm1, %v5501_v32 }
 0x35c   : > { %5510 = vmatmul.msk.f32.gmra.mxu0 %vm283_vm1, %v5502_v39 }
 0x364   : > { %5511 = vmatmul.msk.f32.gmra.mxu0 %vm283_vm1, %v5503_v45 }
 0x36c   : > { %5512 = vmatmul.msk.f32.gmra.mxu0 %vm283_vm1, %v5504_v51 }
 0x374   : > { %5513 = vmatmul.msk.f32.gmra.mxu0 %vm283_vm1, %v5505_v63  ;;  %v5582_v63 = vld [vmem:[#allocation5 + $0x480] sm:$0xf] }
 0x37c   : > { %5514 = vmatmul.msk.f32.gmra.mxu0 %vm283_vm1, %v5506_v31  ;;  %v6364_v31 = vld [vmem:[#allocation5 + $0x48c] sm:$0xf0] }
 0x37d   : > { %v5583_v61 = vor.u32 %v6364_v31, %v5582_v63 }
 0x37f   : > { %2539 = vmatpush.bf16.msra.mxu1 %v5583_v61  ;;  %v6370_v61 = vld [vmem:[#allocation5 + $0x4c4] sm:$0xf] }
 0x384   : > { %5515 = vmatmul.msk.f32.gmra.mxu0 %vm283_vm1, %v5507_v8 }
 0x391   : > { %v7001_v11 = vpop.f32.mrf.mxu0  ;;  %v7003_v26 = vpop.f32.mrf.mxu1 }
 0x392   : > { %7587 = vst [vmem:[#allocation37_spill] sm:$0xff] %v7001_v11 }
 0x393   : > { %7588 = vst [vmem:[#allocation38_spill] sm:$0xff] %v7003_v26  ;;  %v5622_v26 = vld [vmem:[#allocation5 + $0x4c8] sm:$0xf] }
 0x398   : > { %v7005_v7 = vpop.f32.mrf.mxu2  ;;  %v2143_v32 = vpop.f32.mrf.mxu3 }
 0x399   : > { %v7008_v39 = vadd.f32 %v2143_v32, %v6933_v0  ;;  %v2061_v45 = vpop.f32.mrf.mxu0  ;;  %v2089_v51 = vpop.f32.mrf.mxu1  ;;  %v5635_v0 = vor.u32 %v6374_v2, %v5632_v53  ;;  %v5640_v32 = vld [vmem:[#allocation5 + $0x4f8] sm:$0xf0]  ;;  %v5619_v2 = vor.u32 %v6370_v61, %v5616_v41  ;;  %v6373_v53 = vld [vmem:[#allocation5 + $0x4d4] sm:$0xf0]  ;;  %v5590_v61 = vld [vmem:[#allocation5 + $0x488] sm:$0xf] }
 0x39a   : > { %v7011_v8 = vadd.f32 %v2061_v45, %v6941_v33  ;;  %v7014_v15 = vadd.f32 %v2089_v51, %v6936_v10  ;;  %v5566_v45 = vld [vmem:[#allocation5 + $0x460] sm:$0xf]  ;;  %v6360_v10 = vld [vmem:[#allocation5 + $0x46c] sm:$0xf0]  ;;  %v5639_v51 = vor.u32 %v6377_v37, %v5638_v36  ;;  %v5643_v63 = vor.u32 %v6375_v60, %v5640_v32  ;;  %v5600_v36 = vld [vmem:[#allocation5 + $0x4b0] sm:$0xf0] }
 0x39b   : > { %v5567_v31 = vor.u32 %v6360_v10, %v5566_v45  ;;  %2564 = vmatpush.bf16.msrb.mxu2 %v5635_v0  ;;  %v5623_v23 = vor.u32 %v6373_v53, %v5622_v26  ;;  %v5606_v37 = vld [vmem:[#allocation5 + $0x4a8] sm:$0xf]  ;;  %v6369_v45 = vld [vmem:[#allocation5 + $0x4b4] sm:$0xf0]  ;;  %v6367_v10 = vld [vmem:[#allocation5 + $0x4ac] sm:$0xf] }
 0x39c   : > { %2592 = vmatpush.bf16.msrb.mxu3 %v5639_v51  ;;  %2620 = vmatpush.bf16.msra.mxu0 %v5643_v63  ;;  %v5608_v51 = vld [vmem:[#allocation5 + $0x4b8] sm:$0xf0]  ;;  %v5607_v26 = vor.u32 %v6369_v45, %v5606_v37  ;;  %v6356_v53 = vld [vmem:[#allocation5 + $0x44c] sm:$0xf0]  ;;  %v6363_v37 = vld [vmem:[#allocation5 + $0x48c] sm:$0xf] }
 0x39d   : > { %2540 = vmatpush.bf16.msra.mxu1 %v5567_v31  ;;  %v5592_v45 = vld [vmem:[#allocation5 + $0x498] sm:$0xf0] }
 0x39f   : > { %2565 = vmatpush.bf16.msrb.mxu2 %v5619_v2  ;;  %v5550_v2 = vld [vmem:[#allocation5 + $0x440] sm:$0xf] }
 0x3a0   : > { %v7016_v21 = vpop.f32.mrf.mxu2  ;;  %v7018_v47 = vpop.f32.mrf.mxu3  ;;  %2593 = vmatpush.bf16.msrb.mxu3 %v5623_v23 }
 0x3a1   : > { %v7020_v27 = vpop.f32.mrf.mxu0  ;;  %v7022_v33 = vpop.f32.mrf.mxu1 }
 0x3a2   : > { %7589 = vst [vmem:[#allocation39_spill] sm:$0xff] %v7020_v27  ;;  %v5627_v27 = vor.u32 %v6371_v52, %v5624_v54  ;;  %v5611_v54 = vor.u32 %v6367_v10, %v5608_v51  ;;  %v6362_v52 = vld [vmem:[#allocation5 + $0x484] sm:$0xf]  ;;  %v5568_v10 = vld [vmem:[#allocation5 + $0x470] sm:$0xf0] }
 0x3a3   : > { %7590 = vst [vmem:[#allocation40_spill] sm:$0xff] %v7022_v33  ;;  %v6366_v33 = vld [vmem:[#allocation5 + $0x4a4] sm:$0xf] }
 0x3a4   : > { %2621 = vmatpush.bf16.msra.mxu0 %v5627_v27  ;;  %v5603_v32 = vor.u32 %v6366_v33, %v5600_v36  ;;  %2594 = vmatpush.bf16.msrb.mxu3 %v5607_v26  ;;  %v5584_v33 = vld [vmem:[#allocation5 + $0x490] sm:$0xf0]  ;;  %v6365_v36 = vld [vmem:[#allocation5 + $0x494] sm:$0xf0]  ;;  %v6352_v26 = vld [vmem:[#allocation5 + $0x42c] sm:$0xf0] }
 0x3a5   : > { %v5591_v11 = vor.u32 %v6365_v36, %v5590_v61 }
 0x3a6   : > { %2566 = vmatpush.bf16.msrb.mxu2 %v5603_v32  ;;  %v5574_v32 = vld [vmem:[#allocation5 + $0x468] sm:$0xf] }
 0x3a8   : > { %v7024_v60 = vpop.f32.mrf.mxu2  ;;  %v2148_v0 = vpop.f32.mrf.mxu3  ;;  %2622 = vmatpush.bf16.msra.mxu0 %v5611_v54  ;;  %2595 = vmatpush.bf16.msrb.mxu3 %v5591_v11  ;;  %v5576_v11 = vld [vmem:[#allocation5 + $0x478] sm:$0xf0] }
 0x3a9   : > { %v7027_v41 = vadd.f32 %v2148_v0, %v6952_v22  ;;  %v2066_v63 = vpop.f32.mrf.mxu0  ;;  %v2094_v31 = vpop.f32.mrf.mxu1  ;;  %v5587_v22 = vor.u32 %v6362_v52, %v5584_v33  ;;  %v5551_v0 = vor.u32 %v6356_v53, %v5550_v2  ;;  %v6361_v52 = vld [vmem:[#allocation5 + $0x474] sm:$0xf0] }
 0x3aa   : > { %v7030_v23 = vadd.f32 %v2066_v63, %v6960_v29  ;;  %v7033_v27 = vadd.f32 %v2094_v31, %v6955_v55  ;;  %v5595_v29 = vor.u32 %v6363_v37, %v5592_v45  ;;  %v6358_v55 = vld [vmem:[#allocation5 + $0x464] sm:$0xf]  ;;  %v5534_v31 = vld [vmem:[#allocation5 + $0x420] sm:$0xf]  ;;  %v5575_v53 = vor.u32 %v6361_v52, %v5574_v32  ;;  %v5552_v37 = vld [vmem:[#allocation5 + $0x450] sm:$0xf0] }
 0x3ab   : > { %2567 = vmatpush.bf16.msrb.mxu2 %v5587_v22  ;;  %2541 = vmatpush.bf16.msra.mxu1 %v5551_v0  ;;  %v5571_v54 = vor.u32 %v6358_v55, %v5568_v10  ;;  %v5535_v2 = vor.u32 %v6352_v26, %v5534_v31  ;;  %v6359_v22 = vld [vmem:[#allocation5 + $0x46c] sm:$0xf]  ;;  %v6354_v0 = vld [vmem:[#allocation5 + $0x444] sm:$0xf]  ;;  %v5558_v45 = vld [vmem:[#allocation5 + $0x448] sm:$0xf] }
 0x3ac   : > { %2623 = vmatpush.bf16.msra.mxu0 %v5595_v29  ;;  %v5579_v36 = vor.u32 %v6359_v22, %v5576_v11  ;;  %2596 = vmatpush.bf16.msrb.mxu3 %v5575_v53  ;;  %v5555_v29 = vor.u32 %v6354_v0, %v5552_v37  ;;  %v5560_v55 = vld [vmem:[#allocation5 + $0x458] sm:$0xf0]  ;;  %v5559_v10 = vor.u32 %v6357_v20, %v5558_v45  ;;  %v6350_v31 = vld [vmem:[#allocation5 + $0x424] sm:$0xf]  ;;  %v5536_v26 = vld [vmem:[#allocation5 + $0x430] sm:$0xf0] }
 0x3ad   : > { %v5542_v52 = vld [vmem:[#allocation5 + $0x428] sm:$0xf]  ;;  %v5539_v22 = vor.u32 %v6350_v31, %v5536_v26  ;;  %v6351_v11 = vld [vmem:[#allocation5 + $0x42c] sm:$0xf]  ;;  %v6346_v45 = vld [vmem:[#allocation5 + $0x404] sm:$0xf] }
 0x3ae   : > { %v5547_v20 = vor.u32 %v6351_v11, %v5544_v13  ;;  %v6347_v13 = vld [vmem:[#allocation5 + $0x40c] sm:$0xf]  ;;  %v5528_v31 = vld [vmem:[#allocation5 + $0x418] sm:$0xf0] }
 0x3af   : > { %2568 = vmatpush.bf16.msrb.mxu2 %v5571_v54  ;;  %2542 = vmatpush.bf16.msra.mxu1 %v5535_v2  ;;  %v6353_v54 = vld [vmem:[#allocation5 + $0x434] sm:$0xf0] }
 0x3b0   : > { %v7035_v51 = vpop.f32.mrf.mxu2  ;;  %v7037_v63 = vpop.f32.mrf.mxu3  ;;  %2624 = vmatpush.bf16.msra.mxu0 %v5579_v36  ;;  %2597 = vmatpush.bf16.msrb.mxu3 %v5559_v10  ;;  %v5543_v2 = vor.u32 %v6353_v54, %v5542_v52  ;;  %v1849_v52 = vld [vmem:[#allocation2 + $0x20] sm:$0x1] }
 0x3b1   : > { %v7039_v33 = vpop.f32.mrf.mxu0  ;;  %v7041_v61 = vpop.f32.mrf.mxu1 }
 0x3b2   : > { %7591 = vst [vmem:[#allocation41_spill] sm:$0xff] %v7039_v33  ;;  %v5563_v33 = vor.u32 %v6355_v1, %v5560_v55  ;;  %v5526_v55 = vld [vmem:[#allocation5 + $0x408] sm:$0xf] }
 0x3b3   : > { %7592 = vst [vmem:[#allocation42_spill] sm:$0xff] %v7041_v61  ;;  %v6348_v61 = vld [vmem:[#allocation5 + $0x40c] sm:$0xf0]  ;;  %2569 = vmatpush.bf16.msrb.mxu2 %v5555_v29  ;;  %v5520_v29 = vld [vmem:[#allocation5 + $0x410] sm:$0xf0] }
 0x3b4   : > { %v5519_v32 = vor.u32 %v6348_v61, %v5518_v18  ;;  %2625 = vmatpush.bf16.msra.mxu0 %v5563_v33  ;;  %2598 = vmatpush.bf16.msrb.mxu3 %v5543_v2  ;;  %v5523_v10 = vor.u32 %v6346_v45, %v5520_v29  ;;  %v6349_v33 = vld [vmem:[#allocation5 + $0x414] sm:$0xf0] }
 0x3b6   : > { %2543 = vmatpush.bf16.msra.mxu1 %v5519_v32  ;;  %v5531_v32 = vor.u32 %v6347_v13, %v5528_v31 }
 0x3b7   : > { %2570 = vmatpush.bf16.msrb.mxu2 %v5539_v22  ;;  %v1850_v22 = vld [vmem:[#allocation2 + $0x10] sm:$0x1] }
 0x3b8   : > { %v7043_v53 = vpop.f32.mrf.mxu2  ;;  %v2153_v0 = vpop.f32.mrf.mxu3  ;;  %2626 = vmatpush.bf16.msra.mxu0 %v5547_v20  ;;  %v1851_v20 = vld [vmem:[#allocation2 + $0xc8] sm:$0x1] }
 0x3b9   : > { %7593 = vst [vmem:[#allocation43_spill] sm:$0xff] %v7043_v53  ;;  %v7046_v1 = vadd.f32 %v2153_v0, %v6971_v5  ;;  %v2071_v36 = vpop.f32.mrf.mxu0  ;;  %v2099_v18 = vpop.f32.mrf.mxu1  ;;  %v5527_v5 = vor.u32 %v6349_v33, %v5526_v55  ;;  %v6385_v53 = vld [vmem:[#allocation5 + $0x534] sm:$0xf0] }
 0x3ba   : > { %v7049_v61 = vadd.f32 %v2071_v36, %v6979_v46  ;;  %v7052_v37 = vadd.f32 %v2099_v18, %v6974_v25  ;;  %v2713_v25 = vld [vmem:[#allocation3 + $0x8] sm:$0x3]  ;;  %v1852_v18 = vld [vmem:[#allocation2 + $0x70] sm:$0x1] }
 0x3bb   : > { %2571 = vmatpush.bf16.msrb.mxu2 %v5523_v10  ;;  %2599 = vmatpush.bf16.msrb.mxu3 %v5527_v5 }
 0x3bc   : > { %2627 = vmatpush.bf16.msra.mxu0 %v5531_v32  ;;  %5651 = vmatpush.msk.msrb.mxu1 %vm305_vm0, %v2713_v25 }
 0x3be   : > { %2753 = vmatpush.msrb.mxu1 %v6984_v12 }
 0x3c0   : > { %v7054_v26 = vpop.f32.mrf.mxu2  ;;  %v7056_v46 = vpop.f32.mrf.mxu3 }
 0x3c1   : > { %7594 = vst [vmem:[#allocation44_spill] sm:$0xff] %v7054_v26  ;;  %v2074_v54 = vpop.f32.mrf.mxu0  ;;  %v2102_v11 = vpop.f32.mrf.mxu1  ;;  %v6403_v26 = vld [vmem:[#allocation5 + $0x5cc] sm:$0xf] }
 0x3c2   : > { %7595 = vst [vmem:[#allocation45_spill] sm:$0xff] %v7056_v46  ;;  %v2186_v2 = vadd.f32 %v2074_v54, %v1849_v52  ;;  %v2187_v0 = vadd.f32 %v2102_v11, %v1850_v22  ;;  %v6405_v46 = vld [vmem:[#allocation5 + $0x5d4] sm:$0xf0] }
 0x3c4   : > { %2214 = vst [vmem:[#allocation2 + $0x20] sm:$0x1] %v2186_v2 }
 0x3c5   : > { %2215 = vst [vmem:[#allocation2 + $0x10] sm:$0x1] %v2187_v0 }
 0x3c8   : > { %v2130_v36 = vpop.f32.mrf.mxu2  ;;  %v2158_v45 = vpop.f32.mrf.mxu3 }
 0x3c9   : > { %v2188_v29 = vadd.f32 %v2130_v36, %v1851_v20  ;;  %v2189_v55 = vadd.f32 %v2158_v45, %v1852_v18  ;;  %v2076_v10 = vpop.f32.mrf.mxu0  ;;  %v2104_v33 = vpop.f32.mrf.mxu1 }
 0x3cb   : > { %2216 = vst [vmem:[#allocation2 + $0xc8] sm:$0x1] %v2188_v29 }
 0x3cc   : > { %2217 = vst [vmem:[#allocation2 + $0x70] sm:$0x1] %v2189_v55 }
 0x3d0   : > { %v2132_v13 = vpop.f32.mrf.mxu2  ;;  %v2160_v31 = vpop.f32.mrf.mxu3 }
 0x3d1   : > { %v2269_v5 = vpop.f32.mrf.mxu0 }
 0x3d2   : > { %v2297_v32 = vmul.f32 0.01, %v2269_v5  ;;  %vm2290_vm2 = vcmp.ge.f32.partialorder %v2269_v5, 0.0 }
 0x3d4   : > { %v2304_v52 = vsel %vm2290_vm2, %v2269_v5, %v2297_v32 }
 0x3d9   : > { %v2272_v25 = vpop.f32.mrf.mxu0 }
 0x3da   : > { %vm2291_vm3 = vcmp.ge.f32.partialorder %v2272_v25, 0.0  ;;  %v2298_v12 = vmul.f32 0.01, %v2272_v25 }
 0x3dc   : > { %v2305_v54 = vsel %vm2291_vm3, %v2272_v25, %v2298_v12 }
 0x3dd   : > { %v2339_v22 = vpack.c.bf16 %v2305_v54, %v2304_v52  ;;  %v5644_v54 = vld [vmem:[%s6749_s16 + $0x118] sm:$0xff] }
 0x3df   : > { %2544 = vmatmul.bf16.vlgmr.msra.gmra.mxu1 %v2339_v22  ;;  %2572 = vmatmul.bf16.vlgmr.msrb.gmra.mxu2 %v2339_v22 }
 0x3e0   : > { %2600 = vmatmul.bf16.vlgmr.msrb.gmra.mxu3 %v2339_v22  ;;  %2628 = vmatmul.bf16.vlgmr.msra.gmra.mxu0 %v2339_v22  ;;  %v5645_v22 = vld [vmem:[%s6749_s16 + $0x120] sm:$0xff] }
 0x3e1   : > { %v2275_v11 = vpop.f32.mrf.mxu0 }
 0x3e2   : > { %v2299_v2 = vmul.f32 0.01, %v2275_v11  ;;  %vm2292_vm4 = vcmp.ge.f32.partialorder %v2275_v11, 0.0 }
 0x3e4   : > { %v2306_v36 = vsel %vm2292_vm4, %v2275_v11, %v2299_v2  ;;  %v5646_v11 = vld [vmem:[%s6749_s16 + $0x128] sm:$0xff]  ;;  %v5647_v2 = vld [vmem:[%s6749_s16 + $0x130] sm:$0xff] }
 0x3e9   : > { %v2278_v0 = vpop.f32.mrf.mxu0 }
 0x3ea   : > { %vm2293_vm5 = vcmp.ge.f32.partialorder %v2278_v0, 0.0  ;;  %v2300_v20 = vmul.f32 0.01, %v2278_v0 }
 0x3ec   : > { %v2307_v18 = vsel %vm2293_vm5, %v2278_v0, %v2300_v20  ;;  %v5648_v0 = vld [vmem:[%s6749_s16 + $0x138] sm:$0xff]  ;;  %v5649_v20 = vld [vmem:[%s6749_s16 + $0x140] sm:$0xff] }
 0x3ed   : > { %v2340_v45 = vpack.c.bf16 %v2307_v18, %v2306_v36  ;;  %v5650_v36 = vld [vmem:[%s6749_s16 + $0x148] sm:$0x1]  ;;  %v5773_v18 = vld [vmem:[#allocation5 + $0x5e0] sm:$0xf] }
 0x3ef   : > { %2549 = vmatmul.bf16.gmra.mxu1 %v2340_v45  ;;  %2577 = vmatmul.bf16.gmra.mxu2 %v2340_v45 }
 0x3f0   : > { %2605 = vmatmul.bf16.gmra.mxu3 %v2340_v45  ;;  %2633 = vmatmul.bf16.gmra.mxu0 %v2340_v45  ;;  %v6408_v45 = vld [vmem:[#allocation5 + $0x5ec] sm:$0xf0] }
 0x3f1   : > { %v2281_v29 = vpop.f32.mrf.mxu0 }
 0x3f2   : > { %v2301_v55 = vmul.f32 0.01, %v2281_v29  ;;  %vm2294_vm6 = vcmp.ge.f32.partialorder %v2281_v29, 0.0 }
 0x3f4   : > { %v2308_v13 = vsel %vm2294_vm6, %v2281_v29, %v2301_v55  ;;  %v5774_v29 = vor.u32 %v6408_v45, %v5773_v18  ;;  %v5757_v55 = vld [vmem:[#allocation5 + $0x5c0] sm:$0xf]  ;;  %v6406_v45 = vld [vmem:[#allocation5 + $0x5e4] sm:$0xf] }
 0x3f6   : > { %3022 = vmatpush.bf16.msra.mxu2 %v5774_v29  ;;  %v5775_v29 = vld [vmem:[#allocation5 + $0x5f0] sm:$0xf0] }
 0x3f9   : > { %v2284_v10 = vpop.f32.mrf.mxu0 }
 0x3fa   : > { %vm2295_vm7 = vcmp.ge.f32.partialorder %v2284_v10, 0.0  ;;  %v2302_v33 = vmul.f32 0.01, %v2284_v10 }
 0x3fc   : > { %v2309_v31 = vsel %vm2295_vm7, %v2284_v10, %v2302_v33  ;;  %v6404_v10 = vld [vmem:[#allocation5 + $0x5cc] sm:$0xf0] }
 0x3fd   : > { %v2341_v5 = vpack.c.bf16 %v2309_v31, %v2308_v13  ;;  %v5758_v33 = vor.u32 %v6404_v10, %v5757_v55  ;;  %v5741_v31 = vld [vmem:[#allocation5 + $0x5a0] sm:$0xf] }
 0x3ff   : > { %2554 = vmatmul.bf16.gmra.mxu1 %v2341_v5  ;;  %2582 = vmatmul.bf16.gmra.mxu2 %v2341_v5 }
 0x400   : > { %2610 = vmatmul.bf16.gmra.mxu3 %v2341_v5  ;;  %2638 = vmatmul.bf16.gmra.mxu0 %v2341_v5  ;;  %v6400_v5 = vld [vmem:[#allocation5 + $0x5ac] sm:$0xf0] }
 0x401   : > { %v2287_v32 = vpop.f32.mrf.mxu0  ;;  %3023 = vmatpush.bf16.msra.mxu2 %v5758_v33  ;;  %v5778_v33 = vor.u32 %v6406_v45, %v5775_v29  ;;  %v5765_v45 = vld [vmem:[#allocation5 + $0x5c8] sm:$0xf] }
 0x402   : > { %v2303_v25 = vmul.f32 0.01, %v2287_v32  ;;  %vm2296_vm8 = vcmp.ge.f32.partialorder %v2287_v32, 0.0  ;;  %v5766_v57 = vor.u32 %v6405_v46, %v5765_v45  ;;  %v5733_v45 = vld [vmem:[#allocation5 + $0x588] sm:$0xf] }
 0x403   : > { %3050 = vmatpush.bf16.msra.mxu3 %v5778_v33  ;;  %v6398_v33 = vld [vmem:[#allocation5 + $0x5a4] sm:$0xf] }
 0x404   : > { %v2310_v12 = vsel %vm2296_vm8, %v2287_v32, %v2303_v25  ;;  %v5742_v25 = vor.u32 %v6400_v5, %v5741_v31  ;;  %v6409_v31 = vld [vmem:[#allocation5 + $0x5f4] sm:$0xf0]  ;;  %v6407_v5 = vld [vmem:[#allocation5 + $0x5ec] sm:$0xf] }
 0x405   : > { %v2342_v52 = vpack.c.bf16 %v2310_v12, %v2310_v12 }
 0x406   : > { %3024 = vmatpush.bf16.msra.mxu2 %v5742_v25 }
 0x40f   : > { %2559 = vmatmul.bf16.gmra.mxu1 %v2342_v52  ;;  %2587 = vmatmul.bf16.gmra.mxu2 %v2342_v52 }
 0x410   : > { %2615 = vmatmul.bf16.gmra.mxu3 %v2342_v52  ;;  %2643 = vmatmul.bf16.gmra.mxu0 %v2342_v52 }
 0x41f   : > { %5652 = vmatmul.msk.f32.vlgmr.msrb.gmra.mxu1 %vm283_vm1, %v5644_v54 }
 0x427   : > { %5653 = vmatmul.msk.f32.gmra.mxu1 %vm283_vm1, %v5645_v22 }
 0x42f   : > { %5654 = vmatmul.msk.f32.gmra.mxu1 %vm283_vm1, %v5646_v11  ;;  %v5725_v11 = vld [vmem:[#allocation5 + $0x580] sm:$0xf] }
 0x437   : > { %5655 = vmatmul.msk.f32.gmra.mxu1 %vm283_vm1, %v5647_v2  ;;  %v6396_v2 = vld [vmem:[#allocation5 + $0x58c] sm:$0xf0] }
 0x43f   : > { %5656 = vmatmul.msk.f32.gmra.mxu1 %vm283_vm1, %v5648_v0 }
 0x447   : > { %5657 = vmatmul.msk.f32.gmra.mxu1 %vm283_vm1, %v5649_v20 }
 0x44f   : > { %5658 = vmatmul.msk.f32.gmra.mxu1 %vm283_vm1, %v5650_v36  ;;  %v5726_v36 = vor.u32 %v6396_v2, %v5725_v11 }
 0x451   : > { %3025 = vmatpush.bf16.msra.mxu2 %v5726_v36 }
 0x45c   : > { %v7074_v13 = vpop.f32.mrf.mxu1 }
 0x45d   : > { %7596 = vst [vmem:[#allocation46_spill] sm:$0xff] %v7074_v13  ;;  %v2629_v32 = vpop.f32.mrf.mxu0 }
 0x45e   : > { %v7077_v12 = vadd.f32 %v2629_v32, %v7008_v39  ;;  %v5781_v39 = vld [vmem:[#allocation5 + $0x5e8] sm:$0xf]  ;;  %v5783_v32 = vld [vmem:[#allocation5 + $0x5f8] sm:$0xf0] }
 0x45f   : > { %v5786_v11 = vor.u32 %v6407_v5, %v5783_v32  ;;  %v6401_v32 = vld [vmem:[#allocation5 + $0x5b4] sm:$0xf0] }
 0x461   : > { %3106 = vmatpush.bf16.msra.mxu1 %v5786_v11 }
 0x462   : > { %v7079_v52 = vpop.f32.mrf.mxu2 }
 0x463   : > { %7597 = vst [vmem:[#allocation47_spill] sm:$0xff] %v7079_v52  ;;  %v7081_v54 = vpop.f32.mrf.mxu3  ;;  %v5782_v52 = vor.u32 %v6409_v31, %v5781_v39  ;;  %v5749_v31 = vld [vmem:[#allocation5 + $0x5a8] sm:$0xf] }
 0x464   : > { %v2547_v22 = vpop.f32.mrf.mxu1 }
 0x465   : > { %v7084_v0 = vadd.f32 %v2547_v22, %v7011_v8  ;;  %v7086_v20 = vpop.f32.mrf.mxu0  ;;  %v5709_v8 = vld [vmem:[#allocation5 + $0x560] sm:$0xf]  ;;  %v6392_v22 = vld [vmem:[#allocation5 + $0x56c] sm:$0xf0]  ;;  %3078 = vmatpush.bf16.msrb.mxu0 %v5782_v52 }
 0x466   : > { %v5710_v36 = vor.u32 %v6392_v22, %v5709_v8  ;;  %v6399_v8 = vld [vmem:[#allocation5 + $0x5ac] sm:$0xf]  ;;  %v5751_v22 = vld [vmem:[#allocation5 + $0x5b8] sm:$0xf0] }
 0x468   : > { %3026 = vmatpush.bf16.msra.mxu2 %v5710_v36  ;;  %v5754_v36 = vor.u32 %v6399_v8, %v5751_v22  ;;  %v6390_v8 = vld [vmem:[#allocation5 + $0x564] sm:$0xf]  ;;  %v5717_v22 = vld [vmem:[#allocation5 + $0x568] sm:$0xf] }
 0x469   : > { %3079 = vmatpush.bf16.msrb.mxu0 %v5766_v57  ;;  %v5693_v57 = vld [vmem:[#allocation5 + $0x540] sm:$0xf] }
 0x46a   : > { %v2575_v18 = vpop.f32.mrf.mxu2 }
 0x46b   : > { %v7089_v55 = vadd.f32 %v2575_v18, %v7014_v15  ;;  %v7091_v10 = vpop.f32.mrf.mxu3  ;;  %v6402_v15 = vld [vmem:[#allocation5 + $0x5c4] sm:$0xf]  ;;  %v5759_v18 = vld [vmem:[#allocation5 + $0x5d0] sm:$0xf0] }
 0x46c   : > { %v7093_v25 = vpop.f32.mrf.mxu1  ;;  %v5762_v29 = vor.u32 %v6402_v15, %v5759_v18  ;;  %v5727_v18 = vld [vmem:[#allocation5 + $0x590] sm:$0xf0] }
 0x46d   : > { %7598 = vst [vmem:[#allocation48_spill] sm:$0xff] %v7093_v25  ;;  %v2634_v2 = vpop.f32.mrf.mxu0  ;;  %v5767_v25 = vld [vmem:[#allocation5 + $0x5d8] sm:$0xf0] }
 0x46e   : > { %v7096_v13 = vadd.f32 %v2634_v2, %v7027_v41  ;;  %v5770_v44 = vor.u32 %v6403_v26, %v5767_v25  ;;  %3051 = vmatpush.bf16.msra.mxu3 %v5762_v29  ;;  %v5743_v41 = vld [vmem:[#allocation5 + $0x5b0] sm:$0xf0]  ;;  %v5750_v2 = vor.u32 %v6401_v32, %v5749_v31  ;;  %v6394_v25 = vld [vmem:[#allocation5 + $0x584] sm:$0xf]  ;;  %v6397_v29 = vld [vmem:[#allocation5 + $0x594] sm:$0xf0] }
 0x46f   : > { %v5746_v5 = vor.u32 %v6398_v33, %v5743_v41  ;;  %v5730_v33 = vor.u32 %v6394_v25, %v5727_v18  ;;  %v5734_v41 = vor.u32 %v6397_v29, %v5733_v45  ;;  %v5735_v31 = vld [vmem:[#allocation5 + $0x598] sm:$0xf0]  ;;  %v6393_v25 = vld [vmem:[#allocation5 + $0x574] sm:$0xf0]  ;;  %v6391_v45 = vld [vmem:[#allocation5 + $0x56c] sm:$0xf] }
 0x470   : > { %3107 = vmatpush.bf16.msra.mxu1 %v5770_v44  ;;  %v6388_v44 = vld [vmem:[#allocation5 + $0x54c] sm:$0xf0]  ;;  %3080 = vmatpush.bf16.msrb.mxu0 %v5750_v2  ;;  %v5719_v29 = vld [vmem:[#allocation5 + $0x578] sm:$0xf0] }
 0x471   : > { %v5694_v15 = vor.u32 %v6388_v44, %v5693_v57  ;;  %v6384_v57 = vld [vmem:[#allocation5 + $0x52c] sm:$0xf0] }
 0x472   : > { %v7098_v39 = vpop.f32.mrf.mxu2  ;;  %3052 = vmatpush.bf16.msra.mxu3 %v5746_v5  ;;  %v5711_v5 = vld [vmem:[#allocation5 + $0x570] sm:$0xf0] }
 0x473   : > { %7599 = vst [vmem:[#allocation49_spill] sm:$0xff] %v7098_v39  ;;  %v7100_v52 = vpop.f32.mrf.mxu3  ;;  %v6395_v39 = vld [vmem:[#allocation5 + $0x58c] sm:$0xf]  ;;  %3027 = vmatpush.bf16.msra.mxu2 %v5694_v15  ;;  %v5714_v44 = vor.u32 %v6390_v8, %v5711_v5  ;;  %v5703_v5 = vld [vmem:[#allocation5 + $0x558] sm:$0xf0] }
 0x474   : > { %v2552_v11 = vpop.f32.mrf.mxu1  ;;  %3108 = vmatpush.bf16.msra.mxu1 %v5754_v36  ;;  %v5738_v32 = vor.u32 %v6395_v39, %v5735_v31  ;;  %3081 = vmatpush.bf16.msrb.mxu0 %v5734_v41  ;;  %v5677_v36 = vld [vmem:[#allocation5 + $0x520] sm:$0xf]  ;;  %v5718_v39 = vor.u32 %v6393_v25, %v5717_v22  ;;  %v5722_v41 = vor.u32 %v6391_v45, %v5719_v29  ;;  %v6386_v31 = vld [vmem:[#allocation5 + $0x544] sm:$0xf]  ;;  %v6387_v8 = vld [vmem:[#allocation5 + $0x54c] sm:$0xf] }
 0x475   : > { %v7103_v46 = vadd.f32 %v2552_v11, %v7030_v23  ;;  %v7105_v26 = vpop.f32.mrf.mxu0  ;;  %v5678_v15 = vor.u32 %v6384_v57, %v5677_v36  ;;  %v5706_v22 = vor.u32 %v6387_v8, %v5703_v5  ;;  %v5661_v57 = vld [vmem:[#allocation5 + $0x500] sm:$0xf]  ;;  %v6380_v25 = vld [vmem:[#allocation5 + $0x50c] sm:$0xf0]  ;;  %v5679_v29 = vld [vmem:[#allocation5 + $0x530] sm:$0xf0] }
 0x476   : > { %7600 = vst [vmem:[#allocation50_spill] sm:$0xff] %v7105_v26  ;;  %3053 = vmatpush.bf16.msra.mxu3 %v5730_v33  ;;  %v5662_v45 = vor.u32 %v6380_v25, %v5661_v57  ;;  %v5663_v8 = vld [vmem:[#allocation5 + $0x510] sm:$0xf0]  ;;  %v5669_v5 = vld [vmem:[#allocation5 + $0x508] sm:$0xf] }
 0x477   : > { %3028 = vmatpush.bf16.msra.mxu2 %v5678_v15  ;;  %v6379_v57 = vld [vmem:[#allocation5 + $0x50c] sm:$0xf]  ;;  %v5671_v25 = vld [vmem:[#allocation5 + $0x518] sm:$0xf0]  ;;  %v5860_v26 = vld [vmem:[#allocation5 + $0x668] sm:$0xf] }
 0x478   : > { %3109 = vmatpush.bf16.msra.mxu1 %v5738_v32  ;;  %v5698_v32 = vor.u32 %v6386_v31, %v5695_v6  ;;  %3082 = vmatpush.bf16.msrb.mxu0 %v5718_v39 }
 0x47a   : > { %v2580_v23 = vpop.f32.mrf.mxu2  ;;  %3054 = vmatpush.bf16.msra.mxu3 %v5714_v44 }
 0x47b   : > { %v7108_v11 = vadd.f32 %v2580_v23, %v7033_v27  ;;  %v7110_v2 = vpop.f32.mrf.mxu3  ;;  %v6389_v23 = vld [vmem:[#allocation5 + $0x554] sm:$0xf0]  ;;  %3029 = vmatpush.bf16.msra.mxu2 %v5662_v45  ;;  %v2335_v45 = vld [vmem:[#allocation2 + $0x20] sm:$0x1] }
 0x47c   : > { %7601 = vst [vmem:[#allocation51_spill] sm:$0xff] %v7110_v2  ;;  %v7112_v18 = vpop.f32.mrf.mxu1  ;;  %3110 = vmatpush.bf16.msra.mxu1 %v5722_v41  ;;  %v5702_v36 = vor.u32 %v6389_v23, %v5701_v34  ;;  %v5686_v34 = vor.u32 %v6385_v53, %v5685_v19  ;;  %v6378_v23 = vld [vmem:[#allocation5 + $0x504] sm:$0xf]  ;;  %v6431_v2 = vld [vmem:[#allocation5 + $0x6ac] sm:$0xf] }
 0x47d   : > { %7602 = vst [vmem:[#allocation52_spill] sm:$0xff] %v7112_v18  ;;  %v2639_v33 = vpop.f32.mrf.mxu0  ;;  %v6382_v18 = vld [vmem:[#allocation5 + $0x524] sm:$0xf] }
 0x47e   : > { %v7115_v27 = vadd.f32 %v2639_v33, %v7046_v1  ;;  %v5687_v1 = vld [vmem:[#allocation5 + $0x538] sm:$0xf0]  ;;  %3055 = vmatpush.bf16.msra.mxu3 %v5698_v32  ;;  %v5682_v6 = vor.u32 %v6382_v18, %v5679_v29  ;;  %3083 = vmatpush.bf16.msrb.mxu0 %v5702_v36  ;;  %v5666_v32 = vor.u32 %v6378_v23, %v5663_v8  ;;  %v6381_v18 = vld [vmem:[#allocation5 + $0x514] sm:$0xf0] }
 0x47f   : > { %v5690_v15 = vor.u32 %v6383_v59, %v5687_v1  ;;  %v5670_v36 = vor.u32 %v6381_v18, %v5669_v5 }
 0x480   : > { %3111 = vmatpush.bf16.msra.mxu1 %v5706_v22  ;;  %v5674_v22 = vor.u32 %v6379_v57, %v5671_v25 }
 0x482   : > { %v7117_v33 = vpop.f32.mrf.mxu2  ;;  %3056 = vmatpush.bf16.msra.mxu3 %v5682_v6  ;;  %3084 = vmatpush.bf16.msrb.mxu0 %v5686_v34  ;;  %v2338_v6 = vld [vmem:[#allocation2 + $0x70] sm:$0x1] }
 0x483   : > { %7603 = vst [vmem:[#allocation53_spill] sm:$0xff] %v7117_v33  ;;  %v7119_v44 = vpop.f32.mrf.mxu3  ;;  %v5852_v33 = vld [vmem:[#allocation5 + $0x660] sm:$0xf] }
 0x484   : > { %7604 = vst [vmem:[#allocation54_spill] sm:$0xff] %v7119_v44  ;;  %v2557_v39 = vpop.f32.mrf.mxu1  ;;  %3112 = vmatpush.bf16.msra.mxu1 %v5690_v15 }
 0x485   : > { %v7122_v41 = vadd.f32 %v2557_v39, %v7049_v61  ;;  %v7124_v31 = vpop.f32.mrf.mxu0  ;;  %v3199_v61 = vld [vmem:[#allocation3 + $0x8] sm:$0x3]  ;;  %v2336_v39 = vld [vmem:[#allocation2 + $0x10] sm:$0x1] }
 0x486   : > { %7605 = vst [vmem:[#allocation55_spill] sm:$0xff] %v7124_v31  ;;  %3057 = vmatpush.bf16.msra.mxu3 %v5666_v32  ;;  %3085 = vmatpush.bf16.msrb.mxu0 %v5670_v36  ;;  %v5908_v31 = vld [vmem:[#allocation5 + $0x6c8] sm:$0xf] }
 0x487   : > { %5794 = vmatpush.msk.msrb.mxu2 %vm305_vm0, %v3199_v61 }
 0x488   : > { %3113 = vmatpush.bf16.msra.mxu1 %v5674_v22 }
 0x48a   : > { %v2585_v19 = vpop.f32.mrf.mxu2 }
 0x48b   : > { %v7127_v59 = vadd.f32 %v2585_v19, %v7052_v37  ;;  %v7129_v53 = vpop.f32.mrf.mxu3  ;;  %v2337_v37 = vld [vmem:[#allocation2 + $0xc8] sm:$0x1] }
 0x48c   : > { %7606 = vst [vmem:[#allocation56_spill] sm:$0xff] %v7129_v53  ;;  %v2560_v29 = vpop.f32.mrf.mxu1 }
 0x48d   : > { %v2672_v1 = vadd.f32 %v2560_v29, %v2335_v45  ;;  %v2644_v34 = vpop.f32.mrf.mxu0 }
 0x48e   : > { %v2675_v15 = vadd.f32 %v2644_v34, %v2338_v6  ;;  %v7132_v34 = vld [vmem:[#allocation3] sm:$0xff] }
 0x48f   : > { %2700 = vst [vmem:[#allocation2 + $0x20] sm:$0x1] %v2672_v1  ;;  %3239 = vmatpush.msrb.mxu2 %v7132_v34 }
 0x490   : > { %2703 = vst [vmem:[#allocation2 + $0x70] sm:$0x1] %v2675_v15 }
 0x492   : > { %v2588_v23 = vpop.f32.mrf.mxu2 }
 0x493   : > { %v2673_v8 = vadd.f32 %v2588_v23, %v2336_v39  ;;  %v2616_v5 = vpop.f32.mrf.mxu3 }
 0x494   : > { %v2674_v32 = vadd.f32 %v2616_v5, %v2337_v37  ;;  %v2562_v18 = vpop.f32.mrf.mxu1 }
 0x495   : > { %2701 = vst [vmem:[#allocation2 + $0x10] sm:$0x1] %v2673_v8  ;;  %v2646_v57 = vpop.f32.mrf.mxu0 }
 0x496   : > { %2702 = vst [vmem:[#allocation2 + $0xc8] sm:$0x1] %v2674_v32 }
 0x49a   : > { %v2590_v25 = vpop.f32.mrf.mxu2 }
 0x49b   : > { %v2618_v36 = vpop.f32.mrf.mxu3 }
 0x49c   : > { %v2755_v22 = vpop.f32.mrf.mxu1 }
 0x49d   : > { %v2783_v19 = vmul.f32 0.01, %v2755_v22  ;;  %vm2776_vm9 = vcmp.ge.f32.partialorder %v2755_v22, 0.0 }
 0x49f   : > { %v2790_v29 = vsel %vm2776_vm9, %v2755_v22, %v2783_v19 }
 0x4a4   : > { %v2758_v61 = vpop.f32.mrf.mxu1 }
 0x4a5   : > { %vm2777_vm10 = vcmp.ge.f32.partialorder %v2758_v61, 0.0  ;;  %v2784_v45 = vmul.f32 0.01, %v2758_v61 }
 0x4a7   : > { %v2791_v1 = vsel %vm2777_vm10, %v2758_v61, %v2784_v45 }
 0x4a8   : > { %v2825_v6 = vpack.c.bf16 %v2791_v1, %v2790_v29 }
 0x4aa   : > { %3030 = vmatmul.bf16.vlgmr.msra.gmra.mxu2 %v2825_v6  ;;  %3058 = vmatmul.bf16.vlgmr.msra.gmra.mxu3 %v2825_v6 }
 0x4ab   : > { %3086 = vmatmul.bf16.vlgmr.msrb.gmra.mxu0 %v2825_v6  ;;  %3114 = vmatmul.bf16.vlgmr.msra.gmra.mxu1 %v2825_v6 }
 0x4ac   : > { %v2761_v15 = vpop.f32.mrf.mxu1 }
 0x4ad   : > { %v2785_v39 = vmul.f32 0.01, %v2761_v15  ;;  %vm2778_vm11 = vcmp.ge.f32.partialorder %v2761_v15, 0.0 }
 0x4af   : > { %v2792_v37 = vsel %vm2778_vm11, %v2761_v15, %v2785_v39  ;;  %v5787_v15 = vld [vmem:[%s6749_s16 + $0x150] sm:$0xff]  ;;  %v5788_v39 = vld [vmem:[%s6749_s16 + $0x158] sm:$0xff] }
 0x4b4   : > { %v2764_v23 = vpop.f32.mrf.mxu1 }
 0x4b5   : > { %vm2779_vm12 = vcmp.ge.f32.partialorder %v2764_v23, 0.0  ;;  %v2786_v8 = vmul.f32 0.01, %v2764_v23 }
 0x4b7   : > { %v2793_v5 = vsel %vm2779_vm12, %v2764_v23, %v2786_v8  ;;  %v5789_v23 = vld [vmem:[%s6749_s16 + $0x160] sm:$0xff]  ;;  %v5790_v8 = vld [vmem:[%s6749_s16 + $0x168] sm:$0xff] }
 0x4b8   : > { %v2826_v32 = vpack.c.bf16 %v2793_v5, %v2792_v37  ;;  %v5791_v37 = vld [vmem:[%s6749_s16 + $0x170] sm:$0xff]  ;;  %v5792_v5 = vld [vmem:[%s6749_s16 + $0x178] sm:$0xff] }
 0x4ba   : > { %3035 = vmatmul.bf16.gmra.mxu2 %v2826_v32  ;;  %3063 = vmatmul.bf16.gmra.mxu3 %v2826_v32 }
 0x4bb   : > { %3091 = vmatmul.bf16.gmra.mxu0 %v2826_v32  ;;  %3119 = vmatmul.bf16.gmra.mxu1 %v2826_v32  ;;  %v5793_v32 = vld [vmem:[%s6749_s16 + $0x180] sm:$0x1] }
 0x4bc   : > { %v2767_v18 = vpop.f32.mrf.mxu1 }
 0x4bd   : > { %v2787_v57 = vmul.f32 0.01, %v2767_v18  ;;  %vm2780_vm13 = vcmp.ge.f32.partialorder %v2767_v18, 0.0 }
 0x4bf   : > { %v2794_v22 = vsel %vm2780_vm13, %v2767_v18, %v2787_v57  ;;  %v5916_v18 = vld [vmem:[#allocation5 + $0x6e0] sm:$0xf]  ;;  %v6440_v57 = vld [vmem:[#allocation5 + $0x6ec] sm:$0xf0] }
 0x4c4   : > { %v2770_v25 = vpop.f32.mrf.mxu1 }
 0x4c5   : > { %vm2781_vm14 = vcmp.ge.f32.partialorder %v2770_v25, 0.0  ;;  %v2788_v36 = vmul.f32 0.01, %v2770_v25 }
 0x4c7   : > { %v2795_v19 = vsel %vm2781_vm14, %v2770_v25, %v2788_v36  ;;  %v5917_v25 = vor.u32 %v6440_v57, %v5916_v18  ;;  %v5900_v36 = vld [vmem:[#allocation5 + $0x6c0] sm:$0xf] }
 0x4c8   : > { %v2827_v61 = vpack.c.bf16 %v2795_v19, %v2794_v22  ;;  %v6436_v22 = vld [vmem:[#allocation5 + $0x6cc] sm:$0xf0] }
 0x4c9   : > { %3508 = vmatpush.bf16.msrb.mxu3 %v5917_v25  ;;  %v5901_v19 = vor.u32 %v6436_v22, %v5900_v36 }
 0x4ca   : > { %3040 = vmatmul.bf16.gmra.mxu2 %v2827_v61  ;;  %3068 = vmatmul.bf16.gmra.mxu3 %v2827_v61 }
 0x4cb   : > { %3096 = vmatmul.bf16.gmra.mxu0 %v2827_v61  ;;  %3124 = vmatmul.bf16.gmra.mxu1 %v2827_v61 }
 0x4cc   : > { %v2773_v45 = vpop.f32.mrf.mxu1 }
 0x4cd   : > { %v2789_v29 = vmul.f32 0.01, %v2773_v45  ;;  %vm2782_vm15 = vcmp.ge.f32.partialorder %v2773_v45, 0.0  ;;  %3509 = vmatpush.bf16.msrb.mxu3 %v5901_v19 }
 0x4cf   : > { %v2796_v1 = vsel %vm2782_vm15, %v2773_v45, %v2789_v29 }
 0x4d0   : > { %v2828_v6 = vpack.c.bf16 %v2796_v1, %v2796_v1  ;;  %v5884_v1 = vld [vmem:[#allocation5 + $0x6a0] sm:$0xf] }
 0x4da   : > { %3045 = vmatmul.bf16.gmra.mxu2 %v2828_v6  ;;  %3073 = vmatmul.bf16.gmra.mxu3 %v2828_v6 }
 0x4db   : > { %3101 = vmatmul.bf16.gmra.mxu0 %v2828_v6  ;;  %3129 = vmatmul.bf16.gmra.mxu1 %v2828_v6  ;;  %v6432_v6 = vld [vmem:[#allocation5 + $0x6ac] sm:$0xf0] }
 0x4ea   : > { %5795 = vmatmul.msk.f32.vlgmr.msrb.gmra.mxu2 %vm283_vm1, %v5787_v15  ;;  %v5885_v15 = vor.u32 %v6432_v6, %v5884_v1  ;;  %v6438_v1 = vld [vmem:[#allocation5 + $0x6e4] sm:$0xf]  ;;  %v5918_v6 = vld [vmem:[#allocation5 + $0x6f0] sm:$0xf0] }
 0x4ec   : > { %3510 = vmatpush.bf16.msrb.mxu3 %v5885_v15  ;;  %v5924_v15 = vld [vmem:[#allocation5 + $0x6e8] sm:$0xf] }
 0x4f2   : > { %5796 = vmatmul.msk.f32.gmra.mxu2 %vm283_vm1, %v5788_v39 }
 0x4fa   : > { %5797 = vmatmul.msk.f32.gmra.mxu2 %vm283_vm1, %v5789_v23 }
 0x502   : > { %5798 = vmatmul.msk.f32.gmra.mxu2 %vm283_vm1, %v5790_v8 }
 0x50a   : > { %5799 = vmatmul.msk.f32.gmra.mxu2 %vm283_vm1, %v5791_v37 }
 0x512   : > { %5800 = vmatmul.msk.f32.gmra.mxu2 %vm283_vm1, %v5792_v5  ;;  %v5868_v5 = vld [vmem:[#allocation5 + $0x680] sm:$0xf] }
 0x51a   : > { %5801 = vmatmul.msk.f32.gmra.mxu2 %vm283_vm1, %v5793_v32  ;;  %v6428_v32 = vld [vmem:[#allocation5 + $0x68c] sm:$0xf0] }
 0x51b   : > { %v5869_v18 = vor.u32 %v6428_v32, %v5868_v5  ;;  %v6424_v5 = vld [vmem:[#allocation5 + $0x66c] sm:$0xf0]  ;;  %v5921_v32 = vor.u32 %v6438_v1, %v5918_v6  ;;  %v6437_v6 = vld [vmem:[#allocation5 + $0x6d4] sm:$0xf0] }
 0x51d   : > { %3511 = vmatpush.bf16.msrb.mxu3 %v5869_v18  ;;  %v6441_v18 = vld [vmem:[#allocation5 + $0x6f4] sm:$0xf0]  ;;  %3536 = vmatpush.bf16.msra.mxu0 %v5921_v32  ;;  %v6430_v32 = vld [vmem:[#allocation5 + $0x6a4] sm:$0xf] }
 0x528   : > { %v7149_v61 = vpop.f32.mrf.mxu0  ;;  %v3115_v45 = vpop.f32.mrf.mxu1 }
 0x529   : > { %v7152_v29 = vadd.f32 %v3115_v45, %v7077_v12 }
 0x52d   : > { %v7154_v39 = vpop.f32.mrf.mxu2  ;;  %v7156_v23 = vpop.f32.mrf.mxu3 }
 0x52e   : > { %7607 = vst [vmem:[#allocation57_spill] sm:$0xff] %v7154_v39  ;;  %v5926_v39 = vld [vmem:[#allocation5 + $0x6f8] sm:$0xf0] }
 0x52f   : > { %7608 = vst [vmem:[#allocation58_spill] sm:$0xff] %v7156_v23 }
 0x530   : > { %v7158_v8 = vpop.f32.mrf.mxu0  ;;  %v7160_v37 = vpop.f32.mrf.mxu1 }
 0x535   : > { %v3033_v57 = vpop.f32.mrf.mxu2  ;;  %v3061_v25 = vpop.f32.mrf.mxu3 }
 0x536   : > { %v7163_v12 = vadd.f32 %v3033_v57, %v7084_v0  ;;  %v7166_v36 = vadd.f32 %v3061_v25, %v7089_v55  ;;  %v5853_v57 = vor.u32 %v6424_v5, %v5852_v33  ;;  %v5925_v55 = vor.u32 %v6441_v18, %v5924_v15  ;;  %v6439_v25 = vld [vmem:[#allocation5 + $0x6ec] sm:$0xf]  ;;  %v5836_v5 = vld [vmem:[#allocation5 + $0x640] sm:$0xf]  ;;  %v6420_v18 = vld [vmem:[#allocation5 + $0x64c] sm:$0xf0] }
 0x537   : > { %v5929_v53 = vor.u32 %v6439_v25, %v5926_v39  ;;  %v5909_v33 = vor.u32 %v6437_v6, %v5908_v31  ;;  %v5837_v39 = vor.u32 %v6420_v18, %v5836_v5  ;;  %v6433_v25 = vld [vmem:[#allocation5 + $0x6b4] sm:$0xf0]  ;;  %v6426_v31 = vld [vmem:[#allocation5 + $0x684] sm:$0xf]  ;;  %v6427_v18 = vld [vmem:[#allocation5 + $0x68c] sm:$0xf] }
 0x538   : > { %v7168_v22 = vpop.f32.mrf.mxu0  ;;  %v3120_v19 = vpop.f32.mrf.mxu1  ;;  %3512 = vmatpush.bf16.msrb.mxu3 %v5853_v57  ;;  %3564 = vmatpush.bf16.msrb.mxu1 %v5925_v55  ;;  %v5886_v57 = vld [vmem:[#allocation5 + $0x6b0] sm:$0xf0]  ;;  %v5892_v55 = vld [vmem:[#allocation5 + $0x6a8] sm:$0xf]  ;;  %v6429_v5 = vld [vmem:[#allocation5 + $0x694] sm:$0xf0] }
 0x539   : > { %v7171_v45 = vadd.f32 %v3120_v19, %v7096_v13  ;;  %v6434_v13 = vld [vmem:[#allocation5 + $0x6c4] sm:$0xf]  ;;  %v5902_v19 = vld [vmem:[#allocation5 + $0x6d0] sm:$0xf0]  ;;  %3592 = vmatpush.bf16.msra.mxu2 %v5929_v53  ;;  %v5889_v4 = vor.u32 %v6430_v32, %v5886_v57  ;;  %v5878_v32 = vld [vmem:[#allocation5 + $0x698] sm:$0xf0] }
 0x53a   : > { %v5905_v1 = vor.u32 %v6434_v13, %v5902_v19 }
 0x53c   : > { %3537 = vmatpush.bf16.msra.mxu0 %v5905_v1  ;;  %3565 = vmatpush.bf16.msrb.mxu1 %v5909_v33 }
 0x53d   : > { %v7173_v23 = vpop.f32.mrf.mxu2  ;;  %v7175_v0 = vpop.f32.mrf.mxu3  ;;  %3513 = vmatpush.bf16.msrb.mxu3 %v5837_v39  ;;  %v5820_v39 = vld [vmem:[#allocation5 + $0x620] sm:$0xf] }
 0x53e   : > { %7609 = vst [vmem:[#allocation59_spill] sm:$0xff] %v7173_v23  ;;  %v6435_v23 = vld [vmem:[#allocation5 + $0x6cc] sm:$0xf] }
 0x53f   : > { %7610 = vst [vmem:[#allocation60_spill] sm:$0xff] %v7175_v0  ;;  %v5910_v0 = vld [vmem:[#allocation5 + $0x6d8] sm:$0xf0] }
 0x540   : > { %v7177_v44 = vpop.f32.mrf.mxu0  ;;  %v7179_v49 = vpop.f32.mrf.mxu1  ;;  %v5913_v15 = vor.u32 %v6435_v23, %v5910_v0  ;;  %v5870_v23 = vld [vmem:[#allocation5 + $0x690] sm:$0xf0]  ;;  %v5876_v0 = vld [vmem:[#allocation5 + $0x688] sm:$0xf]  ;;  %3538 = vmatpush.bf16.msra.mxu0 %v5889_v4 }
 0x541   : > { %7611 = vst [vmem:[#allocation61_spill] sm:$0xff] %v7177_v44  ;;  %v5893_v44 = vor.u32 %v6433_v25, %v5892_v55  ;;  %v5873_v33 = vor.u32 %v6426_v31, %v5870_v23  ;;  %v5881_v25 = vor.u32 %v6427_v18, %v5878_v32  ;;  %v5862_v31 = vld [vmem:[#allocation5 + $0x678] sm:$0xf0]  ;;  %v6418_v18 = vld [vmem:[#allocation5 + $0x644] sm:$0xf] }
 0x542   : > { %7612 = vst [vmem:[#allocation62_spill] sm:$0xff] %v7179_v49  ;;  %v5894_v49 = vld [vmem:[#allocation5 + $0x6b8] sm:$0xf0]  ;;  %3593 = vmatpush.bf16.msra.mxu2 %v5913_v15  ;;  %v5877_v15 = vor.u32 %v6429_v5, %v5876_v0  ;;  %v5838_v32 = vld [vmem:[#allocation5 + $0x650] sm:$0xf0] }
 0x543   : > { %v5897_v53 = vor.u32 %v6431_v2, %v5894_v49  ;;  %3566 = vmatpush.bf16.msrb.mxu1 %v5893_v44  ;;  %v6416_v49 = vld [vmem:[#allocation5 + $0x62c] sm:$0xf0]  ;;  %v6422_v2 = vld [vmem:[#allocation5 + $0x664] sm:$0xf] }
 0x544   : > { %3539 = vmatpush.bf16.msra.mxu0 %v5873_v33 }
 0x545   : > { %v3038_v13 = vpop.f32.mrf.mxu2  ;;  %v3066_v19 = vpop.f32.mrf.mxu3 }
 0x546   : > { %v7182_v6 = vadd.f32 %v3038_v13, %v7103_v46  ;;  %v7185_v1 = vadd.f32 %v3066_v19, %v7108_v11  ;;  %3594 = vmatpush.bf16.msra.mxu2 %v5897_v53  ;;  %v5821_v46 = vor.u32 %v6416_v49, %v5820_v39  ;;  %v5854_v13 = vld [vmem:[#allocation5 + $0x670] sm:$0xf0]  ;;  %v6425_v11 = vld [vmem:[#allocation5 + $0x674] sm:$0xf0]  ;;  %v6423_v19 = vld [vmem:[#allocation5 + $0x66c] sm:$0xf] }
 0x547   : > { %v5857_v44 = vor.u32 %v6422_v2, %v5854_v13  ;;  %3567 = vmatpush.bf16.msrb.mxu1 %v5877_v15  ;;  %v5861_v23 = vor.u32 %v6425_v11, %v5860_v26  ;;  %v5865_v0 = vor.u32 %v6423_v19, %v5862_v31  ;;  %v5844_v39 = vld [vmem:[#allocation5 + $0x648] sm:$0xf]  ;;  %v6421_v49 = vld [vmem:[#allocation5 + $0x654] sm:$0xf0]  ;;  %v6414_v13 = vld [vmem:[#allocation5 + $0x624] sm:$0xf] }
 0x548   : > { %v7187_v57 = vpop.f32.mrf.mxu0  ;;  %v3125_v55 = vpop.f32.mrf.mxu1  ;;  %3514 = vmatpush.bf16.msrb.mxu3 %v5821_v46  ;;  %v5845_v26 = vor.u32 %v6421_v49, %v5844_v39  ;;  %v6412_v46 = vld [vmem:[#allocation5 + $0x60c] sm:$0xf0]  ;;  %v5822_v19 = vld [vmem:[#allocation5 + $0x630] sm:$0xf0]  ;;  %v5828_v31 = vld [vmem:[#allocation5 + $0x628] sm:$0xf] }
 0x549   : > { %7613 = vst [vmem:[#allocation63_spill] sm:$0xff] %v7187_v57  ;;  %v7190_v4 = vadd.f32 %v3125_v55, %v7115_v27  ;;  %3540 = vmatpush.bf16.msra.mxu0 %v5857_v44  ;;  %v5841_v27 = vor.u32 %v6418_v18, %v5838_v32  ;;  %v6419_v55 = vld [vmem:[#allocation5 + $0x64c] sm:$0xf]  ;;  %v5846_v57 = vld [vmem:[#allocation5 + $0x658] sm:$0xf0] }
 0x54a   : > { %3595 = vmatpush.bf16.msra.mxu2 %v5881_v25  ;;  %v5849_v15 = vor.u32 %v6419_v55, %v5846_v57  ;;  %v5804_v25 = vld [vmem:[#allocation5 + $0x600] sm:$0xf]  ;;  %v6417_v44 = vld [vmem:[#allocation5 + $0x634] sm:$0xf0]  ;;  %v6415_v18 = vld [vmem:[#allocation5 + $0x62c] sm:$0xf] }
 0x54b   : > { %3568 = vmatpush.bf16.msrb.mxu1 %v5861_v23  ;;  %v5805_v11 = vor.u32 %v6412_v46, %v5804_v25  ;;  %v5825_v23 = vor.u32 %v6414_v13, %v5822_v19  ;;  %v5830_v32 = vld [vmem:[#allocation5 + $0x638] sm:$0xf0]  ;;  %v2823_v49 = vld [vmem:[#allocation2 + $0xc8] sm:$0x1]  ;;  %v2824_v55 = vld [vmem:[#allocation2 + $0x70] sm:$0x1] }
 0x54c   : > { %v5806_v25 = vld [vmem:[#allocation5 + $0x610] sm:$0xf0]  ;;  %v5812_v46 = vld [vmem:[#allocation5 + $0x608] sm:$0xf]  ;;  %v6411_v19 = vld [vmem:[#allocation5 + $0x60c] sm:$0xf] }
 0x54d   : > { %v7192_v5 = vpop.f32.mrf.mxu2  ;;  %v7194_v53 = vpop.f32.mrf.mxu3  ;;  %3541 = vmatpush.bf16.msra.mxu0 %v5841_v27  ;;  %3515 = vmatpush.bf16.msrb.mxu3 %v5805_v11  ;;  %v6410_v27 = vld [vmem:[#allocation5 + $0x604] sm:$0xf]  ;;  %v6413_v11 = vld [vmem:[#allocation5 + $0x614] sm:$0xf0] }
 0x54e   : > { %7614 = vst [vmem:[#allocation64_spill] sm:$0xff] %v7192_v5  ;;  %3596 = vmatpush.bf16.msra.mxu2 %v5865_v0  ;;  %v5833_v5 = vor.u32 %v6415_v18, %v5830_v32  ;;  %v2822_v32 = vld [vmem:[#allocation2 + $0x10] sm:$0x1] }
 0x54f   : > { %7615 = vst [vmem:[#allocation65_spill] sm:$0xff] %v7194_v53  ;;  %3569 = vmatpush.bf16.msrb.mxu1 %v5845_v26  ;;  %v5829_v53 = vor.u32 %v6417_v44, %v5828_v31  ;;  %v5814_v31 = vld [vmem:[#allocation5 + $0x618] sm:$0xf0] }
 0x550   : > { %v7196_v33 = vpop.f32.mrf.mxu0  ;;  %v7198_v2 = vpop.f32.mrf.mxu1  ;;  %v5817_v18 = vor.u32 %v6411_v19, %v5814_v31 }
 0x551   : > { %7616 = vst [vmem:[#allocation66_spill] sm:$0xff] %v7196_v33  ;;  %3542 = vmatpush.bf16.msra.mxu0 %v5825_v23  ;;  %v6035_v33 = vld [vmem:[#allocation5 + $0x7a8] sm:$0xf] }
 0x552   : > { %7617 = vst [vmem:[#allocation67_spill] sm:$0xff] %v7198_v2  ;;  %3597 = vmatpush.bf16.msra.mxu2 %v5849_v15  ;;  %v5809_v15 = vor.u32 %v6410_v27, %v5806_v25 }
 0x553   : > { %3570 = vmatpush.bf16.msrb.mxu1 %v5829_v53  ;;  %v2821_v53 = vld [vmem:[#allocation2 + $0x20] sm:$0x1] }
 0x555   : > { %v3043_v2 = vpop.f32.mrf.mxu2  ;;  %v3071_v0 = vpop.f32.mrf.mxu3  ;;  %3543 = vmatpush.bf16.msra.mxu0 %v5809_v15 }
 0x556   : > { %v7201_v57 = vadd.f32 %v3043_v2, %v7122_v41  ;;  %v7204_v39 = vadd.f32 %v3071_v0, %v7127_v59  ;;  %3598 = vmatpush.bf16.msra.mxu2 %v5833_v5  ;;  %v5813_v2 = vor.u32 %v6413_v11, %v5812_v46  ;;  %v3685_v59 = vld [vmem:[#allocation3 + $0x8] sm:$0x3] }
 0x557   : > { %5937 = vmatpush.msk.msra.mxu3 %vm305_vm0, %v3685_v59 }
 0x558   : > { %v3102_v26 = vpop.f32.mrf.mxu0  ;;  %v3130_v13 = vpop.f32.mrf.mxu1  ;;  %3571 = vmatpush.bf16.msrb.mxu1 %v5813_v2 }
 0x559   : > { %v3160_v44 = vadd.f32 %v3102_v26, %v2823_v49  ;;  %v3161_v41 = vadd.f32 %v3130_v13, %v2824_v55  ;;  %3725 = vmatpush.msra.mxu3 %v7132_v34 }
 0x55a   : > { %3599 = vmatpush.bf16.msra.mxu2 %v5817_v18 }
 0x55b   : > { %3188 = vst [vmem:[#allocation2 + $0xc8] sm:$0x1] %v3160_v44 }
 0x55c   : > { %3189 = vst [vmem:[#allocation2 + $0x70] sm:$0x1] %v3161_v41 }
 0x55d   : > { %v3046_v23 = vpop.f32.mrf.mxu2  ;;  %v3074_v0 = vpop.f32.mrf.mxu3 }
 0x55e   : > { %v3158_v5 = vadd.f32 %v3046_v23, %v2821_v53  ;;  %v3159_v27 = vadd.f32 %v3074_v0, %v2822_v32 }
 0x560   : > { %3186 = vst [vmem:[#allocation2 + $0x20] sm:$0x1] %v3158_v5  ;;  %v3104_v49 = vpop.f32.mrf.mxu0  ;;  %v3132_v55 = vpop.f32.mrf.mxu1 }
 0x561   : > { %3187 = vst [vmem:[#allocation2 + $0x10] sm:$0x1] %v3159_v27 }
 0x565   : > { %v3048_v25 = vpop.f32.mrf.mxu2  ;;  %v3076_v46 = vpop.f32.mrf.mxu3 }
 0x56d   : > { %v3241_v26 = vpop.f32.mrf.mxu2 }
 0x56e   : > { %v3269_v13 = vmul.f32 0.01, %v3241_v26  ;;  %vm3262_vm2 = vcmp.ge.f32.partialorder %v3241_v26, 0.0 }
 0x570   : > { %v3276_v19 = vsel %vm3262_vm2, %v3241_v26, %v3269_v13 }
 0x575   : > { %v3244_v15 = vpop.f32.mrf.mxu2 }
 0x576   : > { %vm3263_vm3 = vcmp.ge.f32.partialorder %v3244_v15, 0.0  ;;  %v3270_v11 = vmul.f32 0.01, %v3244_v15 }
 0x578   : > { %v3277_v31 = vsel %vm3263_vm3, %v3244_v15, %v3270_v11  ;;  %v5930_v11 = vld [vmem:[%s6749_s16 + $0x188] sm:$0xff] }
 0x579   : > { %v3311_v44 = vpack.c.bf16 %v3277_v31, %v3276_v19  ;;  %v5931_v19 = vld [vmem:[%s6749_s16 + $0x190] sm:$0xff]  ;;  %v5932_v31 = vld [vmem:[%s6749_s16 + $0x198] sm:$0xff] }
 0x57b   : > { %3516 = vmatmul.bf16.vlgmr.msrb.gmra.mxu3 %v3311_v44  ;;  %3544 = vmatmul.bf16.vlgmr.msra.gmra.mxu0 %v3311_v44 }
 0x57c   : > { %3572 = vmatmul.bf16.vlgmr.msrb.gmra.mxu1 %v3311_v44  ;;  %3600 = vmatmul.bf16.vlgmr.msra.gmra.mxu2 %v3311_v44  ;;  %v5933_v44 = vld [vmem:[%s6749_s16 + $0x1a0] sm:$0xff] }
 0x57d   : > { %v3247_v34 = vpop.f32.mrf.mxu2 }
 0x57e   : > { %v3271_v41 = vmul.f32 0.01, %v3247_v34  ;;  %vm3264_vm4 = vcmp.ge.f32.partialorder %v3247_v34, 0.0 }
 0x580   : > { %v3278_v59 = vsel %vm3264_vm4, %v3247_v34, %v3271_v41  ;;  %v5934_v34 = vld [vmem:[%s6749_s16 + $0x1a8] sm:$0xff]  ;;  %v5935_v41 = vld [vmem:[%s6749_s16 + $0x1b0] sm:$0xff] }
 0x585   : > { %v3250_v2 = vpop.f32.mrf.mxu2 }
 0x586   : > { %vm3265_vm5 = vcmp.ge.f32.partialorder %v3250_v2, 0.0  ;;  %v3272_v18 = vmul.f32 0.01, %v3250_v2 }
 0x588   : > { %v3279_v53 = vsel %vm3265_vm5, %v3250_v2, %v3272_v18  ;;  %v5936_v2 = vld [vmem:[%s6749_s16 + $0x1b8] sm:$0x1]  ;;  %v6059_v18 = vld [vmem:[#allocation5 + $0x7e0] sm:$0xf] }
 0x589   : > { %v3312_v23 = vpack.c.bf16 %v3279_v53, %v3278_v59  ;;  %v6472_v59 = vld [vmem:[#allocation5 + $0x7ec] sm:$0xf0] }
 0x58a   : > { %v6060_v53 = vor.u32 %v6472_v59, %v6059_v18 }
 0x58b   : > { %3521 = vmatmul.bf16.gmra.mxu3 %v3312_v23  ;;  %3549 = vmatmul.bf16.gmra.mxu0 %v3312_v23 }
 0x58c   : > { %3577 = vmatmul.bf16.gmra.mxu1 %v3312_v23  ;;  %3605 = vmatmul.bf16.gmra.mxu2 %v3312_v23  ;;  %v6043_v23 = vld [vmem:[#allocation5 + $0x7c0] sm:$0xf] }
 0x58d   : > { %v3253_v32 = vpop.f32.mrf.mxu2  ;;  %3994 = vmatpush.bf16.msrb.mxu0 %v6060_v53  ;;  %v5995_v53 = vld [vmem:[#allocation5 + $0x760] sm:$0xf] }
 0x58e   : > { %v3273_v0 = vmul.f32 0.01, %v3253_v32  ;;  %vm3266_vm6 = vcmp.ge.f32.partialorder %v3253_v32, 0.0 }
 0x590   : > { %v3280_v49 = vsel %vm3266_vm6, %v3253_v32, %v3273_v0  ;;  %v6468_v32 = vld [vmem:[#allocation5 + $0x7cc] sm:$0xf0] }
 0x591   : > { %v6044_v0 = vor.u32 %v6468_v32, %v6043_v23  ;;  %v6456_v23 = vld [vmem:[#allocation5 + $0x76c] sm:$0xf0] }
 0x592   : > { %v5996_v32 = vor.u32 %v6456_v23, %v5995_v53  ;;  %v6045_v53 = vld [vmem:[#allocation5 + $0x7d0] sm:$0xf0]  ;;  %v6051_v23 = vld [vmem:[#allocation5 + $0x7c8] sm:$0xf] }
 0x593   : > { %3995 = vmatpush.bf16.msrb.mxu0 %v6044_v0  ;;  %v6061_v0 = vld [vmem:[#allocation5 + $0x7f0] sm:$0xf0] }
 0x595   : > { %v3256_v5 = vpop.f32.mrf.mxu2 }
 0x596   : > { %vm3267_vm7 = vcmp.ge.f32.partialorder %v3256_v5, 0.0  ;;  %v3274_v27 = vmul.f32 0.01, %v3256_v5 }
 0x598   : > { %v3281_v55 = vsel %vm3267_vm7, %v3256_v5, %v3274_v27 }
 0x599   : > { %v3313_v25 = vpack.c.bf16 %v3281_v55, %v3280_v49  ;;  %v6027_v49 = vld [vmem:[#allocation5 + $0x7a0] sm:$0xf]  ;;  %v6464_v55 = vld [vmem:[#allocation5 + $0x7ac] sm:$0xf0] }
 0x59b   : > { %3526 = vmatmul.bf16.gmra.mxu3 %v3313_v25  ;;  %3554 = vmatmul.bf16.gmra.mxu0 %v3313_v25 }
 0x59c   : > { %3582 = vmatmul.bf16.gmra.mxu1 %v3313_v25  ;;  %3610 = vmatmul.bf16.gmra.mxu2 %v3313_v25  ;;  %v6028_v25 = vor.u32 %v6464_v55, %v6027_v49  ;;  %v6067_v49 = vld [vmem:[#allocation5 + $0x7e8] sm:$0xf]  ;;  %v6473_v55 = vld [vmem:[#allocation5 + $0x7f4] sm:$0xf0] }
 0x59d   : > { %v3259_v46 = vpop.f32.mrf.mxu2 }
 0x59e   : > { %v3275_v26 = vmul.f32 0.01, %v3259_v46  ;;  %vm3268_vm8 = vcmp.ge.f32.partialorder %v3259_v46, 0.0  ;;  %3996 = vmatpush.bf16.msrb.mxu0 %v6028_v25 }
 0x5a0   : > { %v3282_v13 = vsel %vm3268_vm8, %v3259_v46, %v3275_v26 }
 0x5a1   : > { %v3314_v15 = vpack.c.bf16 %v3282_v13, %v3282_v13 }
 0x5ab   : > { %3531 = vmatmul.bf16.gmra.mxu3 %v3314_v15  ;;  %3559 = vmatmul.bf16.gmra.mxu0 %v3314_v15 }
 0x5ac   : > { %3587 = vmatmul.bf16.gmra.mxu1 %v3314_v15  ;;  %3615 = vmatmul.bf16.gmra.mxu2 %v3314_v15 }
 0x5bb   : > { %5938 = vmatmul.msk.f32.vlgmr.msra.gmra.mxu3 %vm283_vm1, %v5930_v11 }
 0x5c3   : > { %5939 = vmatmul.msk.f32.gmra.mxu3 %vm283_vm1, %v5931_v19 }
 0x5cb   : > { %5940 = vmatmul.msk.f32.gmra.mxu3 %vm283_vm1, %v5932_v31  ;;  %v6011_v31 = vld [vmem:[#allocation5 + $0x780] sm:$0xf] }
 0x5d3   : > { %5941 = vmatmul.msk.f32.gmra.mxu3 %vm283_vm1, %v5933_v44  ;;  %v6460_v44 = vld [vmem:[#allocation5 + $0x78c] sm:$0xf0] }
 0x5db   : > { %5942 = vmatmul.msk.f32.gmra.mxu3 %vm283_vm1, %v5934_v34  ;;  %v6012_v34 = vor.u32 %v6460_v44, %v6011_v31  ;;  %v6471_v31 = vld [vmem:[#allocation5 + $0x7ec] sm:$0xf] }
 0x5dd   : > { %3997 = vmatpush.bf16.msrb.mxu0 %v6012_v34 }
 0x5e1   : > { %3998 = vmatpush.bf16.msrb.mxu0 %v5996_v32  ;;  %v6053_v32 = vld [vmem:[#allocation5 + $0x7d8] sm:$0xf0] }
 0x5e3   : > { %5943 = vmatmul.msk.f32.gmra.mxu3 %vm283_vm1, %v5935_v41 }
 0x5eb   : > { %5944 = vmatmul.msk.f32.gmra.mxu3 %vm283_vm1, %v5936_v2 }
 0x5f8   : > { %v7222_v5 = vpop.f32.mrf.mxu0 }
 0x5f9   : > { %7618 = vst [vmem:[#allocation68_spill] sm:$0xff] %v7222_v5  ;;  %v7224_v27 = vpop.f32.mrf.mxu1  ;;  %v6466_v5 = vld [vmem:[#allocation5 + $0x7c4] sm:$0xf] }
 0x5fe   : > { %v7226_v46 = vpop.f32.mrf.mxu3 }
 0x5ff   : > { %7619 = vst [vmem:[#allocation69_spill] sm:$0xff] %v7226_v46  ;;  %v3601_v26 = vpop.f32.mrf.mxu2 }
 0x600   : > { %v7229_v13 = vadd.f32 %v3601_v26, %v7152_v29  ;;  %v3547_v15 = vpop.f32.mrf.mxu0 }
 0x601   : > { %v7232_v11 = vadd.f32 %v3547_v15, %v7166_v36  ;;  %v7234_v19 = vpop.f32.mrf.mxu1  ;;  %v6470_v36 = vld [vmem:[#allocation5 + $0x7e4] sm:$0xf]  ;;  %v6068_v15 = vor.u32 %v6473_v55, %v6067_v49  ;;  %v6467_v49 = vld [vmem:[#allocation5 + $0x7cc] sm:$0xf] }
 0x602   : > { %v6064_v26 = vor.u32 %v6470_v36, %v6061_v0  ;;  %v6048_v36 = vor.u32 %v6466_v5, %v6045_v53  ;;  %v6469_v0 = vld [vmem:[#allocation5 + $0x7d4] sm:$0xf0] }
 0x603   : > { %4050 = vmatpush.bf16.msrb.mxu2 %v6068_v15  ;;  %v6052_v55 = vor.u32 %v6469_v0, %v6051_v23  ;;  %v6029_v15 = vld [vmem:[#allocation5 + $0x7b0] sm:$0xf0]  ;;  %v6458_v0 = vld [vmem:[#allocation5 + $0x784] sm:$0xf] }
 0x604   : > { %4022 = vmatpush.bf16.msra.mxu1 %v6064_v26 }
 0x606   : > { %v3519_v41 = vpop.f32.mrf.mxu3 }
 0x607   : > { %v7237_v2 = vadd.f32 %v3519_v41, %v7163_v12  ;;  %v7239_v18 = vpop.f32.mrf.mxu2  ;;  %v6069_v12 = vld [vmem:[#allocation5 + $0x7f8] sm:$0xf0]  ;;  %4051 = vmatpush.bf16.msrb.mxu2 %v6052_v55 }
 0x608   : > { %v7241_v59 = vpop.f32.mrf.mxu0  ;;  %v6072_v34 = vor.u32 %v6471_v31, %v6069_v12  ;;  %v6056_v31 = vor.u32 %v6467_v49, %v6053_v32  ;;  %v6452_v12 = vld [vmem:[#allocation5 + $0x74c] sm:$0xf0]  ;;  %4023 = vmatpush.bf16.msra.mxu1 %v6048_v36  ;;  %v6013_v49 = vld [vmem:[#allocation5 + $0x790] sm:$0xf0]  ;;  %v6019_v32 = vld [vmem:[#allocation5 + $0x788] sm:$0xf] }
 0x609   : > { %7620 = vst [vmem:[#allocation70_spill] sm:$0xff] %v7241_v59  ;;  %v7243_v29 = vpop.f32.mrf.mxu1  ;;  %v6016_v36 = vor.u32 %v6458_v0, %v6013_v49  ;;  %v6021_v55 = vld [vmem:[#allocation5 + $0x798] sm:$0xf0] }
 0x60a   : > { %4078 = vmatpush.bf16.msrb.mxu3 %v6072_v34 }
 0x60e   : > { %v7245_v25 = vpop.f32.mrf.mxu3  ;;  %4079 = vmatpush.bf16.msrb.mxu3 %v6056_v31 }
 0x60f   : > { %7621 = vst [vmem:[#allocation71_spill] sm:$0xff] %v7245_v25  ;;  %v3606_v44 = vpop.f32.mrf.mxu2 }
 0x610   : > { %v7248_v41 = vadd.f32 %v3606_v44, %v7171_v45  ;;  %v3552_v59 = vpop.f32.mrf.mxu0  ;;  %v5979_v45 = vld [vmem:[#allocation5 + $0x740] sm:$0xf]  ;;  %v6462_v44 = vld [vmem:[#allocation5 + $0x7a4] sm:$0xf] }
 0x611   : > { %v7251_v46 = vadd.f32 %v3552_v59, %v7185_v1  ;;  %v7253_v25 = vpop.f32.mrf.mxu1  ;;  %v5980_v26 = vor.u32 %v6452_v12, %v5979_v45  ;;  %v6032_v1 = vor.u32 %v6462_v44, %v6029_v15  ;;  %v6448_v12 = vld [vmem:[#allocation5 + $0x72c] sm:$0xf0]  ;;  %v6454_v44 = vld [vmem:[#allocation5 + $0x764] sm:$0xf]  ;;  %v5997_v15 = vld [vmem:[#allocation5 + $0x770] sm:$0xf0] }
 0x612   : > { %7622 = vst [vmem:[#allocation72_spill] sm:$0xff] %v7248_v41  ;;  %v6465_v41 = vld [vmem:[#allocation5 + $0x7b4] sm:$0xf0] }
 0x613   : > { %7623 = vst [vmem:[#allocation73_spill] sm:$0xff] %v7251_v46  ;;  %v6036_v59 = vor.u32 %v6465_v41, %v6035_v33  ;;  %v6463_v46 = vld [vmem:[#allocation5 + $0x7ac] sm:$0xf]  ;;  %3999 = vmatpush.bf16.msrb.mxu0 %v5980_v26  ;;  %4024 = vmatpush.bf16.msra.mxu1 %v6032_v1  ;;  %v6461_v33 = vld [vmem:[#allocation5 + $0x794] sm:$0xf0]  ;;  %v6000_v1 = vor.u32 %v6454_v44, %v5997_v15 }
 0x614   : > { %7624 = vst [vmem:[#allocation74_spill] sm:$0xff] %v7253_v25  ;;  %v6037_v25 = vld [vmem:[#allocation5 + $0x7b8] sm:$0xf0]  ;;  %v6459_v41 = vld [vmem:[#allocation5 + $0x78c] sm:$0xf] }
 0x615   : > { %v6040_v5 = vor.u32 %v6463_v46, %v6037_v25  ;;  %4052 = vmatpush.bf16.msrb.mxu2 %v6036_v59  ;;  %v6020_v46 = vor.u32 %v6461_v33, %v6019_v32  ;;  %v6024_v25 = vor.u32 %v6459_v41, %v6021_v55  ;;  %v6450_v41 = vld [vmem:[#allocation5 + $0x744] sm:$0xf]  ;;  %v5981_v55 = vld [vmem:[#allocation5 + $0x750] sm:$0xf0] }
 0x616   : > { %v3524_v34 = vpop.f32.mrf.mxu3  ;;  %v6446_v15 = vld [vmem:[#allocation5 + $0x724] sm:$0xf] }
 0x617   : > { %v7256_v53 = vadd.f32 %v3524_v34, %v7182_v6  ;;  %v7258_v23 = vpop.f32.mrf.mxu2  ;;  %4080 = vmatpush.bf16.msrb.mxu3 %v6040_v5  ;;  %v5963_v6 = vld [vmem:[#allocation5 + $0x720] sm:$0xf]  ;;  %v6003_v34 = vld [vmem:[#allocation5 + $0x768] sm:$0xf]  ;;  %4025 = vmatpush.bf16.msra.mxu1 %v6016_v36 }
 0x618   : > { %7626 = vst [vmem:[#allocation76_spill] sm:$0xff] %v7258_v23  ;;  %v7260_v45 = vpop.f32.mrf.mxu0  ;;  %v5964_v26 = vor.u32 %v6448_v12, %v5963_v6  ;;  %v6457_v23 = vld [vmem:[#allocation5 + $0x774] sm:$0xf0]  ;;  %v5987_v6 = vld [vmem:[#allocation5 + $0x748] sm:$0xf] }
 0x619   : > { %7625 = vst [vmem:[#allocation75_spill] sm:$0xff] %v7256_v53  ;;  %v7262_v31 = vpop.f32.mrf.mxu1  ;;  %v6455_v53 = vld [vmem:[#allocation5 + $0x76c] sm:$0xf]  ;;  %4053 = vmatpush.bf16.msrb.mxu2 %v6020_v46  ;;  %v6004_v59 = vor.u32 %v6457_v23, %v6003_v34  ;;  %v5984_v23 = vor.u32 %v6450_v41, %v5981_v55 }
 0x61a   : > { %7627 = vst [vmem:[#allocation77_spill] sm:$0xff] %v7260_v45  ;;  %v6005_v45 = vld [vmem:[#allocation5 + $0x778] sm:$0xf0]  ;;  %4000 = vmatpush.bf16.msrb.mxu0 %v5964_v26  ;;  %v6444_v26 = vld [vmem:[#allocation5 + $0x70c] sm:$0xf0] }
 0x61b   : > { %4081 = vmatpush.bf16.msrb.mxu3 %v6024_v25  ;;  %v6008_v0 = vor.u32 %v6455_v53, %v6005_v45  ;;  %4026 = vmatpush.bf16.msra.mxu1 %v6000_v1  ;;  %v6453_v53 = vld [vmem:[#allocation5 + $0x754] sm:$0xf0]  ;;  %v6451_v45 = vld [vmem:[#allocation5 + $0x74c] sm:$0xf]  ;;  %v5989_v25 = vld [vmem:[#allocation5 + $0x758] sm:$0xf0] }
 0x61c   : > { %v5988_v12 = vor.u32 %v6453_v53, %v5987_v6  ;;  %v5992_v44 = vor.u32 %v6451_v45, %v5989_v25  ;;  %v5965_v1 = vld [vmem:[#allocation5 + $0x730] sm:$0xf0]  ;;  %v3308_v53 = vld [vmem:[#allocation2 + $0x10] sm:$0x1]  ;;  %v3309_v45 = vld [vmem:[#allocation2 + $0xc8] sm:$0x1] }
 0x61d   : > { %4054 = vmatpush.bf16.msrb.mxu2 %v6004_v59  ;;  %v5971_v59 = vld [vmem:[#allocation5 + $0x728] sm:$0xf] }
 0x61e   : > { %v7264_v49 = vpop.f32.mrf.mxu3 }
 0x61f   : > { %7628 = vst [vmem:[#allocation78_spill] sm:$0xff] %v7264_v49  ;;  %v3611_v5 = vpop.f32.mrf.mxu2  ;;  %4082 = vmatpush.bf16.msrb.mxu3 %v6008_v0  ;;  %4027 = vmatpush.bf16.msra.mxu1 %v5984_v23  ;;  %v6447_v49 = vld [vmem:[#allocation5 + $0x72c] sm:$0xf]  ;;  %v6442_v23 = vld [vmem:[#allocation5 + $0x704] sm:$0xf] }
 0x620   : > { %v7267_v32 = vadd.f32 %v3611_v5, %v7190_v4  ;;  %v3557_v33 = vpop.f32.mrf.mxu0  ;;  %v5947_v4 = vld [vmem:[#allocation5 + $0x700] sm:$0xf]  ;;  %v6449_v5 = vld [vmem:[#allocation5 + $0x734] sm:$0xf0] }
 0x621   : > { %v7270_v36 = vadd.f32 %v3557_v33, %v7204_v39  ;;  %v7272_v46 = vpop.f32.mrf.mxu1  ;;  %v5948_v34 = vor.u32 %v6444_v26, %v5947_v4  ;;  %4055 = vmatpush.bf16.msrb.mxu2 %v5988_v12  ;;  %v5968_v39 = vor.u32 %v6446_v15, %v5965_v1  ;;  %v5972_v33 = vor.u32 %v6449_v5, %v5971_v59  ;;  %v5949_v12 = vld [vmem:[#allocation5 + $0x710] sm:$0xf0]  ;;  %v5955_v4 = vld [vmem:[#allocation5 + $0x708] sm:$0xf]  ;;  %v4171_v5 = vld [vmem:[#allocation3 + $0x8] sm:$0x3] }
 0x622   : > { %7629 = vst [vmem:[#allocation79_spill] sm:$0xff] %v7272_v46  ;;  %v5973_v46 = vld [vmem:[#allocation5 + $0x738] sm:$0xf0] }
 0x623   : > { %4083 = vmatpush.bf16.msrb.mxu3 %v5992_v44  ;;  %4001 = vmatpush.bf16.msrb.mxu0 %v5948_v34  ;;  %v5976_v0 = vor.u32 %v6447_v49, %v5973_v46  ;;  %v5952_v44 = vor.u32 %v6442_v23, %v5949_v12  ;;  %v6445_v34 = vld [vmem:[#allocation5 + $0x714] sm:$0xf0]  ;;  %v6443_v49 = vld [vmem:[#allocation5 + $0x70c] sm:$0xf]  ;;  %v5957_v46 = vld [vmem:[#allocation5 + $0x718] sm:$0xf0] }
 0x624   : > { %4028 = vmatpush.bf16.msra.mxu1 %v5968_v39  ;;  %v5960_v59 = vor.u32 %v6443_v49, %v5957_v46  ;;  %v3307_v39 = vld [vmem:[#allocation2 + $0x20] sm:$0x1] }
 0x625   : > { %4056 = vmatpush.bf16.msrb.mxu2 %v5972_v33 }
 0x626   : > { %v3529_v41 = vpop.f32.mrf.mxu3 }
 0x627   : > { %v7275_v55 = vadd.f32 %v3529_v41, %v7201_v57  ;;  %v7277_v6 = vpop.f32.mrf.mxu2  ;;  %4084 = vmatpush.bf16.msrb.mxu3 %v5976_v0  ;;  %v5956_v57 = vor.u32 %v6445_v34, %v5955_v4  ;;  %6080 = vmatpush.msk.msra.mxu0 %vm305_vm0, %v4171_v5 }
 0x628   : > { %v3560_v25 = vpop.f32.mrf.mxu0  ;;  %4029 = vmatpush.bf16.msra.mxu1 %v5952_v44 }
 0x629   : > { %v3645_v26 = vadd.f32 %v3560_v25, %v3308_v53  ;;  %v3588_v15 = vpop.f32.mrf.mxu1  ;;  %4057 = vmatpush.bf16.msrb.mxu2 %v5956_v57  ;;  %v3310_v53 = vld [vmem:[#allocation2 + $0x70] sm:$0x1]  ;;  %v4170_v57 = vld [vmem:[#allocation3] sm:$0xff] }
 0x62a   : > { %v3646_v1 = vadd.f32 %v3588_v15, %v3309_v45  ;;  %4211 = vmatpush.msra.mxu0 %v4170_v57  ;;  %v6074_v57 = vld [vmem:[%s6749_s16 + $0x1c8] sm:$0xff] }
 0x62b   : > { %3673 = vst [vmem:[#allocation2 + $0x10] sm:$0x1] %v3645_v26  ;;  %4085 = vmatpush.bf16.msrb.mxu3 %v5960_v59 }
 0x62c   : > { %3674 = vst [vmem:[#allocation2 + $0xc8] sm:$0x1] %v3646_v1 }
 0x62e   : > { %v3532_v33 = vpop.f32.mrf.mxu3 }
 0x62f   : > { %v3644_v41 = vadd.f32 %v3532_v33, %v3307_v39  ;;  %v3616_v0 = vpop.f32.mrf.mxu2 }
 0x630   : > { %v3647_v25 = vadd.f32 %v3616_v0, %v3310_v53  ;;  %v3562_v23 = vpop.f32.mrf.mxu0 }
 0x631   : > { %3672 = vst [vmem:[#allocation2 + $0x20] sm:$0x1] %v3644_v41  ;;  %v3590_v12 = vpop.f32.mrf.mxu1 }
 0x632   : > { %3675 = vst [vmem:[#allocation2 + $0x70] sm:$0x1] %v3647_v25 }
 0x636   : > { %v3534_v45 = vpop.f32.mrf.mxu3 }
 0x637   : > { %v3618_v4 = vpop.f32.mrf.mxu2 }
 0x63e   : > { %v3727_v26 = vpop.f32.mrf.mxu3 }
 0x63f   : > { %v3755_v15 = vmul.f32 0.01, %v3727_v26  ;;  %vm3748_vm9 = vcmp.ge.f32.partialorder %v3727_v26, 0.0 }
 0x641   : > { %v3762_v49 = vsel %vm3748_vm9, %v3727_v26, %v3755_v15 }
 0x646   : > { %v3730_v44 = vpop.f32.mrf.mxu3 }
 0x647   : > { %vm3749_vm10 = vcmp.ge.f32.partialorder %v3730_v44, 0.0  ;;  %v3756_v34 = vmul.f32 0.01, %v3730_v44 }
 0x649   : > { %v3763_v46 = vsel %vm3749_vm10, %v3730_v44, %v3756_v34 }
 0x64a   : > { %v3797_v1 = vpack.c.bf16 %v3763_v46, %v3762_v49 }
 0x64c   : > { %4002 = vmatmul.bf16.vlgmr.msrb.gmra.mxu0 %v3797_v1  ;;  %4030 = vmatmul.bf16.vlgmr.msra.gmra.mxu1 %v3797_v1 }
 0x64d   : > { %4058 = vmatmul.bf16.vlgmr.msrb.gmra.mxu2 %v3797_v1  ;;  %4086 = vmatmul.bf16.vlgmr.msrb.gmra.mxu3 %v3797_v1  ;;  %v6073_v1 = vld [vmem:[%s6749_s16 + $0x1c0] sm:$0xff] }
 0x64e   : > { %v3733_v59 = vpop.f32.mrf.mxu3 }
 0x64f   : > { %v3757_v5 = vmul.f32 0.01, %v3733_v59  ;;  %vm3750_vm0 = vcmp.ge.f32.partialorder %v3733_v59, 0.0 }
 0x651   : > { %v3764_v41 = vsel %vm3750_vm0, %v3733_v59, %v3757_v5  ;;  %v6075_v59 = vld [vmem:[%s6749_s16 + $0x1d0] sm:$0xff]  ;;  %v6076_v5 = vld [vmem:[%s6749_s16 + $0x1d8] sm:$0xff] }
 0x656   : > { %v3736_v39 = vpop.f32.mrf.mxu3 }
 0x657   : > { %vm3751_vm11 = vcmp.ge.f32.partialorder %v3736_v39, 0.0  ;;  %v3758_v33 = vmul.f32 0.01, %v3736_v39 }
 0x659   : > { %v3765_v53 = vsel %vm3751_vm11, %v3736_v39, %v3758_v33  ;;  %v6077_v39 = vld [vmem:[%s6749_s16 + $0x1e0] sm:$0xff]  ;;  %v6078_v33 = vld [vmem:[%s6749_s16 + $0x1e8] sm:$0xff] }
 0x65a   : > { %v3798_v0 = vpack.c.bf16 %v3765_v53, %v3764_v41  ;;  %v6079_v41 = vld [vmem:[%s6749_s16 + $0x1f0] sm:$0x1]  ;;  %v6502_v53 = vld [vmem:[#allocation5 + $0x8e4] sm:$0xf] }
 0x65c   : > { %4007 = vmatmul.bf16.gmra.mxu0 %v3798_v0  ;;  %4035 = vmatmul.bf16.gmra.mxu1 %v3798_v0 }
 0x65d   : > { %4063 = vmatmul.bf16.gmra.mxu2 %v3798_v0  ;;  %4091 = vmatmul.bf16.gmra.mxu3 %v3798_v0  ;;  %v6204_v0 = vld [vmem:[#allocation5 + $0x8f0] sm:$0xf0] }
 0x65e   : > { %v3739_v25 = vpop.f32.mrf.mxu3 }
 0x65f   : > { %v3759_v23 = vmul.f32 0.01, %v3739_v25  ;;  %vm3752_vm12 = vcmp.ge.f32.partialorder %v3739_v25, 0.0 }
 0x661   : > { %v3766_v4 = vsel %vm3752_vm12, %v3739_v25, %v3759_v23  ;;  %v6210_v25 = vld [vmem:[#allocation5 + $0x8e8] sm:$0xf]  ;;  %v6207_v23 = vor.u32 %v6502_v53, %v6204_v0  ;;  %v6212_v53 = vld [vmem:[#allocation5 + $0x8f8] sm:$0xf0] }
 0x663   : > { %4508 = vmatpush.bf16.msra.mxu2 %v6207_v23 }
 0x666   : > { %v3742_v12 = vpop.f32.mrf.mxu3 }
 0x667   : > { %vm3753_vm13 = vcmp.ge.f32.partialorder %v3742_v12, 0.0  ;;  %v3760_v45 = vmul.f32 0.01, %v3742_v12 }
 0x669   : > { %v3767_v26 = vsel %vm3753_vm13, %v3742_v12, %v3760_v45  ;;  %v6505_v12 = vld [vmem:[#allocation5 + $0x8f4] sm:$0xf0]  ;;  %v6202_v45 = vld [vmem:[#allocation5 + $0x8e0] sm:$0xf] }
 0x66a   : > { %v3799_v15 = vpack.c.bf16 %v3767_v26, %v3766_v4  ;;  %v6504_v4 = vld [vmem:[#allocation5 + $0x8ec] sm:$0xf0]  ;;  %v6211_v26 = vor.u32 %v6505_v12, %v6210_v25  ;;  %v1192_v25 = vadd.f32 %v6853_v48, %v6793_v24 }
 0x66c   : > { %4012 = vmatmul.bf16.gmra.mxu0 %v3799_v15  ;;  %4040 = vmatmul.bf16.gmra.mxu1 %v3799_v15 }
 0x66d   : > { %4068 = vmatmul.bf16.gmra.mxu2 %v3799_v15  ;;  %4096 = vmatmul.bf16.gmra.mxu3 %v3799_v15  ;;  %v6203_v15 = vor.u32 %v6504_v4, %v6202_v45  ;;  %v6494_v4 = vld [vmem:[#allocation5 + $0x8a4] sm:$0xf] }
 0x66e   : > { %v3745_v44 = vpop.f32.mrf.mxu3  ;;  %4536 = vmatpush.bf16.msra.mxu3 %v6211_v26  ;;  %v6172_v26 = vld [vmem:[#allocation5 + $0x8b0] sm:$0xf0] }
 0x66f   : > { %v3761_v34 = vmul.f32 0.01, %v3745_v44  ;;  %vm3754_vm14 = vcmp.ge.f32.partialorder %v3745_v44, 0.0  ;;  %4480 = vmatpush.bf16.msrb.mxu1 %v6203_v15  ;;  %v6178_v15 = vld [vmem:[#allocation5 + $0x8a8] sm:$0xf] }
 0x671   : > { %v3768_v49 = vsel %vm3754_vm14, %v3745_v44, %v3761_v34  ;;  %v6498_v44 = vld [vmem:[#allocation5 + $0x8c4] sm:$0xf]  ;;  %v6188_v34 = vld [vmem:[#allocation5 + $0x8d0] sm:$0xf0] }
 0x672   : > { %v3800_v46 = vpack.c.bf16 %v3768_v49, %v3768_v49  ;;  %v6194_v49 = vld [vmem:[#allocation5 + $0x8c8] sm:$0xf] }
 0x67c   : > { %4017 = vmatmul.bf16.gmra.mxu0 %v3800_v46  ;;  %4045 = vmatmul.bf16.gmra.mxu1 %v3800_v46 }
 0x67d   : > { %4073 = vmatmul.bf16.gmra.mxu2 %v3800_v46  ;;  %4101 = vmatmul.bf16.gmra.mxu3 %v3800_v46  ;;  %v6191_v46 = vor.u32 %v6498_v44, %v6188_v34  ;;  %v6175_v44 = vor.u32 %v6494_v4, %v6172_v26  ;;  %v6497_v34 = vld [vmem:[#allocation5 + $0x8b4] sm:$0xf0]  ;;  %v6156_v4 = vld [vmem:[#allocation5 + $0x890] sm:$0xf0] }
 0x67e   : > { %v6179_v48 = vor.u32 %v6497_v34, %v6178_v15  ;;  %v6495_v15 = vld [vmem:[#allocation5 + $0x8ac] sm:$0xf] }
 0x67f   : > { %4509 = vmatpush.bf16.msra.mxu2 %v6191_v46  ;;  %v6196_v46 = vld [vmem:[#allocation5 + $0x8d8] sm:$0xf0] }
 0x683   : > { %4510 = vmatpush.bf16.msra.mxu2 %v6175_v44 }
 0x68c   : > { %6081 = vmatmul.msk.f32.vlgmr.msra.gmra.mxu0 %vm283_vm1, %v6073_v1  ;;  %v6501_v1 = vld [vmem:[#allocation5 + $0x8d4] sm:$0xf0] }
 0x694   : > { %6082 = vmatmul.msk.f32.gmra.mxu0 %vm283_vm1, %v6074_v57  ;;  %v6186_v57 = vld [vmem:[#allocation5 + $0x8c0] sm:$0xf] }
 0x69c   : > { %6083 = vmatmul.msk.f32.gmra.mxu0 %vm283_vm1, %v6075_v59  ;;  %v6500_v59 = vld [vmem:[#allocation5 + $0x8cc] sm:$0xf0] }
 0x6a4   : > { %6084 = vmatmul.msk.f32.gmra.mxu0 %vm283_vm1, %v6076_v5  ;;  %v6195_v5 = vor.u32 %v6501_v1, %v6194_v49  ;;  %v6499_v49 = vld [vmem:[#allocation5 + $0x8cc] sm:$0xf] }
 0x6a5   : > { %v6199_v1 = vor.u32 %v6499_v49, %v6196_v46  ;;  %v6154_v46 = vld [vmem:[#allocation5 + $0x880] sm:$0xf] }
 0x6a6   : > { %4537 = vmatpush.bf16.msra.mxu3 %v6195_v5  ;;  %v1197_v5 = vadd.f32 %v6864_v58, %v6797_v28 }
 0x6aa   : > { %4538 = vmatpush.bf16.msra.mxu3 %v6179_v48 }
 0x6ac   : > { %6085 = vmatmul.msk.f32.gmra.mxu0 %vm283_vm1, %v6077_v39  ;;  %v6187_v39 = vor.u32 %v6500_v59, %v6186_v57  ;;  %v6170_v57 = vld [vmem:[#allocation5 + $0x8a0] sm:$0xf]  ;;  %v6496_v59 = vld [vmem:[#allocation5 + $0x8ac] sm:$0xf0] }
 0x6ae   : > { %4481 = vmatpush.bf16.msrb.mxu1 %v6187_v39 }
 0x6b4   : > { %6086 = vmatmul.msk.f32.gmra.mxu0 %vm283_vm1, %v6078_v33  ;;  %v6503_v33 = vld [vmem:[#allocation5 + $0x8ec] sm:$0xf] }
 0x6b5   : > { %v6215_v0 = vor.u32 %v6503_v33, %v6212_v53 }
 0x6b7   : > { %4564 = vmatpush.bf16.msrb.mxu0 %v6215_v0 }
 0x6bb   : > { %4565 = vmatpush.bf16.msrb.mxu0 %v6199_v1 }
 0x6bc   : > { %6087 = vmatmul.msk.f32.gmra.mxu0 %vm283_vm1, %v6079_v41  ;;  %v1678_v41 = vadd.f32 %v6928_v16, %v1192_v25  ;;  %v6171_v16 = vor.u32 %v6496_v59, %v6170_v57 }
 0x6be   : > { %v2164_v23 = vadd.f32 %v7005_v7, %v1678_v41  ;;  %v1196_v7 = vadd.f32 %v6862_v56, %v6801_v38  ;;  %4482 = vmatpush.bf16.msrb.mxu1 %v6171_v16 }
 0x6c0   : > { %v2650_v24 = vadd.f32 %v7081_v54, %v2164_v23  ;;  %v1682_v33 = vadd.f32 %v6938_v17, %v1196_v7  ;;  %v1683_v54 = vadd.f32 %v6943_v35, %v1197_v5  ;;  %v6490_v23 = vld [vmem:[#allocation5 + $0x884] sm:$0xf]  ;;  %v6162_v17 = vld [vmem:[#allocation5 + $0x888] sm:$0xf] }
 0x6c1   : > { %v6159_v26 = vor.u32 %v6490_v23, %v6156_v4 }
 0x6c2   : > { %v3136_v39 = vadd.f32 %v7149_v61, %v2650_v24  ;;  %v2168_v41 = vadd.f32 %v7016_v21, %v1682_v33  ;;  %v2169_v38 = vadd.f32 %v7018_v47, %v1683_v54  ;;  %v6493_v21 = vld [vmem:[#allocation5 + $0x894] sm:$0xf0]  ;;  %v6180_v47 = vld [vmem:[#allocation5 + $0x8b8] sm:$0xf0]  ;;  %v6492_v24 = vld [vmem:[#allocation5 + $0x88c] sm:$0xf0] }
 0x6c3   : > { %v6163_v34 = vor.u32 %v6493_v21, %v6162_v17  ;;  %v6183_v49 = vor.u32 %v6495_v15, %v6180_v47  ;;  %4511 = vmatpush.bf16.msra.mxu2 %v6159_v26  ;;  %v6155_v48 = vor.u32 %v6492_v24, %v6154_v46  ;;  %v6146_v33 = vld [vmem:[#allocation5 + $0x868] sm:$0xf]  ;;  %v6489_v54 = vld [vmem:[#allocation5 + $0x874] sm:$0xf0]  ;;  %v6482_v46 = vld [vmem:[#allocation5 + $0x844] sm:$0xf] }
 0x6c4   : > { %v3622_v53 = vadd.f32 %v7224_v27, %v3136_v39  ;;  %v2655_v44 = vadd.f32 %v7086_v20, %v2169_v38  ;;  %v6140_v39 = vld [vmem:[#allocation5 + $0x870] sm:$0xf0]  ;;  %v6138_v38 = vld [vmem:[#allocation5 + $0x860] sm:$0xf]  ;;  %v6130_v24 = vld [vmem:[#allocation5 + $0x848] sm:$0xf] }
 0x6c5   : > { %4539 = vmatpush.bf16.msra.mxu3 %v6163_v34  ;;  %4566 = vmatpush.bf16.msrb.mxu0 %v6183_v49  ;;  %v7634_v49 = vld [vmem:[#allocation51_spill] sm:$0xff] }
 0x6c6   : > { %v3141_v1 = vadd.f32 %v7160_v37, %v2655_v44  ;;  %4483 = vmatpush.bf16.msrb.mxu1 %v6155_v48  ;;  %v6486_v37 = vld [vmem:[#allocation5 + $0x864] sm:$0xf]  ;;  %v7635_v48 = vld [vmem:[#allocation16_spill] sm:$0xff] }
 0x6c8   : > { %v3627_v57 = vadd.f32 %v7239_v18, %v3141_v1  ;;  %v6147_v18 = vor.u32 %v6489_v54, %v6146_v33  ;;  %v7637_v1 = vld [vmem:[#allocation61_spill] sm:$0xff]  ;;  %v6484_v54 = vld [vmem:[#allocation5 + $0x84c] sm:$0xf0] }
 0x6c9   : > { %v7298_v12 = vpop.f32.mrf.mxu0  ;;  %v7300_v45 = vpop.f32.mrf.mxu1 }
 0x6ca   : > { %4540 = vmatpush.bf16.msra.mxu3 %v6147_v18 }
 0x6d0   : > { %v4059_v0 = vpop.f32.mrf.mxu2  ;;  %v4087_v25 = vpop.f32.mrf.mxu3 }
 0x6d1   : > { %v7313_v56 = vadd.f32 %v4059_v0, %v3622_v53  ;;  %v7316_v28 = vadd.f32 %v4087_v25, %v7229_v13  ;;  %v4005_v58 = vpop.f32.mrf.mxu0  ;;  %v4033_v61 = vpop.f32.mrf.mxu1  ;;  %v2654_v13 = vadd.f32 %v7091_v10, %v2168_v41  ;;  %v1205_v53 = vadd.f32 %v6883_v42, %v6813_v3  ;;  %v6491_v25 = vld [vmem:[#allocation5 + $0x88c] sm:$0xf]  ;;  %v6164_v41 = vld [vmem:[#allocation5 + $0x898] sm:$0xf0] }
 0x6d2   : > { %v7319_v35 = vadd.f32 %v4005_v58, %v7237_v2  ;;  %v7322_v27 = vadd.f32 %v4033_v61, %v7232_v11  ;;  %v1200_v2 = vadd.f32 %v6872_v9, %v6809_v62  ;;  %v6167_v58 = vor.u32 %v6491_v25, %v6164_v41  ;;  %v6488_v61 = vld [vmem:[#allocation5 + $0x86c] sm:$0xf0] }
 0x6d3   : > { %v3140_v11 = vadd.f32 %v7158_v8, %v2654_v13  ;;  %v6139_v17 = vor.u32 %v6488_v61, %v6138_v38  ;;  %v7633_v13 = vld [vmem:[#allocation50_spill] sm:$0xff] }
 0x6d4   : > { %v1686_v20 = vadd.f32 %v6947_v50, %v1200_v2  ;;  %v6143_v50 = vor.u32 %v6486_v37, %v6140_v39  ;;  %4567 = vmatpush.bf16.msrb.mxu0 %v6167_v58  ;;  %v7636_v2 = vld [vmem:[#allocation23_spill] sm:$0xff]  ;;  %v6148_v37 = vld [vmem:[#allocation5 + $0x878] sm:$0xf0]  ;;  %v6478_v61 = vld [vmem:[#allocation5 + $0x824] sm:$0xf] }
 0x6d5   : > { %v3626_v10 = vadd.f32 %v7234_v19, %v3140_v11  ;;  %4484 = vmatpush.bf16.msrb.mxu1 %v6139_v17  ;;  %v1208_v11 = vadd.f32 %v7636_v2, %v7635_v48  ;;  %v7645_v48 = vld [vmem:[#allocation26_spill] sm:$0xff] }
 0x6d6   : > { %v2172_v7 = vadd.f32 %v7024_v60, %v1686_v20  ;;  %4512 = vmatpush.bf16.msra.mxu2 %v6143_v50  ;;  %v1204_v60 = vadd.f32 %v6881_v40, %v6817_v30  ;;  %v6122_v50 = vld [vmem:[#allocation5 + $0x840] sm:$0xf] }
 0x6d7   : > { %v6123_v41 = vor.u32 %v6484_v54, %v6122_v50  ;;  %v6479_v50 = vld [vmem:[#allocation5 + $0x82c] sm:$0xf]  ;;  %v6116_v54 = vld [vmem:[#allocation5 + $0x838] sm:$0xf0] }
 0x6d8   : > { %v4061_v59 = vpop.f32.mrf.mxu2  ;;  %v4089_v16 = vpop.f32.mrf.mxu3  ;;  %v2658_v19 = vadd.f32 %v7100_v52, %v2172_v7  ;;  %v1690_v23 = vadd.f32 %v6957_v14, %v1204_v60  ;;  %v1691_v52 = vadd.f32 %v6962_v43, %v1205_v53  ;;  %v7631_v14 = vld [vmem:[#allocation75_spill] sm:$0xff]  ;;  %v7640_v60 = vld [vmem:[#allocation74_spill] sm:$0xff] }
 0x6d9   : > { %v7334_v5 = vadd.f32 %v4061_v59, %v3626_v10  ;;  %v7336_v62 = vadd.f32 %v4089_v16, %v3627_v57  ;;  %v7338_v9 = vpop.f32.mrf.mxu0  ;;  %v7340_v8 = vpop.f32.mrf.mxu1  ;;  %v7638_v10 = vld [vmem:[#allocation62_spill] sm:$0xff]  ;;  %v6485_v16 = vld [vmem:[#allocation5 + $0x854] sm:$0xf0]  ;;  %v6487_v7 = vld [vmem:[#allocation5 + $0x86c] sm:$0xf]  ;;  %4485 = vmatpush.bf16.msrb.mxu1 %v6123_v41 }
 0x6da   : > { %v3144_v0 = vadd.f32 %v7168_v22, %v2658_v19  ;;  %v2176_v3 = vadd.f32 %v7035_v51, %v1690_v23  ;;  %v2177_v40 = vadd.f32 %v7037_v63, %v1691_v52  ;;  %v7630_v22 = vld [vmem:[#allocation72_spill] sm:$0xff]  ;;  %v6131_v39 = vor.u32 %v6485_v16, %v6130_v24  ;;  %v7639_v19 = vld [vmem:[#allocation33_spill] sm:$0xff]  ;;  %v6114_v52 = vld [vmem:[#allocation5 + $0x828] sm:$0xf] }
 0x6db   : > { %v6124_v63 = vld [vmem:[#allocation5 + $0x850] sm:$0xf0]  ;;  %v6151_v33 = vor.u32 %v6487_v7, %v6148_v37  ;;  %v1694_v18 = vadd.f32 %v7639_v19, %v1208_v11  ;;  %v7644_v24 = vld [vmem:[#allocation18_spill] sm:$0xff]  ;;  %v7646_v11 = vld [vmem:[#allocation17_spill] sm:$0xff] }
 0x6dc   : > { %v3630_v4 = vadd.f32 %v7243_v29, %v3144_v0  ;;  %v7632_v29 = vld [vmem:[#allocation73_spill] sm:$0xff]  ;;  %v2663_v34 = vadd.f32 %v7633_v13, %v2177_v40  ;;  %v2662_v51 = vadd.f32 %v7634_v49, %v2176_v3  ;;  %v6127_v59 = vor.u32 %v6482_v46, %v6124_v63  ;;  %v7641_v0 = vld [vmem:[#allocation76_spill] sm:$0xff]  ;;  %4541 = vmatpush.bf16.msra.mxu3 %v6131_v39  ;;  %v6480_v46 = vld [vmem:[#allocation5 + $0x82c] sm:$0xf0] }
 0x6dd   : > { %4568 = vmatpush.bf16.msrb.mxu0 %v6151_v33  ;;  %v6108_v23 = vld [vmem:[#allocation5 + $0x830] sm:$0xf0]  ;;  %v6474_v63 = vld [vmem:[#allocation5 + $0x804] sm:$0xf]  ;;  %v1212_v2 = vadd.f32 %v7645_v48, %v7644_v24  ;;  %v6098_v7 = vld [vmem:[#allocation5 + $0x808] sm:$0xf] }
 0x6de   : > { %v3148_v20 = vadd.f32 %v7637_v1, %v2662_v51  ;;  %v3149_v57 = vadd.f32 %v7638_v10, %v2663_v34  ;;  %4513 = vmatpush.bf16.msra.mxu2 %v6127_v59  ;;  %v7643_v34 = vld [vmem:[#allocation54_spill] sm:$0xff]  ;;  %v6106_v51 = vld [vmem:[#allocation5 + $0x820] sm:$0xf]  ;;  %v7647_v1 = vld [vmem:[#allocation27_spill] sm:$0xff] }
 0x6df   : > { %v7648_v10 = vld [vmem:[#allocation63_spill] sm:$0xff]  ;;  %v6107_v59 = vor.u32 %v6480_v46, %v6106_v51  ;;  %v6092_v16 = vld [vmem:[#allocation5 + $0x810] sm:$0xf0]  ;;  %v6477_v37 = vld [vmem:[#allocation5 + $0x814] sm:$0xf0] }
 0x6e0   : > { %v4064_v26 = vpop.f32.mrf.mxu2  ;;  %v4092_v30 = vpop.f32.mrf.mxu3  ;;  %v3634_v53 = vadd.f32 %v7640_v60, %v3148_v20  ;;  %v3635_v25 = vadd.f32 %v7641_v0, %v3149_v57  ;;  %v1213_v20 = vadd.f32 %v7647_v1, %v7646_v11  ;;  %v6095_v39 = vor.u32 %v6474_v63, %v6092_v16  ;;  %v7649_v19 = vld [vmem:[#allocation35_spill] sm:$0xff]  ;;  %v7650_v60 = vld [vmem:[#allocation36_spill] sm:$0xff]  ;;  %v6100_v24 = vld [vmem:[#allocation5 + $0x818] sm:$0xf0] }
 0x6e1   : > { %v7353_v42 = vadd.f32 %v4064_v26, %v3630_v4  ;;  %v7356_v21 = vadd.f32 %v4092_v30, %v7630_v22  ;;  %v4010_v15 = vpop.f32.mrf.mxu0  ;;  %v4038_v47 = vpop.f32.mrf.mxu1  ;;  %v7642_v4 = vld [vmem:[#allocation43_spill] sm:$0xff]  ;;  %v6111_v22 = vor.u32 %v6478_v61, %v6108_v23  ;;  %v6099_v33 = vor.u32 %v6477_v37, %v6098_v7  ;;  %4486 = vmatpush.bf16.msrb.mxu1 %v6107_v59  ;;  %v7652_v23 = vld [vmem:[#allocation45_spill] sm:$0xff] }
 0x6e2   : > { %v7359_v43 = vadd.f32 %v4010_v15, %v7631_v14  ;;  %v7362_v44 = vadd.f32 %v4038_v47, %v7632_v29  ;;  %v2180_v17 = vadd.f32 %v7642_v4, %v1694_v18  ;;  %v6481_v15 = vld [vmem:[#allocation5 + $0x834] sm:$0xf0]  ;;  %v6483_v47 = vld [vmem:[#allocation5 + $0x84c] sm:$0xf]  ;;  %v6132_v14 = vld [vmem:[#allocation5 + $0x858] sm:$0xf0]  ;;  %v1698_v18 = vadd.f32 %v7649_v19, %v1212_v2 }
 0x6e3   : > { %v6115_v29 = vor.u32 %v6481_v15, %v6114_v52  ;;  %v6135_v13 = vor.u32 %v6483_v47, %v6132_v14  ;;  %4514 = vmatpush.bf16.msra.mxu2 %v6111_v22  ;;  %v7653_v14 = vld [vmem:[#allocation55_spill] sm:$0xff]  ;;  %v3795_v19 = vld [vmem:[#allocation2 + $0xc8] sm:$0x1] }
 0x6e4   : > { %v2666_v49 = vadd.f32 %v7643_v34, %v2180_v17  ;;  %v6476_v51 = vld [vmem:[#allocation5 + $0x80c] sm:$0xf0]  ;;  %v6475_v46 = vld [vmem:[#allocation5 + $0x80c] sm:$0xf] }
 0x6e5   : > { %4542 = vmatpush.bf16.msra.mxu3 %v6115_v29  ;;  %4569 = vmatpush.bf16.msrb.mxu0 %v6135_v13  ;;  %v7654_v13 = vld [vmem:[#allocation56_spill] sm:$0xff]  ;;  %v7656_v2 = vld [vmem:[#allocation67_spill] sm:$0xff]  ;;  %v6103_v1 = vor.u32 %v6475_v46, %v6100_v24 }
 0x6e6   : > { %v3152_v57 = vadd.f32 %v7648_v10, %v2666_v49  ;;  %v6090_v49 = vld [vmem:[#allocation5 + $0x800] sm:$0xf]  ;;  %v3793_v7 = vld [vmem:[#allocation2 + $0x20] sm:$0x1] }
 0x6e7   : > { %4515 = vmatpush.bf16.msra.mxu2 %v6095_v39  ;;  %v6091_v63 = vor.u32 %v6476_v51, %v6090_v49  ;;  %v3794_v39 = vld [vmem:[#allocation2 + $0x10] sm:$0x1] }
 0x6e8   : > { %v4066_v38 = vpop.f32.mrf.mxu2  ;;  %v4094_v58 = vpop.f32.mrf.mxu3  ;;  %v3638_v0 = vadd.f32 %v7262_v31, %v3152_v57 }
 0x6e9   : > { %v7374_v26 = vadd.f32 %v4066_v38, %v3634_v53  ;;  %v7376_v30 = vadd.f32 %v4094_v58, %v3635_v25  ;;  %v7378_v3 = vpop.f32.mrf.mxu0  ;;  %v7380_v40 = vpop.f32.mrf.mxu1  ;;  %v1699_v53 = vadd.f32 %v7650_v60, %v1213_v20  ;;  %v6119_v25 = vor.u32 %v6479_v50, %v6116_v54  ;;  %4543 = vmatpush.bf16.msra.mxu3 %v6099_v33  ;;  %v7651_v58 = vld [vmem:[#allocation44_spill] sm:$0xff]  ;;  %v3796_v60 = vld [vmem:[#allocation2 + $0x70] sm:$0x1] }
 0x6ea   : > { %v2184_v61 = vadd.f32 %v7651_v58, %v1698_v18  ;;  %4487 = vmatpush.bf16.msrb.mxu1 %v6091_v63 }
 0x6eb   : > { %v2185_v52 = vadd.f32 %v7652_v23, %v1699_v53  ;;  %4570 = vmatpush.bf16.msrb.mxu0 %v6119_v25 }
 0x6ec   : > { %v2670_v34 = vadd.f32 %v7654_v13, %v2184_v61 }
 0x6ed   : > { %v2671_v29 = vadd.f32 %v7653_v14, %v2185_v52 }
 0x6ef   : > { %v3157_v11 = vadd.f32 %v7656_v2, %v2671_v29  ;;  %4571 = vmatpush.bf16.msrb.mxu0 %v6103_v1 }
 0x6f0   : > { %v4069_v41 = vpop.f32.mrf.mxu2  ;;  %v4097_v38 = vpop.f32.mrf.mxu3 }
 0x6f1   : > { %v7393_v4 = vadd.f32 %v4069_v41, %v3638_v0  ;;  %v7396_v17 = vadd.f32 %v4097_v38, %v7267_v32  ;;  %v4015_v22 = vpop.f32.mrf.mxu0  ;;  %v4043_v15 = vpop.f32.mrf.mxu1  ;;  %v7655_v32 = vld [vmem:[#allocation66_spill] sm:$0xff] }
 0x6f2   : > { %v7399_v31 = vadd.f32 %v4015_v22, %v7275_v55  ;;  %v7402_v47 = vadd.f32 %v4043_v15, %v7270_v36  ;;  %v3156_v48 = vadd.f32 %v7655_v32, %v2670_v34  ;;  %v7657_v55 = vld [vmem:[#allocation79_spill] sm:$0xff]  ;;  %v3643_v36 = vadd.f32 %v7277_v6, %v3157_v11 }
 0x6f4   : > { %v3642_v20 = vadd.f32 %v7657_v55, %v3156_v48 }
 0x6f8   : > { %v4071_v10 = vpop.f32.mrf.mxu2  ;;  %v4099_v57 = vpop.f32.mrf.mxu3 }
 0x6f9   : > { %v7410_v59 = vadd.f32 %v4071_v10, %v3642_v20  ;;  %v7412_v16 = vadd.f32 %v4099_v57, %v3643_v36  ;;  %v4018_v37 = vpop.f32.mrf.mxu0  ;;  %v4046_v33 = vpop.f32.mrf.mxu1 }
 0x6fa   : > { %v4130_v50 = vadd.f32 %v4018_v37, %v3793_v7  ;;  %v4131_v54 = vadd.f32 %v4046_v33, %v3794_v39  ;;  %v7658_v37 = vld [vmem:[#allocation10_spill] sm:$0xff]  ;;  %v7659_v39 = vld [vmem:[#allocation19_spill] sm:$0xff] }
 0x6fb   : > { %v1190_v33 = vadd.f32 %v7659_v39, %v7658_v37  ;;  %v7675_v39 = vld [vmem:[#allocation13_spill] sm:$0xff] }
 0x6fc   : > { %4158 = vst [vmem:[#allocation2 + $0x20] sm:$0x1] %v4130_v50  ;;  %v7660_v50 = vld [vmem:[#allocation29_spill] sm:$0xff] }
 0x6fd   : > { %4159 = vst [vmem:[#allocation2 + $0x10] sm:$0x1] %v4131_v54  ;;  %v1676_v54 = vadd.f32 %v7660_v50, %v1190_v33  ;;  %v7676_v33 = vld [vmem:[#allocation22_spill] sm:$0xff] }
 0x6fe   : > { %v1199_v50 = vadd.f32 %v7676_v33, %v7675_v39 }
 0x700   : > { %v4074_v18 = vpop.f32.mrf.mxu2  ;;  %v4102_v53 = vpop.f32.mrf.mxu3 }
 0x701   : > { %v4132_v6 = vadd.f32 %v4074_v18, %v3795_v19  ;;  %v4133_v0 = vadd.f32 %v4102_v53, %v3796_v60  ;;  %v4020_v25 = vpop.f32.mrf.mxu0  ;;  %v4048_v41 = vpop.f32.mrf.mxu1  ;;  %v7661_v19 = vld [vmem:[#allocation37_spill] sm:$0xff]  ;;  %v7662_v60 = vld [vmem:[#allocation11_spill] sm:$0xff]  ;;  %v7663_v53 = vld [vmem:[#allocation20_spill] sm:$0xff] }
 0x702   : > { %v2162_v18 = vadd.f32 %v7661_v19, %v1676_v54  ;;  %v7665_v41 = vld [vmem:[#allocation28_spill] sm:$0xff] }
 0x703   : > { %4160 = vst [vmem:[#allocation2 + $0xc8] sm:$0x1] %v4132_v6  ;;  %v1191_v6 = vadd.f32 %v7663_v53, %v7662_v60 }
 0x704   : > { %4161 = vst [vmem:[#allocation2 + $0x70] sm:$0x1] %v4133_v0  ;;  %v7664_v0 = vld [vmem:[#allocation46_spill] sm:$0xff] }
 0x705   : > { %v2648_v25 = vadd.f32 %v7664_v0, %v2162_v18  ;;  %v7677_v18 = vld [vmem:[#allocation39_spill] sm:$0xff]  ;;  %v7678_v0 = vld [vmem:[#allocation30_spill] sm:$0xff] }
 0x708   : > { %v4076_v38 = vpop.f32.mrf.mxu2  ;;  %v4104_v58 = vpop.f32.mrf.mxu3 }
 0x709   : > { %v4213_v61 = vpop.f32.mrf.mxu0  ;;  %v1677_v38 = vadd.f32 %v7665_v41, %v1191_v6  ;;  %v7666_v58 = vld [vmem:[#allocation57_spill] sm:$0xff] }
 0x70a   : > { %v4241_v23 = vmul.f32 0.01, %v4213_v61  ;;  %vm4234_vm1 = vcmp.ge.f32.partialorder %v4213_v61, 0.0 }
 0x70c   : > { %v4248_v15 = vsel %vm4234_vm1, %v4213_v61, %v4241_v23  ;;  %v3134_v61 = vadd.f32 %v7666_v58, %v2648_v25  ;;  %v7667_v23 = vld [vmem:[#allocation38_spill] sm:$0xff]  ;;  %v1685_v25 = vadd.f32 %v7678_v0, %v1199_v50 }
 0x70d   : > { %v7684_v50 = vld [vmem:[#allocation14_spill] sm:$0xff] }
 0x711   : > { %v4216_v52 = vpop.f32.mrf.mxu0 }
 0x712   : > { %vm4235_vm15 = vcmp.ge.f32.partialorder %v4216_v52, 0.0  ;;  %v4242_v22 = vmul.f32 0.01, %v4216_v52 }
 0x714   : > { %v4249_v14 = vsel %vm4235_vm15, %v4216_v52, %v4242_v22  ;;  %v2163_v52 = vadd.f32 %v7667_v23, %v1677_v38  ;;  %v7668_v22 = vld [vmem:[#allocation69_spill] sm:$0xff]  ;;  %v7679_v38 = vld [vmem:[#allocation48_spill] sm:$0xff] }
 0x715   : > { %v4283_v29 = vpack.c.bf16 %v4249_v14, %v4248_v15  ;;  %v3620_v15 = vadd.f32 %v7668_v22, %v3134_v61  ;;  %v4676_v14 = vld [vmem:[#allocation7] sm:$0xf] }
 0x716   : > { %v7439_v37 = vperm.slane %v4676_v14, 1  ;;  %v7444_v19 = vperm.slane %v4676_v14, 2 }
 0x717   : > { %4488 = vmatmul.bf16.vlgmr.msrb.gmra.mxu1 %v4283_v29  ;;  %4516 = vmatmul.bf16.vlgmr.msra.gmra.mxu2 %v4283_v29 }
 0x718   : > { %4544 = vmatmul.bf16.vlgmr.msra.gmra.mxu3 %v4283_v29  ;;  %4572 = vmatmul.bf16.vlgmr.msrb.gmra.mxu0 %v4283_v29  ;;  %v7669_v29 = vld [vmem:[#allocation47_spill] sm:$0xff] }
 0x719   : > { %v4219_v13 = vpop.f32.mrf.mxu0 }
 0x71a   : > { %v4243_v34 = vmul.f32 0.01, %v4219_v13  ;;  %vm4236_vm2 = vcmp.ge.f32.partialorder %v4219_v13, 0.0 }
 0x71c   : > { %v4250_v46 = vsel %vm4236_vm2, %v4219_v13, %v4243_v34  ;;  %v2649_v13 = vadd.f32 %v7669_v29, %v2163_v52  ;;  %v4106_v34 = vadd.f32 %v7298_v12, %v3620_v15 }
 0x721   : > { %v4222_v49 = vpop.f32.mrf.mxu0 }
 0x722   : > { %vm4237_vm3 = vcmp.ge.f32.partialorder %v4222_v49, 0.0  ;;  %v4244_v51 = vmul.f32 0.01, %v4222_v49 }
 0x724   : > { %v4251_v63 = vsel %vm4237_vm3, %v4222_v49, %v4244_v51  ;;  %v7670_v51 = vld [vmem:[#allocation58_spill] sm:$0xff] }
 0x725   : > { %v4284_v24 = vpack.c.bf16 %v4251_v63, %v4250_v46  ;;  %v3135_v46 = vadd.f32 %v7670_v51, %v2649_v13  ;;  %v7680_v13 = vld [vmem:[#allocation59_spill] sm:$0xff] }
 0x727   : > { %4493 = vmatmul.bf16.gmra.mxu1 %v4284_v24  ;;  %4521 = vmatmul.bf16.gmra.mxu2 %v4284_v24 }
 0x728   : > { %4549 = vmatmul.bf16.gmra.mxu3 %v4284_v24  ;;  %4577 = vmatmul.bf16.gmra.mxu0 %v4284_v24  ;;  %v7428_v24 = vperm.slane %v4676_v14, 0 }
 0x729   : > { %v4225_v32 = vpop.f32.mrf.mxu0 }
 0x72a   : > { %v4245_v48 = vmul.f32 0.01, %v4225_v32  ;;  %vm4238_vm4 = vcmp.ge.f32.partialorder %v4225_v32, 0.0 }
 0x72c   : > { %v4252_v1 = vsel %vm4238_vm4, %v4225_v32, %v4245_v48 }
 0x731   : > { %v4228_v2 = vpop.f32.mrf.mxu0 }
 0x732   : > { %vm4239_vm5 = vcmp.ge.f32.partialorder %v4228_v2, 0.0  ;;  %v4246_v11 = vmul.f32 0.01, %v4228_v2 }
 0x734   : > { %v4253_v55 = vsel %vm4239_vm5, %v4228_v2, %v4246_v11  ;;  %v7431_v2 = vperm.slane %v4676_v14, 3  ;;  %v7671_v11 = vld [vmem:[#allocation12_spill] sm:$0xff] }
 0x735   : > { %v4285_v20 = vpack.c.bf16 %v4253_v55, %v4252_v1  ;;  %v7672_v1 = vld [vmem:[#allocation21_spill] sm:$0xff] }
 0x736   : > { %v1198_v55 = vadd.f32 %v7672_v1, %v7671_v11 }
 0x737   : > { %4498 = vmatmul.bf16.gmra.mxu1 %v4285_v20  ;;  %4526 = vmatmul.bf16.gmra.mxu2 %v4285_v20 }
 0x738   : > { %4554 = vmatmul.bf16.gmra.mxu3 %v4285_v20  ;;  %4582 = vmatmul.bf16.gmra.mxu0 %v4285_v20  ;;  %v7673_v20 = vld [vmem:[#allocation68_spill] sm:$0xff] }
 0x739   : > { %v4231_v36 = vpop.f32.mrf.mxu0 }
 0x73a   : > { %v4247_v10 = vmul.f32 0.01, %v4231_v36  ;;  %vm4240_vm6 = vcmp.ge.f32.partialorder %v4231_v36, 0.0 }
 0x73c   : > { %v4254_v57 = vsel %vm4240_vm6, %v4231_v36, %v4247_v10  ;;  %v3621_v36 = vadd.f32 %v7673_v20, %v3135_v46  ;;  %v7674_v10 = vld [vmem:[#allocation31_spill] sm:$0xff] }
 0x73d   : > { %v4286_v7 = vpack.c.bf16 %v4254_v57, %v4254_v57  ;;  %v1684_v57 = vadd.f32 %v7674_v10, %v1198_v55  ;;  %v7683_v10 = vld [vmem:[#allocation49_spill] sm:$0xff] }
 0x73e   : > { %v4107_v12 = vadd.f32 %v7300_v45, %v3621_v36 }
 0x73f   : > { %v2170_v60 = vadd.f32 %v7677_v18, %v1684_v57 }
 0x741   : > { %v2656_v58 = vadd.f32 %v7679_v38, %v2170_v60 }
 0x747   : > { %4503 = vmatmul.bf16.gmra.mxu1 %v4286_v7  ;;  %4531 = vmatmul.bf16.gmra.mxu2 %v4286_v7 }
 0x748   : > { %4559 = vmatmul.bf16.gmra.mxu3 %v4286_v7  ;;  %4587 = vmatmul.bf16.gmra.mxu0 %v4286_v7 }
 0x794   : > { %v4489_v49 = vpop.f32.mrf.mxu1 }
 0x795   : > { %v4592_v63 = vadd.f32 %v4489_v49, %v4106_v34  ;;  %v4573_v32 = vpop.f32.mrf.mxu0  ;;  %v3142_v34 = vadd.f32 %v7680_v13, %v2656_v58  ;;  %v7681_v49 = vld [vmem:[#allocation40_spill] sm:$0xff]  ;;  %v7687_v58 = vld [vmem:[#allocation70_spill] sm:$0xff] }
 0x796   : > { %v4595_v48 = vadd.f32 %v4573_v32, %v7316_v28  ;;  %v2171_v51 = vadd.f32 %v7681_v49, %v1685_v25 }
 0x797   : > { %v4686_v7 = vadd.f32 %v7428_v24, %v4592_v63  ;;  %v7682_v63 = vld [vmem:[#allocation71_spill] sm:$0xff] }
 0x798   : > { %v4689_v28 = vadd.f32 %v7431_v2, %v4595_v48  ;;  %v3628_v32 = vadd.f32 %v7682_v63, %v3142_v34  ;;  %v2657_v57 = vadd.f32 %v7683_v10, %v2171_v51 }
 0x799   : > { %v4742_v61 = vmul.f32 0.01, %v4686_v7  ;;  %vm4714_vm7 = vcmp.ge.f32.partialorder %v4686_v7, 0.0 }
 0x79a   : > { %v4517_v54 = vpop.f32.mrf.mxu2  ;;  %v4745_v15 = vmul.f32 0.01, %v4689_v28  ;;  %vm4717_vm8 = vcmp.ge.f32.partialorder %v4689_v28, 0.0 }
 0x79b   : > { %v4593_v53 = vadd.f32 %v4517_v54, %v4107_v12  ;;  %v4545_v6 = vpop.f32.mrf.mxu3  ;;  %v4770_v48 = vsel %vm4714_vm7, %v4686_v7, %v4742_v61  ;;  %v4114_v12 = vadd.f32 %v7338_v9, %v3628_v32  ;;  %v7685_v54 = vld [vmem:[#allocation24_spill] sm:$0xff] }
 0x79c   : > { %v4594_v45 = vadd.f32 %v4545_v6, %v7313_v56  ;;  %v4491_v41 = vpop.f32.mrf.mxu1  ;;  %v4773_v11 = vsel %vm4717_vm8, %v4689_v28, %v4745_v15  ;;  %v1206_v18 = vadd.f32 %v7685_v54, %v7684_v50  ;;  %v7690_v15 = vld [vmem:[#allocation34_spill] sm:$0xff] }
 0x79d   : > { %v4687_v23 = vadd.f32 %v7439_v37, %v4593_v53  ;;  %v4596_v52 = vadd.f32 %v4491_v41, %v7319_v35  ;;  %v4575_v22 = vpop.f32.mrf.mxu0  ;;  %v7686_v53 = vld [vmem:[#allocation60_spill] sm:$0xff] }
 0x79e   : > { %v4688_v14 = vadd.f32 %v7444_v19, %v4594_v45  ;;  %v4599_v29 = vadd.f32 %v4575_v22, %v7336_v62  ;;  %v3143_v6 = vadd.f32 %v7686_v53, %v2657_v57  ;;  %v7693_v57 = vld [vmem:[#allocation52_spill] sm:$0xff]  ;;  %v7695_v53 = vld [vmem:[#allocation42_spill] sm:$0xff] }
 0x79f   : > { %vm4715_vm9 = vcmp.ge.f32.partialorder %v4687_v23, 0.0  ;;  %v4743_v56 = vmul.f32 0.01, %v4687_v23  ;;  %v4690_v62 = vadd.f32 %v7428_v24, %v4596_v52  ;;  %v7689_v52 = vld [vmem:[#allocation25_spill] sm:$0xff] }
 0x7a0   : > { %vm4716_vm10 = vcmp.ge.f32.partialorder %v4688_v14, 0.0  ;;  %v4744_v46 = vmul.f32 0.01, %v4688_v14  ;;  %v4693_v20 = vadd.f32 %v7431_v2, %v4599_v29  ;;  %v3629_v61 = vadd.f32 %v7687_v58, %v3143_v6 }
 0x7a1   : > { %v4771_v35 = vsel %vm4715_vm9, %v4687_v23, %v4743_v56  ;;  %v4746_v0 = vmul.f32 0.01, %v4690_v62  ;;  %vm4718_vm0 = vcmp.ge.f32.partialorder %v4690_v62, 0.0  ;;  %v7688_v23 = vld [vmem:[#allocation15_spill] sm:$0xff] }
 0x7a2   : > { %v4798_v1 = vpack.c.bf16 %v4771_v35, %v4770_v48  ;;  %v4772_v55 = vsel %vm4716_vm10, %v4688_v14, %v4744_v46  ;;  %v4519_v36 = vpop.f32.mrf.mxu2  ;;  %v4749_v9 = vmul.f32 0.01, %v4693_v20  ;;  %vm4721_vm11 = vcmp.ge.f32.partialorder %v4693_v20, 0.0  ;;  %v7691_v48 = vld [vmem:[#allocation41_spill] sm:$0xff] }
 0x7a3   : > { %v4799_v7 = vpack.c.bf16 %v4773_v11, %v4772_v55  ;;  %v4597_v39 = vadd.f32 %v4519_v36, %v7322_v27  ;;  %v4547_v33 = vpop.f32.mrf.mxu3  ;;  %v1207_v22 = vadd.f32 %v7689_v52, %v7688_v23  ;;  %v1692_v14 = vadd.f32 %v7690_v15, %v1206_v18  ;;  %v7692_v36 = vld [vmem:[#allocation32_spill] sm:$0xff] }
 0x7a4   : > { %4812 = vst [vmem:[%s7461_s20] sm:$0xff] %v4798_v1  ;;  %v4598_v60 = vadd.f32 %v4547_v33, %v7334_v5  ;;  %v4494_v28 = vpop.f32.mrf.mxu1  ;;  %v4115_v13 = vadd.f32 %v7340_v8, %v3629_v61  ;;  %v4774_v34 = vsel %vm4718_vm0, %v4690_v62, %v4746_v0  ;;  %v4777_v49 = vsel %vm4721_vm11, %v4693_v20, %v4749_v9 }
 0x7a5   : > { %4813 = vst [vmem:[%s7461_s20 + $0x8] sm:$0xff] %v4799_v7  ;;  %v4691_v25 = vadd.f32 %v7439_v37, %v4597_v39  ;;  %v4600_v45 = vadd.f32 %v4494_v28, %v4114_v12  ;;  %v4578_v41 = vpop.f32.mrf.mxu0  ;;  %v2178_v35 = vadd.f32 %v7691_v48, %v1692_v14  ;;  %v1693_v10 = vadd.f32 %v7692_v36, %v1207_v22 }
 0x7a6   : > { %v4692_v27 = vadd.f32 %v7444_v19, %v4598_v60  ;;  %v4603_v38 = vadd.f32 %v4578_v41, %v7356_v21  ;;  %v7694_v60 = vld [vmem:[#allocation64_spill] sm:$0xff] }
 0x7a7   : > { %vm4719_vm12 = vcmp.ge.f32.partialorder %v4691_v25, 0.0  ;;  %v4747_v5 = vmul.f32 0.01, %v4691_v25  ;;  %v4694_v21 = vadd.f32 %v7428_v24, %v4600_v45  ;;  %v2664_v12 = vadd.f32 %v7693_v57, %v2178_v35 }
 0x7a8   : > { %vm4720_vm13 = vcmp.ge.f32.partialorder %v4692_v27, 0.0  ;;  %v4748_v29 = vmul.f32 0.01, %v4692_v27  ;;  %v4697_v63 = vadd.f32 %v7431_v2, %v4603_v38  ;;  %v2179_v6 = vadd.f32 %v7695_v53, %v1693_v10 }
 0x7a9   : > { %v4775_v56 = vsel %vm4719_vm12, %v4691_v25, %v4747_v5  ;;  %v4750_v20 = vmul.f32 0.01, %v4694_v21  ;;  %vm4722_vm14 = vcmp.ge.f32.partialorder %v4694_v21, 0.0  ;;  %v3150_v28 = vadd.f32 %v7694_v60, %v2664_v12  ;;  %v7696_v25 = vld [vmem:[#allocation78_spill] sm:$0xff]  ;;  %v7697_v5 = vld [vmem:[#allocation53_spill] sm:$0xff] }
 0x7aa   : > { %v4800_v51 = vpack.c.bf16 %v4775_v56, %v4774_v34  ;;  %v4776_v46 = vsel %vm4720_vm13, %v4692_v27, %v4748_v29  ;;  %v4522_v32 = vpop.f32.mrf.mxu2  ;;  %v4753_v50 = vmul.f32 0.01, %v4697_v63  ;;  %vm4725_vm1 = vcmp.ge.f32.partialorder %v4697_v63, 0.0  ;;  %v7698_v34 = vld [vmem:[#allocation65_spill] sm:$0xff] }
 0x7ab   : > { %v4801_v11 = vpack.c.bf16 %v4777_v49, %v4776_v46  ;;  %v4601_v1 = vadd.f32 %v4522_v32, %v4115_v13  ;;  %v4550_v55 = vpop.f32.mrf.mxu3  ;;  %v3636_v45 = vadd.f32 %v7696_v25, %v3150_v28  ;;  %v2665_v23 = vadd.f32 %v7697_v5, %v2179_v6 }
 0x7ac   : > { %4814 = vst [vmem:[%s7461_s20 + $0x10] sm:$0xff] %v4800_v51  ;;  %v4602_v8 = vadd.f32 %v4550_v55, %v7353_v42  ;;  %v4496_v62 = vpop.f32.mrf.mxu1  ;;  %v4781_v27 = vsel %vm4725_vm1, %v4697_v63, %v4753_v50  ;;  %vm4825_vm1 = vsmask.f32 256 }
 0x7ad   : > { %4815 = vst [vmem:[%s7461_s20 + $0x18] sm:$0xff] %v4801_v11  ;;  %v4695_v7 = vadd.f32 %v7439_v37, %v4601_v1  ;;  %v4604_v39 = vadd.f32 %v4496_v62, %v7359_v43  ;;  %v4580_v33 = vpop.f32.mrf.mxu0  ;;  %v4778_v43 = vsel %vm4722_vm14, %v4694_v21, %v4750_v20  ;;  %v4122_v52 = vadd.f32 %v7378_v3, %v3636_v45 }
 0x7ae   : > { %v4696_v54 = vadd.f32 %v7444_v19, %v4602_v8  ;;  %v4607_v18 = vadd.f32 %v4580_v33, %v7376_v30  ;;  %v3151_v56 = vadd.f32 %v7698_v34, %v2665_v23  ;;  %vm4824_vm14 = vcmask 1040384  }
 0x7af   : > { %vm4723_vm15 = vcmp.ge.f32.partialorder %v4695_v7, 0.0  ;;  %v4751_v42 = vmul.f32 0.01, %v4695_v7  ;;  %v4698_v9 = vadd.f32 %v7428_v24, %v4604_v39 }
 0x7b0   : > { %vm4724_vm2 = vcmp.ge.f32.partialorder %v4696_v54, 0.0  ;;  %v4752_v0 = vmul.f32 0.01, %v4696_v54  ;;  %v4701_v58 = vadd.f32 %v7431_v2, %v4607_v18 }
 0x7b1   : > { %v4779_v41 = vsel %vm4723_vm15, %v4695_v7, %v4751_v42  ;;  %v4754_v21 = vmul.f32 0.01, %v4698_v9  ;;  %vm4726_vm3 = vcmp.ge.f32.partialorder %v4698_v9, 0.0  ;;  %vm4827_vm15 = vcmask 1044484  }
 0x7b2   : > { %v4802_v38 = vpack.c.bf16 %v4779_v41, %v4778_v43  ;;  %v4780_v30 = vsel %vm4724_vm2, %v4696_v54, %v4752_v0  ;;  %v4524_v61 = vpop.f32.mrf.mxu2  ;;  %v4757_v63 = vmul.f32 0.01, %v4701_v58  ;;  %vm4729_vm4 = vcmp.ge.f32.partialorder %v4701_v58, 0.0 }
 0x7b3   : > { %v4803_v22 = vpack.c.bf16 %v4781_v27, %v4780_v30  ;;  %v4605_v15 = vadd.f32 %v4524_v61, %v7362_v44  ;;  %v4552_v14 = vpop.f32.mrf.mxu3  ;;  %v7699_v44 = vld [vmem:[#allocation77_spill] sm:$0xff]  ;;  %v4782_v1 = vsel %vm4726_vm3, %v4698_v9, %v4754_v21  ;;  %vm4828_vm2 = vsmask.f32 4352  ;;  %vm7533_vm3 = vmand %vm4824_vm14, %vm4825_vm1 }
 0x7b4   : > { %4816 = vst [vmem:[%s7461_s20 + $0x20] sm:$0xff] %v4802_v38  ;;  %v4606_v29 = vadd.f32 %v4552_v14, %v7374_v26  ;;  %v4499_v13 = vpop.f32.mrf.mxu1  ;;  %v3637_v48 = vadd.f32 %v7699_v44, %v3151_v56  ;;  %v4785_v10 = vsel %vm4729_vm4, %v4701_v58, %v4757_v63  ;;  %v4279_v58 = vld [vmem:[#allocation2 + $0x20] sm:$0x1]  ;;  %v4281_v44 = vld [vmem:[#allocation2 + $0xc8] sm:$0x1] }
 0x7b5   : > { %4817 = vst [vmem:[%s7461_s20 + $0x28] sm:$0xff] %v4803_v22  ;;  %v4699_v49 = vadd.f32 %v7439_v37, %v4605_v15  ;;  %v4608_v51 = vadd.f32 %v4499_v13, %v4122_v52  ;;  %v4583_v46 = vpop.f32.mrf.mxu0  ;;  %v4282_v22 = vld [vmem:[#allocation2 + $0x70] sm:$0x1] }
 0x7b6   : > { %v4700_v3 = vadd.f32 %v7444_v19, %v4606_v29  ;;  %v4611_v32 = vadd.f32 %v4583_v46, %v7396_v17  ;;  %v4123_v11 = vadd.f32 %v7380_v40, %v3637_v48  ;;  %v4280_v46 = vld [vmem:[#allocation2 + $0x10] sm:$0x1] }
 0x7b7   : > { %vm4727_vm5 = vcmp.ge.f32.partialorder %v4699_v49, 0.0  ;;  %v4755_v26 = vmul.f32 0.01, %v4699_v49  ;;  %v4702_v36 = vadd.f32 %v7428_v24, %v4608_v51 }
 0x7b8   : > { %vm4728_vm6 = vcmp.ge.f32.partialorder %v4700_v3, 0.0  ;;  %v4756_v35 = vmul.f32 0.01, %v4700_v3  ;;  %v4705_v17 = vadd.f32 %v7431_v2, %v4611_v32 }
 0x7b9   : > { %v4783_v55 = vsel %vm4727_vm5, %v4699_v49, %v4755_v26  ;;  %v4758_v50 = vmul.f32 0.01, %v4702_v36  ;;  %vm4730_vm7 = vcmp.ge.f32.partialorder %v4702_v36, 0.0  ;;  %vm7537_vm5 = vmand %vm4827_vm15, %vm4828_vm2 }
 0x7ba   : > { %v4804_v8 = vpack.c.bf16 %v4783_v55, %v4782_v1  ;;  %v4784_v62 = vsel %vm4728_vm6, %v4700_v3, %v4756_v35  ;;  %v4527_v57 = vpop.f32.mrf.mxu2  ;;  %v4761_v60 = vmul.f32 0.01, %v4705_v17  ;;  %vm4733_vm8 = vcmp.ge.f32.partialorder %v4705_v17, 0.0 }
 0x7bb   : > { %v4805_v12 = vpack.c.bf16 %v4785_v10, %v4784_v62  ;;  %v4609_v20 = vadd.f32 %v4527_v57, %v4123_v11  ;;  %v4555_v7 = vpop.f32.mrf.mxu3  ;;  %v4786_v6 = vsel %vm4730_vm7, %v4702_v36, %v4758_v50 }
 0x7bc   : > { %4818 = vst [vmem:[%s7461_s20 + $0x30] sm:$0xff] %v4804_v8  ;;  %v4610_v39 = vadd.f32 %v4555_v7, %v7393_v4  ;;  %v4501_v33 = vpop.f32.mrf.mxu1  ;;  %v4789_v45 = vsel %vm4733_vm8, %v4705_v17, %v4761_v60 }
 0x7bd   : > { %4819 = vst [vmem:[%s7461_s20 + $0x38] sm:$0xff] %v4805_v12  ;;  %v4703_v40 = vadd.f32 %v7439_v37, %v4609_v20  ;;  %v4612_v54 = vadd.f32 %v4501_v33, %v7399_v31  ;;  %v4585_v18 = vpop.f32.mrf.mxu0 }
 0x7be   : > { %v4704_v28 = vadd.f32 %v7444_v19, %v4610_v39  ;;  %v4615_v42 = vadd.f32 %v4585_v18, %v7412_v16 }
 0x7bf   : > { %vm4731_vm9 = vcmp.ge.f32.partialorder %v4703_v40, 0.0  ;;  %v4759_v53 = vmul.f32 0.01, %v4703_v40  ;;  %v4706_v25 = vadd.f32 %v7428_v24, %v4612_v54  ;;  %v4831_v54 = vld [vmem:[%s7461_s20 + $0x60] sm:$0x11] }
 0x7c0   : > { %vm4732_vm10 = vcmp.ge.f32.partialorder %v4704_v28, 0.0  ;;  %v4760_v4 = vmul.f32 0.01, %v4704_v28  ;;  %v4709_v41 = vadd.f32 %v7431_v2, %v4615_v42  ;;  %v4834_v42 = vld [vmem:[%s7461_s20 + $0x68] sm:$0x11] }
 0x7c1   : > { %v4787_v0 = vsel %vm4731_vm9, %v4703_v40, %v4759_v53  ;;  %v4762_v5 = vmul.f32 0.01, %v4706_v25  ;;  %vm4734_vm0 = vcmp.ge.f32.partialorder %v4706_v25, 0.0  ;;  %vm4830_vm9 = vmor %vm7537_vm5, %vm7533_vm3 }
 0x7c2   : > { %v4806_v31 = vpack.c.bf16 %v4787_v0, %v4786_v6  ;;  %v4788_v43 = vsel %vm4732_vm10, %v4704_v28, %v4760_v4  ;;  %v4529_v9 = vpop.f32.mrf.mxu2  ;;  %v4765_v14 = vmul.f32 0.01, %v4709_v41  ;;  %vm4737_vm11 = vcmp.ge.f32.partialorder %v4709_v41, 0.0 }
 0x7c3   : > { %v4807_v27 = vpack.c.bf16 %v4789_v45, %v4788_v43  ;;  %v4613_v16 = vadd.f32 %v4529_v9, %v7402_v47  ;;  %v4557_v38 = vpop.f32.mrf.mxu3  ;;  %v4790_v34 = vsel %vm4734_vm0, %v4706_v25, %v4762_v5 }
 0x7c4   : > { %4820 = vst [vmem:[%s7461_s20 + $0x40] sm:$0xff] %v4806_v31  ;;  %v4614_v30 = vadd.f32 %v4557_v38, %v7410_v59  ;;  %v4504_v61 = vpop.f32.mrf.mxu1  ;;  %v4793_v21 = vsel %vm4737_vm11, %v4709_v41, %v4765_v14 }
 0x7c5   : > { %4821 = vst [vmem:[%s7461_s20 + $0x48] sm:$0xff] %v4807_v27  ;;  %v4707_v23 = vadd.f32 %v7439_v37, %v4613_v16  ;;  %v4616_v52 = vadd.f32 %v4504_v61, %v4279_v58  ;;  %v4588_v15 = vpop.f32.mrf.mxu0 }
 0x7c6   : > { %v4708_v29 = vadd.f32 %v7444_v19, %v4614_v30  ;;  %v4619_v13 = vadd.f32 %v4588_v15, %v4282_v22 }
 0x7c7   : > { %vm4735_vm12 = vcmp.ge.f32.partialorder %v4707_v23, 0.0  ;;  %v4763_v47 = vmul.f32 0.01, %v4707_v23  ;;  %4644 = vst [vmem:[#allocation2 + $0x20] sm:$0x1] %v4616_v52 }
 0x7c8   : > { %vm4736_vm13 = vcmp.ge.f32.partialorder %v4708_v29, 0.0  ;;  %v4764_v59 = vmul.f32 0.01, %v4708_v29  ;;  %4647 = vst [vmem:[#allocation2 + $0x70] sm:$0x1] %v4619_v13 }
 0x7c9   : > { %v4791_v56 = vsel %vm4735_vm12, %v4707_v23, %v4763_v47 }
 0x7ca   : > { %v4808_v49 = vpack.c.bf16 %v4791_v56, %v4790_v34  ;;  %v4792_v51 = vsel %vm4736_vm13, %v4708_v29, %v4764_v59  ;;  %v4532_v63 = vpop.f32.mrf.mxu2 }
 0x7cb   : > { %v4809_v3 = vpack.c.bf16 %v4793_v21, %v4792_v51  ;;  %v4617_v32 = vadd.f32 %v4532_v63, %v4280_v46  ;;  %v4560_v48 = vpop.f32.mrf.mxu3 }
 0x7cc   : > { %4822 = vst [vmem:[%s7461_s20 + $0x50] sm:$0xff] %v4808_v49  ;;  %v4618_v26 = vadd.f32 %v4560_v48, %v4281_v44  ;;  %v4506_v35 = vpop.f32.mrf.mxu1 }
 0x7cd   : > { %4823 = vst [vmem:[%s7461_s20 + $0x58] sm:$0xff] %v4809_v3  ;;  %v4590_v11 = vpop.f32.mrf.mxu0 }
 0x7ce   : > { %4645 = vst [vmem:[#allocation2 + $0x10] sm:$0x1] %v4617_v32  ;;  %v4672_v1 = vld [vmem:[#allocation2 + $0x20] sm:$0x1] }
 0x7cf   : > { %4646 = vst [vmem:[#allocation2 + $0xc8] sm:$0x1] %v4618_v26  ;;  %v4675_v55 = vld [vmem:[#allocation2 + $0x70] sm:$0x1]  ;;  %v4710_v36 = vadd.f32 %v7428_v24, %v4672_v1 }
 0x7d0   : > { %v4713_v8 = vadd.f32 %v7431_v2, %v4675_v55 }
 0x7d1   : > { %v4766_v57 = vmul.f32 0.01, %v4710_v36  ;;  %vm4738_vm4 = vcmp.ge.f32.partialorder %v4710_v36, 0.0 }
 0x7d2   : > { %v4534_v10 = vpop.f32.mrf.mxu2  ;;  %v4769_v24 = vmul.f32 0.01, %v4713_v8  ;;  %vm4741_vm6 = vcmp.ge.f32.partialorder %v4713_v8, 0.0 }
 0x7d3   : > { %v4562_v62 = vpop.f32.mrf.mxu3  ;;  %v4794_v50 = vsel %vm4738_vm4, %v4710_v36, %v4766_v57 }
 0x7d4   : > { %v4797_v18 = vsel %vm4741_vm6, %v4713_v8, %v4769_v24 }
 0x7d5   : > { %v4673_v17 = vld [vmem:[#allocation2 + $0x10] sm:$0x1] }
 0x7d6   : > { %v4711_v12 = vadd.f32 %v7439_v37, %v4673_v17  ;;  %v4674_v7 = vld [vmem:[#allocation2 + $0xc8] sm:$0x1] }
 0x7d7   : > { %v4712_v39 = vadd.f32 %v7444_v19, %v4674_v7 }
 0x7d8   : > { %vm4739_vm7 = vcmp.ge.f32.partialorder %v4711_v12, 0.0  ;;  %v4767_v33 = vmul.f32 0.01, %v4711_v12 }
 0x7d9   : > { %vm4740_vm8 = vcmp.ge.f32.partialorder %v4712_v39, 0.0  ;;  %v4768_v37 = vmul.f32 0.01, %v4712_v39 }
 0x7da   : > { %v4795_v40 = vsel %vm4739_vm7, %v4711_v12, %v4767_v33 }
 0x7db   : > { %v4810_v60 = vpack.c.bf16 %v4795_v40, %v4794_v50  ;;  %v4796_v28 = vsel %vm4740_vm8, %v4712_v39, %v4768_v37 }
 0x7dc   : > { %v4811_v19 = vpack.c.bf16 %v4797_v18, %v4796_v28 }
 0x7dd   : > { %v4832_v53 = vsel %vm4830_vm9, %v4810_v60, %v4831_v54 }
 0x7de   : > { %4833 = vst [vmem:[%s7461_s20 + $0x60] sm:$0x11] %v4832_v53  ;;  %v4835_v4 = vsel %vm4830_vm9, %v4811_v19, %v4834_v42 }
 0x7df   : > { %4836 = vst [vmem:[%s7461_s20 + $0x68] sm:$0x11] %v4835_v4 }
 0x7e0 PF: > { %s16_s15 = sadd.s32 1, %s6658_s15  }
 0x7e1   : > { %p13_p7 = scmp.ge.s32.totalorder %s16_s15, 4  }
 0x7e3   :  { %15 = sbr.rel (!%p13_p7) target bundleno = 2 (0x2), region = 95 }
 0x7e8   :  { %4858 = vsyncpa [#allocation4], 1 }
 0x7e9   :  { %4860 = vsyncpa [#allocation4 + $0x1], 1 }
 0x7ea   :  { %4861 = vsyncpa [#allocation6], 1 }

// kernel: encoder_forward.3
= control target key start
LH: loop header
LB: loop body
LE: loop exit
PB: predicated region body
PF: predicated region fallthrough
CT: control target
= control target key end

     0   :  { %8 = vsyncpa [#allocation4], 0  ;;  %s13187_s0 = inlined_call_operand.vmem [shape: bf16[2,25088], index: 0, kind: input, shape index: {}]   ;;  %s13188_s1 = inlined_call_operand.hbm [shape: bf16[25088,128], index: 1, kind: input, shape index: {}]   ;;  %s13189_s2 = inlined_call_operand.hbm [shape: f32[1,128], index: 2, kind: input, shape index: {}]   ;;  %s13190_s3 = inlined_call_operand.hbm [shape: f32[2,128], index: 3, kind: output, shape index: {}]  }
   0x1   :  { %10 = vsyncpa [#allocation4 + $0x1], 0 }
   0x2   :  { %11 = vsyncpa [#allocation7], 0 }
   0x3   :  { %12 = vsyncpa [#allocation5], 0  ;;  %s12249_s12 = smov 0   ;;  %s12251_s13 = smov 0  }
   0x4   :  { %s12253_s14 = smov 0   ;;  %s12255_s15 = smov 0  }
   0x5 LB: > { %s12268_s16 = sadd.s32 4294967295, %s12222_s15   ;;  %s12271_s17 = sadd.s32 1, %s12222_s15   ;;  %s12222_s15 = sphi %s12255_s15, %s13198_s15   ;;  %s12218_s14 = sphi %s12253_s14, %s13197_s14   ;;  %s12214_s13 = sphi %s12251_s13, %s13196_s13   ;;  %s12210_s12 = sphi %s12249_s12, %s13195_s12  }
   0x6   : > { %s48_s18 = ssub.s32 %s12222_s15, %s12271_s17  ;;  %s51_s19 = sadd.s32 1, %s12218_s14 }
   0x7   : > { %p49_p0 = scmp.eq.s32.totalorder %s48_s18, 0  ;;  %p58_p1 = scmp.ne.s32.totalorder %s12218_s14, %s12214_s13 }
   0x8   : > { %p59_p2 = scmp.eq.s32.totalorder %s12222_s15, 0  ;;  %p64_p3 = scmp.ne.s32.totalorder %s12214_s13, %s12210_s12 }
   0x9   : > { %s12281_s20 = scalar_select %p49_p0, %s12218_s14, %s51_s19  }
   0xa   : > { %p12283_p4 = por %p59_p2, %p58_p1  ;;  %p65_p5 = scmp.eq.s32.totalorder %s12268_s16, 0 }
   0xb   : > { %p8094_p6 = scmp.ge.s32.totalorder %s12222_s15, 1  ;;  %p117_p7 = scmp.lt.s32.totalorder %s12222_s15, 3 }
   0xc   : > { %p12292_p8 = por %p65_p5, %p64_p3  ;;  %p8095_p9 = scmp.ne.s32.totalorder %s12268_s16, 0 }
   0xd   : > { %p12297_p10 = pnand %p8094_p6, %p117_p7  ;;  %s129_s26 = sshll.u32 %s13189_s2, 4  ;;  %s130_s26 = int_to_ptr.hbm [resolvable:$true] %s129_s26 }
   0xe   : > { %s12224_s27 = smov [#allocation6]   ;;  %p12048_p13 = scmp.lt.s32.totalorder %s12222_s15, 2 }
   0xf   : > { %p12039_p11 = pneg %p12297_p10  ;;  %s131_s28 = sshll.u32 %s12224_s27, 4  ;;  %s132_s28 = int_to_ptr.vmem [resolvable:$true] %s131_s28 }
  0x10   : > { %s150_s29 = sand.u32 1, %s12218_s14   ;;  %s11242_s30 = smul.u32 6272, %s12222_s15 }
  0x11   : > { %p12040_p12 = pnand %p12039_p11, %p65_p5  ;;  %p12313_p0 = pnand %p12048_p13, %p12283_p4 }
  0x12   : > { %s12027_s5 = smul.u32 6272, %s150_s29  ;;  %s159_s8 = scalar_lea.hbm %s13188_s1, %s11242_s30 }
  0x13   : > { %12042 = dma.hbm_to_vmem [thread:$0]  (!%p12040_p12), %s130_s26, 16, %s132_s28, [#allocation7]  }
  0x14   : > { %s160_s9 = sshll.u32 %s159_s8, 4  ;;  %s154_s10 = scalar_lea.vmem [#allocation3], %s12027_s5  ;;  %s161_s9 = int_to_ptr.hbm [resolvable:$true] %s160_s9 }
  0x15   : > { %s162_s11 = sshll.u32 %s154_s10, 4  ;;  %s151_s12 = scalar_lea.sflag [#allocation4], %s150_s29  ;;  %s163_s11 = int_to_ptr.vmem [resolvable:$true] %s162_s11 }
  0x16   : > { %s12122_s18 = sshra.s32 %s161_s9, 4  ;;  %p12126_p2 = pneg %p12313_p0  ;;  %s12123_s18 = int_to_ptr.hbm [resolvable:$true] %s12122_s18 }
  0x17   : > { %s12124_s15 = scalar_lea.hbm %s12123_s18, 6272  ;;  %s12129_s24 = scalar_lea.hbm %s13188_s1, 12544 }
  0x18   : > { %p12125_p1 = scmp.ne.s32.totalorder %s12123_s18, %s12124_s15  ;;  %p12130_p6 = scmp.lt.s32.totalorder %s12123_s18, %s13188_s1 }
  0x19   : > { %p12131_p7 = scmp.lt.s32.totalorder %s12129_s24, %s12124_s15 }
  0x1a   : > { %p12127_p3 = pnand %p12126_p2, %p12125_p1 }
  0x1b   : > { %p12132_p11 = por %p12131_p7, %p12130_p6 }
  0x1c   : > { %p12128_p4 = pneg %p12127_p3 }
  0x1e   : > { %p12133_p12 = pnand %p12132_p11, %p12128_p4 }
  0x20   : > { %12136 = shalt.err (!%p12133_p12)
}
  0x21   : > { %s12225_s27 = smov 64   ;;  %s12226_s28 = smov 4  }
  0x22   : > { %12046 = dma.hbm_to_vmem [thread:$0]  (!%p12313_p0), %s161_s9, 100352, %s163_s11, %s151_s12, %s12225_s27, %s12225_s27, %s12226_s28  }
  0x23   : > { %174 = sbr.rel (%p12297_p10) target bundleno = 1006 (0x3ee), region = 32  ;;  %s176_s29 = sand.u32 (!%p12297_p10), 1, %s12214_s13  }
  0x24   : > { %s12028_s30 = smul.u32 (!%p12297_p10), 6272, %s176_s29  ;;  %s177_s5 = scalar_lea.sflag (!%p12297_p10), [#allocation4], %s176_s29 }
  0x26   : > { %s12333_s6 = scalar_lea.vmem (!%p12297_p10), [#allocation3], %s12028_s30 }
  0x28   : > { %12197 = dma.done.wait (%p12292_p8), %s177_s5, 100352  }
  0x29   : > { %12199 = vsyncadd (%p12292_p8), %s177_s5, 4294866944 }
  0x2a   : > { %12201 = dma.done.wait (%p65_p5), [#allocation7], 16  }
  0x2b   : > { %12203 = vsyncadd (%p65_p5), [#allocation7], 4294967280  ;;  %s208_s23 = smul.u32 98, %s12268_s16 }
  0x2c   : > { %217 = sbr.rel (%p8095_p9) target bundleno = 51 (0x33), region = 44 }
  0x2d   : > { %p209_p10 = scmp.lt.s32.totalorder %s208_s23, 195 }
  0x2f   : > { %s13200_s23 = smov (!%p209_p10, %s208_s23), 195 }
  0x30   : > { %s12347_s8 = scalar_lea.vmem %s13187_s0, %s13200_s23 }
  0x31   : > { %v12227_v0 = vmov 0.0  }
  0x32   : > { %218 = vst [vmem:[#allocation2] sm:$0x3] %v12227_v0 }
  0x33 PF: > { %v11250_v1 = vld [vmem:[%s12333_s6 + $0x38] sm:$0xff]  ;;  %v11249_v5 = vld [vmem:[%s12333_s6 + $0x30] sm:$0xff]  ;;  %v11248_v9 = vld [vmem:[%s12333_s6 + $0x28] sm:$0xff]  ;;  %p11237_p5 = scmp.ne.s32.totalorder %s12268_s16, 1 }
  0x34   : > { %v11258_v2 = vld [vmem:[%s12333_s6 + $0x78] sm:$0xff]  ;;  %6727 = vmatpush.bf16.msra.mxu0 %v11250_v1  ;;  %v11257_v6 = vld [vmem:[%s12333_s6 + $0x70] sm:$0xff]  ;;  %v11256_v10 = vld [vmem:[%s12333_s6 + $0x68] sm:$0xff] }
  0x35   : > { %v11266_v3 = vld [vmem:[%s12333_s6 + $0xb8] sm:$0xff]  ;;  %6740 = vmatpush.bf16.msra.mxu1 %v11258_v2  ;;  %v11265_v7 = vld [vmem:[%s12333_s6 + $0xb0] sm:$0xff]  ;;  %v11264_v11 = vld [vmem:[%s12333_s6 + $0xa8] sm:$0xff] }
  0x36   : > { %v11274_v4 = vld [vmem:[%s12333_s6 + $0xf8] sm:$0xff]  ;;  %6753 = vmatpush.bf16.msra.mxu2 %v11266_v3  ;;  %v11273_v8 = vld [vmem:[%s12333_s6 + $0xf0] sm:$0xff]  ;;  %v11272_v12 = vld [vmem:[%s12333_s6 + $0xe8] sm:$0xff] }
  0x37   : > { %6766 = vmatpush.bf16.msra.mxu3 %v11274_v4  ;;  %v11247_v13 = vld [vmem:[%s12333_s6 + $0x20] sm:$0xff]  ;;  %v11246_v17 = vld [vmem:[%s12333_s6 + $0x18] sm:$0xff]  ;;  %v11245_v22 = vld [vmem:[%s12333_s6 + $0x10] sm:$0xff] }
  0x38   : > { %6728 = vmatpush.bf16.msra.mxu0 %v11249_v5  ;;  %v11255_v14 = vld [vmem:[%s12333_s6 + $0x60] sm:$0xff]  ;;  %v11254_v18 = vld [vmem:[%s12333_s6 + $0x58] sm:$0xff]  ;;  %v11253_v23 = vld [vmem:[%s12333_s6 + $0x50] sm:$0xff] }
  0x39   : > { %6741 = vmatpush.bf16.msra.mxu1 %v11257_v6  ;;  %v11263_v15 = vld [vmem:[%s12333_s6 + $0xa0] sm:$0xff]  ;;  %v11262_v19 = vld [vmem:[%s12333_s6 + $0x98] sm:$0xff]  ;;  %v11261_v24 = vld [vmem:[%s12333_s6 + $0x90] sm:$0xff] }
  0x3a   : > { %6754 = vmatpush.bf16.msra.mxu2 %v11265_v7  ;;  %v11271_v16 = vld [vmem:[%s12333_s6 + $0xe0] sm:$0xff]  ;;  %v11270_v20 = vld [vmem:[%s12333_s6 + $0xd8] sm:$0xff]  ;;  %v11269_v25 = vld [vmem:[%s12333_s6 + $0xd0] sm:$0xff] }
  0x3b   : > { %6767 = vmatpush.bf16.msra.mxu3 %v11273_v8  ;;  %v220_v21 = vld [vmem:[%s12347_s8] sm:$0xff]  ;;  %v11244_v26 = vld [vmem:[%s12333_s6 + $0x8] sm:$0xff]  ;;  %v11243_v30 = vld [vmem:[%s12333_s6] sm:$0xff] }
  0x3c   : > { %6729 = vmatpush.bf16.msra.mxu0 %v11248_v9  ;;  %1802 = vst [vmem:[#allocation1] ss:$9 sm:$0xff] %v220_v21  ;;  %v11252_v27 = vld [vmem:[%s12333_s6 + $0x48] sm:$0xff]  ;;  %v11251_v31 = vld [vmem:[%s12333_s6 + $0x40] sm:$0xff]  ;;  %v11282_v33 = vld [vmem:[%s12333_s6 + $0x138] sm:$0xff] }
  0x3d   : > { %6742 = vmatpush.bf16.msra.mxu1 %v11256_v10  ;;  %v11260_v28 = vld [vmem:[%s12333_s6 + $0x88] sm:$0xff]  ;;  %v11259_v32 = vld [vmem:[%s12333_s6 + $0x80] sm:$0xff]  ;;  %v11290_v34 = vld [vmem:[%s12333_s6 + $0x178] sm:$0xff] }
  0x3e   : > { %6755 = vmatpush.bf16.msra.mxu2 %v11264_v11  ;;  %v11268_v29 = vld [vmem:[%s12333_s6 + $0xc8] sm:$0xff]  ;;  %v11298_v35 = vld [vmem:[%s12333_s6 + $0x1b8] sm:$0xff]  ;;  %v11267_v36 = vld [vmem:[%s12333_s6 + $0xc0] sm:$0xff] }
  0x3f   : > { %6768 = vmatpush.bf16.msra.mxu3 %v11272_v12  ;;  %v11306_v37 = vld [vmem:[%s12333_s6 + $0x1f8] sm:$0xff]  ;;  %v11281_v39 = vld [vmem:[%s12333_s6 + $0x130] sm:$0xff]  ;;  %v11280_v46 = vld [vmem:[%s12333_s6 + $0x128] sm:$0xff] }
  0x40   : > { %6730 = vmatpush.bf16.msra.mxu0 %v11247_v13  ;;  %v11289_v41 = vld [vmem:[%s12333_s6 + $0x170] sm:$0xff]  ;;  %v11288_v47 = vld [vmem:[%s12333_s6 + $0x168] sm:$0xff]  ;;  %v11279_v50 = vld [vmem:[%s12333_s6 + $0x120] sm:$0xff] }
  0x41   : > { %6743 = vmatpush.bf16.msra.mxu1 %v11255_v14  ;;  %v11297_v42 = vld [vmem:[%s12333_s6 + $0x1b0] sm:$0xff]  ;;  %v11296_v48 = vld [vmem:[%s12333_s6 + $0x1a8] sm:$0xff]  ;;  %v11287_v51 = vld [vmem:[%s12333_s6 + $0x160] sm:$0xff] }
  0x42   : > { %6756 = vmatpush.bf16.msra.mxu2 %v11263_v15  ;;  %v11305_v44 = vld [vmem:[%s12333_s6 + $0x1f0] sm:$0xff]  ;;  %v11304_v49 = vld [vmem:[%s12333_s6 + $0x1e8] sm:$0xff]  ;;  %v11295_v52 = vld [vmem:[%s12333_s6 + $0x1a0] sm:$0xff] }
  0x43   : > { %6769 = vmatpush.bf16.msra.mxu3 %v11271_v16  ;;  %v1803_v38 = vld [vmem:[#allocation1] sm:$0xff]  ;;  %v1805_v40 = vld [vmem:[#allocation1 + $0x12] sm:$0xff]  ;;  %v1804_v43 = vld [vmem:[#allocation1 + $0x9] sm:$0xff] }
  0x44   : > { %6731 = vmatpush.bf16.msra.mxu0 %v11246_v17  ;;  %v1806_v45 = vld [vmem:[#allocation1 + $0x1b] sm:$0xff]  ;;  %v11303_v53 = vld [vmem:[%s12333_s6 + $0x1e0] sm:$0xff]  ;;  %v11276_v62 = vld [vmem:[%s12333_s6 + $0x108] sm:$0xff] }
  0x45   : > { %6744 = vmatpush.bf16.msra.mxu1 %v11254_v18  ;;  %v11278_v54 = vld [vmem:[%s12333_s6 + $0x118] sm:$0xff]  ;;  %v11277_v58 = vld [vmem:[%s12333_s6 + $0x110] sm:$0xff]  ;;  %v11284_v63 = vld [vmem:[%s12333_s6 + $0x148] sm:$0xff] }
  0x46   : > { %6757 = vmatpush.bf16.msra.mxu2 %v11262_v19  ;;  %v11286_v55 = vld [vmem:[%s12333_s6 + $0x158] sm:$0xff]  ;;  %v11285_v59 = vld [vmem:[%s12333_s6 + $0x150] sm:$0xff]  ;;  %v11292_v0 = vld [vmem:[%s12333_s6 + $0x188] sm:$0xff] }
  0x47   : > { %6770 = vmatpush.bf16.msra.mxu3 %v11270_v20  ;;  %v11294_v56 = vld [vmem:[%s12333_s6 + $0x198] sm:$0xff]  ;;  %v11293_v60 = vld [vmem:[%s12333_s6 + $0x190] sm:$0xff]  ;;  %v1808_v4 = vld [vmem:[#allocation1 + $0x2d] sm:$0xff] }
  0x48   : > { %6732 = vmatpush.bf16.msra.mxu0 %v11245_v22  ;;  %v11302_v57 = vld [vmem:[%s12333_s6 + $0x1d8] sm:$0xff]  ;;  %v11301_v61 = vld [vmem:[%s12333_s6 + $0x1d0] sm:$0xff]  ;;  %v11300_v6 = vld [vmem:[%s12333_s6 + $0x1c8] sm:$0xff] }
  0x49   : > { %6745 = vmatpush.bf16.msra.mxu1 %v11253_v23  ;;  %v1809_v1 = vld [vmem:[#allocation1 + $0x36] sm:$0xff]  ;;  %v1807_v2 = vld [vmem:[#allocation1 + $0x24] sm:$0xff] }
  0x4a   : > { %6758 = vmatpush.bf16.msra.mxu2 %v11261_v24  ;;  %v1810_v3 = vld [vmem:[#allocation1 + $0x3f] sm:$0xff]  ;;  %v221_v5 = vld [vmem:[%s12347_s8 + $0x8] sm:$0xff]  ;;  %v11312_v19 = vld [vmem:[%s12333_s6 + $0x228] sm:$0xff] }
  0x4b   : > { %6771 = vmatpush.bf16.msra.mxu3 %v11269_v25  ;;  %1812 = vst [vmem:[#allocation1] ss:$9 sm:$0xff] %v221_v5  ;;  %v11275_v7 = vld [vmem:[%s12333_s6 + $0x100] sm:$0xff]  ;;  %v11314_v10 = vld [vmem:[%s12333_s6 + $0x238] sm:$0xff]  ;;  %v11313_v15 = vld [vmem:[%s12333_s6 + $0x230] sm:$0xff] }
  0x4c   : > { %6733 = vmatpush.bf16.msra.mxu0 %v11244_v26  ;;  %v11283_v8 = vld [vmem:[%s12333_s6 + $0x140] sm:$0xff]  ;;  %v11322_v11 = vld [vmem:[%s12333_s6 + $0x278] sm:$0xff]  ;;  %v11321_v16 = vld [vmem:[%s12333_s6 + $0x270] sm:$0xff] }
  0x4d   : > { %6746 = vmatpush.bf16.msra.mxu1 %v11252_v27  ;;  %v11291_v9 = vld [vmem:[%s12333_s6 + $0x180] sm:$0xff]  ;;  %v11330_v12 = vld [vmem:[%s12333_s6 + $0x2b8] sm:$0xff]  ;;  %v11329_v17 = vld [vmem:[%s12333_s6 + $0x2b0] sm:$0xff] }
  0x4e   : > { %6759 = vmatpush.bf16.msra.mxu2 %v11260_v28  ;;  %v11299_v13 = vld [vmem:[%s12333_s6 + $0x1c0] sm:$0xff]  ;;  %v11338_v14 = vld [vmem:[%s12333_s6 + $0x2f8] sm:$0xff]  ;;  %v11337_v18 = vld [vmem:[%s12333_s6 + $0x2f0] sm:$0xff] }
  0x4f   : > { %6772 = vmatpush.bf16.msra.mxu3 %v11268_v29  ;;  %v11320_v20 = vld [vmem:[%s12333_s6 + $0x268] sm:$0xff]  ;;  %v11311_v23 = vld [vmem:[%s12333_s6 + $0x220] sm:$0xff]  ;;  %v11310_v27 = vld [vmem:[%s12333_s6 + $0x218] sm:$0xff] }
  0x50   : > { %6734 = vmatpush.bf16.msra.mxu0 %v11243_v30  ;;  %v11328_v21 = vld [vmem:[%s12333_s6 + $0x2a8] sm:$0xff]  ;;  %v11319_v24 = vld [vmem:[%s12333_s6 + $0x260] sm:$0xff]  ;;  %v11318_v28 = vld [vmem:[%s12333_s6 + $0x258] sm:$0xff] }
  0x51   : > { %6747 = vmatpush.bf16.msra.mxu1 %v11251_v31  ;;  %v11336_v22 = vld [vmem:[%s12333_s6 + $0x2e8] sm:$0xff]  ;;  %v11327_v25 = vld [vmem:[%s12333_s6 + $0x2a0] sm:$0xff]  ;;  %v11326_v29 = vld [vmem:[%s12333_s6 + $0x298] sm:$0xff] }
  0x52   : > { %6760 = vmatpush.bf16.msra.mxu2 %v11259_v32  ;;  %v11335_v26 = vld [vmem:[%s12333_s6 + $0x2e0] sm:$0xff]  ;;  %v11334_v30 = vld [vmem:[%s12333_s6 + $0x2d8] sm:$0xff]  ;;  %v11309_v31 = vld [vmem:[%s12333_s6 + $0x210] sm:$0xff] }
  0x53   : > { %6773 = vmatpush.bf16.msra.mxu3 %v11267_v36  ;;  %6735 = vmatmul.bf16.vlgmr.msra.gmra.mxu0 %v1803_v38  ;;  %v11317_v32 = vld [vmem:[%s12333_s6 + $0x250] sm:$0xff]  ;;  %v11316_v36 = vld [vmem:[%s12333_s6 + $0x248] sm:$0xff] }
  0x54   : > { %6779 = vmatpush.bf16.msrb.mxu0 %v11282_v33  ;;  %6748 = vmatmul.bf16.vlgmr.msra.gmra.mxu1 %v1804_v43  ;;  %v11325_v33 = vld [vmem:[%s12333_s6 + $0x290] sm:$0xff]  ;;  %v11332_v38 = vld [vmem:[%s12333_s6 + $0x2c8] sm:$0xff]  ;;  %v11354_v43 = vld [vmem:[%s12333_s6 + $0x378] sm:$0xff] }
  0x55   : > { %6792 = vmatpush.bf16.msrb.mxu1 %v11290_v34  ;;  %6761 = vmatmul.bf16.vlgmr.msra.gmra.mxu2 %v1805_v40  ;;  %v11333_v34 = vld [vmem:[%s12333_s6 + $0x2d0] sm:$0xff]  ;;  %v11315_v40 = vld [vmem:[%s12333_s6 + $0x240] sm:$0xff] }
  0x56   : > { %6805 = vmatpush.bf16.msrb.mxu2 %v11298_v35  ;;  %6774 = vmatmul.bf16.vlgmr.msra.gmra.mxu3 %v1806_v45  ;;  %v11308_v35 = vld [vmem:[%s12333_s6 + $0x208] sm:$0xff]  ;;  %v11331_v45 = vld [vmem:[%s12333_s6 + $0x2c0] sm:$0xff]  ;;  %v11357_v5 = vld [vmem:[%s12333_s6 + $0x390] sm:$0xff] }
  0x57   : > { %6818 = vmatpush.bf16.msrb.mxu3 %v11306_v37  ;;  %v11324_v37 = vld [vmem:[%s12333_s6 + $0x288] sm:$0xff] }
  0x58   : > { %6780 = vmatpush.bf16.msrb.mxu0 %v11281_v39  ;;  %v11307_v39 = vld [vmem:[%s12333_s6 + $0x200] sm:$0xff] }
  0x59   : > { %6793 = vmatpush.bf16.msrb.mxu1 %v11289_v41  ;;  %v11323_v41 = vld [vmem:[%s12333_s6 + $0x280] sm:$0xff] }
  0x5a   : > { %6806 = vmatpush.bf16.msrb.mxu2 %v11297_v42  ;;  %v11346_v42 = vld [vmem:[%s12333_s6 + $0x338] sm:$0xff] }
  0x5b   : > { %6819 = vmatpush.bf16.msrb.mxu3 %v11305_v44  ;;  %v11362_v44 = vld [vmem:[%s12333_s6 + $0x3b8] sm:$0xff] }
  0x5c   : > { %6781 = vmatpush.bf16.msrb.mxu0 %v11280_v46  ;;  %v1813_v46 = vld [vmem:[#allocation1] sm:$0xff] }
  0x5d   : > { %6794 = vmatpush.bf16.msrb.mxu1 %v11288_v47  ;;  %v11370_v47 = vld [vmem:[%s12333_s6 + $0x3f8] sm:$0xff] }
  0x5e   : > { %6807 = vmatpush.bf16.msrb.mxu2 %v11296_v48  ;;  %v1815_v48 = vld [vmem:[#allocation1 + $0x12] sm:$0xff] }
  0x5f   : > { %6820 = vmatpush.bf16.msrb.mxu3 %v11304_v49  ;;  %v11345_v49 = vld [vmem:[%s12333_s6 + $0x330] sm:$0xff] }
  0x60   : > { %6782 = vmatpush.bf16.msrb.mxu0 %v11279_v50  ;;  %v1814_v50 = vld [vmem:[#allocation1 + $0x9] sm:$0xff] }
  0x61   : > { %6795 = vmatpush.bf16.msrb.mxu1 %v11287_v51  ;;  %v11353_v51 = vld [vmem:[%s12333_s6 + $0x370] sm:$0xff] }
  0x62   : > { %6808 = vmatpush.bf16.msrb.mxu2 %v11295_v52  ;;  %v1816_v52 = vld [vmem:[#allocation1 + $0x1b] sm:$0xff] }
  0x63   : > { %6821 = vmatpush.bf16.msrb.mxu3 %v11303_v53  ;;  %v11361_v53 = vld [vmem:[%s12333_s6 + $0x3b0] sm:$0xff] }
  0x64   : > { %6783 = vmatpush.bf16.msrb.mxu0 %v11278_v54  ;;  %v11369_v54 = vld [vmem:[%s12333_s6 + $0x3f0] sm:$0xff] }
  0x65   : > { %6796 = vmatpush.bf16.msrb.mxu1 %v11286_v55  ;;  %v11344_v55 = vld [vmem:[%s12333_s6 + $0x328] sm:$0xff] }
  0x66   : > { %6809 = vmatpush.bf16.msrb.mxu2 %v11294_v56  ;;  %v11352_v56 = vld [vmem:[%s12333_s6 + $0x368] sm:$0xff] }
  0x67   : > { %6822 = vmatpush.bf16.msrb.mxu3 %v11302_v57  ;;  %v11360_v57 = vld [vmem:[%s12333_s6 + $0x3a8] sm:$0xff] }
  0x68   : > { %6784 = vmatpush.bf16.msrb.mxu0 %v11277_v58  ;;  %v11368_v58 = vld [vmem:[%s12333_s6 + $0x3e8] sm:$0xff] }
  0x69   : > { %6797 = vmatpush.bf16.msrb.mxu1 %v11285_v59  ;;  %v11343_v59 = vld [vmem:[%s12333_s6 + $0x320] sm:$0xff] }
  0x6a   : > { %6810 = vmatpush.bf16.msrb.mxu2 %v11293_v60  ;;  %v11351_v60 = vld [vmem:[%s12333_s6 + $0x360] sm:$0xff] }
  0x6b   : > { %6823 = vmatpush.bf16.msrb.mxu3 %v11301_v61  ;;  %v11359_v61 = vld [vmem:[%s12333_s6 + $0x3a0] sm:$0xff] }
  0x6c   : > { %6785 = vmatpush.bf16.msrb.mxu0 %v11276_v62  ;;  %v11367_v62 = vld [vmem:[%s12333_s6 + $0x3e0] sm:$0xff] }
  0x6d   : > { %6798 = vmatpush.bf16.msrb.mxu1 %v11284_v63  ;;  %v11342_v63 = vld [vmem:[%s12333_s6 + $0x318] sm:$0xff] }
  0x6e   : > { %6811 = vmatpush.bf16.msrb.mxu2 %v11292_v0  ;;  %v11350_v0 = vld [vmem:[%s12333_s6 + $0x358] sm:$0xff] }
  0x6f   : > { %6824 = vmatpush.bf16.msrb.mxu3 %v11300_v6  ;;  %v11365_v6 = vld [vmem:[%s12333_s6 + $0x3d0] sm:$0xff] }
  0x70   : > { %6786 = vmatpush.bf16.msrb.mxu0 %v11275_v7  ;;  %v11340_v7 = vld [vmem:[%s12333_s6 + $0x308] sm:$0xff] }
  0x71   : > { %6799 = vmatpush.bf16.msrb.mxu1 %v11283_v8  ;;  %v11348_v8 = vld [vmem:[%s12333_s6 + $0x348] sm:$0xff] }
  0x72   : > { %6812 = vmatpush.bf16.msrb.mxu2 %v11291_v9  ;;  %v11356_v9 = vld [vmem:[%s12333_s6 + $0x388] sm:$0xff] }
  0x73   : > { %6825 = vmatpush.bf16.msrb.mxu3 %v11299_v13  ;;  %6787 = vmatmul.bf16.vlgmr.msrb.gmra.mxu0 %v1807_v2  ;;  %v11366_v2 = vld [vmem:[%s12333_s6 + $0x3d8] sm:$0xff] }
  0x74   : > { %6831 = vmatpush.bf16.msra.mxu0 %v11314_v10  ;;  %6800 = vmatmul.bf16.vlgmr.msrb.gmra.mxu1 %v1808_v4  ;;  %v11349_v4 = vld [vmem:[%s12333_s6 + $0x350] sm:$0xff]  ;;  %v1817_v10 = vld [vmem:[#allocation1 + $0x24] sm:$0xff] }
  0x75   : > { %6844 = vmatpush.bf16.msra.mxu1 %v11322_v11  ;;  %6813 = vmatmul.bf16.vlgmr.msrb.gmra.mxu2 %v1809_v1  ;;  %v11358_v1 = vld [vmem:[%s12333_s6 + $0x398] sm:$0xff]  ;;  %v1819_v11 = vld [vmem:[#allocation1 + $0x36] sm:$0xff] }
  0x76   : > { %6857 = vmatpush.bf16.msra.mxu2 %v11330_v12  ;;  %6826 = vmatmul.bf16.vlgmr.msrb.gmra.mxu3 %v1810_v3  ;;  %v11341_v3 = vld [vmem:[%s12333_s6 + $0x310] sm:$0xff]  ;;  %v1818_v12 = vld [vmem:[#allocation1 + $0x2d] sm:$0xff] }
  0x77   : > { %6870 = vmatpush.bf16.msra.mxu3 %v11338_v14  ;;  %v1820_v13 = vld [vmem:[#allocation1 + $0x3f] sm:$0xff]  ;;  %v222_v14 = vld [vmem:[%s12347_s8 + $0x10] sm:$0xff] }
  0x78   : > { %6832 = vmatpush.bf16.msra.mxu0 %v11313_v15  ;;  %v11364_v15 = vld [vmem:[%s12333_s6 + $0x3c8] sm:$0xff]  ;;  %1822 = vst [vmem:[#allocation1] ss:$9 sm:$0xff] %v222_v14  ;;  %v11430_v14 = vld [vmem:[%s12333_s6 + $0x5d8] sm:$0xff] }
  0x79   : > { %6845 = vmatpush.bf16.msra.mxu1 %v11321_v16  ;;  %v11339_v16 = vld [vmem:[%s12333_s6 + $0x300] sm:$0xff] }
  0x7a   : > { %6858 = vmatpush.bf16.msra.mxu2 %v11329_v17  ;;  %v11347_v17 = vld [vmem:[%s12333_s6 + $0x340] sm:$0xff] }
  0x7b   : > { %6871 = vmatpush.bf16.msra.mxu3 %v11337_v18  ;;  %v11378_v18 = vld [vmem:[%s12333_s6 + $0x438] sm:$0xff] }
  0x7c   : > { %6833 = vmatpush.bf16.msra.mxu0 %v11312_v19  ;;  %v11355_v19 = vld [vmem:[%s12333_s6 + $0x380] sm:$0xff] }
  0x7d   : > { %6846 = vmatpush.bf16.msra.mxu1 %v11320_v20  ;;  %v11386_v20 = vld [vmem:[%s12333_s6 + $0x478] sm:$0xff] }
  0x7e   : > { %6859 = vmatpush.bf16.msra.mxu2 %v11328_v21  ;;  %v11394_v21 = vld [vmem:[%s12333_s6 + $0x4b8] sm:$0xff] }
  0x7f   : > { %6872 = vmatpush.bf16.msra.mxu3 %v11336_v22  ;;  %v11363_v22 = vld [vmem:[%s12333_s6 + $0x3c0] sm:$0xff] }
  0x80   : > { %6834 = vmatpush.bf16.msra.mxu0 %v11311_v23  ;;  %v11402_v23 = vld [vmem:[%s12333_s6 + $0x4f8] sm:$0xff] }
  0x81   : > { %6847 = vmatpush.bf16.msra.mxu1 %v11319_v24  ;;  %v11377_v24 = vld [vmem:[%s12333_s6 + $0x430] sm:$0xff] }
  0x82   : > { %6860 = vmatpush.bf16.msra.mxu2 %v11327_v25  ;;  %v11385_v25 = vld [vmem:[%s12333_s6 + $0x470] sm:$0xff] }
  0x83   : > { %6873 = vmatpush.bf16.msra.mxu3 %v11335_v26  ;;  %v11393_v26 = vld [vmem:[%s12333_s6 + $0x4b0] sm:$0xff] }
  0x84   : > { %6835 = vmatpush.bf16.msra.mxu0 %v11310_v27  ;;  %v11401_v27 = vld [vmem:[%s12333_s6 + $0x4f0] sm:$0xff] }
  0x85   : > { %6848 = vmatpush.bf16.msra.mxu1 %v11318_v28  ;;  %v11376_v28 = vld [vmem:[%s12333_s6 + $0x428] sm:$0xff] }
  0x86   : > { %6861 = vmatpush.bf16.msra.mxu2 %v11326_v29  ;;  %v11384_v29 = vld [vmem:[%s12333_s6 + $0x468] sm:$0xff] }
  0x87   : > { %6874 = vmatpush.bf16.msra.mxu3 %v11334_v30  ;;  %v11392_v30 = vld [vmem:[%s12333_s6 + $0x4a8] sm:$0xff] }
  0x88   : > { %6836 = vmatpush.bf16.msra.mxu0 %v11309_v31  ;;  %v11400_v31 = vld [vmem:[%s12333_s6 + $0x4e8] sm:$0xff] }
  0x89   : > { %6849 = vmatpush.bf16.msra.mxu1 %v11317_v32  ;;  %v11375_v32 = vld [vmem:[%s12333_s6 + $0x420] sm:$0xff] }
  0x8a   : > { %6862 = vmatpush.bf16.msra.mxu2 %v11325_v33  ;;  %v11383_v33 = vld [vmem:[%s12333_s6 + $0x460] sm:$0xff] }
  0x8b   : > { %6875 = vmatpush.bf16.msra.mxu3 %v11333_v34  ;;  %v11391_v34 = vld [vmem:[%s12333_s6 + $0x4a0] sm:$0xff] }
  0x8c   : > { %6837 = vmatpush.bf16.msra.mxu0 %v11308_v35  ;;  %v11399_v35 = vld [vmem:[%s12333_s6 + $0x4e0] sm:$0xff] }
  0x8d   : > { %6850 = vmatpush.bf16.msra.mxu1 %v11316_v36  ;;  %v11374_v36 = vld [vmem:[%s12333_s6 + $0x418] sm:$0xff] }
  0x8e   : > { %6863 = vmatpush.bf16.msra.mxu2 %v11324_v37  ;;  %v11382_v37 = vld [vmem:[%s12333_s6 + $0x458] sm:$0xff] }
  0x8f   : > { %6876 = vmatpush.bf16.msra.mxu3 %v11332_v38  ;;  %v11390_v38 = vld [vmem:[%s12333_s6 + $0x498] sm:$0xff] }
  0x90   : > { %6838 = vmatpush.bf16.msra.mxu0 %v11307_v39  ;;  %v11398_v39 = vld [vmem:[%s12333_s6 + $0x4d8] sm:$0xff] }
  0x91   : > { %6851 = vmatpush.bf16.msra.mxu1 %v11315_v40  ;;  %v11373_v40 = vld [vmem:[%s12333_s6 + $0x410] sm:$0xff] }
  0x92   : > { %6864 = vmatpush.bf16.msra.mxu2 %v11323_v41  ;;  %v11381_v41 = vld [vmem:[%s12333_s6 + $0x450] sm:$0xff] }
  0x93   : > { %6877 = vmatpush.bf16.msra.mxu3 %v11331_v45  ;;  %6839 = vmatmul.bf16.vlgmr.msra.gmra.mxu0 %v1813_v46  ;;  %v11380_v45 = vld [vmem:[%s12333_s6 + $0x448] sm:$0xff] }
  0x94   : > { %6883 = vmatpush.bf16.msrb.mxu0 %v11346_v42  ;;  %6852 = vmatmul.bf16.vlgmr.msra.gmra.mxu1 %v1814_v50  ;;  %v11389_v42 = vld [vmem:[%s12333_s6 + $0x490] sm:$0xff]  ;;  %v11388_v46 = vld [vmem:[%s12333_s6 + $0x488] sm:$0xff]  ;;  %v11387_v50 = vld [vmem:[%s12333_s6 + $0x480] sm:$0xff] }
  0x95   : > { %6896 = vmatpush.bf16.msrb.mxu1 %v11354_v43  ;;  %6865 = vmatmul.bf16.vlgmr.msra.gmra.mxu2 %v1815_v48  ;;  %v11397_v43 = vld [vmem:[%s12333_s6 + $0x4d0] sm:$0xff]  ;;  %v11371_v48 = vld [vmem:[%s12333_s6 + $0x400] sm:$0xff] }
  0x96   : > { %6909 = vmatpush.bf16.msrb.mxu2 %v11362_v44  ;;  %6878 = vmatmul.bf16.vlgmr.msra.gmra.mxu3 %v1816_v52  ;;  %v11372_v44 = vld [vmem:[%s12333_s6 + $0x408] sm:$0xff]  ;;  %v11418_v52 = vld [vmem:[%s12333_s6 + $0x578] sm:$0xff] }
  0x97   : > { %6922 = vmatpush.bf16.msrb.mxu3 %v11370_v47  ;;  %v11396_v47 = vld [vmem:[%s12333_s6 + $0x4c8] sm:$0xff] }
  0x98   : > { %6884 = vmatpush.bf16.msrb.mxu0 %v11345_v49  ;;  %v11379_v49 = vld [vmem:[%s12333_s6 + $0x440] sm:$0xff] }
  0x99   : > { %6897 = vmatpush.bf16.msrb.mxu1 %v11353_v51  ;;  %v11410_v51 = vld [vmem:[%s12333_s6 + $0x538] sm:$0xff] }
  0x9a   : > { %6910 = vmatpush.bf16.msrb.mxu2 %v11361_v53  ;;  %v11426_v53 = vld [vmem:[%s12333_s6 + $0x5b8] sm:$0xff] }
  0x9b   : > { %6923 = vmatpush.bf16.msrb.mxu3 %v11369_v54  ;;  %v11395_v54 = vld [vmem:[%s12333_s6 + $0x4c0] sm:$0xff] }
  0x9c   : > { %6885 = vmatpush.bf16.msrb.mxu0 %v11344_v55  ;;  %v1823_v55 = vld [vmem:[#allocation1] sm:$0xff] }
  0x9d   : > { %6898 = vmatpush.bf16.msrb.mxu1 %v11352_v56  ;;  %v1825_v56 = vld [vmem:[#allocation1 + $0x12] sm:$0xff] }
  0x9e   : > { %6911 = vmatpush.bf16.msrb.mxu2 %v11360_v57  ;;  %v11434_v57 = vld [vmem:[%s12333_s6 + $0x5f8] sm:$0xff] }
  0x9f   : > { %6924 = vmatpush.bf16.msrb.mxu3 %v11368_v58  ;;  %v1824_v58 = vld [vmem:[#allocation1 + $0x9] sm:$0xff] }
  0xa0   : > { %6886 = vmatpush.bf16.msrb.mxu0 %v11343_v59  ;;  %v11409_v59 = vld [vmem:[%s12333_s6 + $0x530] sm:$0xff] }
  0xa1   : > { %6899 = vmatpush.bf16.msrb.mxu1 %v11351_v60  ;;  %v1826_v60 = vld [vmem:[#allocation1 + $0x1b] sm:$0xff] }
  0xa2   : > { %6912 = vmatpush.bf16.msrb.mxu2 %v11359_v61  ;;  %v11417_v61 = vld [vmem:[%s12333_s6 + $0x570] sm:$0xff] }
  0xa3   : > { %6925 = vmatpush.bf16.msrb.mxu3 %v11367_v62  ;;  %v11425_v62 = vld [vmem:[%s12333_s6 + $0x5b0] sm:$0xff] }
  0xa4   : > { %6887 = vmatpush.bf16.msrb.mxu0 %v11342_v63  ;;  %v11433_v63 = vld [vmem:[%s12333_s6 + $0x5f0] sm:$0xff] }
  0xa5   : > { %6900 = vmatpush.bf16.msrb.mxu1 %v11350_v0  ;;  %v11408_v0 = vld [vmem:[%s12333_s6 + $0x528] sm:$0xff] }
  0xa6   : > { %6913 = vmatpush.bf16.msrb.mxu2 %v11358_v1  ;;  %v11416_v1 = vld [vmem:[%s12333_s6 + $0x568] sm:$0xff] }
  0xa7   : > { %6926 = vmatpush.bf16.msrb.mxu3 %v11366_v2  ;;  %v11424_v2 = vld [vmem:[%s12333_s6 + $0x5a8] sm:$0xff] }
  0xa8   : > { %6888 = vmatpush.bf16.msrb.mxu0 %v11341_v3  ;;  %v11432_v3 = vld [vmem:[%s12333_s6 + $0x5e8] sm:$0xff] }
  0xa9   : > { %6901 = vmatpush.bf16.msrb.mxu1 %v11349_v4  ;;  %v11407_v4 = vld [vmem:[%s12333_s6 + $0x520] sm:$0xff] }
  0xaa   : > { %6914 = vmatpush.bf16.msrb.mxu2 %v11357_v5 }
  0xab   : > { %6927 = vmatpush.bf16.msrb.mxu3 %v11365_v6  ;;  %v11415_v6 = vld [vmem:[%s12333_s6 + $0x560] sm:$0xff] }
  0xac   : > { %6889 = vmatpush.bf16.msrb.mxu0 %v11340_v7  ;;  %v11423_v7 = vld [vmem:[%s12333_s6 + $0x5a0] sm:$0xff] }
  0xad   : > { %6902 = vmatpush.bf16.msrb.mxu1 %v11348_v8 }
  0xae   : > { %6915 = vmatpush.bf16.msrb.mxu2 %v11356_v9  ;;  %v11431_v9 = vld [vmem:[%s12333_s6 + $0x5e0] sm:$0xff] }
  0xaf   : > { %6928 = vmatpush.bf16.msrb.mxu3 %v11364_v15 }
  0xb0   : > { %6890 = vmatpush.bf16.msrb.mxu0 %v11339_v16  ;;  %v11405_v16 = vld [vmem:[%s12333_s6 + $0x510] sm:$0xff] }
  0xb1   : > { %6903 = vmatpush.bf16.msrb.mxu1 %v11347_v17 }
  0xb2   : > { %6916 = vmatpush.bf16.msrb.mxu2 %v11355_v19  ;;  %v11413_v19 = vld [vmem:[%s12333_s6 + $0x550] sm:$0xff] }
  0xb3   : > { %6929 = vmatpush.bf16.msrb.mxu3 %v11363_v22  ;;  %6891 = vmatmul.bf16.vlgmr.msrb.gmra.mxu0 %v1817_v10 }
  0xb4   : > { %6935 = vmatpush.bf16.msra.mxu0 %v11378_v18  ;;  %6904 = vmatmul.bf16.vlgmr.msrb.gmra.mxu1 %v1818_v12  ;;  %v11414_v12 = vld [vmem:[%s12333_s6 + $0x558] sm:$0xff] }
  0xb5   : > { %6948 = vmatpush.bf16.msra.mxu1 %v11386_v20  ;;  %6917 = vmatmul.bf16.vlgmr.msrb.gmra.mxu2 %v1819_v11  ;;  %v11406_v11 = vld [vmem:[%s12333_s6 + $0x518] sm:$0xff]  ;;  %v11421_v20 = vld [vmem:[%s12333_s6 + $0x590] sm:$0xff] }
  0xb6   : > { %6961 = vmatpush.bf16.msra.mxu2 %v11394_v21  ;;  %6930 = vmatmul.bf16.vlgmr.msrb.gmra.mxu3 %v1820_v13  ;;  %v11422_v13 = vld [vmem:[%s12333_s6 + $0x598] sm:$0xff] }
  0xb7   : > { %6974 = vmatpush.bf16.msra.mxu3 %v11402_v23  ;;  %v11429_v23 = vld [vmem:[%s12333_s6 + $0x5d0] sm:$0xff] }
  0xb8   : > { %6936 = vmatpush.bf16.msra.mxu0 %v11377_v24 }
  0xb9   : > { %6949 = vmatpush.bf16.msra.mxu1 %v11385_v25  ;;  %v11404_v25 = vld [vmem:[%s12333_s6 + $0x508] sm:$0xff] }
  0xba   : > { %6962 = vmatpush.bf16.msra.mxu2 %v11393_v26  ;;  %v11412_v26 = vld [vmem:[%s12333_s6 + $0x548] sm:$0xff] }
  0xbb   : > { %6975 = vmatpush.bf16.msra.mxu3 %v11401_v27  ;;  %v11420_v27 = vld [vmem:[%s12333_s6 + $0x588] sm:$0xff] }
  0xbc   : > { %6937 = vmatpush.bf16.msra.mxu0 %v11376_v28  ;;  %v1827_v28 = vld [vmem:[#allocation1 + $0x24] sm:$0xff] }
  0xbd   : > { %6950 = vmatpush.bf16.msra.mxu1 %v11384_v29  ;;  %v1829_v29 = vld [vmem:[#allocation1 + $0x36] sm:$0xff] }
  0xbe   : > { %6963 = vmatpush.bf16.msra.mxu2 %v11392_v30  ;;  %v1828_v30 = vld [vmem:[#allocation1 + $0x2d] sm:$0xff] }
  0xbf   : > { %6976 = vmatpush.bf16.msra.mxu3 %v11400_v31  ;;  %v1830_v31 = vld [vmem:[#allocation1 + $0x3f] sm:$0xff] }
  0xc0   : > { %6938 = vmatpush.bf16.msra.mxu0 %v11375_v32  ;;  %v223_v32 = vld [vmem:[%s12347_s8 + $0x18] sm:$0xff] }
  0xc1   : > { %6951 = vmatpush.bf16.msra.mxu1 %v11383_v33  ;;  %v11428_v33 = vld [vmem:[%s12333_s6 + $0x5c8] sm:$0xff]  ;;  %1832 = vst [vmem:[#allocation1] ss:$9 sm:$0xff] %v223_v32 }
  0xc2   : > { %6964 = vmatpush.bf16.msra.mxu2 %v11391_v34  ;;  %v11472_v32 = vld [vmem:[%s12333_s6 + $0x728] sm:$0xff] }
  0xc3   : > { %6977 = vmatpush.bf16.msra.mxu3 %v11399_v35  ;;  %v11403_v35 = vld [vmem:[%s12333_s6 + $0x500] sm:$0xff] }
  0xc4   : > { %6939 = vmatpush.bf16.msra.mxu0 %v11374_v36  ;;  %v11411_v36 = vld [vmem:[%s12333_s6 + $0x540] sm:$0xff] }
  0xc5   : > { %6952 = vmatpush.bf16.msra.mxu1 %v11382_v37  ;;  %v11419_v37 = vld [vmem:[%s12333_s6 + $0x580] sm:$0xff] }
  0xc6   : > { %6965 = vmatpush.bf16.msra.mxu2 %v11390_v38  ;;  %v11442_v38 = vld [vmem:[%s12333_s6 + $0x638] sm:$0xff] }
  0xc7   : > { %6978 = vmatpush.bf16.msra.mxu3 %v11398_v39  ;;  %v11450_v39 = vld [vmem:[%s12333_s6 + $0x678] sm:$0xff] }
  0xc8   : > { %6940 = vmatpush.bf16.msra.mxu0 %v11373_v40 }
  0xc9   : > { %6953 = vmatpush.bf16.msra.mxu1 %v11381_v41  ;;  %v11458_v41 = vld [vmem:[%s12333_s6 + $0x6b8] sm:$0xff] }
  0xca   : > { %6966 = vmatpush.bf16.msra.mxu2 %v11389_v42  ;;  %v11427_v42 = vld [vmem:[%s12333_s6 + $0x5c0] sm:$0xff] }
  0xcb   : > { %6979 = vmatpush.bf16.msra.mxu3 %v11397_v43  ;;  %v11466_v43 = vld [vmem:[%s12333_s6 + $0x6f8] sm:$0xff] }
  0xcc   : > { %6941 = vmatpush.bf16.msra.mxu0 %v11372_v44  ;;  %v11441_v44 = vld [vmem:[%s12333_s6 + $0x630] sm:$0xff] }
  0xcd   : > { %6954 = vmatpush.bf16.msra.mxu1 %v11380_v45  ;;  %v11449_v45 = vld [vmem:[%s12333_s6 + $0x670] sm:$0xff] }
  0xce   : > { %6967 = vmatpush.bf16.msra.mxu2 %v11388_v46  ;;  %v11457_v46 = vld [vmem:[%s12333_s6 + $0x6b0] sm:$0xff] }
  0xcf   : > { %6980 = vmatpush.bf16.msra.mxu3 %v11396_v47  ;;  %v11465_v47 = vld [vmem:[%s12333_s6 + $0x6f0] sm:$0xff] }
  0xd0   : > { %6942 = vmatpush.bf16.msra.mxu0 %v11371_v48  ;;  %v6736_v5 = vpop.f32.mrf.mxu0  ;;  %v11440_v48 = vld [vmem:[%s12333_s6 + $0x628] sm:$0xff] }
  0xd1   : > { %6955 = vmatpush.bf16.msra.mxu1 %v11379_v49  ;;  %v6749_v8 = vpop.f32.mrf.mxu1  ;;  %v11448_v49 = vld [vmem:[%s12333_s6 + $0x668] sm:$0xff] }
  0xd2   : > { %6968 = vmatpush.bf16.msra.mxu2 %v11387_v50  ;;  %v6750_v10 = vadd.f32 %v6749_v8, %v6736_v5  ;;  %v11456_v50 = vld [vmem:[%s12333_s6 + $0x6a8] sm:$0xff] }
  0xd3   : > { %6981 = vmatpush.bf16.msra.mxu3 %v11395_v54  ;;  %6943 = vmatmul.bf16.vlgmr.msra.gmra.mxu0 %v1823_v55  ;;  %v11455_v54 = vld [vmem:[%s12333_s6 + $0x6a0] sm:$0xff] }
  0xd4   : > { %6987 = vmatpush.bf16.msrb.mxu0 %v11410_v51  ;;  %6956 = vmatmul.bf16.vlgmr.msra.gmra.mxu1 %v1824_v58  ;;  %v11464_v51 = vld [vmem:[%s12333_s6 + $0x6e8] sm:$0xff]  ;;  %v11463_v58 = vld [vmem:[%s12333_s6 + $0x6e0] sm:$0xff] }
  0xd5   : > { %7000 = vmatpush.bf16.msrb.mxu1 %v11418_v52  ;;  %6969 = vmatmul.bf16.vlgmr.msra.gmra.mxu2 %v1825_v56  ;;  %v11439_v52 = vld [vmem:[%s12333_s6 + $0x620] sm:$0xff] }
  0xd6   : > { %7013 = vmatpush.bf16.msrb.mxu2 %v11426_v53  ;;  %6982 = vmatmul.bf16.vlgmr.msra.gmra.mxu3 %v1826_v60  ;;  %v11447_v53 = vld [vmem:[%s12333_s6 + $0x660] sm:$0xff] }
  0xd7   : > { %7026 = vmatpush.bf16.msrb.mxu3 %v11434_v57 }
  0xd8   : > { %6988 = vmatpush.bf16.msrb.mxu0 %v11409_v59  ;;  %v6762_v15 = vpop.f32.mrf.mxu2  ;;  %v6738_v18 = vpop.f32.mrf.mxu0  ;;  %v11438_v59 = vld [vmem:[%s12333_s6 + $0x618] sm:$0xff] }
  0xd9   : > { %7001 = vmatpush.bf16.msrb.mxu1 %v11417_v61  ;;  %v6763_v17 = vadd.f32 %v6762_v15, %v6750_v10  ;;  %v6775_v21 = vpop.f32.mrf.mxu3  ;;  %v6751_v22 = vpop.f32.mrf.mxu1  ;;  %v11446_v61 = vld [vmem:[%s12333_s6 + $0x658] sm:$0xff]  ;;  %v11436_v10 = vld [vmem:[%s12333_s6 + $0x608] sm:$0xff]  ;;  %v11435_v15 = vld [vmem:[%s12333_s6 + $0x600] sm:$0xff] }
  0xda   : > { %7014 = vmatpush.bf16.msrb.mxu2 %v11425_v62  ;;  %v11454_v62 = vld [vmem:[%s12333_s6 + $0x698] sm:$0xff]  ;;  %v11459_v22 = vld [vmem:[%s12333_s6 + $0x6c0] sm:$0xff] }
  0xdb   : > { %7027 = vmatpush.bf16.msrb.mxu3 %v11433_v63  ;;  %v6776_v24 = vadd.f32 %v6775_v21, %v6763_v17  ;;  %v11451_v17 = vld [vmem:[%s12333_s6 + $0x680] sm:$0xff]  ;;  %v11490_v21 = vld [vmem:[%s12333_s6 + $0x7b8] sm:$0xff] }
  0xdc   : > { %6989 = vmatpush.bf16.msrb.mxu0 %v11408_v0  ;;  %v11462_v0 = vld [vmem:[%s12333_s6 + $0x6d8] sm:$0xff] }
  0xdd   : > { %7002 = vmatpush.bf16.msrb.mxu1 %v11416_v1 }
  0xde   : > { %7015 = vmatpush.bf16.msrb.mxu2 %v11424_v2  ;;  %v11437_v2 = vld [vmem:[%s12333_s6 + $0x610] sm:$0xff] }
  0xdf   : > { %7028 = vmatpush.bf16.msrb.mxu3 %v11432_v3  ;;  %v11445_v3 = vld [vmem:[%s12333_s6 + $0x650] sm:$0xff] }
  0xe0   : > { %6990 = vmatpush.bf16.msrb.mxu0 %v11407_v4  ;;  %v6764_v34 = vpop.f32.mrf.mxu2  ;;  %v11453_v4 = vld [vmem:[%s12333_s6 + $0x690] sm:$0xff] }
  0xe1   : > { %7003 = vmatpush.bf16.msrb.mxu1 %v11415_v6  ;;  %v6777_v40 = vpop.f32.mrf.mxu3  ;;  %v11488_v34 = vld [vmem:[%s12333_s6 + $0x7a8] sm:$0xff] }
  0xe2   : > { %7016 = vmatpush.bf16.msrb.mxu2 %v11423_v7  ;;  %v11487_v40 = vld [vmem:[%s12333_s6 + $0x7a0] sm:$0xff] }
  0xe3   : > { %7029 = vmatpush.bf16.msrb.mxu3 %v11431_v9  ;;  %v11461_v9 = vld [vmem:[%s12333_s6 + $0x6d0] sm:$0xff] }
  0xe4   : > { %6991 = vmatpush.bf16.msrb.mxu0 %v11406_v11  ;;  %v11444_v11 = vld [vmem:[%s12333_s6 + $0x648] sm:$0xff] }
  0xe5   : > { %7004 = vmatpush.bf16.msrb.mxu1 %v11414_v12  ;;  %v11452_v12 = vld [vmem:[%s12333_s6 + $0x688] sm:$0xff] }
  0xe6   : > { %7017 = vmatpush.bf16.msrb.mxu2 %v11422_v13 }
  0xe7   : > { %7030 = vmatpush.bf16.msrb.mxu3 %v11430_v14  ;;  %v11460_v14 = vld [vmem:[%s12333_s6 + $0x6c8] sm:$0xff] }
  0xe8   : > { %6992 = vmatpush.bf16.msrb.mxu0 %v11405_v16  ;;  %v11443_v16 = vld [vmem:[%s12333_s6 + $0x640] sm:$0xff] }
  0xe9   : > { %7005 = vmatpush.bf16.msrb.mxu1 %v11413_v19  ;;  %v11474_v19 = vld [vmem:[%s12333_s6 + $0x738] sm:$0xff] }
  0xea   : > { %7018 = vmatpush.bf16.msrb.mxu2 %v11421_v20  ;;  %v11482_v20 = vld [vmem:[%s12333_s6 + $0x778] sm:$0xff] }
  0xeb   : > { %7031 = vmatpush.bf16.msrb.mxu3 %v11429_v23  ;;  %v1833_v23 = vld [vmem:[#allocation1] sm:$0xff] }
  0xec   : > { %6993 = vmatpush.bf16.msrb.mxu0 %v11404_v25  ;;  %v11498_v25 = vld [vmem:[%s12333_s6 + $0x7f8] sm:$0xff] }
  0xed   : > { %7006 = vmatpush.bf16.msrb.mxu1 %v11412_v26  ;;  %v1834_v26 = vld [vmem:[#allocation1 + $0x9] sm:$0xff] }
  0xee   : > { %7019 = vmatpush.bf16.msrb.mxu2 %v11420_v27  ;;  %v11473_v27 = vld [vmem:[%s12333_s6 + $0x730] sm:$0xff] }
  0xef   : > { %7032 = vmatpush.bf16.msrb.mxu3 %v11428_v33  ;;  %v11480_v33 = vld [vmem:[%s12333_s6 + $0x768] sm:$0xff] }
  0xf0   : > { %6994 = vmatpush.bf16.msrb.mxu0 %v11403_v35  ;;  %v6788_v55 = vpop.f32.mrf.mxu0  ;;  %v11496_v35 = vld [vmem:[%s12333_s6 + $0x7e8] sm:$0xff] }
  0xf1   : > { %7007 = vmatpush.bf16.msrb.mxu1 %v11411_v36  ;;  %v6801_v56 = vpop.f32.mrf.mxu1  ;;  %v6789_v57 = vadd.f32 %v6788_v55, %v6776_v24  ;;  %v1835_v24 = vld [vmem:[#allocation1 + $0x12] sm:$0xff]  ;;  %v11485_v55 = vld [vmem:[%s12333_s6 + $0x790] sm:$0xff] }
  0xf2   : > { %7020 = vmatpush.bf16.msrb.mxu2 %v11419_v37 }
  0xf3   : > { %7033 = vmatpush.bf16.msrb.mxu3 %v11427_v42  ;;  %6995 = vmatmul.bf16.vlgmr.msrb.gmra.mxu0 %v1827_v28  ;;  %v6802_v60 = vadd.f32 %v6801_v56, %v6789_v57  ;;  %v1836_v28 = vld [vmem:[#allocation1 + $0x1b] sm:$0xff] }
  0xf4   : > { %7039 = vmatpush.bf16.msra.mxu0 %v11442_v38  ;;  %7008 = vmatmul.bf16.vlgmr.msrb.gmra.mxu1 %v1828_v30  ;;  %v11489_v30 = vld [vmem:[%s12333_s6 + $0x7b0] sm:$0xff]  ;;  %v11471_v38 = vld [vmem:[%s12333_s6 + $0x720] sm:$0xff] }
  0xf5   : > { %7052 = vmatpush.bf16.msra.mxu1 %v11450_v39  ;;  %7021 = vmatmul.bf16.vlgmr.msrb.gmra.mxu2 %v1829_v29  ;;  %v11481_v29 = vld [vmem:[%s12333_s6 + $0x770] sm:$0xff]  ;;  %v11479_v39 = vld [vmem:[%s12333_s6 + $0x760] sm:$0xff] }
  0xf6   : > { %7065 = vmatpush.bf16.msra.mxu2 %v11458_v41  ;;  %7034 = vmatmul.bf16.vlgmr.msrb.gmra.mxu3 %v1830_v31  ;;  %v11497_v31 = vld [vmem:[%s12333_s6 + $0x7f0] sm:$0xff] }
  0xf7   : > { %7078 = vmatpush.bf16.msra.mxu3 %v11466_v43  ;;  %v11495_v43 = vld [vmem:[%s12333_s6 + $0x7e0] sm:$0xff]  ;;  %v11493_v57 = vld [vmem:[%s12333_s6 + $0x7d0] sm:$0xff] }
  0xf8   : > { %7040 = vmatpush.bf16.msra.mxu0 %v11441_v44  ;;  %v6814_v63 = vpop.f32.mrf.mxu2  ;;  %v6790_v6 = vpop.f32.mrf.mxu0  ;;  %v11470_v44 = vld [vmem:[%s12333_s6 + $0x718] sm:$0xff] }
  0xf9   : > { %7053 = vmatpush.bf16.msra.mxu1 %v11449_v45  ;;  %v6815_v1 = vadd.f32 %v6814_v63, %v6802_v60  ;;  %v6827_v5 = vpop.f32.mrf.mxu3  ;;  %v6803_v8 = vpop.f32.mrf.mxu1  ;;  %v11478_v45 = vld [vmem:[%s12333_s6 + $0x758] sm:$0xff]  ;;  %v11484_v60 = vld [vmem:[%s12333_s6 + $0x788] sm:$0xff]  ;;  %v11475_v6 = vld [vmem:[%s12333_s6 + $0x740] sm:$0xff] }
  0xfa   : > { %7066 = vmatpush.bf16.msra.mxu2 %v11457_v46  ;;  %v11486_v46 = vld [vmem:[%s12333_s6 + $0x798] sm:$0xff]  ;;  %v1838_v63 = vld [vmem:[#allocation1 + $0x2d] sm:$0xff] }
  0xfb   : > { %7079 = vmatpush.bf16.msra.mxu3 %v11465_v47  ;;  %v6828_v7 = vadd.f32 %v6827_v5, %v6815_v1  ;;  %v11506_v8 = vld [vmem:[%s12333_s6 + $0x838] sm:$0xff] }
  0xfc   : > { %7041 = vmatpush.bf16.msra.mxu0 %v11440_v48 }
  0xfd   : > { %7054 = vmatpush.bf16.msra.mxu1 %v11448_v49  ;;  %v11494_v49 = vld [vmem:[%s12333_s6 + $0x7d8] sm:$0xff] }
  0xfe   : > { %7067 = vmatpush.bf16.msra.mxu2 %v11456_v50 }
  0xff   : > { %7080 = vmatpush.bf16.msra.mxu3 %v11464_v51 }
 0x100   : > { %7042 = vmatpush.bf16.msra.mxu0 %v11439_v52  ;;  %v6816_v13 = vpop.f32.mrf.mxu2  ;;  %v11469_v52 = vld [vmem:[%s12333_s6 + $0x710] sm:$0xff] }
 0x101   : > { %7055 = vmatpush.bf16.msra.mxu1 %v11447_v53  ;;  %v6829_v18 = vpop.f32.mrf.mxu3  ;;  %v11505_v13 = vld [vmem:[%s12333_s6 + $0x830] sm:$0xff] }
 0x102   : > { %7068 = vmatpush.bf16.msra.mxu2 %v11455_v54  ;;  %v11477_v54 = vld [vmem:[%s12333_s6 + $0x750] sm:$0xff]  ;;  %v11512_v18 = vld [vmem:[%s12333_s6 + $0x868] sm:$0xff] }
 0x103   : > { %7081 = vmatpush.bf16.msra.mxu3 %v11463_v58  ;;  %v11468_v58 = vld [vmem:[%s12333_s6 + $0x708] sm:$0xff] }
 0x104   : > { %7043 = vmatpush.bf16.msra.mxu0 %v11438_v59  ;;  %v11476_v59 = vld [vmem:[%s12333_s6 + $0x748] sm:$0xff] }
 0x105   : > { %7056 = vmatpush.bf16.msra.mxu1 %v11446_v61  ;;  %v1837_v61 = vld [vmem:[#allocation1 + $0x24] sm:$0xff] }
 0x106   : > { %7069 = vmatpush.bf16.msra.mxu2 %v11454_v62  ;;  %v1839_v62 = vld [vmem:[#allocation1 + $0x36] sm:$0xff] }
 0x107   : > { %7082 = vmatpush.bf16.msra.mxu3 %v11462_v0  ;;  %v1840_v0 = vld [vmem:[#allocation1 + $0x3f] sm:$0xff] }
 0x108   : > { %7044 = vmatpush.bf16.msra.mxu0 %v11437_v2  ;;  %v224_v2 = vld [vmem:[%s12347_s8 + $0x20] sm:$0xff] }
 0x109   : > { %7057 = vmatpush.bf16.msra.mxu1 %v11445_v3  ;;  %v11492_v3 = vld [vmem:[%s12333_s6 + $0x7c8] sm:$0xff]  ;;  %1842 = vst [vmem:[#allocation1] ss:$9 sm:$0xff] %v224_v2 }
 0x10a   : > { %7070 = vmatpush.bf16.msra.mxu2 %v11453_v4  ;;  %v11467_v4 = vld [vmem:[%s12333_s6 + $0x700] sm:$0xff]  ;;  %v11544_v2 = vld [vmem:[%s12333_s6 + $0x968] sm:$0xff] }
 0x10b   : > { %7083 = vmatpush.bf16.msra.mxu3 %v11461_v9  ;;  %v11514_v9 = vld [vmem:[%s12333_s6 + $0x878] sm:$0xff] }
 0x10c   : > { %7045 = vmatpush.bf16.msra.mxu0 %v11436_v10  ;;  %v11522_v10 = vld [vmem:[%s12333_s6 + $0x8b8] sm:$0xff] }
 0x10d   : > { %7058 = vmatpush.bf16.msra.mxu1 %v11444_v11  ;;  %v11491_v11 = vld [vmem:[%s12333_s6 + $0x7c0] sm:$0xff] }
 0x10e   : > { %7071 = vmatpush.bf16.msra.mxu2 %v11452_v12  ;;  %v11530_v12 = vld [vmem:[%s12333_s6 + $0x8f8] sm:$0xff] }
 0x10f   : > { %7084 = vmatpush.bf16.msra.mxu3 %v11460_v14  ;;  %v11513_v14 = vld [vmem:[%s12333_s6 + $0x870] sm:$0xff] }
 0x110   : > { %7046 = vmatpush.bf16.msra.mxu0 %v11435_v15  ;;  %v6840_v36 = vpop.f32.mrf.mxu0  ;;  %v11521_v15 = vld [vmem:[%s12333_s6 + $0x8b0] sm:$0xff] }
 0x111   : > { %7059 = vmatpush.bf16.msra.mxu1 %v11443_v16  ;;  %v6841_v37 = vadd.f32 %v6840_v36, %v6828_v7  ;;  %v6853_v41 = vpop.f32.mrf.mxu1  ;;  %v11483_v7 = vld [vmem:[%s12333_s6 + $0x780] sm:$0xff]  ;;  %v11529_v16 = vld [vmem:[%s12333_s6 + $0x8f0] sm:$0xff] }
 0x112   : > { %7072 = vmatpush.bf16.msra.mxu2 %v11451_v17  ;;  %v11504_v17 = vld [vmem:[%s12333_s6 + $0x828] sm:$0xff] }
 0x113   : > { %7085 = vmatpush.bf16.msra.mxu3 %v11459_v22  ;;  %7047 = vmatmul.bf16.vlgmr.msra.gmra.mxu0 %v1833_v23  ;;  %v6854_v42 = vadd.f32 %v6853_v41, %v6841_v37  ;;  %v11503_v23 = vld [vmem:[%s12333_s6 + $0x820] sm:$0xff]  ;;  %v11501_v37 = vld [vmem:[%s12333_s6 + $0x810] sm:$0xff] }
 0x114   : > { %7091 = vmatpush.bf16.msrb.mxu0 %v11474_v19  ;;  %7060 = vmatmul.bf16.vlgmr.msra.gmra.mxu1 %v1834_v26  ;;  %v11520_v19 = vld [vmem:[%s12333_s6 + $0x8a8] sm:$0xff]  ;;  %v11519_v26 = vld [vmem:[%s12333_s6 + $0x8a0] sm:$0xff]  ;;  %v11517_v41 = vld [vmem:[%s12333_s6 + $0x890] sm:$0xff] }
 0x115   : > { %7104 = vmatpush.bf16.msrb.mxu1 %v11482_v20  ;;  %7073 = vmatmul.bf16.vlgmr.msra.gmra.mxu2 %v1835_v24  ;;  %v11528_v20 = vld [vmem:[%s12333_s6 + $0x8e8] sm:$0xff] }
 0x116   : > { %7117 = vmatpush.bf16.msrb.mxu2 %v11490_v21  ;;  %7086 = vmatmul.bf16.vlgmr.msra.gmra.mxu3 %v1836_v28  ;;  %v11527_v28 = vld [vmem:[%s12333_s6 + $0x8e0] sm:$0xff] }
 0x117   : > { %7130 = vmatpush.bf16.msrb.mxu3 %v11498_v25  ;;  %v11511_v25 = vld [vmem:[%s12333_s6 + $0x860] sm:$0xff] }
 0x118   : > { %7092 = vmatpush.bf16.msrb.mxu0 %v11473_v27  ;;  %v6866_v47 = vpop.f32.mrf.mxu2  ;;  %v6842_v50 = vpop.f32.mrf.mxu0 }
 0x119   : > { %7105 = vmatpush.bf16.msrb.mxu1 %v11481_v29  ;;  %v6867_v48 = vadd.f32 %v6866_v47, %v6854_v42  ;;  %v6879_v51 = vpop.f32.mrf.mxu3  ;;  %v6855_v56 = vpop.f32.mrf.mxu1  ;;  %v11502_v29 = vld [vmem:[%s12333_s6 + $0x818] sm:$0xff]  ;;  %v11525_v42 = vld [vmem:[%s12333_s6 + $0x8d0] sm:$0xff]  ;;  %v11524_v47 = vld [vmem:[%s12333_s6 + $0x8c8] sm:$0xff] }
 0x11a   : > { %7118 = vmatpush.bf16.msrb.mxu2 %v11489_v30  ;;  %v11510_v30 = vld [vmem:[%s12333_s6 + $0x858] sm:$0xff]  ;;  %v11507_v50 = vld [vmem:[%s12333_s6 + $0x840] sm:$0xff] }
 0x11b   : > { %7131 = vmatpush.bf16.msrb.mxu3 %v11497_v31  ;;  %v6880_v53 = vadd.f32 %v6879_v51, %v6867_v48  ;;  %v11518_v31 = vld [vmem:[%s12333_s6 + $0x898] sm:$0xff]  ;;  %v11515_v51 = vld [vmem:[%s12333_s6 + $0x880] sm:$0xff] }
 0x11c   : > { %7093 = vmatpush.bf16.msrb.mxu0 %v11472_v32  ;;  %v1843_v56 = vld [vmem:[#allocation1] sm:$0xff] }
 0x11d   : > { %7106 = vmatpush.bf16.msrb.mxu1 %v11480_v33 }
 0x11e   : > { %7119 = vmatpush.bf16.msrb.mxu2 %v11488_v34  ;;  %v11526_v34 = vld [vmem:[%s12333_s6 + $0x8d8] sm:$0xff] }
 0x11f   : > { %7132 = vmatpush.bf16.msrb.mxu3 %v11496_v35 }
 0x120   : > { %7094 = vmatpush.bf16.msrb.mxu0 %v11471_v38  ;;  %v6868_v1 = vpop.f32.mrf.mxu2 }
 0x121   : > { %7107 = vmatpush.bf16.msrb.mxu1 %v11479_v39  ;;  %v6881_v5 = vpop.f32.mrf.mxu3  ;;  %v11536_v1 = vld [vmem:[%s12333_s6 + $0x928] sm:$0xff] }
 0x122   : > { %7120 = vmatpush.bf16.msrb.mxu2 %v11487_v40  ;;  %v11509_v40 = vld [vmem:[%s12333_s6 + $0x850] sm:$0xff] }
 0x123   : > { %7133 = vmatpush.bf16.msrb.mxu3 %v11495_v43  ;;  %v11500_v43 = vld [vmem:[%s12333_s6 + $0x808] sm:$0xff] }
 0x124   : > { %7095 = vmatpush.bf16.msrb.mxu0 %v11470_v44  ;;  %v11508_v44 = vld [vmem:[%s12333_s6 + $0x848] sm:$0xff] }
 0x125   : > { %7108 = vmatpush.bf16.msrb.mxu1 %v11478_v45  ;;  %v11516_v45 = vld [vmem:[%s12333_s6 + $0x888] sm:$0xff] }
 0x126   : > { %7121 = vmatpush.bf16.msrb.mxu2 %v11486_v46 }
 0x127   : > { %7134 = vmatpush.bf16.msrb.mxu3 %v11494_v49  ;;  %v11499_v49 = vld [vmem:[%s12333_s6 + $0x800] sm:$0xff] }
 0x128   : > { %7096 = vmatpush.bf16.msrb.mxu0 %v11469_v52  ;;  %v11538_v52 = vld [vmem:[%s12333_s6 + $0x938] sm:$0xff] }
 0x129   : > { %7109 = vmatpush.bf16.msrb.mxu1 %v11477_v54  ;;  %v11554_v54 = vld [vmem:[%s12333_s6 + $0x9b8] sm:$0xff] }
 0x12a   : > { %7122 = vmatpush.bf16.msrb.mxu2 %v11485_v55  ;;  %v11523_v55 = vld [vmem:[%s12333_s6 + $0x8c0] sm:$0xff] }
 0x12b   : > { %7135 = vmatpush.bf16.msrb.mxu3 %v11493_v57  ;;  %v1845_v57 = vld [vmem:[#allocation1 + $0x12] sm:$0xff] }
 0x12c   : > { %7097 = vmatpush.bf16.msrb.mxu0 %v11468_v58  ;;  %v11562_v58 = vld [vmem:[%s12333_s6 + $0x9f8] sm:$0xff] }
 0x12d   : > { %7110 = vmatpush.bf16.msrb.mxu1 %v11476_v59  ;;  %v1844_v59 = vld [vmem:[#allocation1 + $0x9] sm:$0xff] }
 0x12e   : > { %7123 = vmatpush.bf16.msrb.mxu2 %v11484_v60  ;;  %v11537_v60 = vld [vmem:[%s12333_s6 + $0x930] sm:$0xff] }
 0x12f   : > { %7136 = vmatpush.bf16.msrb.mxu3 %v11492_v3  ;;  %v11552_v3 = vld [vmem:[%s12333_s6 + $0x9a8] sm:$0xff] }
 0x130   : > { %7098 = vmatpush.bf16.msrb.mxu0 %v11467_v4  ;;  %v6892_v21 = vpop.f32.mrf.mxu0  ;;  %v11560_v4 = vld [vmem:[%s12333_s6 + $0x9e8] sm:$0xff] }
 0x131   : > { %7111 = vmatpush.bf16.msrb.mxu1 %v11475_v6  ;;  %v6893_v22 = vadd.f32 %v6892_v21, %v6880_v53  ;;  %v6905_v24 = vpop.f32.mrf.mxu1  ;;  %v11546_v53 = vld [vmem:[%s12333_s6 + $0x978] sm:$0xff] }
 0x132   : > { %7124 = vmatpush.bf16.msrb.mxu2 %v11483_v7  ;;  %v11535_v7 = vld [vmem:[%s12333_s6 + $0x920] sm:$0xff] }
 0x133   : > { %7137 = vmatpush.bf16.msrb.mxu3 %v11491_v11  ;;  %7099 = vmatmul.bf16.vlgmr.msrb.gmra.mxu0 %v1837_v61  ;;  %v6906_v27 = vadd.f32 %v6905_v24, %v6893_v22  ;;  %v1846_v61 = vld [vmem:[#allocation1 + $0x1b] sm:$0xff] }
 0x134   : > { %7143 = vmatpush.bf16.msra.mxu0 %v11506_v8  ;;  %7112 = vmatmul.bf16.vlgmr.msrb.gmra.mxu1 %v1838_v63  ;;  %v11553_v63 = vld [vmem:[%s12333_s6 + $0x9b0] sm:$0xff] }
 0x135   : > { %7156 = vmatpush.bf16.msra.mxu1 %v11514_v9  ;;  %7125 = vmatmul.bf16.vlgmr.msrb.gmra.mxu2 %v1839_v62  ;;  %v11545_v62 = vld [vmem:[%s12333_s6 + $0x970] sm:$0xff]  ;;  %v11543_v9 = vld [vmem:[%s12333_s6 + $0x960] sm:$0xff] }
 0x136   : > { %7169 = vmatpush.bf16.msra.mxu2 %v11522_v10  ;;  %7138 = vmatmul.bf16.vlgmr.msrb.gmra.mxu3 %v1840_v0  ;;  %v11561_v0 = vld [vmem:[%s12333_s6 + $0x9f0] sm:$0xff]  ;;  %v11551_v10 = vld [vmem:[%s12333_s6 + $0x9a0] sm:$0xff] }
 0x137   : > { %7182 = vmatpush.bf16.msra.mxu3 %v11530_v12  ;;  %v11559_v12 = vld [vmem:[%s12333_s6 + $0x9e0] sm:$0xff]  ;;  %v11533_v22 = vld [vmem:[%s12333_s6 + $0x910] sm:$0xff] }
 0x138   : > { %7144 = vmatpush.bf16.msra.mxu0 %v11505_v13  ;;  %v6918_v32 = vpop.f32.mrf.mxu2  ;;  %v6894_v36 = vpop.f32.mrf.mxu0  ;;  %v11534_v13 = vld [vmem:[%s12333_s6 + $0x918] sm:$0xff]  ;;  %v11541_v24 = vld [vmem:[%s12333_s6 + $0x950] sm:$0xff] }
 0x139   : > { %7157 = vmatpush.bf16.msra.mxu1 %v11513_v14  ;;  %v6919_v33 = vadd.f32 %v6918_v32, %v6906_v27  ;;  %v6931_v35 = vpop.f32.mrf.mxu3  ;;  %v6907_v38 = vpop.f32.mrf.mxu1  ;;  %v11542_v14 = vld [vmem:[%s12333_s6 + $0x958] sm:$0xff]  ;;  %v11532_v27 = vld [vmem:[%s12333_s6 + $0x908] sm:$0xff] }
 0x13a   : > { %7170 = vmatpush.bf16.msra.mxu2 %v11521_v15  ;;  %v11550_v15 = vld [vmem:[%s12333_s6 + $0x998] sm:$0xff]  ;;  %v11556_v36 = vld [vmem:[%s12333_s6 + $0x9c8] sm:$0xff]  ;;  %v11531_v38 = vld [vmem:[%s12333_s6 + $0x900] sm:$0xff] }
 0x13b   : > { %7183 = vmatpush.bf16.msra.mxu3 %v11529_v16  ;;  %v6932_v39 = vadd.f32 %v6931_v35, %v6919_v33  ;;  %v1848_v33 = vld [vmem:[#allocation1 + $0x2d] sm:$0xff] }
 0x13c   : > { %7145 = vmatpush.bf16.msra.mxu0 %v11504_v17  ;;  %v225_v35 = vld [vmem:[%s12347_s8 + $0x28] sm:$0xff] }
 0x13d   : > { %7158 = vmatpush.bf16.msra.mxu1 %v11512_v18  ;;  %v11558_v18 = vld [vmem:[%s12333_s6 + $0x9d8] sm:$0xff] }
 0x13e   : > { %7171 = vmatpush.bf16.msra.mxu2 %v11520_v19 }
 0x13f   : > { %7184 = vmatpush.bf16.msra.mxu3 %v11528_v20 }
 0x140   : > { %7146 = vmatpush.bf16.msra.mxu0 %v11503_v23  ;;  %v6920_v46 = vpop.f32.mrf.mxu2 }
 0x141   : > { %7159 = vmatpush.bf16.msra.mxu1 %v11511_v25  ;;  %v6933_v48 = vpop.f32.mrf.mxu3  ;;  %v11549_v25 = vld [vmem:[%s12333_s6 + $0x990] sm:$0xff] }
 0x142   : > { %7172 = vmatpush.bf16.msra.mxu2 %v11519_v26  ;;  %v11557_v26 = vld [vmem:[%s12333_s6 + $0x9d0] sm:$0xff] }
 0x143   : > { %7185 = vmatpush.bf16.msra.mxu3 %v11527_v28  ;;  %v11540_v28 = vld [vmem:[%s12333_s6 + $0x948] sm:$0xff]  ;;  %v11569_v46 = vld [vmem:[%s12333_s6 + $0xa30] sm:$0xff] }
 0x144   : > { %7147 = vmatpush.bf16.msra.mxu0 %v11502_v29  ;;  %v11548_v29 = vld [vmem:[%s12333_s6 + $0x988] sm:$0xff]  ;;  %v11585_v48 = vld [vmem:[%s12333_s6 + $0xab0] sm:$0xff] }
 0x145   : > { %7160 = vmatpush.bf16.msra.mxu1 %v11510_v30  ;;  %v1847_v30 = vld [vmem:[#allocation1 + $0x24] sm:$0xff] }
 0x146   : > { %7173 = vmatpush.bf16.msra.mxu2 %v11518_v31  ;;  %v1849_v31 = vld [vmem:[#allocation1 + $0x36] sm:$0xff] }
 0x147   : > { %7186 = vmatpush.bf16.msra.mxu3 %v11526_v34  ;;  %v1850_v34 = vld [vmem:[#allocation1 + $0x3f] sm:$0xff] }
 0x148   : > { %7148 = vmatpush.bf16.msra.mxu0 %v11501_v37  ;;  %1852 = vst [vmem:[#allocation1] ss:$9 sm:$0xff] %v225_v35  ;;  %v11608_v35 = vld [vmem:[%s12333_s6 + $0xb68] sm:$0xff] }
 0x149   : > { %7161 = vmatpush.bf16.msra.mxu1 %v11509_v40  ;;  %v11547_v40 = vld [vmem:[%s12333_s6 + $0x980] sm:$0xff] }
 0x14a   : > { %7174 = vmatpush.bf16.msra.mxu2 %v11517_v41  ;;  %v11570_v41 = vld [vmem:[%s12333_s6 + $0xa38] sm:$0xff] }
 0x14b   : > { %7187 = vmatpush.bf16.msra.mxu3 %v11525_v42  ;;  %v11578_v42 = vld [vmem:[%s12333_s6 + $0xa78] sm:$0xff] }
 0x14c   : > { %7149 = vmatpush.bf16.msra.mxu0 %v11500_v43  ;;  %v11586_v43 = vld [vmem:[%s12333_s6 + $0xab8] sm:$0xff] }
 0x14d   : > { %7162 = vmatpush.bf16.msra.mxu1 %v11508_v44  ;;  %v11555_v44 = vld [vmem:[%s12333_s6 + $0x9c0] sm:$0xff] }
 0x14e   : > { %7175 = vmatpush.bf16.msra.mxu2 %v11516_v45  ;;  %v11594_v45 = vld [vmem:[%s12333_s6 + $0xaf8] sm:$0xff] }
 0x14f   : > { %7188 = vmatpush.bf16.msra.mxu3 %v11524_v47  ;;  %v11577_v47 = vld [vmem:[%s12333_s6 + $0xa70] sm:$0xff] }
 0x150   : > { %7150 = vmatpush.bf16.msra.mxu0 %v11499_v49  ;;  %v6944_v5 = vpop.f32.mrf.mxu0  ;;  %v11593_v49 = vld [vmem:[%s12333_s6 + $0xaf0] sm:$0xff] }
 0x151   : > { %7163 = vmatpush.bf16.msra.mxu1 %v11507_v50  ;;  %v6945_v6 = vadd.f32 %v6944_v5, %v6932_v39  ;;  %v6957_v8 = vpop.f32.mrf.mxu1  ;;  %v11539_v39 = vld [vmem:[%s12333_s6 + $0x940] sm:$0xff]  ;;  %v11568_v50 = vld [vmem:[%s12333_s6 + $0xa28] sm:$0xff] }
 0x152   : > { %7176 = vmatpush.bf16.msra.mxu2 %v11515_v51  ;;  %v11576_v51 = vld [vmem:[%s12333_s6 + $0xa68] sm:$0xff] }
 0x153   : > { %7189 = vmatpush.bf16.msra.mxu3 %v11523_v55  ;;  %7151 = vmatmul.bf16.vlgmr.msra.gmra.mxu0 %v1843_v56  ;;  %v6958_v11 = vadd.f32 %v6957_v8, %v6945_v6  ;;  %v11567_v56 = vld [vmem:[%s12333_s6 + $0xa20] sm:$0xff] }
 0x154   : > { %7195 = vmatpush.bf16.msrb.mxu0 %v11538_v52  ;;  %7164 = vmatmul.bf16.vlgmr.msra.gmra.mxu1 %v1844_v59  ;;  %v11584_v52 = vld [vmem:[%s12333_s6 + $0xaa8] sm:$0xff]  ;;  %v11583_v59 = vld [vmem:[%s12333_s6 + $0xaa0] sm:$0xff] }
 0x155   : > { %7208 = vmatpush.bf16.msrb.mxu1 %v11546_v53  ;;  %7177 = vmatmul.bf16.vlgmr.msra.gmra.mxu2 %v1845_v57  ;;  %v11592_v53 = vld [vmem:[%s12333_s6 + $0xae8] sm:$0xff] }
 0x156   : > { %7221 = vmatpush.bf16.msrb.mxu2 %v11554_v54  ;;  %7190 = vmatmul.bf16.vlgmr.msra.gmra.mxu3 %v1846_v61  ;;  %v11591_v61 = vld [vmem:[%s12333_s6 + $0xae0] sm:$0xff] }
 0x157   : > { %7234 = vmatpush.bf16.msrb.mxu3 %v11562_v58  ;;  %v11575_v58 = vld [vmem:[%s12333_s6 + $0xa60] sm:$0xff] }
 0x158   : > { %7196 = vmatpush.bf16.msrb.mxu0 %v11537_v60  ;;  %v6970_v16 = vpop.f32.mrf.mxu2  ;;  %v6946_v20 = vpop.f32.mrf.mxu0 }
 0x159   : > { %7209 = vmatpush.bf16.msrb.mxu1 %v11545_v62  ;;  %v6971_v17 = vadd.f32 %v6970_v16, %v6958_v11  ;;  %v6983_v19 = vpop.f32.mrf.mxu3  ;;  %v6959_v23 = vpop.f32.mrf.mxu1  ;;  %v11566_v62 = vld [vmem:[%s12333_s6 + $0xa18] sm:$0xff]  ;;  %v11589_v11 = vld [vmem:[%s12333_s6 + $0xad0] sm:$0xff]  ;;  %v11588_v16 = vld [vmem:[%s12333_s6 + $0xac8] sm:$0xff] }
 0x15a   : > { %7222 = vmatpush.bf16.msrb.mxu2 %v11553_v63  ;;  %v11574_v63 = vld [vmem:[%s12333_s6 + $0xa58] sm:$0xff]  ;;  %v11579_v20 = vld [vmem:[%s12333_s6 + $0xa80] sm:$0xff] }
 0x15b   : > { %7235 = vmatpush.bf16.msrb.mxu3 %v11561_v0  ;;  %v12664_v21 = vadd.f32 %v6983_v19, %v6971_v17  ;;  %v11582_v0 = vld [vmem:[%s12333_s6 + $0xa98] sm:$0xff]  ;;  %v11571_v19 = vld [vmem:[%s12333_s6 + $0xa40] sm:$0xff] }
 0x15c   : > { %7197 = vmatpush.bf16.msrb.mxu0 %v11536_v1  ;;  %v11618_v23 = vld [vmem:[%s12333_s6 + $0xbb8] sm:$0xff] }
 0x15d   : > { %7210 = vmatpush.bf16.msrb.mxu1 %v11544_v2 }
 0x15e   : > { %7223 = vmatpush.bf16.msrb.mxu2 %v11552_v3  ;;  %v11590_v3 = vld [vmem:[%s12333_s6 + $0xad8] sm:$0xff] }
 0x15f   : > { %7236 = vmatpush.bf16.msrb.mxu3 %v11560_v4 }
 0x160   : > { %7198 = vmatpush.bf16.msrb.mxu0 %v11535_v7  ;;  %v6972_v32 = vpop.f32.mrf.mxu2  ;;  %v11565_v7 = vld [vmem:[%s12333_s6 + $0xa10] sm:$0xff] }
 0x161   : > { %7211 = vmatpush.bf16.msrb.mxu1 %v11543_v9  ;;  %v6985_v37 = vpop.f32.mrf.mxu3  ;;  %v11573_v9 = vld [vmem:[%s12333_s6 + $0xa50] sm:$0xff] }
 0x162   : > { %7224 = vmatpush.bf16.msrb.mxu2 %v11551_v10  ;;  %v11581_v10 = vld [vmem:[%s12333_s6 + $0xa90] sm:$0xff]  ;;  %v11624_v37 = vld [vmem:[%s12333_s6 + $0xbe8] sm:$0xff] }
 0x163   : > { %7237 = vmatpush.bf16.msrb.mxu3 %v11559_v12  ;;  %v11564_v12 = vld [vmem:[%s12333_s6 + $0xa08] sm:$0xff]  ;;  %v11617_v32 = vld [vmem:[%s12333_s6 + $0xbb0] sm:$0xff] }
 0x164   : > { %7199 = vmatpush.bf16.msrb.mxu0 %v11534_v13  ;;  %v11572_v13 = vld [vmem:[%s12333_s6 + $0xa48] sm:$0xff] }
 0x165   : > { %7212 = vmatpush.bf16.msrb.mxu1 %v11542_v14  ;;  %v11580_v14 = vld [vmem:[%s12333_s6 + $0xa88] sm:$0xff] }
 0x166   : > { %7225 = vmatpush.bf16.msrb.mxu2 %v11550_v15 }
 0x167   : > { %7238 = vmatpush.bf16.msrb.mxu3 %v11558_v18  ;;  %v11563_v18 = vld [vmem:[%s12333_s6 + $0xa00] sm:$0xff] }
 0x168   : > { %7200 = vmatpush.bf16.msrb.mxu0 %v11533_v22  ;;  %v11610_v22 = vld [vmem:[%s12333_s6 + $0xb78] sm:$0xff] }
 0x169   : > { %7213 = vmatpush.bf16.msrb.mxu1 %v11541_v24  ;;  %v11587_v24 = vld [vmem:[%s12333_s6 + $0xac0] sm:$0xff] }
 0x16a   : > { %7226 = vmatpush.bf16.msrb.mxu2 %v11549_v25  ;;  %v1853_v25 = vld [vmem:[#allocation1] sm:$0xff] }
 0x16b   : > { %7239 = vmatpush.bf16.msrb.mxu3 %v11557_v26  ;;  %v1855_v26 = vld [vmem:[#allocation1 + $0x12] sm:$0xff] }
 0x16c   : > { %7201 = vmatpush.bf16.msrb.mxu0 %v11532_v27  ;;  %v11626_v27 = vld [vmem:[%s12333_s6 + $0xbf8] sm:$0xff] }
 0x16d   : > { %7214 = vmatpush.bf16.msrb.mxu1 %v11540_v28  ;;  %v1854_v28 = vld [vmem:[#allocation1 + $0x9] sm:$0xff] }
 0x16e   : > { %7227 = vmatpush.bf16.msrb.mxu2 %v11548_v29  ;;  %v11601_v29 = vld [vmem:[%s12333_s6 + $0xb30] sm:$0xff] }
 0x16f   : > { %7240 = vmatpush.bf16.msrb.mxu3 %v11556_v36  ;;  %v11616_v36 = vld [vmem:[%s12333_s6 + $0xba8] sm:$0xff] }
 0x170   : > { %7202 = vmatpush.bf16.msrb.mxu0 %v11531_v38  ;;  %v6996_v54 = vpop.f32.mrf.mxu0 }
 0x171   : > { %7215 = vmatpush.bf16.msrb.mxu1 %v11539_v39  ;;  %v6997_v55 = vadd.f32 %v6996_v54, %v12664_v21  ;;  %v7009_v57 = vpop.f32.mrf.mxu1  ;;  %v11602_v21 = vld [vmem:[%s12333_s6 + $0xb38] sm:$0xff] }
 0x172   : > { %7228 = vmatpush.bf16.msrb.mxu2 %v11547_v40  ;;  %v11599_v40 = vld [vmem:[%s12333_s6 + $0xb20] sm:$0xff] }
 0x173   : > { %7241 = vmatpush.bf16.msrb.mxu3 %v11555_v44  ;;  %7203 = vmatmul.bf16.vlgmr.msrb.gmra.mxu0 %v1847_v30  ;;  %v7010_v60 = vadd.f32 %v7009_v57, %v6997_v55  ;;  %v1856_v30 = vld [vmem:[#allocation1 + $0x1b] sm:$0xff] }
 0x174   : > { %7247 = vmatpush.bf16.msra.mxu0 %v11570_v41  ;;  %7216 = vmatmul.bf16.vlgmr.msrb.gmra.mxu1 %v1848_v33  ;;  %v11625_v33 = vld [vmem:[%s12333_s6 + $0xbf0] sm:$0xff] }
 0x175   : > { %7260 = vmatpush.bf16.msra.mxu1 %v11578_v42  ;;  %7229 = vmatmul.bf16.vlgmr.msrb.gmra.mxu2 %v1849_v31  ;;  %v11609_v31 = vld [vmem:[%s12333_s6 + $0xb70] sm:$0xff]  ;;  %v11607_v42 = vld [vmem:[%s12333_s6 + $0xb60] sm:$0xff] }
 0x176   : > { %7273 = vmatpush.bf16.msra.mxu2 %v11586_v43  ;;  %7242 = vmatmul.bf16.vlgmr.msrb.gmra.mxu3 %v1850_v34  ;;  %v11600_v34 = vld [vmem:[%s12333_s6 + $0xb28] sm:$0xff]  ;;  %v11615_v43 = vld [vmem:[%s12333_s6 + $0xba0] sm:$0xff]  ;;  %v11597_v55 = vld [vmem:[%s12333_s6 + $0xb10] sm:$0xff] }
 0x177   : > { %7286 = vmatpush.bf16.msra.mxu3 %v11594_v45  ;;  %v11623_v45 = vld [vmem:[%s12333_s6 + $0xbe0] sm:$0xff]  ;;  %v11605_v57 = vld [vmem:[%s12333_s6 + $0xb50] sm:$0xff] }
 0x178   : > { %7248 = vmatpush.bf16.msra.mxu0 %v11569_v46  ;;  %v7022_v1 = vpop.f32.mrf.mxu2  ;;  %v6998_v5 = vpop.f32.mrf.mxu0  ;;  %v11598_v46 = vld [vmem:[%s12333_s6 + $0xb18] sm:$0xff] }
 0x179   : > { %7261 = vmatpush.bf16.msra.mxu1 %v11577_v47  ;;  %v7023_v2 = vadd.f32 %v7022_v1, %v7010_v60  ;;  %v7035_v4 = vpop.f32.mrf.mxu3  ;;  %v7011_v8 = vpop.f32.mrf.mxu1  ;;  %v11606_v47 = vld [vmem:[%s12333_s6 + $0xb58] sm:$0xff]  ;;  %v11596_v60 = vld [vmem:[%s12333_s6 + $0xb08] sm:$0xff] }
 0x17a   : > { %7274 = vmatpush.bf16.msra.mxu2 %v11585_v48  ;;  %v11614_v48 = vld [vmem:[%s12333_s6 + $0xb98] sm:$0xff]  ;;  %v11620_v5 = vld [vmem:[%s12333_s6 + $0xbc8] sm:$0xff]  ;;  %v11603_v8 = vld [vmem:[%s12333_s6 + $0xb40] sm:$0xff] }
 0x17b   : > { %7287 = vmatpush.bf16.msra.mxu3 %v11593_v49  ;;  %v7036_v6 = vadd.f32 %v7035_v4, %v7023_v2  ;;  %v1858_v2 = vld [vmem:[#allocation1 + $0x2d] sm:$0xff] }
 0x17c   : > { %7249 = vmatpush.bf16.msra.mxu0 %v11568_v50  ;;  %v226_v4 = vld [vmem:[%s12347_s8 + $0x30] sm:$0xff] }
 0x17d   : > { %7262 = vmatpush.bf16.msra.mxu1 %v11576_v51  ;;  %v11622_v51 = vld [vmem:[%s12333_s6 + $0xbd8] sm:$0xff] }
 0x17e   : > { %7275 = vmatpush.bf16.msra.mxu2 %v11584_v52 }
 0x17f   : > { %7288 = vmatpush.bf16.msra.mxu3 %v11592_v53 }
 0x180   : > { %7250 = vmatpush.bf16.msra.mxu0 %v11567_v56  ;;  %v7024_v15 = vpop.f32.mrf.mxu2 }
 0x181   : > { %7263 = vmatpush.bf16.msra.mxu1 %v11575_v58  ;;  %v7037_v17 = vpop.f32.mrf.mxu3  ;;  %v11613_v58 = vld [vmem:[%s12333_s6 + $0xb90] sm:$0xff] }
 0x182   : > { %7276 = vmatpush.bf16.msra.mxu2 %v11583_v59  ;;  %v11621_v59 = vld [vmem:[%s12333_s6 + $0xbd0] sm:$0xff] }
 0x183   : > { %7289 = vmatpush.bf16.msra.mxu3 %v11591_v61  ;;  %v11604_v61 = vld [vmem:[%s12333_s6 + $0xb48] sm:$0xff]  ;;  %v11633_v15 = vld [vmem:[%s12333_s6 + $0xc30] sm:$0xff] }
 0x184   : > { %7251 = vmatpush.bf16.msra.mxu0 %v11566_v62  ;;  %v11612_v62 = vld [vmem:[%s12333_s6 + $0xb88] sm:$0xff]  ;;  %v11649_v17 = vld [vmem:[%s12333_s6 + $0xcb0] sm:$0xff] }
 0x185   : > { %7264 = vmatpush.bf16.msra.mxu1 %v11574_v63  ;;  %v1857_v63 = vld [vmem:[#allocation1 + $0x24] sm:$0xff] }
 0x186   : > { %7277 = vmatpush.bf16.msra.mxu2 %v11582_v0  ;;  %v1859_v0 = vld [vmem:[#allocation1 + $0x36] sm:$0xff] }
 0x187   : > { %7290 = vmatpush.bf16.msra.mxu3 %v11590_v3  ;;  %v1860_v3 = vld [vmem:[#allocation1 + $0x3f] sm:$0xff] }
 0x188   : > { %7252 = vmatpush.bf16.msra.mxu0 %v11565_v7  ;;  %1862 = vst [vmem:[#allocation1] ss:$9 sm:$0xff] %v226_v4  ;;  %v11595_v7 = vld [vmem:[%s12333_s6 + $0xb00] sm:$0xff]  ;;  %v11672_v4 = vld [vmem:[%s12333_s6 + $0xd68] sm:$0xff] }
 0x189   : > { %7265 = vmatpush.bf16.msra.mxu1 %v11573_v9  ;;  %v11611_v9 = vld [vmem:[%s12333_s6 + $0xb80] sm:$0xff] }
 0x18a   : > { %7278 = vmatpush.bf16.msra.mxu2 %v11581_v10  ;;  %v11634_v10 = vld [vmem:[%s12333_s6 + $0xc38] sm:$0xff] }
 0x18b   : > { %7291 = vmatpush.bf16.msra.mxu3 %v11589_v11  ;;  %v11642_v11 = vld [vmem:[%s12333_s6 + $0xc78] sm:$0xff] }
 0x18c   : > { %7253 = vmatpush.bf16.msra.mxu0 %v11564_v12  ;;  %v11650_v12 = vld [vmem:[%s12333_s6 + $0xcb8] sm:$0xff] }
 0x18d   : > { %7266 = vmatpush.bf16.msra.mxu1 %v11572_v13  ;;  %v11619_v13 = vld [vmem:[%s12333_s6 + $0xbc0] sm:$0xff] }
 0x18e   : > { %7279 = vmatpush.bf16.msra.mxu2 %v11580_v14  ;;  %v11658_v14 = vld [vmem:[%s12333_s6 + $0xcf8] sm:$0xff] }
 0x18f   : > { %7292 = vmatpush.bf16.msra.mxu3 %v11588_v16  ;;  %v11641_v16 = vld [vmem:[%s12333_s6 + $0xc70] sm:$0xff] }
 0x190   : > { %7254 = vmatpush.bf16.msra.mxu0 %v11563_v18  ;;  %v7048_v38 = vpop.f32.mrf.mxu0  ;;  %v11657_v18 = vld [vmem:[%s12333_s6 + $0xcf0] sm:$0xff] }
 0x191   : > { %7267 = vmatpush.bf16.msra.mxu1 %v11571_v19  ;;  %v7049_v39 = vadd.f32 %v7048_v38, %v7036_v6  ;;  %v7061_v41 = vpop.f32.mrf.mxu1  ;;  %v11632_v19 = vld [vmem:[%s12333_s6 + $0xc28] sm:$0xff] }
 0x192   : > { %7280 = vmatpush.bf16.msra.mxu2 %v11579_v20  ;;  %v11640_v20 = vld [vmem:[%s12333_s6 + $0xc68] sm:$0xff] }
 0x193   : > { %7293 = vmatpush.bf16.msra.mxu3 %v11587_v24  ;;  %7255 = vmatmul.bf16.vlgmr.msra.gmra.mxu0 %v1853_v25  ;;  %v7062_v44 = vadd.f32 %v7061_v41, %v7049_v39  ;;  %v11631_v25 = vld [vmem:[%s12333_s6 + $0xc20] sm:$0xff] }
 0x194   : > { %7299 = vmatpush.bf16.msrb.mxu0 %v11602_v21  ;;  %7268 = vmatmul.bf16.vlgmr.msra.gmra.mxu1 %v1854_v28  ;;  %v11648_v21 = vld [vmem:[%s12333_s6 + $0xca8] sm:$0xff]  ;;  %v11647_v28 = vld [vmem:[%s12333_s6 + $0xca0] sm:$0xff] }
 0x195   : > { %7312 = vmatpush.bf16.msrb.mxu1 %v11610_v22  ;;  %7281 = vmatmul.bf16.vlgmr.msra.gmra.mxu2 %v1855_v26  ;;  %v11656_v22 = vld [vmem:[%s12333_s6 + $0xce8] sm:$0xff] }
 0x196   : > { %7325 = vmatpush.bf16.msrb.mxu2 %v11618_v23  ;;  %7294 = vmatmul.bf16.vlgmr.msra.gmra.mxu3 %v1856_v30  ;;  %v11655_v30 = vld [vmem:[%s12333_s6 + $0xce0] sm:$0xff] }
 0x197   : > { %7338 = vmatpush.bf16.msrb.mxu3 %v11626_v27  ;;  %v11639_v27 = vld [vmem:[%s12333_s6 + $0xc60] sm:$0xff] }
 0x198   : > { %7300 = vmatpush.bf16.msrb.mxu0 %v11601_v29  ;;  %v7074_v49 = vpop.f32.mrf.mxu2  ;;  %v7050_v53 = vpop.f32.mrf.mxu0 }
 0x199   : > { %7313 = vmatpush.bf16.msrb.mxu1 %v11609_v31  ;;  %v7075_v50 = vadd.f32 %v7074_v49, %v7062_v44  ;;  %v7087_v52 = vpop.f32.mrf.mxu3  ;;  %v7063_v56 = vpop.f32.mrf.mxu1  ;;  %v11630_v31 = vld [vmem:[%s12333_s6 + $0xc18] sm:$0xff]  ;;  %v11653_v44 = vld [vmem:[%s12333_s6 + $0xcd0] sm:$0xff]  ;;  %v11652_v49 = vld [vmem:[%s12333_s6 + $0xcc8] sm:$0xff] }
 0x19a   : > { %7326 = vmatpush.bf16.msrb.mxu2 %v11617_v32  ;;  %v11638_v32 = vld [vmem:[%s12333_s6 + $0xc58] sm:$0xff]  ;;  %v11643_v53 = vld [vmem:[%s12333_s6 + $0xc80] sm:$0xff] }
 0x19b   : > { %7339 = vmatpush.bf16.msrb.mxu3 %v11625_v33  ;;  %v12732_v54 = vadd.f32 %v7087_v52, %v7075_v50  ;;  %v11646_v33 = vld [vmem:[%s12333_s6 + $0xc98] sm:$0xff]  ;;  %v11635_v52 = vld [vmem:[%s12333_s6 + $0xc40] sm:$0xff] }
 0x19c   : > { %7301 = vmatpush.bf16.msrb.mxu0 %v11600_v34  ;;  %v11682_v56 = vld [vmem:[%s12333_s6 + $0xdb8] sm:$0xff] }
 0x19d   : > { %7314 = vmatpush.bf16.msrb.mxu1 %v11608_v35 }
 0x19e   : > { %7327 = vmatpush.bf16.msrb.mxu2 %v11616_v36  ;;  %v11654_v36 = vld [vmem:[%s12333_s6 + $0xcd8] sm:$0xff] }
 0x19f   : > { %7340 = vmatpush.bf16.msrb.mxu3 %v11624_v37 }
 0x1a0   : > { %7302 = vmatpush.bf16.msrb.mxu0 %v11599_v40  ;;  %v7076_v1 = vpop.f32.mrf.mxu2  ;;  %v11629_v40 = vld [vmem:[%s12333_s6 + $0xc10] sm:$0xff] }
 0x1a1   : > { %7315 = vmatpush.bf16.msrb.mxu1 %v11607_v42  ;;  %v7089_v6 = vpop.f32.mrf.mxu3  ;;  %v11637_v42 = vld [vmem:[%s12333_s6 + $0xc50] sm:$0xff] }
 0x1a2   : > { %7328 = vmatpush.bf16.msrb.mxu2 %v11615_v43  ;;  %v11645_v43 = vld [vmem:[%s12333_s6 + $0xc90] sm:$0xff]  ;;  %v11688_v6 = vld [vmem:[%s12333_s6 + $0xde8] sm:$0xff] }
 0x1a3   : > { %7341 = vmatpush.bf16.msrb.mxu3 %v11623_v45  ;;  %v11628_v45 = vld [vmem:[%s12333_s6 + $0xc08] sm:$0xff]  ;;  %v11681_v1 = vld [vmem:[%s12333_s6 + $0xdb0] sm:$0xff] }
 0x1a4   : > { %7303 = vmatpush.bf16.msrb.mxu0 %v11598_v46  ;;  %v11636_v46 = vld [vmem:[%s12333_s6 + $0xc48] sm:$0xff] }
 0x1a5   : > { %7316 = vmatpush.bf16.msrb.mxu1 %v11606_v47  ;;  %v11644_v47 = vld [vmem:[%s12333_s6 + $0xc88] sm:$0xff] }
 0x1a6   : > { %7329 = vmatpush.bf16.msrb.mxu2 %v11614_v48 }
 0x1a7   : > { %7342 = vmatpush.bf16.msrb.mxu3 %v11622_v51  ;;  %v11627_v51 = vld [vmem:[%s12333_s6 + $0xc00] sm:$0xff] }
 0x1a8   : > { %7304 = vmatpush.bf16.msrb.mxu0 %v11597_v55  ;;  %v11674_v55 = vld [vmem:[%s12333_s6 + $0xd78] sm:$0xff] }
 0x1a9   : > { %7317 = vmatpush.bf16.msrb.mxu1 %v11605_v57  ;;  %v11651_v57 = vld [vmem:[%s12333_s6 + $0xcc0] sm:$0xff] }
 0x1aa   : > { %7330 = vmatpush.bf16.msrb.mxu2 %v11613_v58  ;;  %v1863_v58 = vld [vmem:[#allocation1] sm:$0xff] }
 0x1ab   : > { %7343 = vmatpush.bf16.msrb.mxu3 %v11621_v59  ;;  %v1865_v59 = vld [vmem:[#allocation1 + $0x12] sm:$0xff] }
 0x1ac   : > { %7305 = vmatpush.bf16.msrb.mxu0 %v11596_v60  ;;  %v11690_v60 = vld [vmem:[%s12333_s6 + $0xdf8] sm:$0xff] }
 0x1ad   : > { %7318 = vmatpush.bf16.msrb.mxu1 %v11604_v61  ;;  %v1864_v61 = vld [vmem:[#allocation1 + $0x9] sm:$0xff] }
 0x1ae   : > { %7331 = vmatpush.bf16.msrb.mxu2 %v11612_v62  ;;  %v11665_v62 = vld [vmem:[%s12333_s6 + $0xd30] sm:$0xff] }
 0x1af   : > { %7344 = vmatpush.bf16.msrb.mxu3 %v11620_v5  ;;  %v11680_v5 = vld [vmem:[%s12333_s6 + $0xda8] sm:$0xff] }
 0x1b0   : > { %7306 = vmatpush.bf16.msrb.mxu0 %v11595_v7  ;;  %v7100_v23 = vpop.f32.mrf.mxu0 }
 0x1b1   : > { %7319 = vmatpush.bf16.msrb.mxu1 %v11603_v8  ;;  %v7101_v24 = vadd.f32 %v7100_v23, %v12732_v54  ;;  %v7113_v26 = vpop.f32.mrf.mxu1  ;;  %v11666_v54 = vld [vmem:[%s12333_s6 + $0xd38] sm:$0xff] }
 0x1b2   : > { %7332 = vmatpush.bf16.msrb.mxu2 %v11611_v9  ;;  %v11663_v9 = vld [vmem:[%s12333_s6 + $0xd20] sm:$0xff] }
 0x1b3   : > { %7345 = vmatpush.bf16.msrb.mxu3 %v11619_v13  ;;  %7307 = vmatmul.bf16.vlgmr.msrb.gmra.mxu0 %v1857_v63  ;;  %v7114_v29 = vadd.f32 %v7113_v26, %v7101_v24  ;;  %v1866_v63 = vld [vmem:[#allocation1 + $0x1b] sm:$0xff] }
 0x1b4   : > { %7351 = vmatpush.bf16.msra.mxu0 %v11634_v10  ;;  %7320 = vmatmul.bf16.vlgmr.msrb.gmra.mxu1 %v1858_v2  ;;  %v11689_v2 = vld [vmem:[%s12333_s6 + $0xdf0] sm:$0xff] }
 0x1b5   : > { %7364 = vmatpush.bf16.msra.mxu1 %v11642_v11  ;;  %7333 = vmatmul.bf16.vlgmr.msrb.gmra.mxu2 %v1859_v0  ;;  %v11673_v0 = vld [vmem:[%s12333_s6 + $0xd70] sm:$0xff]  ;;  %v11671_v11 = vld [vmem:[%s12333_s6 + $0xd60] sm:$0xff] }
 0x1b6   : > { %7377 = vmatpush.bf16.msra.mxu2 %v11650_v12  ;;  %7346 = vmatmul.bf16.vlgmr.msrb.gmra.mxu3 %v1860_v3  ;;  %v11664_v3 = vld [vmem:[%s12333_s6 + $0xd28] sm:$0xff]  ;;  %v11679_v12 = vld [vmem:[%s12333_s6 + $0xda0] sm:$0xff]  ;;  %v11661_v24 = vld [vmem:[%s12333_s6 + $0xd10] sm:$0xff] }
 0x1b7   : > { %7390 = vmatpush.bf16.msra.mxu3 %v11658_v14  ;;  %v11687_v14 = vld [vmem:[%s12333_s6 + $0xde0] sm:$0xff]  ;;  %v11669_v26 = vld [vmem:[%s12333_s6 + $0xd50] sm:$0xff] }
 0x1b8   : > { %7352 = vmatpush.bf16.msra.mxu0 %v11633_v15  ;;  %v7126_v34 = vpop.f32.mrf.mxu2  ;;  %v7102_v38 = vpop.f32.mrf.mxu0  ;;  %v11662_v15 = vld [vmem:[%s12333_s6 + $0xd18] sm:$0xff] }
 0x1b9   : > { %7365 = vmatpush.bf16.msra.mxu1 %v11641_v16  ;;  %v7127_v35 = vadd.f32 %v7126_v34, %v7114_v29  ;;  %v7139_v37 = vpop.f32.mrf.mxu3  ;;  %v7115_v41 = vpop.f32.mrf.mxu1  ;;  %v11670_v16 = vld [vmem:[%s12333_s6 + $0xd58] sm:$0xff]  ;;  %v11660_v29 = vld [vmem:[%s12333_s6 + $0xd08] sm:$0xff] }
 0x1ba   : > { %7378 = vmatpush.bf16.msra.mxu2 %v11649_v17  ;;  %v11678_v17 = vld [vmem:[%s12333_s6 + $0xd98] sm:$0xff]  ;;  %v11684_v38 = vld [vmem:[%s12333_s6 + $0xdc8] sm:$0xff]  ;;  %v11667_v41 = vld [vmem:[%s12333_s6 + $0xd40] sm:$0xff] }
 0x1bb   : > { %7391 = vmatpush.bf16.msra.mxu3 %v11657_v18  ;;  %v7140_v39 = vadd.f32 %v7139_v37, %v7127_v35  ;;  %v1868_v35 = vld [vmem:[#allocation1 + $0x2d] sm:$0xff]  ;;  %v227_v37 = vld [vmem:[%s12347_s8 + $0x38] sm:$0xff] }
 0x1bc   : > { %7353 = vmatpush.bf16.msra.mxu0 %v11632_v19 }
 0x1bd   : > { %7366 = vmatpush.bf16.msra.mxu1 %v11640_v20  ;;  %v11686_v20 = vld [vmem:[%s12333_s6 + $0xdd8] sm:$0xff] }
 0x1be   : > { %7379 = vmatpush.bf16.msra.mxu2 %v11648_v21 }
 0x1bf   : > { %7392 = vmatpush.bf16.msra.mxu3 %v11656_v22 }
 0x1c0   : > { %7354 = vmatpush.bf16.msra.mxu0 %v11631_v25  ;;  %v7128_v48 = vpop.f32.mrf.mxu2 }
 0x1c1   : > { %7367 = vmatpush.bf16.msra.mxu1 %v11639_v27  ;;  %v7141_v50 = vpop.f32.mrf.mxu3  ;;  %v11677_v27 = vld [vmem:[%s12333_s6 + $0xd90] sm:$0xff] }
 0x1c2   : > { %7380 = vmatpush.bf16.msra.mxu2 %v11647_v28  ;;  %v11685_v28 = vld [vmem:[%s12333_s6 + $0xdd0] sm:$0xff] }
 0x1c3   : > { %7393 = vmatpush.bf16.msra.mxu3 %v11655_v30  ;;  %v11668_v30 = vld [vmem:[%s12333_s6 + $0xd48] sm:$0xff]  ;;  %v11697_v48 = vld [vmem:[%s12333_s6 + $0xe30] sm:$0xff] }
 0x1c4   : > { %7355 = vmatpush.bf16.msra.mxu0 %v11630_v31  ;;  %v11676_v31 = vld [vmem:[%s12333_s6 + $0xd88] sm:$0xff]  ;;  %v11713_v50 = vld [vmem:[%s12333_s6 + $0xeb0] sm:$0xff] }
 0x1c5   : > { %7368 = vmatpush.bf16.msra.mxu1 %v11638_v32  ;;  %v1867_v32 = vld [vmem:[#allocation1 + $0x24] sm:$0xff] }
 0x1c6   : > { %7381 = vmatpush.bf16.msra.mxu2 %v11646_v33  ;;  %v1869_v33 = vld [vmem:[#allocation1 + $0x36] sm:$0xff] }
 0x1c7   : > { %7394 = vmatpush.bf16.msra.mxu3 %v11654_v36  ;;  %v1870_v36 = vld [vmem:[#allocation1 + $0x3f] sm:$0xff] }
 0x1c8   : > { %7356 = vmatpush.bf16.msra.mxu0 %v11629_v40  ;;  %1872 = vst [vmem:[#allocation1] ss:$9 sm:$0xff] %v227_v37  ;;  %v11659_v40 = vld [vmem:[%s12333_s6 + $0xd00] sm:$0xff]  ;;  %v11736_v37 = vld [vmem:[%s12333_s6 + $0xf68] sm:$0xff] }
 0x1c9   : > { %7369 = vmatpush.bf16.msra.mxu1 %v11637_v42  ;;  %v11675_v42 = vld [vmem:[%s12333_s6 + $0xd80] sm:$0xff] }
 0x1ca   : > { %7382 = vmatpush.bf16.msra.mxu2 %v11645_v43  ;;  %v11698_v43 = vld [vmem:[%s12333_s6 + $0xe38] sm:$0xff] }
 0x1cb   : > { %7395 = vmatpush.bf16.msra.mxu3 %v11653_v44  ;;  %v11706_v44 = vld [vmem:[%s12333_s6 + $0xe78] sm:$0xff] }
 0x1cc   : > { %7357 = vmatpush.bf16.msra.mxu0 %v11628_v45  ;;  %v11714_v45 = vld [vmem:[%s12333_s6 + $0xeb8] sm:$0xff] }
 0x1cd   : > { %7370 = vmatpush.bf16.msra.mxu1 %v11636_v46  ;;  %v11683_v46 = vld [vmem:[%s12333_s6 + $0xdc0] sm:$0xff] }
 0x1ce   : > { %7383 = vmatpush.bf16.msra.mxu2 %v11644_v47  ;;  %v11722_v47 = vld [vmem:[%s12333_s6 + $0xef8] sm:$0xff] }
 0x1cf   : > { %7396 = vmatpush.bf16.msra.mxu3 %v11652_v49  ;;  %v11705_v49 = vld [vmem:[%s12333_s6 + $0xe70] sm:$0xff] }
 0x1d0   : > { %7358 = vmatpush.bf16.msra.mxu0 %v11627_v51  ;;  %v7152_v7 = vpop.f32.mrf.mxu0  ;;  %v11721_v51 = vld [vmem:[%s12333_s6 + $0xef0] sm:$0xff] }
 0x1d1   : > { %7371 = vmatpush.bf16.msra.mxu1 %v11635_v52  ;;  %v7153_v8 = vadd.f32 %v7152_v7, %v7140_v39  ;;  %v7165_v10 = vpop.f32.mrf.mxu1  ;;  %v11696_v52 = vld [vmem:[%s12333_s6 + $0xe28] sm:$0xff] }
 0x1d2   : > { %7384 = vmatpush.bf16.msra.mxu2 %v11643_v53  ;;  %v11704_v53 = vld [vmem:[%s12333_s6 + $0xe68] sm:$0xff] }
 0x1d3   : > { %7397 = vmatpush.bf16.msra.mxu3 %v11651_v57  ;;  %7359 = vmatmul.bf16.vlgmr.msra.gmra.mxu0 %v1863_v58  ;;  %v7166_v13 = vadd.f32 %v7165_v10, %v7153_v8  ;;  %v11695_v58 = vld [vmem:[%s12333_s6 + $0xe20] sm:$0xff] }
 0x1d4   : > { %7403 = vmatpush.bf16.msrb.mxu0 %v11666_v54  ;;  %7372 = vmatmul.bf16.vlgmr.msra.gmra.mxu1 %v1864_v61  ;;  %v11712_v54 = vld [vmem:[%s12333_s6 + $0xea8] sm:$0xff]  ;;  %v11711_v61 = vld [vmem:[%s12333_s6 + $0xea0] sm:$0xff] }
 0x1d5   : > { %7416 = vmatpush.bf16.msrb.mxu1 %v11674_v55  ;;  %7385 = vmatmul.bf16.vlgmr.msra.gmra.mxu2 %v1865_v59  ;;  %v11720_v55 = vld [vmem:[%s12333_s6 + $0xee8] sm:$0xff] }
 0x1d6   : > { %7429 = vmatpush.bf16.msrb.mxu2 %v11682_v56  ;;  %7398 = vmatmul.bf16.vlgmr.msra.gmra.mxu3 %v1866_v63  ;;  %v11719_v63 = vld [vmem:[%s12333_s6 + $0xee0] sm:$0xff] }
 0x1d7   : > { %7442 = vmatpush.bf16.msrb.mxu3 %v11690_v60  ;;  %v11703_v60 = vld [vmem:[%s12333_s6 + $0xe60] sm:$0xff] }
 0x1d8   : > { %7404 = vmatpush.bf16.msrb.mxu0 %v11665_v62  ;;  %v7178_v18 = vpop.f32.mrf.mxu2  ;;  %v7154_v22 = vpop.f32.mrf.mxu0 }
 0x1d9   : > { %7417 = vmatpush.bf16.msrb.mxu1 %v11673_v0  ;;  %v7179_v19 = vadd.f32 %v7178_v18, %v7166_v13  ;;  %v7191_v21 = vpop.f32.mrf.mxu3  ;;  %v7167_v25 = vpop.f32.mrf.mxu1  ;;  %v11694_v0 = vld [vmem:[%s12333_s6 + $0xe18] sm:$0xff]  ;;  %v11717_v13 = vld [vmem:[%s12333_s6 + $0xed0] sm:$0xff]  ;;  %v11716_v18 = vld [vmem:[%s12333_s6 + $0xec8] sm:$0xff] }
 0x1da   : > { %7430 = vmatpush.bf16.msrb.mxu2 %v11681_v1  ;;  %v11702_v1 = vld [vmem:[%s12333_s6 + $0xe58] sm:$0xff]  ;;  %v11707_v22 = vld [vmem:[%s12333_s6 + $0xe80] sm:$0xff] }
 0x1db   : > { %7443 = vmatpush.bf16.msrb.mxu3 %v11689_v2  ;;  %v12800_v23 = vadd.f32 %v7191_v21, %v7179_v19  ;;  %v11710_v2 = vld [vmem:[%s12333_s6 + $0xe98] sm:$0xff]  ;;  %v11699_v21 = vld [vmem:[%s12333_s6 + $0xe40] sm:$0xff] }
 0x1dc   : > { %7405 = vmatpush.bf16.msrb.mxu0 %v11664_v3  ;;  %v11746_v25 = vld [vmem:[%s12333_s6 + $0xfb8] sm:$0xff] }
 0x1dd   : > { %7418 = vmatpush.bf16.msrb.mxu1 %v11672_v4 }
 0x1de   : > { %7431 = vmatpush.bf16.msrb.mxu2 %v11680_v5  ;;  %v11718_v5 = vld [vmem:[%s12333_s6 + $0xed8] sm:$0xff] }
 0x1df   : > { %7444 = vmatpush.bf16.msrb.mxu3 %v11688_v6 }
 0x1e0   : > { %7406 = vmatpush.bf16.msrb.mxu0 %v11663_v9  ;;  %v7180_v34 = vpop.f32.mrf.mxu2  ;;  %v11693_v9 = vld [vmem:[%s12333_s6 + $0xe10] sm:$0xff] }
 0x1e1   : > { %7419 = vmatpush.bf16.msrb.mxu1 %v11671_v11  ;;  %v7193_v39 = vpop.f32.mrf.mxu3  ;;  %v11701_v11 = vld [vmem:[%s12333_s6 + $0xe50] sm:$0xff] }
 0x1e2   : > { %7432 = vmatpush.bf16.msrb.mxu2 %v11679_v12  ;;  %v11709_v12 = vld [vmem:[%s12333_s6 + $0xe90] sm:$0xff]  ;;  %v11752_v39 = vld [vmem:[%s12333_s6 + $0xfe8] sm:$0xff] }
 0x1e3   : > { %7445 = vmatpush.bf16.msrb.mxu3 %v11687_v14  ;;  %v11692_v14 = vld [vmem:[%s12333_s6 + $0xe08] sm:$0xff]  ;;  %v11745_v34 = vld [vmem:[%s12333_s6 + $0xfb0] sm:$0xff] }
 0x1e4   : > { %7407 = vmatpush.bf16.msrb.mxu0 %v11662_v15  ;;  %v11700_v15 = vld [vmem:[%s12333_s6 + $0xe48] sm:$0xff] }
 0x1e5   : > { %7420 = vmatpush.bf16.msrb.mxu1 %v11670_v16  ;;  %v11708_v16 = vld [vmem:[%s12333_s6 + $0xe88] sm:$0xff] }
 0x1e6   : > { %7433 = vmatpush.bf16.msrb.mxu2 %v11678_v17 }
 0x1e7   : > { %7446 = vmatpush.bf16.msrb.mxu3 %v11686_v20  ;;  %v11691_v20 = vld [vmem:[%s12333_s6 + $0xe00] sm:$0xff] }
 0x1e8   : > { %7408 = vmatpush.bf16.msrb.mxu0 %v11661_v24  ;;  %v11738_v24 = vld [vmem:[%s12333_s6 + $0xf78] sm:$0xff] }
 0x1e9   : > { %7421 = vmatpush.bf16.msrb.mxu1 %v11669_v26  ;;  %v11715_v26 = vld [vmem:[%s12333_s6 + $0xec0] sm:$0xff] }
 0x1ea   : > { %7434 = vmatpush.bf16.msrb.mxu2 %v11677_v27  ;;  %v1873_v27 = vld [vmem:[#allocation1] sm:$0xff] }
 0x1eb   : > { %7447 = vmatpush.bf16.msrb.mxu3 %v11685_v28  ;;  %v1875_v28 = vld [vmem:[#allocation1 + $0x12] sm:$0xff] }
 0x1ec   : > { %7409 = vmatpush.bf16.msrb.mxu0 %v11660_v29  ;;  %v11754_v29 = vld [vmem:[%s12333_s6 + $0xff8] sm:$0xff] }
 0x1ed   : > { %7422 = vmatpush.bf16.msrb.mxu1 %v11668_v30  ;;  %v1874_v30 = vld [vmem:[#allocation1 + $0x9] sm:$0xff] }
 0x1ee   : > { %7435 = vmatpush.bf16.msrb.mxu2 %v11676_v31  ;;  %v11729_v31 = vld [vmem:[%s12333_s6 + $0xf30] sm:$0xff] }
 0x1ef   : > { %7448 = vmatpush.bf16.msrb.mxu3 %v11684_v38  ;;  %v11744_v38 = vld [vmem:[%s12333_s6 + $0xfa8] sm:$0xff] }
 0x1f0   : > { %7410 = vmatpush.bf16.msrb.mxu0 %v11659_v40  ;;  %v7204_v56 = vpop.f32.mrf.mxu0 }
 0x1f1   : > { %7423 = vmatpush.bf16.msrb.mxu1 %v11667_v41  ;;  %v7205_v57 = vadd.f32 %v7204_v56, %v12800_v23  ;;  %v7217_v59 = vpop.f32.mrf.mxu1  ;;  %v11730_v23 = vld [vmem:[%s12333_s6 + $0xf38] sm:$0xff] }
 0x1f2   : > { %7436 = vmatpush.bf16.msrb.mxu2 %v11675_v42  ;;  %v11727_v42 = vld [vmem:[%s12333_s6 + $0xf20] sm:$0xff] }
 0x1f3   : > { %7449 = vmatpush.bf16.msrb.mxu3 %v11683_v46  ;;  %7411 = vmatmul.bf16.vlgmr.msrb.gmra.mxu0 %v1867_v32  ;;  %v7218_v62 = vadd.f32 %v7217_v59, %v7205_v57  ;;  %v1876_v32 = vld [vmem:[#allocation1 + $0x1b] sm:$0xff] }
 0x1f4   : > { %7455 = vmatpush.bf16.msra.mxu0 %v11698_v43  ;;  %7424 = vmatmul.bf16.vlgmr.msrb.gmra.mxu1 %v1868_v35  ;;  %v11753_v35 = vld [vmem:[%s12333_s6 + $0xff0] sm:$0xff] }
 0x1f5   : > { %7468 = vmatpush.bf16.msra.mxu1 %v11706_v44  ;;  %7437 = vmatmul.bf16.vlgmr.msrb.gmra.mxu2 %v1869_v33  ;;  %v11737_v33 = vld [vmem:[%s12333_s6 + $0xf70] sm:$0xff]  ;;  %v11735_v44 = vld [vmem:[%s12333_s6 + $0xf60] sm:$0xff] }
 0x1f6   : > { %7481 = vmatpush.bf16.msra.mxu2 %v11714_v45  ;;  %7450 = vmatmul.bf16.vlgmr.msrb.gmra.mxu3 %v1870_v36  ;;  %v11728_v36 = vld [vmem:[%s12333_s6 + $0xf28] sm:$0xff]  ;;  %v11743_v45 = vld [vmem:[%s12333_s6 + $0xfa0] sm:$0xff]  ;;  %v11725_v57 = vld [vmem:[%s12333_s6 + $0xf10] sm:$0xff] }
 0x1f7   : > { %7494 = vmatpush.bf16.msra.mxu3 %v11722_v47  ;;  %v11751_v47 = vld [vmem:[%s12333_s6 + $0xfe0] sm:$0xff]  ;;  %v11733_v59 = vld [vmem:[%s12333_s6 + $0xf50] sm:$0xff] }
 0x1f8   : > { %7456 = vmatpush.bf16.msra.mxu0 %v11697_v48  ;;  %v7230_v3 = vpop.f32.mrf.mxu2  ;;  %v7206_v7 = vpop.f32.mrf.mxu0  ;;  %v11726_v48 = vld [vmem:[%s12333_s6 + $0xf18] sm:$0xff] }
 0x1f9   : > { %7469 = vmatpush.bf16.msra.mxu1 %v11705_v49  ;;  %v7231_v4 = vadd.f32 %v7230_v3, %v7218_v62  ;;  %v7243_v6 = vpop.f32.mrf.mxu3  ;;  %v7219_v10 = vpop.f32.mrf.mxu1  ;;  %v11734_v49 = vld [vmem:[%s12333_s6 + $0xf58] sm:$0xff]  ;;  %v11724_v62 = vld [vmem:[%s12333_s6 + $0xf08] sm:$0xff] }
 0x1fa   : > { %7482 = vmatpush.bf16.msra.mxu2 %v11713_v50  ;;  %v11742_v50 = vld [vmem:[%s12333_s6 + $0xf98] sm:$0xff]  ;;  %v11748_v7 = vld [vmem:[%s12333_s6 + $0xfc8] sm:$0xff]  ;;  %v11731_v10 = vld [vmem:[%s12333_s6 + $0xf40] sm:$0xff] }
 0x1fb   : > { %7495 = vmatpush.bf16.msra.mxu3 %v11721_v51  ;;  %v7244_v8 = vadd.f32 %v7243_v6, %v7231_v4  ;;  %v1878_v4 = vld [vmem:[#allocation1 + $0x2d] sm:$0xff]  ;;  %v228_v6 = vld [vmem:[%s12347_s8 + $0x40] sm:$0xff] }
 0x1fc   : > { %7457 = vmatpush.bf16.msra.mxu0 %v11696_v52 }
 0x1fd   : > { %7470 = vmatpush.bf16.msra.mxu1 %v11704_v53  ;;  %v11750_v53 = vld [vmem:[%s12333_s6 + $0xfd8] sm:$0xff] }
 0x1fe   : > { %7483 = vmatpush.bf16.msra.mxu2 %v11712_v54 }
 0x1ff   : > { %7496 = vmatpush.bf16.msra.mxu3 %v11720_v55 }
 0x200   : > { %7458 = vmatpush.bf16.msra.mxu0 %v11695_v58  ;;  %v7232_v17 = vpop.f32.mrf.mxu2 }
 0x201   : > { %7471 = vmatpush.bf16.msra.mxu1 %v11703_v60  ;;  %v7245_v19 = vpop.f32.mrf.mxu3  ;;  %v11741_v60 = vld [vmem:[%s12333_s6 + $0xf90] sm:$0xff] }
 0x202   : > { %7484 = vmatpush.bf16.msra.mxu2 %v11711_v61  ;;  %v11749_v61 = vld [vmem:[%s12333_s6 + $0xfd0] sm:$0xff] }
 0x203   : > { %7497 = vmatpush.bf16.msra.mxu3 %v11719_v63  ;;  %v11732_v63 = vld [vmem:[%s12333_s6 + $0xf48] sm:$0xff]  ;;  %v11761_v17 = vld [vmem:[%s12333_s6 + $0x1030] sm:$0xff] }
 0x204   : > { %7459 = vmatpush.bf16.msra.mxu0 %v11694_v0  ;;  %v11740_v0 = vld [vmem:[%s12333_s6 + $0xf88] sm:$0xff]  ;;  %v11777_v19 = vld [vmem:[%s12333_s6 + $0x10b0] sm:$0xff] }
 0x205   : > { %7472 = vmatpush.bf16.msra.mxu1 %v11702_v1  ;;  %v1877_v1 = vld [vmem:[#allocation1 + $0x24] sm:$0xff] }
 0x206   : > { %7485 = vmatpush.bf16.msra.mxu2 %v11710_v2  ;;  %v1879_v2 = vld [vmem:[#allocation1 + $0x36] sm:$0xff] }
 0x207   : > { %7498 = vmatpush.bf16.msra.mxu3 %v11718_v5  ;;  %v1880_v5 = vld [vmem:[#allocation1 + $0x3f] sm:$0xff] }
 0x208   : > { %7460 = vmatpush.bf16.msra.mxu0 %v11693_v9  ;;  %1882 = vst [vmem:[#allocation1] ss:$9 sm:$0xff] %v228_v6  ;;  %v11723_v9 = vld [vmem:[%s12333_s6 + $0xf00] sm:$0xff]  ;;  %v11800_v6 = vld [vmem:[%s12333_s6 + $0x1168] sm:$0xff] }
 0x209   : > { %7473 = vmatpush.bf16.msra.mxu1 %v11701_v11  ;;  %v11739_v11 = vld [vmem:[%s12333_s6 + $0xf80] sm:$0xff] }
 0x20a   : > { %7486 = vmatpush.bf16.msra.mxu2 %v11709_v12  ;;  %v11762_v12 = vld [vmem:[%s12333_s6 + $0x1038] sm:$0xff] }
 0x20b   : > { %7499 = vmatpush.bf16.msra.mxu3 %v11717_v13  ;;  %v11770_v13 = vld [vmem:[%s12333_s6 + $0x1078] sm:$0xff] }
 0x20c   : > { %7461 = vmatpush.bf16.msra.mxu0 %v11692_v14  ;;  %v11778_v14 = vld [vmem:[%s12333_s6 + $0x10b8] sm:$0xff] }
 0x20d   : > { %7474 = vmatpush.bf16.msra.mxu1 %v11700_v15  ;;  %v11747_v15 = vld [vmem:[%s12333_s6 + $0xfc0] sm:$0xff] }
 0x20e   : > { %7487 = vmatpush.bf16.msra.mxu2 %v11708_v16  ;;  %v11786_v16 = vld [vmem:[%s12333_s6 + $0x10f8] sm:$0xff] }
 0x20f   : > { %7500 = vmatpush.bf16.msra.mxu3 %v11716_v18  ;;  %v11769_v18 = vld [vmem:[%s12333_s6 + $0x1070] sm:$0xff] }
 0x210   : > { %7462 = vmatpush.bf16.msra.mxu0 %v11691_v20  ;;  %v7256_v40 = vpop.f32.mrf.mxu0  ;;  %v11785_v20 = vld [vmem:[%s12333_s6 + $0x10f0] sm:$0xff] }
 0x211   : > { %7475 = vmatpush.bf16.msra.mxu1 %v11699_v21  ;;  %v7257_v41 = vadd.f32 %v7256_v40, %v7244_v8  ;;  %v7269_v43 = vpop.f32.mrf.mxu1  ;;  %v11760_v21 = vld [vmem:[%s12333_s6 + $0x1028] sm:$0xff] }
 0x212   : > { %7488 = vmatpush.bf16.msra.mxu2 %v11707_v22  ;;  %v11768_v22 = vld [vmem:[%s12333_s6 + $0x1068] sm:$0xff] }
 0x213   : > { %7501 = vmatpush.bf16.msra.mxu3 %v11715_v26  ;;  %7463 = vmatmul.bf16.vlgmr.msra.gmra.mxu0 %v1873_v27  ;;  %v7270_v46 = vadd.f32 %v7269_v43, %v7257_v41  ;;  %v11759_v27 = vld [vmem:[%s12333_s6 + $0x1020] sm:$0xff] }
 0x214   : > { %7507 = vmatpush.bf16.msrb.mxu0 %v11730_v23  ;;  %7476 = vmatmul.bf16.vlgmr.msra.gmra.mxu1 %v1874_v30  ;;  %v11776_v23 = vld [vmem:[%s12333_s6 + $0x10a8] sm:$0xff]  ;;  %v11775_v30 = vld [vmem:[%s12333_s6 + $0x10a0] sm:$0xff] }
 0x215   : > { %7520 = vmatpush.bf16.msrb.mxu1 %v11738_v24  ;;  %7489 = vmatmul.bf16.vlgmr.msra.gmra.mxu2 %v1875_v28  ;;  %v11784_v24 = vld [vmem:[%s12333_s6 + $0x10e8] sm:$0xff] }
 0x216   : > { %7533 = vmatpush.bf16.msrb.mxu2 %v11746_v25  ;;  %7502 = vmatmul.bf16.vlgmr.msra.gmra.mxu3 %v1876_v32  ;;  %v11783_v32 = vld [vmem:[%s12333_s6 + $0x10e0] sm:$0xff] }
 0x217   : > { %7546 = vmatpush.bf16.msrb.mxu3 %v11754_v29  ;;  %v11767_v29 = vld [vmem:[%s12333_s6 + $0x1060] sm:$0xff] }
 0x218   : > { %7508 = vmatpush.bf16.msrb.mxu0 %v11729_v31  ;;  %v7282_v51 = vpop.f32.mrf.mxu2  ;;  %v7258_v55 = vpop.f32.mrf.mxu0 }
 0x219   : > { %7521 = vmatpush.bf16.msrb.mxu1 %v11737_v33  ;;  %v7283_v52 = vadd.f32 %v7282_v51, %v7270_v46  ;;  %v7295_v54 = vpop.f32.mrf.mxu3  ;;  %v7271_v58 = vpop.f32.mrf.mxu1  ;;  %v11758_v33 = vld [vmem:[%s12333_s6 + $0x1018] sm:$0xff]  ;;  %v11781_v46 = vld [vmem:[%s12333_s6 + $0x10d0] sm:$0xff]  ;;  %v11780_v51 = vld [vmem:[%s12333_s6 + $0x10c8] sm:$0xff] }
 0x21a   : > { %7534 = vmatpush.bf16.msrb.mxu2 %v11745_v34  ;;  %v11766_v34 = vld [vmem:[%s12333_s6 + $0x1058] sm:$0xff]  ;;  %v11771_v55 = vld [vmem:[%s12333_s6 + $0x1080] sm:$0xff] }
 0x21b   : > { %7547 = vmatpush.bf16.msrb.mxu3 %v11753_v35  ;;  %v12868_v56 = vadd.f32 %v7295_v54, %v7283_v52  ;;  %v11774_v35 = vld [vmem:[%s12333_s6 + $0x1098] sm:$0xff]  ;;  %v11763_v54 = vld [vmem:[%s12333_s6 + $0x1040] sm:$0xff] }
 0x21c   : > { %7509 = vmatpush.bf16.msrb.mxu0 %v11728_v36  ;;  %v11810_v58 = vld [vmem:[%s12333_s6 + $0x11b8] sm:$0xff] }
 0x21d   : > { %7522 = vmatpush.bf16.msrb.mxu1 %v11736_v37 }
 0x21e   : > { %7535 = vmatpush.bf16.msrb.mxu2 %v11744_v38  ;;  %v11782_v38 = vld [vmem:[%s12333_s6 + $0x10d8] sm:$0xff] }
 0x21f   : > { %7548 = vmatpush.bf16.msrb.mxu3 %v11752_v39 }
 0x220   : > { %7510 = vmatpush.bf16.msrb.mxu0 %v11727_v42  ;;  %v7284_v3 = vpop.f32.mrf.mxu2  ;;  %v11757_v42 = vld [vmem:[%s12333_s6 + $0x1010] sm:$0xff] }
 0x221   : > { %7523 = vmatpush.bf16.msrb.mxu1 %v11735_v44  ;;  %v7297_v8 = vpop.f32.mrf.mxu3  ;;  %v11765_v44 = vld [vmem:[%s12333_s6 + $0x1050] sm:$0xff] }
 0x222   : > { %7536 = vmatpush.bf16.msrb.mxu2 %v11743_v45  ;;  %v11773_v45 = vld [vmem:[%s12333_s6 + $0x1090] sm:$0xff]  ;;  %v11816_v8 = vld [vmem:[%s12333_s6 + $0x11e8] sm:$0xff] }
 0x223   : > { %7549 = vmatpush.bf16.msrb.mxu3 %v11751_v47  ;;  %v11756_v47 = vld [vmem:[%s12333_s6 + $0x1008] sm:$0xff]  ;;  %v11809_v3 = vld [vmem:[%s12333_s6 + $0x11b0] sm:$0xff] }
 0x224   : > { %7511 = vmatpush.bf16.msrb.mxu0 %v11726_v48  ;;  %v11764_v48 = vld [vmem:[%s12333_s6 + $0x1048] sm:$0xff] }
 0x225   : > { %7524 = vmatpush.bf16.msrb.mxu1 %v11734_v49  ;;  %v11772_v49 = vld [vmem:[%s12333_s6 + $0x1088] sm:$0xff] }
 0x226   : > { %7537 = vmatpush.bf16.msrb.mxu2 %v11742_v50 }
 0x227   : > { %7550 = vmatpush.bf16.msrb.mxu3 %v11750_v53  ;;  %v11755_v53 = vld [vmem:[%s12333_s6 + $0x1000] sm:$0xff] }
 0x228   : > { %7512 = vmatpush.bf16.msrb.mxu0 %v11725_v57  ;;  %v11802_v57 = vld [vmem:[%s12333_s6 + $0x1178] sm:$0xff] }
 0x229   : > { %7525 = vmatpush.bf16.msrb.mxu1 %v11733_v59  ;;  %v11779_v59 = vld [vmem:[%s12333_s6 + $0x10c0] sm:$0xff] }
 0x22a   : > { %7538 = vmatpush.bf16.msrb.mxu2 %v11741_v60  ;;  %v1883_v60 = vld [vmem:[#allocation1] sm:$0xff] }
 0x22b   : > { %7551 = vmatpush.bf16.msrb.mxu3 %v11749_v61  ;;  %v1885_v61 = vld [vmem:[#allocation1 + $0x12] sm:$0xff] }
 0x22c   : > { %7513 = vmatpush.bf16.msrb.mxu0 %v11724_v62  ;;  %v11818_v62 = vld [vmem:[%s12333_s6 + $0x11f8] sm:$0xff] }
 0x22d   : > { %7526 = vmatpush.bf16.msrb.mxu1 %v11732_v63  ;;  %v1884_v63 = vld [vmem:[#allocation1 + $0x9] sm:$0xff] }
 0x22e   : > { %7539 = vmatpush.bf16.msrb.mxu2 %v11740_v0  ;;  %v11793_v0 = vld [vmem:[%s12333_s6 + $0x1130] sm:$0xff] }
 0x22f   : > { %7552 = vmatpush.bf16.msrb.mxu3 %v11748_v7  ;;  %v11808_v7 = vld [vmem:[%s12333_s6 + $0x11a8] sm:$0xff] }
 0x230   : > { %7514 = vmatpush.bf16.msrb.mxu0 %v11723_v9  ;;  %v7308_v25 = vpop.f32.mrf.mxu0 }
 0x231   : > { %7527 = vmatpush.bf16.msrb.mxu1 %v11731_v10  ;;  %v7309_v26 = vadd.f32 %v7308_v25, %v12868_v56  ;;  %v7321_v28 = vpop.f32.mrf.mxu1  ;;  %v11794_v56 = vld [vmem:[%s12333_s6 + $0x1138] sm:$0xff] }
 0x232   : > { %7540 = vmatpush.bf16.msrb.mxu2 %v11739_v11  ;;  %v11791_v11 = vld [vmem:[%s12333_s6 + $0x1120] sm:$0xff] }
 0x233   : > { %7553 = vmatpush.bf16.msrb.mxu3 %v11747_v15  ;;  %7515 = vmatmul.bf16.vlgmr.msrb.gmra.mxu0 %v1877_v1  ;;  %v7322_v31 = vadd.f32 %v7321_v28, %v7309_v26  ;;  %v1886_v1 = vld [vmem:[#allocation1 + $0x1b] sm:$0xff] }
 0x234   : > { %7559 = vmatpush.bf16.msra.mxu0 %v11762_v12  ;;  %7528 = vmatmul.bf16.vlgmr.msrb.gmra.mxu1 %v1878_v4  ;;  %v11817_v4 = vld [vmem:[%s12333_s6 + $0x11f0] sm:$0xff] }
 0x235   : > { %7572 = vmatpush.bf16.msra.mxu1 %v11770_v13  ;;  %7541 = vmatmul.bf16.vlgmr.msrb.gmra.mxu2 %v1879_v2  ;;  %v11801_v2 = vld [vmem:[%s12333_s6 + $0x1170] sm:$0xff]  ;;  %v11799_v13 = vld [vmem:[%s12333_s6 + $0x1160] sm:$0xff] }
 0x236   : > { %7585 = vmatpush.bf16.msra.mxu2 %v11778_v14  ;;  %7554 = vmatmul.bf16.vlgmr.msrb.gmra.mxu3 %v1880_v5  ;;  %v11792_v5 = vld [vmem:[%s12333_s6 + $0x1128] sm:$0xff]  ;;  %v11807_v14 = vld [vmem:[%s12333_s6 + $0x11a0] sm:$0xff]  ;;  %v11789_v26 = vld [vmem:[%s12333_s6 + $0x1110] sm:$0xff] }
 0x237   : > { %7598 = vmatpush.bf16.msra.mxu3 %v11786_v16  ;;  %v11815_v16 = vld [vmem:[%s12333_s6 + $0x11e0] sm:$0xff]  ;;  %v11797_v28 = vld [vmem:[%s12333_s6 + $0x1150] sm:$0xff] }
 0x238   : > { %7560 = vmatpush.bf16.msra.mxu0 %v11761_v17  ;;  %v7334_v36 = vpop.f32.mrf.mxu2  ;;  %v7310_v40 = vpop.f32.mrf.mxu0  ;;  %v11790_v17 = vld [vmem:[%s12333_s6 + $0x1118] sm:$0xff] }
 0x239   : > { %7573 = vmatpush.bf16.msra.mxu1 %v11769_v18  ;;  %v7335_v37 = vadd.f32 %v7334_v36, %v7322_v31  ;;  %v7347_v39 = vpop.f32.mrf.mxu3  ;;  %v7323_v43 = vpop.f32.mrf.mxu1  ;;  %v11798_v18 = vld [vmem:[%s12333_s6 + $0x1158] sm:$0xff]  ;;  %v11788_v31 = vld [vmem:[%s12333_s6 + $0x1108] sm:$0xff] }
 0x23a   : > { %7586 = vmatpush.bf16.msra.mxu2 %v11777_v19  ;;  %v11806_v19 = vld [vmem:[%s12333_s6 + $0x1198] sm:$0xff]  ;;  %v11812_v40 = vld [vmem:[%s12333_s6 + $0x11c8] sm:$0xff]  ;;  %v11795_v43 = vld [vmem:[%s12333_s6 + $0x1140] sm:$0xff] }
 0x23b   : > { %7599 = vmatpush.bf16.msra.mxu3 %v11785_v20  ;;  %v7348_v41 = vadd.f32 %v7347_v39, %v7335_v37  ;;  %v1888_v37 = vld [vmem:[#allocation1 + $0x2d] sm:$0xff] }
 0x23c   : > { %7561 = vmatpush.bf16.msra.mxu0 %v11760_v21  ;;  %v229_v39 = vld [vmem:[%s12347_s8 + $0x48] sm:$0xff] }
 0x23d   : > { %7574 = vmatpush.bf16.msra.mxu1 %v11768_v22  ;;  %v11814_v22 = vld [vmem:[%s12333_s6 + $0x11d8] sm:$0xff] }
 0x23e   : > { %7587 = vmatpush.bf16.msra.mxu2 %v11776_v23 }
 0x23f   : > { %7600 = vmatpush.bf16.msra.mxu3 %v11784_v24 }
 0x240   : > { %7562 = vmatpush.bf16.msra.mxu0 %v11759_v27  ;;  %v7336_v50 = vpop.f32.mrf.mxu2 }
 0x241   : > { %7575 = vmatpush.bf16.msra.mxu1 %v11767_v29  ;;  %v7349_v52 = vpop.f32.mrf.mxu3  ;;  %v11805_v29 = vld [vmem:[%s12333_s6 + $0x1190] sm:$0xff] }
 0x242   : > { %7588 = vmatpush.bf16.msra.mxu2 %v11775_v30  ;;  %v11813_v30 = vld [vmem:[%s12333_s6 + $0x11d0] sm:$0xff] }
 0x243   : > { %7601 = vmatpush.bf16.msra.mxu3 %v11783_v32  ;;  %v11796_v32 = vld [vmem:[%s12333_s6 + $0x1148] sm:$0xff]  ;;  %v11825_v50 = vld [vmem:[%s12333_s6 + $0x1230] sm:$0xff] }
 0x244   : > { %7563 = vmatpush.bf16.msra.mxu0 %v11758_v33  ;;  %v11804_v33 = vld [vmem:[%s12333_s6 + $0x1188] sm:$0xff]  ;;  %v11841_v52 = vld [vmem:[%s12333_s6 + $0x12b0] sm:$0xff] }
 0x245   : > { %7576 = vmatpush.bf16.msra.mxu1 %v11766_v34  ;;  %v1887_v34 = vld [vmem:[#allocation1 + $0x24] sm:$0xff] }
 0x246   : > { %7589 = vmatpush.bf16.msra.mxu2 %v11774_v35  ;;  %v1889_v35 = vld [vmem:[#allocation1 + $0x36] sm:$0xff] }
 0x247   : > { %7602 = vmatpush.bf16.msra.mxu3 %v11782_v38  ;;  %v1890_v38 = vld [vmem:[#allocation1 + $0x3f] sm:$0xff] }
 0x248   : > { %7564 = vmatpush.bf16.msra.mxu0 %v11757_v42  ;;  %1892 = vst [vmem:[#allocation1] ss:$9 sm:$0xff] %v229_v39  ;;  %v11787_v42 = vld [vmem:[%s12333_s6 + $0x1100] sm:$0xff]  ;;  %v11864_v39 = vld [vmem:[%s12333_s6 + $0x1368] sm:$0xff] }
 0x249   : > { %7577 = vmatpush.bf16.msra.mxu1 %v11765_v44  ;;  %v11803_v44 = vld [vmem:[%s12333_s6 + $0x1180] sm:$0xff] }
 0x24a   : > { %7590 = vmatpush.bf16.msra.mxu2 %v11773_v45  ;;  %v11826_v45 = vld [vmem:[%s12333_s6 + $0x1238] sm:$0xff] }
 0x24b   : > { %7603 = vmatpush.bf16.msra.mxu3 %v11781_v46  ;;  %v11834_v46 = vld [vmem:[%s12333_s6 + $0x1278] sm:$0xff] }
 0x24c   : > { %7565 = vmatpush.bf16.msra.mxu0 %v11756_v47  ;;  %v11842_v47 = vld [vmem:[%s12333_s6 + $0x12b8] sm:$0xff] }
 0x24d   : > { %7578 = vmatpush.bf16.msra.mxu1 %v11764_v48  ;;  %v11811_v48 = vld [vmem:[%s12333_s6 + $0x11c0] sm:$0xff] }
 0x24e   : > { %7591 = vmatpush.bf16.msra.mxu2 %v11772_v49  ;;  %v11850_v49 = vld [vmem:[%s12333_s6 + $0x12f8] sm:$0xff] }
 0x24f   : > { %7604 = vmatpush.bf16.msra.mxu3 %v11780_v51  ;;  %v11833_v51 = vld [vmem:[%s12333_s6 + $0x1270] sm:$0xff] }
 0x250   : > { %7566 = vmatpush.bf16.msra.mxu0 %v11755_v53  ;;  %v7360_v9 = vpop.f32.mrf.mxu0  ;;  %v11849_v53 = vld [vmem:[%s12333_s6 + $0x12f0] sm:$0xff] }
 0x251   : > { %7579 = vmatpush.bf16.msra.mxu1 %v11763_v54  ;;  %v7361_v10 = vadd.f32 %v7360_v9, %v7348_v41  ;;  %v7373_v12 = vpop.f32.mrf.mxu1  ;;  %v11824_v54 = vld [vmem:[%s12333_s6 + $0x1228] sm:$0xff] }
 0x252   : > { %7592 = vmatpush.bf16.msra.mxu2 %v11771_v55  ;;  %v11832_v55 = vld [vmem:[%s12333_s6 + $0x1268] sm:$0xff] }
 0x253   : > { %7605 = vmatpush.bf16.msra.mxu3 %v11779_v59  ;;  %7567 = vmatmul.bf16.vlgmr.msra.gmra.mxu0 %v1883_v60  ;;  %v7374_v15 = vadd.f32 %v7373_v12, %v7361_v10  ;;  %v11823_v60 = vld [vmem:[%s12333_s6 + $0x1220] sm:$0xff] }
 0x254   : > { %7611 = vmatpush.bf16.msrb.mxu0 %v11794_v56  ;;  %7580 = vmatmul.bf16.vlgmr.msra.gmra.mxu1 %v1884_v63  ;;  %v11840_v56 = vld [vmem:[%s12333_s6 + $0x12a8] sm:$0xff]  ;;  %v11839_v63 = vld [vmem:[%s12333_s6 + $0x12a0] sm:$0xff] }
 0x255   : > { %7624 = vmatpush.bf16.msrb.mxu1 %v11802_v57  ;;  %7593 = vmatmul.bf16.vlgmr.msra.gmra.mxu2 %v1885_v61  ;;  %v11848_v57 = vld [vmem:[%s12333_s6 + $0x12e8] sm:$0xff] }
 0x256   : > { %7637 = vmatpush.bf16.msrb.mxu2 %v11810_v58  ;;  %7606 = vmatmul.bf16.vlgmr.msra.gmra.mxu3 %v1886_v1  ;;  %v11847_v1 = vld [vmem:[%s12333_s6 + $0x12e0] sm:$0xff] }
 0x257   : > { %7650 = vmatpush.bf16.msrb.mxu3 %v11818_v62  ;;  %v11831_v62 = vld [vmem:[%s12333_s6 + $0x1260] sm:$0xff] }
 0x258   : > { %7612 = vmatpush.bf16.msrb.mxu0 %v11793_v0  ;;  %v7386_v20 = vpop.f32.mrf.mxu2  ;;  %v7362_v24 = vpop.f32.mrf.mxu0 }
 0x259   : > { %7625 = vmatpush.bf16.msrb.mxu1 %v11801_v2  ;;  %v7387_v21 = vadd.f32 %v7386_v20, %v7374_v15  ;;  %v7399_v23 = vpop.f32.mrf.mxu3  ;;  %v7375_v27 = vpop.f32.mrf.mxu1  ;;  %v11822_v2 = vld [vmem:[%s12333_s6 + $0x1218] sm:$0xff]  ;;  %v11845_v15 = vld [vmem:[%s12333_s6 + $0x12d0] sm:$0xff]  ;;  %v11844_v20 = vld [vmem:[%s12333_s6 + $0x12c8] sm:$0xff] }
 0x25a   : > { %7638 = vmatpush.bf16.msrb.mxu2 %v11809_v3  ;;  %v11830_v3 = vld [vmem:[%s12333_s6 + $0x1258] sm:$0xff]  ;;  %v11835_v24 = vld [vmem:[%s12333_s6 + $0x1280] sm:$0xff] }
 0x25b   : > { %7651 = vmatpush.bf16.msrb.mxu3 %v11817_v4  ;;  %v12936_v25 = vadd.f32 %v7399_v23, %v7387_v21  ;;  %v11838_v4 = vld [vmem:[%s12333_s6 + $0x1298] sm:$0xff]  ;;  %v11827_v23 = vld [vmem:[%s12333_s6 + $0x1240] sm:$0xff] }
 0x25c   : > { %7613 = vmatpush.bf16.msrb.mxu0 %v11792_v5  ;;  %v11874_v27 = vld [vmem:[%s12333_s6 + $0x13b8] sm:$0xff] }
 0x25d   : > { %7626 = vmatpush.bf16.msrb.mxu1 %v11800_v6 }
 0x25e   : > { %7639 = vmatpush.bf16.msrb.mxu2 %v11808_v7  ;;  %v11846_v7 = vld [vmem:[%s12333_s6 + $0x12d8] sm:$0xff] }
 0x25f   : > { %7652 = vmatpush.bf16.msrb.mxu3 %v11816_v8 }
 0x260   : > { %7614 = vmatpush.bf16.msrb.mxu0 %v11791_v11  ;;  %v7388_v36 = vpop.f32.mrf.mxu2  ;;  %v11821_v11 = vld [vmem:[%s12333_s6 + $0x1210] sm:$0xff] }
 0x261   : > { %7627 = vmatpush.bf16.msrb.mxu1 %v11799_v13  ;;  %v7401_v41 = vpop.f32.mrf.mxu3  ;;  %v11829_v13 = vld [vmem:[%s12333_s6 + $0x1250] sm:$0xff] }
 0x262   : > { %7640 = vmatpush.bf16.msrb.mxu2 %v11807_v14  ;;  %v11837_v14 = vld [vmem:[%s12333_s6 + $0x1290] sm:$0xff]  ;;  %v11880_v41 = vld [vmem:[%s12333_s6 + $0x13e8] sm:$0xff] }
 0x263   : > { %7653 = vmatpush.bf16.msrb.mxu3 %v11815_v16  ;;  %v11820_v16 = vld [vmem:[%s12333_s6 + $0x1208] sm:$0xff]  ;;  %v11873_v36 = vld [vmem:[%s12333_s6 + $0x13b0] sm:$0xff] }
 0x264   : > { %7615 = vmatpush.bf16.msrb.mxu0 %v11790_v17  ;;  %v11828_v17 = vld [vmem:[%s12333_s6 + $0x1248] sm:$0xff] }
 0x265   : > { %7628 = vmatpush.bf16.msrb.mxu1 %v11798_v18  ;;  %v11836_v18 = vld [vmem:[%s12333_s6 + $0x1288] sm:$0xff] }
 0x266   : > { %7641 = vmatpush.bf16.msrb.mxu2 %v11806_v19 }
 0x267   : > { %7654 = vmatpush.bf16.msrb.mxu3 %v11814_v22  ;;  %v11819_v22 = vld [vmem:[%s12333_s6 + $0x1200] sm:$0xff] }
 0x268   : > { %7616 = vmatpush.bf16.msrb.mxu0 %v11789_v26  ;;  %v11866_v26 = vld [vmem:[%s12333_s6 + $0x1378] sm:$0xff] }
 0x269   : > { %7629 = vmatpush.bf16.msrb.mxu1 %v11797_v28  ;;  %v11843_v28 = vld [vmem:[%s12333_s6 + $0x12c0] sm:$0xff] }
 0x26a   : > { %7642 = vmatpush.bf16.msrb.mxu2 %v11805_v29  ;;  %v1893_v29 = vld [vmem:[#allocation1] sm:$0xff] }
 0x26b   : > { %7655 = vmatpush.bf16.msrb.mxu3 %v11813_v30  ;;  %v1895_v30 = vld [vmem:[#allocation1 + $0x12] sm:$0xff] }
 0x26c   : > { %7617 = vmatpush.bf16.msrb.mxu0 %v11788_v31  ;;  %v11882_v31 = vld [vmem:[%s12333_s6 + $0x13f8] sm:$0xff] }
 0x26d   : > { %7630 = vmatpush.bf16.msrb.mxu1 %v11796_v32  ;;  %v1894_v32 = vld [vmem:[#allocation1 + $0x9] sm:$0xff] }
 0x26e   : > { %7643 = vmatpush.bf16.msrb.mxu2 %v11804_v33  ;;  %v11857_v33 = vld [vmem:[%s12333_s6 + $0x1330] sm:$0xff] }
 0x26f   : > { %7656 = vmatpush.bf16.msrb.mxu3 %v11812_v40  ;;  %v11872_v40 = vld [vmem:[%s12333_s6 + $0x13a8] sm:$0xff] }
 0x270   : > { %7618 = vmatpush.bf16.msrb.mxu0 %v11787_v42  ;;  %v7412_v58 = vpop.f32.mrf.mxu0 }
 0x271   : > { %7631 = vmatpush.bf16.msrb.mxu1 %v11795_v43  ;;  %v7413_v59 = vadd.f32 %v7412_v58, %v12936_v25  ;;  %v7425_v61 = vpop.f32.mrf.mxu1  ;;  %v11858_v25 = vld [vmem:[%s12333_s6 + $0x1338] sm:$0xff] }
 0x272   : > { %7644 = vmatpush.bf16.msrb.mxu2 %v11803_v44  ;;  %v11855_v44 = vld [vmem:[%s12333_s6 + $0x1320] sm:$0xff] }
 0x273   : > { %7657 = vmatpush.bf16.msrb.mxu3 %v11811_v48  ;;  %7619 = vmatmul.bf16.vlgmr.msrb.gmra.mxu0 %v1887_v34  ;;  %v7426_v0 = vadd.f32 %v7425_v61, %v7413_v59  ;;  %v1896_v34 = vld [vmem:[#allocation1 + $0x1b] sm:$0xff] }
 0x274   : > { %7663 = vmatpush.bf16.msra.mxu0 %v11826_v45  ;;  %7632 = vmatmul.bf16.vlgmr.msrb.gmra.mxu1 %v1888_v37  ;;  %v11881_v37 = vld [vmem:[%s12333_s6 + $0x13f0] sm:$0xff] }
 0x275   : > { %7676 = vmatpush.bf16.msra.mxu1 %v11834_v46  ;;  %7645 = vmatmul.bf16.vlgmr.msrb.gmra.mxu2 %v1889_v35  ;;  %v11865_v35 = vld [vmem:[%s12333_s6 + $0x1370] sm:$0xff]  ;;  %v11863_v46 = vld [vmem:[%s12333_s6 + $0x1360] sm:$0xff] }
 0x276   : > { %7689 = vmatpush.bf16.msra.mxu2 %v11842_v47  ;;  %7658 = vmatmul.bf16.vlgmr.msrb.gmra.mxu3 %v1890_v38  ;;  %v11856_v38 = vld [vmem:[%s12333_s6 + $0x1328] sm:$0xff]  ;;  %v11871_v47 = vld [vmem:[%s12333_s6 + $0x13a0] sm:$0xff]  ;;  %v11853_v59 = vld [vmem:[%s12333_s6 + $0x1310] sm:$0xff] }
 0x277   : > { %7702 = vmatpush.bf16.msra.mxu3 %v11850_v49  ;;  %v11879_v49 = vld [vmem:[%s12333_s6 + $0x13e0] sm:$0xff]  ;;  %v11861_v61 = vld [vmem:[%s12333_s6 + $0x1350] sm:$0xff] }
 0x278   : > { %7664 = vmatpush.bf16.msra.mxu0 %v11825_v50  ;;  %v7438_v5 = vpop.f32.mrf.mxu2  ;;  %v7414_v9 = vpop.f32.mrf.mxu0  ;;  %v11854_v50 = vld [vmem:[%s12333_s6 + $0x1318] sm:$0xff] }
 0x279   : > { %7677 = vmatpush.bf16.msra.mxu1 %v11833_v51  ;;  %v7439_v6 = vadd.f32 %v7438_v5, %v7426_v0  ;;  %v7451_v8 = vpop.f32.mrf.mxu3  ;;  %v7427_v12 = vpop.f32.mrf.mxu1  ;;  %v11862_v51 = vld [vmem:[%s12333_s6 + $0x1358] sm:$0xff]  ;;  %v11852_v0 = vld [vmem:[%s12333_s6 + $0x1308] sm:$0xff] }
 0x27a   : > { %7690 = vmatpush.bf16.msra.mxu2 %v11841_v52  ;;  %v11870_v52 = vld [vmem:[%s12333_s6 + $0x1398] sm:$0xff]  ;;  %v11876_v9 = vld [vmem:[%s12333_s6 + $0x13c8] sm:$0xff]  ;;  %v11859_v12 = vld [vmem:[%s12333_s6 + $0x1340] sm:$0xff] }
 0x27b   : > { %7703 = vmatpush.bf16.msra.mxu3 %v11849_v53  ;;  %v7452_v10 = vadd.f32 %v7451_v8, %v7439_v6  ;;  %v1898_v6 = vld [vmem:[#allocation1 + $0x2d] sm:$0xff] }
 0x27c   : > { %7665 = vmatpush.bf16.msra.mxu0 %v11824_v54  ;;  %v230_v8 = vld [vmem:[%s12347_s8 + $0x50] sm:$0xff] }
 0x27d   : > { %7678 = vmatpush.bf16.msra.mxu1 %v11832_v55  ;;  %v11878_v55 = vld [vmem:[%s12333_s6 + $0x13d8] sm:$0xff] }
 0x27e   : > { %7691 = vmatpush.bf16.msra.mxu2 %v11840_v56 }
 0x27f   : > { %7704 = vmatpush.bf16.msra.mxu3 %v11848_v57 }
 0x280   : > { %7666 = vmatpush.bf16.msra.mxu0 %v11823_v60  ;;  %v7440_v19 = vpop.f32.mrf.mxu2 }
 0x281   : > { %7679 = vmatpush.bf16.msra.mxu1 %v11831_v62  ;;  %v7453_v21 = vpop.f32.mrf.mxu3  ;;  %v11869_v62 = vld [vmem:[%s12333_s6 + $0x1390] sm:$0xff] }
 0x282   : > { %7692 = vmatpush.bf16.msra.mxu2 %v11839_v63  ;;  %v11877_v63 = vld [vmem:[%s12333_s6 + $0x13d0] sm:$0xff] }
 0x283   : > { %7705 = vmatpush.bf16.msra.mxu3 %v11847_v1  ;;  %v11860_v1 = vld [vmem:[%s12333_s6 + $0x1348] sm:$0xff]  ;;  %v11889_v19 = vld [vmem:[%s12333_s6 + $0x1430] sm:$0xff] }
 0x284   : > { %7667 = vmatpush.bf16.msra.mxu0 %v11822_v2  ;;  %v11868_v2 = vld [vmem:[%s12333_s6 + $0x1388] sm:$0xff]  ;;  %v11905_v21 = vld [vmem:[%s12333_s6 + $0x14b0] sm:$0xff] }
 0x285   : > { %7680 = vmatpush.bf16.msra.mxu1 %v11830_v3  ;;  %v1897_v3 = vld [vmem:[#allocation1 + $0x24] sm:$0xff] }
 0x286   : > { %7693 = vmatpush.bf16.msra.mxu2 %v11838_v4  ;;  %v1899_v4 = vld [vmem:[#allocation1 + $0x36] sm:$0xff] }
 0x287   : > { %7706 = vmatpush.bf16.msra.mxu3 %v11846_v7  ;;  %v1900_v7 = vld [vmem:[#allocation1 + $0x3f] sm:$0xff] }
 0x288   : > { %7668 = vmatpush.bf16.msra.mxu0 %v11821_v11  ;;  %1902 = vst [vmem:[#allocation1] ss:$9 sm:$0xff] %v230_v8  ;;  %v11851_v11 = vld [vmem:[%s12333_s6 + $0x1300] sm:$0xff]  ;;  %v11928_v8 = vld [vmem:[%s12333_s6 + $0x1568] sm:$0xff] }
 0x289   : > { %7681 = vmatpush.bf16.msra.mxu1 %v11829_v13  ;;  %v11867_v13 = vld [vmem:[%s12333_s6 + $0x1380] sm:$0xff] }
 0x28a   : > { %7694 = vmatpush.bf16.msra.mxu2 %v11837_v14  ;;  %v11890_v14 = vld [vmem:[%s12333_s6 + $0x1438] sm:$0xff] }
 0x28b   : > { %7707 = vmatpush.bf16.msra.mxu3 %v11845_v15  ;;  %v11898_v15 = vld [vmem:[%s12333_s6 + $0x1478] sm:$0xff] }
 0x28c   : > { %7669 = vmatpush.bf16.msra.mxu0 %v11820_v16  ;;  %v11906_v16 = vld [vmem:[%s12333_s6 + $0x14b8] sm:$0xff] }
 0x28d   : > { %7682 = vmatpush.bf16.msra.mxu1 %v11828_v17  ;;  %v11875_v17 = vld [vmem:[%s12333_s6 + $0x13c0] sm:$0xff] }
 0x28e   : > { %7695 = vmatpush.bf16.msra.mxu2 %v11836_v18  ;;  %v11914_v18 = vld [vmem:[%s12333_s6 + $0x14f8] sm:$0xff] }
 0x28f   : > { %7708 = vmatpush.bf16.msra.mxu3 %v11844_v20  ;;  %v11897_v20 = vld [vmem:[%s12333_s6 + $0x1470] sm:$0xff] }
 0x290   : > { %7670 = vmatpush.bf16.msra.mxu0 %v11819_v22  ;;  %v7464_v42 = vpop.f32.mrf.mxu0  ;;  %v11913_v22 = vld [vmem:[%s12333_s6 + $0x14f0] sm:$0xff] }
 0x291   : > { %7683 = vmatpush.bf16.msra.mxu1 %v11827_v23  ;;  %v7465_v43 = vadd.f32 %v7464_v42, %v7452_v10  ;;  %v7477_v45 = vpop.f32.mrf.mxu1  ;;  %v11888_v23 = vld [vmem:[%s12333_s6 + $0x1428] sm:$0xff] }
 0x292   : > { %7696 = vmatpush.bf16.msra.mxu2 %v11835_v24  ;;  %v11896_v24 = vld [vmem:[%s12333_s6 + $0x1468] sm:$0xff] }
 0x293   : > { %7709 = vmatpush.bf16.msra.mxu3 %v11843_v28  ;;  %7671 = vmatmul.bf16.vlgmr.msra.gmra.mxu0 %v1893_v29  ;;  %v7478_v48 = vadd.f32 %v7477_v45, %v7465_v43  ;;  %v11887_v29 = vld [vmem:[%s12333_s6 + $0x1420] sm:$0xff] }
 0x294   : > { %7715 = vmatpush.bf16.msrb.mxu0 %v11858_v25  ;;  %7684 = vmatmul.bf16.vlgmr.msra.gmra.mxu1 %v1894_v32  ;;  %v11904_v25 = vld [vmem:[%s12333_s6 + $0x14a8] sm:$0xff]  ;;  %v11903_v32 = vld [vmem:[%s12333_s6 + $0x14a0] sm:$0xff] }
 0x295   : > { %7728 = vmatpush.bf16.msrb.mxu1 %v11866_v26  ;;  %7697 = vmatmul.bf16.vlgmr.msra.gmra.mxu2 %v1895_v30  ;;  %v11912_v26 = vld [vmem:[%s12333_s6 + $0x14e8] sm:$0xff] }
 0x296   : > { %7741 = vmatpush.bf16.msrb.mxu2 %v11874_v27  ;;  %7710 = vmatmul.bf16.vlgmr.msra.gmra.mxu3 %v1896_v34  ;;  %v11911_v34 = vld [vmem:[%s12333_s6 + $0x14e0] sm:$0xff] }
 0x297   : > { %7754 = vmatpush.bf16.msrb.mxu3 %v11882_v31  ;;  %v11895_v31 = vld [vmem:[%s12333_s6 + $0x1460] sm:$0xff] }
 0x298   : > { %7716 = vmatpush.bf16.msrb.mxu0 %v11857_v33  ;;  %v7490_v53 = vpop.f32.mrf.mxu2  ;;  %v7466_v57 = vpop.f32.mrf.mxu0 }
 0x299   : > { %7729 = vmatpush.bf16.msrb.mxu1 %v11865_v35  ;;  %v7491_v54 = vadd.f32 %v7490_v53, %v7478_v48  ;;  %v7503_v56 = vpop.f32.mrf.mxu3  ;;  %v7479_v60 = vpop.f32.mrf.mxu1  ;;  %v11886_v35 = vld [vmem:[%s12333_s6 + $0x1418] sm:$0xff]  ;;  %v11909_v48 = vld [vmem:[%s12333_s6 + $0x14d0] sm:$0xff]  ;;  %v11908_v53 = vld [vmem:[%s12333_s6 + $0x14c8] sm:$0xff] }
 0x29a   : > { %7742 = vmatpush.bf16.msrb.mxu2 %v11873_v36  ;;  %v11894_v36 = vld [vmem:[%s12333_s6 + $0x1458] sm:$0xff]  ;;  %v11899_v57 = vld [vmem:[%s12333_s6 + $0x1480] sm:$0xff] }
 0x29b   : > { %7755 = vmatpush.bf16.msrb.mxu3 %v11881_v37  ;;  %v13004_v58 = vadd.f32 %v7503_v56, %v7491_v54  ;;  %v11902_v37 = vld [vmem:[%s12333_s6 + $0x1498] sm:$0xff]  ;;  %v11891_v56 = vld [vmem:[%s12333_s6 + $0x1440] sm:$0xff] }
 0x29c   : > { %7717 = vmatpush.bf16.msrb.mxu0 %v11856_v38  ;;  %v11938_v60 = vld [vmem:[%s12333_s6 + $0x15b8] sm:$0xff] }
 0x29d   : > { %7730 = vmatpush.bf16.msrb.mxu1 %v11864_v39 }
 0x29e   : > { %7743 = vmatpush.bf16.msrb.mxu2 %v11872_v40  ;;  %v11910_v40 = vld [vmem:[%s12333_s6 + $0x14d8] sm:$0xff] }
 0x29f   : > { %7756 = vmatpush.bf16.msrb.mxu3 %v11880_v41 }
 0x2a0   : > { %7718 = vmatpush.bf16.msrb.mxu0 %v11855_v44  ;;  %v7492_v5 = vpop.f32.mrf.mxu2  ;;  %v11885_v44 = vld [vmem:[%s12333_s6 + $0x1410] sm:$0xff] }
 0x2a1   : > { %7731 = vmatpush.bf16.msrb.mxu1 %v11863_v46  ;;  %v7505_v10 = vpop.f32.mrf.mxu3  ;;  %v11893_v46 = vld [vmem:[%s12333_s6 + $0x1450] sm:$0xff] }
 0x2a2   : > { %7744 = vmatpush.bf16.msrb.mxu2 %v11871_v47  ;;  %v11901_v47 = vld [vmem:[%s12333_s6 + $0x1490] sm:$0xff]  ;;  %v11944_v10 = vld [vmem:[%s12333_s6 + $0x15e8] sm:$0xff] }
 0x2a3   : > { %7757 = vmatpush.bf16.msrb.mxu3 %v11879_v49  ;;  %v11884_v49 = vld [vmem:[%s12333_s6 + $0x1408] sm:$0xff]  ;;  %v11937_v5 = vld [vmem:[%s12333_s6 + $0x15b0] sm:$0xff] }
 0x2a4   : > { %7719 = vmatpush.bf16.msrb.mxu0 %v11854_v50  ;;  %v11892_v50 = vld [vmem:[%s12333_s6 + $0x1448] sm:$0xff] }
 0x2a5   : > { %7732 = vmatpush.bf16.msrb.mxu1 %v11862_v51  ;;  %v11900_v51 = vld [vmem:[%s12333_s6 + $0x1488] sm:$0xff] }
 0x2a6   : > { %7745 = vmatpush.bf16.msrb.mxu2 %v11870_v52 }
 0x2a7   : > { %7758 = vmatpush.bf16.msrb.mxu3 %v11878_v55  ;;  %v11883_v55 = vld [vmem:[%s12333_s6 + $0x1400] sm:$0xff] }
 0x2a8   : > { %7720 = vmatpush.bf16.msrb.mxu0 %v11853_v59  ;;  %v11930_v59 = vld [vmem:[%s12333_s6 + $0x1578] sm:$0xff] }
 0x2a9   : > { %7733 = vmatpush.bf16.msrb.mxu1 %v11861_v61  ;;  %v11907_v61 = vld [vmem:[%s12333_s6 + $0x14c0] sm:$0xff] }
 0x2aa   : > { %7746 = vmatpush.bf16.msrb.mxu2 %v11869_v62  ;;  %v1903_v62 = vld [vmem:[#allocation1] sm:$0xff] }
 0x2ab   : > { %7759 = vmatpush.bf16.msrb.mxu3 %v11877_v63  ;;  %v1905_v63 = vld [vmem:[#allocation1 + $0x12] sm:$0xff] }
 0x2ac   : > { %7721 = vmatpush.bf16.msrb.mxu0 %v11852_v0  ;;  %v11946_v0 = vld [vmem:[%s12333_s6 + $0x15f8] sm:$0xff] }
 0x2ad   : > { %7734 = vmatpush.bf16.msrb.mxu1 %v11860_v1  ;;  %v1904_v1 = vld [vmem:[#allocation1 + $0x9] sm:$0xff] }
 0x2ae   : > { %7747 = vmatpush.bf16.msrb.mxu2 %v11868_v2  ;;  %v11921_v2 = vld [vmem:[%s12333_s6 + $0x1530] sm:$0xff] }
 0x2af   : > { %7760 = vmatpush.bf16.msrb.mxu3 %v11876_v9  ;;  %v11936_v9 = vld [vmem:[%s12333_s6 + $0x15a8] sm:$0xff] }
 0x2b0   : > { %7722 = vmatpush.bf16.msrb.mxu0 %v11851_v11  ;;  %v7516_v27 = vpop.f32.mrf.mxu0 }
 0x2b1   : > { %7735 = vmatpush.bf16.msrb.mxu1 %v11859_v12  ;;  %v7517_v28 = vadd.f32 %v7516_v27, %v13004_v58  ;;  %v7529_v30 = vpop.f32.mrf.mxu1  ;;  %v11922_v58 = vld [vmem:[%s12333_s6 + $0x1538] sm:$0xff] }
 0x2b2   : > { %7748 = vmatpush.bf16.msrb.mxu2 %v11867_v13  ;;  %v11919_v13 = vld [vmem:[%s12333_s6 + $0x1520] sm:$0xff] }
 0x2b3   : > { %7761 = vmatpush.bf16.msrb.mxu3 %v11875_v17  ;;  %7723 = vmatmul.bf16.vlgmr.msrb.gmra.mxu0 %v1897_v3  ;;  %v7530_v33 = vadd.f32 %v7529_v30, %v7517_v28  ;;  %v1906_v3 = vld [vmem:[#allocation1 + $0x1b] sm:$0xff] }
 0x2b4   : > { %7767 = vmatpush.bf16.msra.mxu0 %v11890_v14  ;;  %7736 = vmatmul.bf16.vlgmr.msrb.gmra.mxu1 %v1898_v6  ;;  %v11945_v6 = vld [vmem:[%s12333_s6 + $0x15f0] sm:$0xff] }
 0x2b5   : > { %7780 = vmatpush.bf16.msra.mxu1 %v11898_v15  ;;  %7749 = vmatmul.bf16.vlgmr.msrb.gmra.mxu2 %v1899_v4  ;;  %v11929_v4 = vld [vmem:[%s12333_s6 + $0x1570] sm:$0xff]  ;;  %v11927_v15 = vld [vmem:[%s12333_s6 + $0x1560] sm:$0xff] }
 0x2b6   : > { %7793 = vmatpush.bf16.msra.mxu2 %v11906_v16  ;;  %7762 = vmatmul.bf16.vlgmr.msrb.gmra.mxu3 %v1900_v7  ;;  %v11920_v7 = vld [vmem:[%s12333_s6 + $0x1528] sm:$0xff]  ;;  %v11935_v16 = vld [vmem:[%s12333_s6 + $0x15a0] sm:$0xff]  ;;  %v11917_v28 = vld [vmem:[%s12333_s6 + $0x1510] sm:$0xff] }
 0x2b7   : > { %7806 = vmatpush.bf16.msra.mxu3 %v11914_v18  ;;  %v11943_v18 = vld [vmem:[%s12333_s6 + $0x15e0] sm:$0xff]  ;;  %v11925_v30 = vld [vmem:[%s12333_s6 + $0x1550] sm:$0xff] }
 0x2b8   : > { %7768 = vmatpush.bf16.msra.mxu0 %v11889_v19  ;;  %v7542_v38 = vpop.f32.mrf.mxu2  ;;  %v7518_v42 = vpop.f32.mrf.mxu0  ;;  %v11918_v19 = vld [vmem:[%s12333_s6 + $0x1518] sm:$0xff] }
 0x2b9   : > { %7781 = vmatpush.bf16.msra.mxu1 %v11897_v20  ;;  %v7543_v39 = vadd.f32 %v7542_v38, %v7530_v33  ;;  %v7555_v41 = vpop.f32.mrf.mxu3  ;;  %v7531_v45 = vpop.f32.mrf.mxu1  ;;  %v11926_v20 = vld [vmem:[%s12333_s6 + $0x1558] sm:$0xff]  ;;  %v11916_v33 = vld [vmem:[%s12333_s6 + $0x1508] sm:$0xff] }
 0x2ba   : > { %7794 = vmatpush.bf16.msra.mxu2 %v11905_v21  ;;  %v11934_v21 = vld [vmem:[%s12333_s6 + $0x1598] sm:$0xff]  ;;  %v11940_v42 = vld [vmem:[%s12333_s6 + $0x15c8] sm:$0xff]  ;;  %v11923_v45 = vld [vmem:[%s12333_s6 + $0x1540] sm:$0xff] }
 0x2bb   : > { %7807 = vmatpush.bf16.msra.mxu3 %v11913_v22  ;;  %v7556_v43 = vadd.f32 %v7555_v41, %v7543_v39  ;;  %v1908_v39 = vld [vmem:[#allocation1 + $0x2d] sm:$0xff]  ;;  %v231_v41 = vld [vmem:[%s12347_s8 + $0x58] sm:$0xff] }
 0x2bc   : > { %7769 = vmatpush.bf16.msra.mxu0 %v11888_v23 }
 0x2bd   : > { %7782 = vmatpush.bf16.msra.mxu1 %v11896_v24  ;;  %v11942_v24 = vld [vmem:[%s12333_s6 + $0x15d8] sm:$0xff] }
 0x2be   : > { %7795 = vmatpush.bf16.msra.mxu2 %v11904_v25 }
 0x2bf   : > { %7808 = vmatpush.bf16.msra.mxu3 %v11912_v26 }
 0x2c0   : > { %7770 = vmatpush.bf16.msra.mxu0 %v11887_v29  ;;  %v7544_v52 = vpop.f32.mrf.mxu2 }
 0x2c1   : > { %7783 = vmatpush.bf16.msra.mxu1 %v11895_v31  ;;  %v7557_v54 = vpop.f32.mrf.mxu3  ;;  %v11933_v31 = vld [vmem:[%s12333_s6 + $0x1590] sm:$0xff] }
 0x2c2   : > { %7796 = vmatpush.bf16.msra.mxu2 %v11903_v32  ;;  %v11941_v32 = vld [vmem:[%s12333_s6 + $0x15d0] sm:$0xff] }
 0x2c3   : > { %7809 = vmatpush.bf16.msra.mxu3 %v11911_v34  ;;  %v11924_v34 = vld [vmem:[%s12333_s6 + $0x1548] sm:$0xff]  ;;  %v11953_v52 = vld [vmem:[%s12333_s6 + $0x1630] sm:$0xff] }
 0x2c4   : > { %7771 = vmatpush.bf16.msra.mxu0 %v11886_v35  ;;  %v11932_v35 = vld [vmem:[%s12333_s6 + $0x1588] sm:$0xff]  ;;  %v11969_v54 = vld [vmem:[%s12333_s6 + $0x16b0] sm:$0xff] }
 0x2c5   : > { %7784 = vmatpush.bf16.msra.mxu1 %v11894_v36  ;;  %v1907_v36 = vld [vmem:[#allocation1 + $0x24] sm:$0xff] }
 0x2c6   : > { %7797 = vmatpush.bf16.msra.mxu2 %v11902_v37  ;;  %v1909_v37 = vld [vmem:[#allocation1 + $0x36] sm:$0xff] }
 0x2c7   : > { %7810 = vmatpush.bf16.msra.mxu3 %v11910_v40  ;;  %v1910_v40 = vld [vmem:[#allocation1 + $0x3f] sm:$0xff] }
 0x2c8   : > { %7772 = vmatpush.bf16.msra.mxu0 %v11885_v44  ;;  %1912 = vst [vmem:[#allocation1] ss:$9 sm:$0xff] %v231_v41  ;;  %v11915_v44 = vld [vmem:[%s12333_s6 + $0x1500] sm:$0xff]  ;;  %v11992_v41 = vld [vmem:[%s12333_s6 + $0x1768] sm:$0xff] }
 0x2c9   : > { %7785 = vmatpush.bf16.msra.mxu1 %v11893_v46  ;;  %v11931_v46 = vld [vmem:[%s12333_s6 + $0x1580] sm:$0xff] }
 0x2ca   : > { %7798 = vmatpush.bf16.msra.mxu2 %v11901_v47  ;;  %v11954_v47 = vld [vmem:[%s12333_s6 + $0x1638] sm:$0xff] }
 0x2cb   : > { %7811 = vmatpush.bf16.msra.mxu3 %v11909_v48  ;;  %v11962_v48 = vld [vmem:[%s12333_s6 + $0x1678] sm:$0xff] }
 0x2cc   : > { %7773 = vmatpush.bf16.msra.mxu0 %v11884_v49  ;;  %v11970_v49 = vld [vmem:[%s12333_s6 + $0x16b8] sm:$0xff] }
 0x2cd   : > { %7786 = vmatpush.bf16.msra.mxu1 %v11892_v50  ;;  %v11939_v50 = vld [vmem:[%s12333_s6 + $0x15c0] sm:$0xff] }
 0x2ce   : > { %7799 = vmatpush.bf16.msra.mxu2 %v11900_v51  ;;  %v11978_v51 = vld [vmem:[%s12333_s6 + $0x16f8] sm:$0xff] }
 0x2cf   : > { %7812 = vmatpush.bf16.msra.mxu3 %v11908_v53  ;;  %v11961_v53 = vld [vmem:[%s12333_s6 + $0x1670] sm:$0xff] }
 0x2d0   : > { %7774 = vmatpush.bf16.msra.mxu0 %v11883_v55  ;;  %v7568_v11 = vpop.f32.mrf.mxu0  ;;  %v11977_v55 = vld [vmem:[%s12333_s6 + $0x16f0] sm:$0xff] }
 0x2d1   : > { %7787 = vmatpush.bf16.msra.mxu1 %v11891_v56  ;;  %v7569_v12 = vadd.f32 %v7568_v11, %v7556_v43  ;;  %v7581_v14 = vpop.f32.mrf.mxu1  ;;  %v11952_v56 = vld [vmem:[%s12333_s6 + $0x1628] sm:$0xff] }
 0x2d2   : > { %7800 = vmatpush.bf16.msra.mxu2 %v11899_v57  ;;  %v11960_v57 = vld [vmem:[%s12333_s6 + $0x1668] sm:$0xff] }
 0x2d3   : > { %7813 = vmatpush.bf16.msra.mxu3 %v11907_v61  ;;  %7775 = vmatmul.bf16.vlgmr.msra.gmra.mxu0 %v1903_v62  ;;  %v7582_v17 = vadd.f32 %v7581_v14, %v7569_v12  ;;  %v11951_v62 = vld [vmem:[%s12333_s6 + $0x1620] sm:$0xff] }
 0x2d4   : > { %7819 = vmatpush.bf16.msrb.mxu0 %v11922_v58  ;;  %7788 = vmatmul.bf16.vlgmr.msra.gmra.mxu1 %v1904_v1  ;;  %v11968_v58 = vld [vmem:[%s12333_s6 + $0x16a8] sm:$0xff]  ;;  %v11967_v1 = vld [vmem:[%s12333_s6 + $0x16a0] sm:$0xff] }
 0x2d5   : > { %7832 = vmatpush.bf16.msrb.mxu1 %v11930_v59  ;;  %7801 = vmatmul.bf16.vlgmr.msra.gmra.mxu2 %v1905_v63  ;;  %v11976_v59 = vld [vmem:[%s12333_s6 + $0x16e8] sm:$0xff] }
 0x2d6   : > { %7845 = vmatpush.bf16.msrb.mxu2 %v11938_v60  ;;  %7814 = vmatmul.bf16.vlgmr.msra.gmra.mxu3 %v1906_v3  ;;  %v11975_v3 = vld [vmem:[%s12333_s6 + $0x16e0] sm:$0xff] }
 0x2d7   : > { %7858 = vmatpush.bf16.msrb.mxu3 %v11946_v0  ;;  %v11959_v0 = vld [vmem:[%s12333_s6 + $0x1660] sm:$0xff] }
 0x2d8   : > { %7820 = vmatpush.bf16.msrb.mxu0 %v11921_v2  ;;  %v7594_v22 = vpop.f32.mrf.mxu2  ;;  %v7570_v26 = vpop.f32.mrf.mxu0 }
 0x2d9   : > { %7833 = vmatpush.bf16.msrb.mxu1 %v11929_v4  ;;  %v7595_v23 = vadd.f32 %v7594_v22, %v7582_v17  ;;  %v7607_v25 = vpop.f32.mrf.mxu3  ;;  %v7583_v29 = vpop.f32.mrf.mxu1  ;;  %v11950_v4 = vld [vmem:[%s12333_s6 + $0x1618] sm:$0xff]  ;;  %v11973_v17 = vld [vmem:[%s12333_s6 + $0x16d0] sm:$0xff]  ;;  %v11972_v22 = vld [vmem:[%s12333_s6 + $0x16c8] sm:$0xff] }
 0x2da   : > { %7846 = vmatpush.bf16.msrb.mxu2 %v11937_v5  ;;  %v11958_v5 = vld [vmem:[%s12333_s6 + $0x1658] sm:$0xff]  ;;  %v11963_v26 = vld [vmem:[%s12333_s6 + $0x1680] sm:$0xff] }
 0x2db   : > { %7859 = vmatpush.bf16.msrb.mxu3 %v11945_v6  ;;  %v13072_v27 = vadd.f32 %v7607_v25, %v7595_v23  ;;  %v11966_v6 = vld [vmem:[%s12333_s6 + $0x1698] sm:$0xff]  ;;  %v11955_v25 = vld [vmem:[%s12333_s6 + $0x1640] sm:$0xff] }
 0x2dc   : > { %7821 = vmatpush.bf16.msrb.mxu0 %v11920_v7  ;;  %v12002_v29 = vld [vmem:[%s12333_s6 + $0x17b8] sm:$0xff] }
 0x2dd   : > { %7834 = vmatpush.bf16.msrb.mxu1 %v11928_v8 }
 0x2de   : > { %7847 = vmatpush.bf16.msrb.mxu2 %v11936_v9  ;;  %v11974_v9 = vld [vmem:[%s12333_s6 + $0x16d8] sm:$0xff] }
 0x2df   : > { %7860 = vmatpush.bf16.msrb.mxu3 %v11944_v10 }
 0x2e0   : > { %7822 = vmatpush.bf16.msrb.mxu0 %v11919_v13  ;;  %v7596_v38 = vpop.f32.mrf.mxu2  ;;  %v11949_v13 = vld [vmem:[%s12333_s6 + $0x1610] sm:$0xff] }
 0x2e1   : > { %7835 = vmatpush.bf16.msrb.mxu1 %v11927_v15  ;;  %v7609_v43 = vpop.f32.mrf.mxu3  ;;  %v11957_v15 = vld [vmem:[%s12333_s6 + $0x1650] sm:$0xff] }
 0x2e2   : > { %7848 = vmatpush.bf16.msrb.mxu2 %v11935_v16  ;;  %v11965_v16 = vld [vmem:[%s12333_s6 + $0x1690] sm:$0xff]  ;;  %v12008_v43 = vld [vmem:[%s12333_s6 + $0x17e8] sm:$0xff] }
 0x2e3   : > { %7861 = vmatpush.bf16.msrb.mxu3 %v11943_v18  ;;  %v11948_v18 = vld [vmem:[%s12333_s6 + $0x1608] sm:$0xff]  ;;  %v12001_v38 = vld [vmem:[%s12333_s6 + $0x17b0] sm:$0xff] }
 0x2e4   : > { %7823 = vmatpush.bf16.msrb.mxu0 %v11918_v19  ;;  %v11956_v19 = vld [vmem:[%s12333_s6 + $0x1648] sm:$0xff] }
 0x2e5   : > { %7836 = vmatpush.bf16.msrb.mxu1 %v11926_v20  ;;  %v11964_v20 = vld [vmem:[%s12333_s6 + $0x1688] sm:$0xff] }
 0x2e6   : > { %7849 = vmatpush.bf16.msrb.mxu2 %v11934_v21 }
 0x2e7   : > { %7862 = vmatpush.bf16.msrb.mxu3 %v11942_v24  ;;  %v11947_v24 = vld [vmem:[%s12333_s6 + $0x1600] sm:$0xff] }
 0x2e8   : > { %7824 = vmatpush.bf16.msrb.mxu0 %v11917_v28  ;;  %v11994_v28 = vld [vmem:[%s12333_s6 + $0x1778] sm:$0xff] }
 0x2e9   : > { %7837 = vmatpush.bf16.msrb.mxu1 %v11925_v30  ;;  %v11971_v30 = vld [vmem:[%s12333_s6 + $0x16c0] sm:$0xff] }
 0x2ea   : > { %7850 = vmatpush.bf16.msrb.mxu2 %v11933_v31  ;;  %v1913_v31 = vld [vmem:[#allocation1] sm:$0xff] }
 0x2eb   : > { %7863 = vmatpush.bf16.msrb.mxu3 %v11941_v32  ;;  %v1915_v32 = vld [vmem:[#allocation1 + $0x12] sm:$0xff] }
 0x2ec   : > { %7825 = vmatpush.bf16.msrb.mxu0 %v11916_v33  ;;  %v12010_v33 = vld [vmem:[%s12333_s6 + $0x17f8] sm:$0xff] }
 0x2ed   : > { %7838 = vmatpush.bf16.msrb.mxu1 %v11924_v34  ;;  %v1914_v34 = vld [vmem:[#allocation1 + $0x9] sm:$0xff] }
 0x2ee   : > { %7851 = vmatpush.bf16.msrb.mxu2 %v11932_v35  ;;  %v11985_v35 = vld [vmem:[%s12333_s6 + $0x1730] sm:$0xff] }
 0x2ef   : > { %7864 = vmatpush.bf16.msrb.mxu3 %v11940_v42  ;;  %v12000_v42 = vld [vmem:[%s12333_s6 + $0x17a8] sm:$0xff] }
 0x2f0   : > { %7826 = vmatpush.bf16.msrb.mxu0 %v11915_v44  ;;  %v7620_v60 = vpop.f32.mrf.mxu0 }
 0x2f1   : > { %7839 = vmatpush.bf16.msrb.mxu1 %v11923_v45  ;;  %v7621_v61 = vadd.f32 %v7620_v60, %v13072_v27  ;;  %v7633_v63 = vpop.f32.mrf.mxu1  ;;  %v11986_v27 = vld [vmem:[%s12333_s6 + $0x1738] sm:$0xff] }
 0x2f2   : > { %7852 = vmatpush.bf16.msrb.mxu2 %v11931_v46  ;;  %v11983_v46 = vld [vmem:[%s12333_s6 + $0x1720] sm:$0xff] }
 0x2f3   : > { %7865 = vmatpush.bf16.msrb.mxu3 %v11939_v50  ;;  %7827 = vmatmul.bf16.vlgmr.msrb.gmra.mxu0 %v1907_v36  ;;  %v7634_v2 = vadd.f32 %v7633_v63, %v7621_v61  ;;  %v1916_v36 = vld [vmem:[#allocation1 + $0x1b] sm:$0xff] }
 0x2f4   : > { %7871 = vmatpush.bf16.msra.mxu0 %v11954_v47  ;;  %7840 = vmatmul.bf16.vlgmr.msrb.gmra.mxu1 %v1908_v39  ;;  %v12009_v39 = vld [vmem:[%s12333_s6 + $0x17f0] sm:$0xff] }
 0x2f5   : > { %7884 = vmatpush.bf16.msra.mxu1 %v11962_v48  ;;  %7853 = vmatmul.bf16.vlgmr.msrb.gmra.mxu2 %v1909_v37  ;;  %v11993_v37 = vld [vmem:[%s12333_s6 + $0x1770] sm:$0xff]  ;;  %v11991_v48 = vld [vmem:[%s12333_s6 + $0x1760] sm:$0xff] }
 0x2f6   : > { %7897 = vmatpush.bf16.msra.mxu2 %v11970_v49  ;;  %7866 = vmatmul.bf16.vlgmr.msrb.gmra.mxu3 %v1910_v40  ;;  %v11984_v40 = vld [vmem:[%s12333_s6 + $0x1728] sm:$0xff]  ;;  %v11999_v49 = vld [vmem:[%s12333_s6 + $0x17a0] sm:$0xff]  ;;  %v11981_v61 = vld [vmem:[%s12333_s6 + $0x1710] sm:$0xff] }
 0x2f7   : > { %7910 = vmatpush.bf16.msra.mxu3 %v11978_v51  ;;  %v12007_v51 = vld [vmem:[%s12333_s6 + $0x17e0] sm:$0xff]  ;;  %v11989_v63 = vld [vmem:[%s12333_s6 + $0x1750] sm:$0xff] }
 0x2f8   : > { %7872 = vmatpush.bf16.msra.mxu0 %v11953_v52  ;;  %v7646_v7 = vpop.f32.mrf.mxu2  ;;  %v7622_v11 = vpop.f32.mrf.mxu0  ;;  %v11982_v52 = vld [vmem:[%s12333_s6 + $0x1718] sm:$0xff] }
 0x2f9   : > { %7885 = vmatpush.bf16.msra.mxu1 %v11961_v53  ;;  %v7647_v8 = vadd.f32 %v7646_v7, %v7634_v2  ;;  %v7659_v10 = vpop.f32.mrf.mxu3  ;;  %v7635_v14 = vpop.f32.mrf.mxu1  ;;  %v11990_v53 = vld [vmem:[%s12333_s6 + $0x1758] sm:$0xff]  ;;  %v11980_v2 = vld [vmem:[%s12333_s6 + $0x1708] sm:$0xff] }
 0x2fa   : > { %7898 = vmatpush.bf16.msra.mxu2 %v11969_v54  ;;  %v11998_v54 = vld [vmem:[%s12333_s6 + $0x1798] sm:$0xff]  ;;  %v1918_v7 = vld [vmem:[#allocation1 + $0x2d] sm:$0xff] }
 0x2fb   : > { %7911 = vmatpush.bf16.msra.mxu3 %v11977_v55  ;;  %v7660_v12 = vadd.f32 %v7659_v10, %v7647_v8  ;;  %v1920_v8 = vld [vmem:[#allocation1 + $0x3f] sm:$0xff]  ;;  %v12004_v11 = vld [vmem:[%s12333_s6 + $0x17c8] sm:$0xff]  ;;  %v11987_v14 = vld [vmem:[%s12333_s6 + $0x1740] sm:$0xff] }
 0x2fc   : > { %7873 = vmatpush.bf16.msra.mxu0 %v11952_v56  ;;  %v232_v10 = vld [vmem:[%s12347_s8 + $0x60] sm:$0x3] }
 0x2fd   : > { %7886 = vmatpush.bf16.msra.mxu1 %v11960_v57  ;;  %v12006_v57 = vld [vmem:[%s12333_s6 + $0x17d8] sm:$0xff] }
 0x2fe   : > { %7899 = vmatpush.bf16.msra.mxu2 %v11968_v58 }
 0x2ff   : > { %7912 = vmatpush.bf16.msra.mxu3 %v11976_v59 }
 0x300   : > { %7874 = vmatpush.bf16.msra.mxu0 %v11951_v62  ;;  %v7648_v21 = vpop.f32.mrf.mxu2 }
 0x301   : > { %7887 = vmatpush.bf16.msra.mxu1 %v11959_v0  ;;  %v7661_v23 = vpop.f32.mrf.mxu3  ;;  %v11997_v0 = vld [vmem:[%s12333_s6 + $0x1790] sm:$0xff]  ;;  %v12016_v21 = vld [vmem:[%s12333_s6 + $0x1828] sm:$0xff] }
 0x302   : > { %7900 = vmatpush.bf16.msra.mxu2 %v11967_v1  ;;  %v12005_v1 = vld [vmem:[%s12333_s6 + $0x17d0] sm:$0xff] }
 0x303   : > { %7913 = vmatpush.bf16.msra.mxu3 %v11975_v3  ;;  %v11988_v3 = vld [vmem:[%s12333_s6 + $0x1748] sm:$0xff] }
 0x304   : > { %7875 = vmatpush.bf16.msra.mxu0 %v11950_v4  ;;  %v11996_v4 = vld [vmem:[%s12333_s6 + $0x1788] sm:$0xff] }
 0x305   : > { %7888 = vmatpush.bf16.msra.mxu1 %v11958_v5  ;;  %v1917_v5 = vld [vmem:[#allocation1 + $0x24] sm:$0xff] }
 0x306   : > { %7901 = vmatpush.bf16.msra.mxu2 %v11966_v6  ;;  %v1919_v6 = vld [vmem:[#allocation1 + $0x36] sm:$0xff] }
 0x307   : > { %7914 = vmatpush.bf16.msra.mxu3 %v11974_v9  ;;  %1922 = vst [vmem:[#allocation1] ss:$9 sm:$0xff] %v232_v10 }
 0x308   : > { %7876 = vmatpush.bf16.msra.mxu0 %v11949_v13  ;;  %v11979_v13 = vld [vmem:[%s12333_s6 + $0x1700] sm:$0xff] }
 0x309   : > { %7889 = vmatpush.bf16.msra.mxu1 %v11957_v15  ;;  %v11995_v15 = vld [vmem:[%s12333_s6 + $0x1780] sm:$0xff] }
 0x30a   : > { %7902 = vmatpush.bf16.msra.mxu2 %v11965_v16  ;;  %v12018_v16 = vld [vmem:[%s12333_s6 + $0x1838] sm:$0xff] }
 0x30b   : > { %7915 = vmatpush.bf16.msra.mxu3 %v11973_v17  ;;  %v12026_v17 = vld [vmem:[%s12333_s6 + $0x1878] sm:$0xff] }
 0x30c   : > { %7877 = vmatpush.bf16.msra.mxu0 %v11948_v18  ;;  %v12003_v18 = vld [vmem:[%s12333_s6 + $0x17c0] sm:$0xff] }
 0x30d   : > { %7890 = vmatpush.bf16.msra.mxu1 %v11956_v19  ;;  %v12017_v19 = vld [vmem:[%s12333_s6 + $0x1830] sm:$0xff] }
 0x30e   : > { %7903 = vmatpush.bf16.msra.mxu2 %v11964_v20  ;;  %v12025_v20 = vld [vmem:[%s12333_s6 + $0x1870] sm:$0xff] }
 0x30f   : > { %7916 = vmatpush.bf16.msra.mxu3 %v11972_v22  ;;  %v12024_v22 = vld [vmem:[%s12333_s6 + $0x1868] sm:$0xff] }
 0x310   : > { %7878 = vmatpush.bf16.msra.mxu0 %v11947_v24  ;;  %v7672_v44 = vpop.f32.mrf.mxu0 }
 0x311   : > { %7891 = vmatpush.bf16.msra.mxu1 %v11955_v25  ;;  %v7673_v45 = vadd.f32 %v7672_v44, %v7660_v12  ;;  %v7685_v47 = vpop.f32.mrf.mxu1  ;;  %v12015_v25 = vld [vmem:[%s12333_s6 + $0x1820] sm:$0xff] }
 0x312   : > { %7904 = vmatpush.bf16.msra.mxu2 %v11963_v26  ;;  %v12019_v44 = vld [vmem:[%s12333_s6 + $0x1840] sm:$0xff] }
 0x313   : > { %7917 = vmatpush.bf16.msra.mxu3 %v11971_v30  ;;  %7879 = vmatmul.bf16.vlgmr.msra.gmra.mxu0 %v1913_v31  ;;  %v7686_v50 = vadd.f32 %v7685_v47, %v7673_v45  ;;  %v12022_v30 = vld [vmem:[%s12333_s6 + $0x1858] sm:$0xff] }
 0x314   : > { %7923 = vmatpush.bf16.msrb.mxu0 %v11986_v27  ;;  %7892 = vmatmul.bf16.vlgmr.msra.gmra.mxu1 %v1914_v34  ;;  %v12023_v27 = vld [vmem:[%s12333_s6 + $0x1860] sm:$0xff]  ;;  %v1923_v45 = vld [vmem:[#allocation1] sm:$0xff] }
 0x315   : > { %7936 = vmatpush.bf16.msrb.mxu1 %v11994_v28  ;;  %7905 = vmatmul.bf16.vlgmr.msra.gmra.mxu2 %v1915_v32 }
 0x316   : > { %7949 = vmatpush.bf16.msrb.mxu2 %v12002_v29  ;;  %7918 = vmatmul.bf16.vlgmr.msra.gmra.mxu3 %v1916_v36  ;;  %v12014_v29 = vld [vmem:[%s12333_s6 + $0x1818] sm:$0xff]  ;;  %v12013_v36 = vld [vmem:[%s12333_s6 + $0x1810] sm:$0xff] }
 0x317   : > { %7962 = vmatpush.bf16.msrb.mxu3 %v12010_v33 }
 0x318   : > { %7924 = vmatpush.bf16.msrb.mxu0 %v11985_v35  ;;  %v7698_v55 = vpop.f32.mrf.mxu2  ;;  %v7674_v59 = vpop.f32.mrf.mxu0 }
 0x319   : > { %7937 = vmatpush.bf16.msrb.mxu1 %v11993_v37  ;;  %v7699_v56 = vadd.f32 %v7698_v55, %v7686_v50  ;;  %v7711_v58 = vpop.f32.mrf.mxu3  ;;  %v7687_v62 = vpop.f32.mrf.mxu1 }
 0x31a   : > { %7950 = vmatpush.bf16.msrb.mxu2 %v12001_v38  ;;  %v12021_v38 = vld [vmem:[%s12333_s6 + $0x1850] sm:$0xff] }
 0x31b   : > { %7963 = vmatpush.bf16.msrb.mxu3 %v12009_v39  ;;  %v7712_v60 = vadd.f32 %v7711_v58, %v7699_v56  ;;  %v12012_v39 = vld [vmem:[%s12333_s6 + $0x1808] sm:$0xff] }
 0x31c   : > { %7925 = vmatpush.bf16.msrb.mxu0 %v11984_v40  ;;  %v12020_v40 = vld [vmem:[%s12333_s6 + $0x1848] sm:$0xff] }
 0x31d   : > { %7938 = vmatpush.bf16.msrb.mxu1 %v11992_v41 }
 0x31e   : > { %7951 = vmatpush.bf16.msrb.mxu2 %v12000_v42 }
 0x31f   : > { %7964 = vmatpush.bf16.msrb.mxu3 %v12008_v43  ;;  %v12011_v43 = vld [vmem:[%s12333_s6 + $0x1800] sm:$0xff] }
 0x320   : > { %7926 = vmatpush.bf16.msrb.mxu0 %v11983_v46  ;;  %v7700_v9 = vpop.f32.mrf.mxu2  ;;  %v1924_v46 = vld [vmem:[#allocation1 + $0x9] sm:$0xff] }
 0x321   : > { %7939 = vmatpush.bf16.msrb.mxu1 %v11991_v48  ;;  %v7713_v12 = vpop.f32.mrf.mxu3 }
 0x322   : > { %7952 = vmatpush.bf16.msrb.mxu2 %v11999_v49 }
 0x323   : > { %7965 = vmatpush.bf16.msrb.mxu3 %v12007_v51 }
 0x324   : > { %7927 = vmatpush.bf16.msrb.mxu0 %v11982_v52 }
 0x325   : > { %7940 = vmatpush.bf16.msrb.mxu1 %v11990_v53 }
 0x326   : > { %7953 = vmatpush.bf16.msrb.mxu2 %v11998_v54 }
 0x327   : > { %7966 = vmatpush.bf16.msrb.mxu3 %v12006_v57 }
 0x328   : > { %7928 = vmatpush.bf16.msrb.mxu0 %v11981_v61 }
 0x329   : > { %7941 = vmatpush.bf16.msrb.mxu1 %v11989_v63 }
 0x32a   : > { %7954 = vmatpush.bf16.msrb.mxu2 %v11997_v0 }
 0x32b   : > { %7967 = vmatpush.bf16.msrb.mxu3 %v12005_v1 }
 0x32c   : > { %7929 = vmatpush.bf16.msrb.mxu0 %v11980_v2 }
 0x32d   : > { %7942 = vmatpush.bf16.msrb.mxu1 %v11988_v3 }
 0x32e   : > { %7955 = vmatpush.bf16.msrb.mxu2 %v11996_v4 }
 0x32f   : > { %7968 = vmatpush.bf16.msrb.mxu3 %v12004_v11 }
 0x330   : > { %7930 = vmatpush.bf16.msrb.mxu0 %v11979_v13  ;;  %v7724_v23 = vpop.f32.mrf.mxu0 }
 0x331   : > { %7943 = vmatpush.bf16.msrb.mxu1 %v11987_v14  ;;  %v7725_v24 = vadd.f32 %v7724_v23, %v7712_v60  ;;  %v7737_v26 = vpop.f32.mrf.mxu1 }
 0x332   : > { %7956 = vmatpush.bf16.msrb.mxu2 %v11995_v15 }
 0x333   : > { %7969 = vmatpush.bf16.msrb.mxu3 %v12003_v18  ;;  %7931 = vmatmul.bf16.vlgmr.msrb.gmra.mxu0 %v1917_v5  ;;  %v7738_v28 = vadd.f32 %v7737_v26, %v7725_v24 }
 0x334   : > { %7975 = vmatpush.bf16.msra.mxu0 %v12018_v16  ;;  %7944 = vmatmul.bf16.vlgmr.msrb.gmra.mxu1 %v1918_v7 }
 0x335   : > { %7988 = vmatpush.bf16.msra.mxu1 %v12026_v17  ;;  %7957 = vmatmul.bf16.vlgmr.msrb.gmra.mxu2 %v1919_v6 }
 0x336   : > { %7970 = vmatmul.bf16.vlgmr.msrb.gmra.mxu3 %v1920_v8 }
 0x338   : > { %7976 = vmatpush.bf16.msra.mxu0 %v12017_v19  ;;  %v7750_v31 = vpop.f32.mrf.mxu2  ;;  %v7726_v34 = vpop.f32.mrf.mxu0 }
 0x339   : > { %7989 = vmatpush.bf16.msra.mxu1 %v12025_v20  ;;  %v7751_v32 = vadd.f32 %v7750_v31, %v7738_v28  ;;  %v7763_v33 = vpop.f32.mrf.mxu3  ;;  %v7739_v37 = vpop.f32.mrf.mxu1  ;;  %v219_v34 = vld [vmem:[#allocation2] sm:$0x3] }
 0x33b   : > { %v7764_v35 = vadd.f32 %v7763_v33, %v7751_v32 }
 0x33c   : > { %7977 = vmatpush.bf16.msra.mxu0 %v12016_v21 }
 0x33d   : > { %7990 = vmatpush.bf16.msra.mxu1 %v12024_v22 }
 0x340   : > { %7978 = vmatpush.bf16.msra.mxu0 %v12015_v25  ;;  %v7752_v41 = vpop.f32.mrf.mxu2 }
 0x341   : > { %7991 = vmatpush.bf16.msra.mxu1 %v12023_v27  ;;  %v7765_v42 = vpop.f32.mrf.mxu3 }
 0x344   : > { %7979 = vmatpush.bf16.msra.mxu0 %v12014_v29 }
 0x345   : > { %7992 = vmatpush.bf16.msra.mxu1 %v12022_v30 }
 0x348   : > { %7980 = vmatpush.bf16.msra.mxu0 %v12013_v36 }
 0x349   : > { %7993 = vmatpush.bf16.msra.mxu1 %v12021_v38 }
 0x34c   : > { %7981 = vmatpush.bf16.msra.mxu0 %v12012_v39 }
 0x34d   : > { %7994 = vmatpush.bf16.msra.mxu1 %v12020_v40 }
 0x350   : > { %7982 = vmatpush.bf16.msra.mxu0 %v12011_v43  ;;  %v7776_v47 = vpop.f32.mrf.mxu0 }
 0x351   : > { %7995 = vmatpush.bf16.msra.mxu1 %v12019_v44  ;;  %v7777_v48 = vadd.f32 %v7776_v47, %v7764_v35  ;;  %v7789_v49 = vpop.f32.mrf.mxu1 }
 0x353   : > { %7983 = vmatmul.bf16.vlgmr.msra.gmra.mxu0 %v1923_v45  ;;  %v7790_v50 = vadd.f32 %v7789_v49, %v7777_v48 }
 0x354   : > { %7996 = vmatmul.bf16.vlgmr.msra.gmra.mxu1 %v1924_v46 }
 0x358   : > { %v7802_v51 = vpop.f32.mrf.mxu2  ;;  %v7778_v54 = vpop.f32.mrf.mxu0 }
 0x359   : > { %v7803_v52 = vadd.f32 %v7802_v51, %v7790_v50  ;;  %v7815_v53 = vpop.f32.mrf.mxu3  ;;  %v7791_v56 = vpop.f32.mrf.mxu1 }
 0x35b   : > { %v7816_v55 = vadd.f32 %v7815_v53, %v7803_v52 }
 0x360   : > { %v7804_v57 = vpop.f32.mrf.mxu2 }
 0x361   : > { %v7817_v58 = vpop.f32.mrf.mxu3 }
 0x370   : > { %v7828_v59 = vpop.f32.mrf.mxu0 }
 0x371   : > { %v7829_v60 = vadd.f32 %v7828_v59, %v7816_v55  ;;  %v7841_v61 = vpop.f32.mrf.mxu1 }
 0x373   : > { %v7842_v62 = vadd.f32 %v7841_v61, %v7829_v60 }
 0x378   : > { %v7854_v63 = vpop.f32.mrf.mxu2  ;;  %v7830_v1 = vpop.f32.mrf.mxu0 }
 0x379   : > { %v7867_v0 = vpop.f32.mrf.mxu3  ;;  %v7843_v2 = vpop.f32.mrf.mxu1  ;;  %v7855_v14 = vadd.f32 %v7854_v63, %v7842_v62 }
 0x37b   : > { %v7868_v16 = vadd.f32 %v7867_v0, %v7855_v14 }
 0x380   : > { %v7856_v3 = vpop.f32.mrf.mxu2 }
 0x381   : > { %v7869_v4 = vpop.f32.mrf.mxu3 }
 0x390   : > { %v7880_v5 = vpop.f32.mrf.mxu0 }
 0x391   : > { %v7893_v6 = vpop.f32.mrf.mxu1  ;;  %v7881_v17 = vadd.f32 %v7880_v5, %v7868_v16 }
 0x393   : > { %v7894_v22 = vadd.f32 %v7893_v6, %v7881_v17 }
 0x398   : > { %v7906_v7 = vpop.f32.mrf.mxu2  ;;  %v7882_v9 = vpop.f32.mrf.mxu0 }
 0x399   : > { %v7919_v8 = vpop.f32.mrf.mxu3  ;;  %v7895_v10 = vpop.f32.mrf.mxu1  ;;  %v7907_v23 = vadd.f32 %v7906_v7, %v7894_v22 }
 0x39b   : > { %v7920_v25 = vadd.f32 %v7919_v8, %v7907_v23 }
 0x3a0   : > { %v7908_v11 = vpop.f32.mrf.mxu2 }
 0x3a1   : > { %v7921_v12 = vpop.f32.mrf.mxu3 }
 0x3b0   : > { %v7932_v13 = vpop.f32.mrf.mxu0 }
 0x3b1   : > { %v7945_v15 = vpop.f32.mrf.mxu1  ;;  %v7933_v27 = vadd.f32 %v7932_v13, %v7920_v25 }
 0x3b3   : > { %v7946_v28 = vadd.f32 %v7945_v15, %v7933_v27 }
 0x3b8   : > { %v7958_v18 = vpop.f32.mrf.mxu2  ;;  %v7934_v19 = vpop.f32.mrf.mxu0 }
 0x3b9   : > { %v7971_v20 = vpop.f32.mrf.mxu3  ;;  %v7947_v21 = vpop.f32.mrf.mxu1  ;;  %v7959_v29 = vadd.f32 %v7958_v18, %v7946_v28 }
 0x3bb   : > { %v7972_v30 = vadd.f32 %v7971_v20, %v7959_v29 }
 0x3c0   : > { %v7960_v24 = vpop.f32.mrf.mxu2 }
 0x3c1   : > { %v7973_v26 = vpop.f32.mrf.mxu3 }
 0x3d0   : > { %v7984_v31 = vpop.f32.mrf.mxu0 }
 0x3d1   : > { %v7985_v32 = vadd.f32 %v7984_v31, %v7972_v30  ;;  %v7997_v33 = vpop.f32.mrf.mxu1 }
 0x3d3   : > { %v7998_v35 = vadd.f32 %v7997_v33, %v7985_v32 }
 0x3d5   : > { %v8001_v36 = vadd.f32 %v7998_v35, %v219_v34  ;;  %8006 = sbr.rel (%p11237_p5) target bundleno = 1001 (0x3e9), region = 48 }
 0x3d7   : > { %8002 = vst [vmem:[#allocation2] sm:$0x3] %v8001_v36 }
 0x3d8   : > { %v7986_v37 = vpop.f32.mrf.mxu0 }
 0x3d9   : > { %v7999_v38 = vpop.f32.mrf.mxu1 }
 0x3da   : > { %v12089_v40 = vld [vmem:[#allocation6] ss:$0 sm:$0xff] }
 0x3de   : > { %v8007_v39 = vld [vmem:[#allocation2] sm:$0x3] }
 0x3df   : > { %v8012_v41 = vadd.f32 %v12089_v40, %v8007_v39 }
 0x3e1   : > { %12090 = vtanh.f32 %v8012_v41 }
 0x3e7   : > { %v12091_v42 = vpop.eup %12090 }
 0x3e8   : > { %8014 = vst [vmem:[#allocation8] sm:$0x3] %v12091_v42 }
 0x3e9 PF: > { %p12050_p8 = scmp.eq.s32.totalorder %s12268_s16, 1  ;;  %s12228_s22 = smov [#allocation8]  }
 0x3ea   : > { %s8021_s9 = sshll.u32 %s12228_s22, 4  ;;  %s8023_s12 = sshll.u32 %s13190_s3, 4  ;;  %s8022_s9 = int_to_ptr.vmem [resolvable:$true] %s8021_s9  ;;  %s8024_s12 = int_to_ptr.hbm [resolvable:$true] %s8023_s12 }
 0x3eb   : > { %12036 = dma.vmem_to_hbm [thread:$0]  (%p12050_p8), %s8022_s9, 32, %s8024_s12, [#allocation5]  }
 0x3ec   : > { %12205 = dma.done.wait (%p12050_p8), [#allocation5], 32  }
 0x3ed   : > { %12207 = vsyncadd (%p12050_p8), [#allocation5], 4294967264 }
 0x3ee PF: > { %p15_p9 = scmp.ge.s32.totalorder %s12271_s17, 4   ;;  %s13195_s12 = smov %s12214_s13 }
 0x3ef   : > { %s13196_s13 = smov %s12218_s14  ;;  %s13197_s14 = smov %s12281_s20 }
 0x3f0   : > { %s13198_s15 = smov %s12271_s17  ;;  %17 = sbr.rel (!%p15_p9) target bundleno = 5 (0x5), region = 84 }
 0x3f5   :  { %8037 = vsyncpa [#allocation4], 1 }
 0x3f6   :  { %8039 = vsyncpa [#allocation4 + $0x1], 1 }
 0x3f7   :  { %8040 = vsyncpa [#allocation7], 1 }
 0x3f8   :  { %8041 = vsyncpa [#allocation5], 1 }
 0x3f9   :  { %8043 = vsyncpa [#allocation5 + $0x1], 1 }

</bundles_post_ra>
